<compile_context>
chip_gen: v6e
topology: v6e:2x2x1
jax: 0.10.0
libtpu: 0.0.40
codegen_flags: <defaults>
</compile_context>

<pallas_src>
import functools

import jax
import jax.numpy as jnp
import numpy as np
from jax.experimental import pallas as pl
from jax.experimental.pallas import tpu as pltpu

EPS = 1e-5  # nn.InstanceNorm2d default eps (affine=False, no running stats)
_VMEM = pl.BlockSpec(memory_space=pltpu.MemorySpace.VMEM)
_HI = jax.lax.Precision.HIGHEST  # reference path only

# bf16 operands (f32 accumulation) on real TPUs; plain f32 elsewhere so the
# kernel also executes under a CPU/interpret harness.
_MM_DTYPE = jnp.bfloat16 if jax.default_backend() == "tpu" else jnp.float32


# --------------------------------------------------------------------------
# In-kernel helpers
# --------------------------------------------------------------------------
def _instance_norm(a):
    """InstanceNorm over the spatial (lane) axis of a [C, HW] f32 tensor.
    Centered two-pass variance: same op count as E[x^2]-E[x]^2, no
    cancellation when |mean| >> std."""
    inv_n = 1.0 / a.shape[-1]
    m = jnp.sum(a, axis=-1, keepdims=True) * inv_n
    c = a - m
    var = jnp.sum(c * c, axis=-1, keepdims=True) * inv_n
    return c * jax.lax.rsqrt(var + EPS)


def _lane_roll(x, s):
    """y[:, i] = x[:, (i + s) % N] for static int s (== jnp.roll(x, -s, -1)).
    Wrapped positions are zeroed by the caller's mask."""
    n = x.shape[-1]
    k = s % n
    if k == 0:
        return x
    return jnp.concatenate([x[:, k:], x[:, :k]], axis=-1)


# --------------------------------------------------------------------------
# The single fused Pallas kernel
# --------------------------------------------------------------------------
def _fused_kernel(*refs, W, layers, dilations):
    """conv1_1 + all BasicBlocks + final_conv; every intermediate activation
    stays in VMEM/vregs.

    refs = (x, mask[d0], ..., mask[dk-1], <weights in consumption order>,
            o_ref, patch_scratch)
    layers: tuple of (cin, cout, dilation, residual, has_input_conv)."""
    n_masks = len(dilations)
    x_ref = refs[0]
    mask_refs = refs[1:1 + n_masks]
    o_ref = refs[-2]
    patch_ref = refs[-1]                         # [9*maxC, HW] im2col scratch
    weights = iter(refs[1 + n_masks:-2])
    cdt = patch_ref.dtype                        # matmul compute dtype

    def conv3x3(act, w_ref, b_ref, d):
        """Dilated 3x3 SAME conv of a [Cin, HW] f32 activation as a single
        MXU matmul: out = W[Cout, 9*Cin] @ im2col[9*Cin, HW].  Taps are built
        with lane rotations + precomputed 0/1 masks and streamed into the
        VMEM scratch one tap at a time (low vreg pressure)."""
        cin = act.shape[0]
        xc = act.astype(cdt)
        m_ref = mask_refs[dilations.index(d)]
        shifts = [(kh - 1) * d * W + (kw - 1) * d
                  for kh in range(3) for kw in range(3)]
        for t, s in enumerate(shifts):
            sh = xc if s == 0 else _lane_roll(xc, s)
            if t != 4:                           # centre tap is always valid
                sh = sh * m_ref[t:t + 1, :]
            patch_ref[t * cin:(t + 1) * cin, :] = sh
        acc = jnp.dot(w_ref[...], patch_ref[:9 * cin, :],
                      preferred_element_type=jnp.float32)
        return acc + b_ref[...]

    # ---- conv1_1: 1x1 conv + InstanceNorm + ReLU ---------------------------
    c1w, c1b = next(weights), next(weights)
    h = jnp.dot(c1w[...], x_ref[...].astype(cdt),
                preferred_element_type=jnp.float32)
    h = jnp.maximum(_instance_norm(h + c1b[...]), 0.0)

    # ---- middle BasicBlocks ------------------------------------------------
    for (_cin, _cout, d, residual, has_in) in layers:
        if has_in:                               # 1x1 input_conv + IN (no ReLU)
            iw, ib = next(weights), next(weights)
            xin = jnp.dot(iw[...], h.astype(cdt),
                          preferred_element_type=jnp.float32)
            xin = _instance_norm(xin + ib[...])
        else:
            xin = h
        w1, b1 = next(weights), next(weights)
        w2, b2 = next(weights), next(weights)
        y = jnp.maximum(_instance_norm(conv3x3(xin, w1, b1, d)), 0.0)
        z = _instance_norm(conv3x3(y, w2, b2, d))
        if residual:
            z = z + xin
        h = jnp.maximum(z, 0.0)

    # ---- final_conv: plain 3x3 conv (dilation 1) + bias --------------------
    fw, fb = next(weights), next(weights)
    o_ref[...] = conv3x3(h, fw, fb, 1)


# --------------------------------------------------------------------------
# Host-side helpers: masks, weight re-layout, forward wrapper
# --------------------------------------------------------------------------
def _make_masks_np(H, W, d):
    """[9, H*W] 0/1 validity masks for a dilated 3x3 SAME conv (numpy, so they
    become trace-time constants - zero runtime cost)."""
    hh, ww = np.divmod(np.arange(H * W), W)
    rows = []
    for kh in range(3):
        for kw in range(3):
            dh, dw = (kh - 1) * d, (kw - 1) * d
            ok = np.ones(H * W, dtype=bool)
            if dh > 0:
                ok &= hh < H - dh
            elif dh < 0:
                ok &= hh >= -dh
            if dw > 0:
                ok &= ww < W - dw
            elif dw < 0:
                ok &= ww >= -dw
            rows.append(ok)
    return np.stack(rows).astype(np.float32)


def _w3x3_to_2d(w):
    """[3, 3, Cin, Cout] -> [Cout, 9*Cin] (tap-major K, matches im2col rows)."""
    cout = w.shape[-1]
    return jnp.transpose(w, (3, 0, 1, 2)).reshape(cout, -1).astype(_MM_DTYPE)


def _col_bias(b):
    return b.reshape(-1, 1).astype(jnp.float32)


def prepare_params(params, hyper_params):
    """One-time weight re-layout (hoisted out of the forward call)."""
    flat = [params['conv1_1']['w'].T.astype(_MM_DTYPE),
            _col_bias(params['conv1_1']['b'])]
    cfg = []
    for blk, (ci, co, d, res) in zip(params['blocks'],
                                     hyper_params['residual_layers']):
        has_in = ci != co
        if has_in:
            flat += [blk['in_w'].T.astype(_MM_DTYPE), _col_bias(blk['in_b'])]
        flat += [_w3x3_to_2d(blk['w1']), _col_bias(blk['b1']),
                 _w3x3_to_2d(blk['w2']), _col_bias(blk['b2'])]
        cfg.append((int(ci), int(co), int(d), bool(res), has_in))
    flat += [_w3x3_to_2d(params['final']['w']), _col_bias(params['final']['b'])]
    return flat, tuple(cfg)


def dilation_model_forward(flat_weights, x_nchw, layer_cfg):
    """x: [1, 441, L, L] -> out: [1, 10, L, L] (float32), one pallas_call."""
    _, c0, H, W = x_nchw.shape
    HW = H * W
    x = x_nchw[0].reshape(c0, HW)            # NCHW -> lane-dense [C, HW], free

    dils = tuple(sorted({d for (_, _, d, _, _) in layer_cfg} | {1}))
    masks = [jnp.asarray(_make_masks_np(H, W, d), dtype=_MM_DTYPE)
             for d in dils]
    max_c = max(co for (_, co, _, _, _) in layer_cfg)
    n_out = flat_weights[-2].shape[0]        # final_conv out channels (10)

    kern = functools.partial(_fused_kernel, W=W,
                             layers=layer_cfg, dilations=dils)
    out = pl.pallas_call(
        kern,
        out_shape=jax.ShapeDtypeStruct((n_out, HW), jnp.float32),
        in_specs=[_VMEM] * (1 + len(masks) + len(flat_weights)),
        out_specs=_VMEM,
        scratch_shapes=[pltpu.VMEM((9 * max_c, HW), _MM_DTYPE)],
    )(x, *masks, *flat_weights)
    return out.reshape(1, n_out, H, W)


# --------------------------------------------------------------------------
# Parameter init (reference-friendly layouts: [Cin,Cout] and [3,3,Cin,Cout])
# --------------------------------------------------------------------------
def init_params(key, hyper_params):
    rl = hyper_params['residual_layers']
    first, last = rl[0][0], rl[-1][1]
    keys = iter(jax.random.split(key, 8 + 8 * len(rl)))

    def rnd(shape):
        return 0.1 * jax.random.normal(next(keys), shape, jnp.float32)

    params = {
        'conv1_1': {'w': rnd((441, first)), 'b': rnd((first,))},
        'blocks': [],
        'final': {'w': rnd((3, 3, last, 10)), 'b': rnd((10,))},
    }
    for (ci, co, _d, _res) in rl:
        blk = {}
        if ci != co:
            blk['in_w'] = rnd((ci, co))
            blk['in_b'] = rnd((co,))
        blk['w1'] = rnd((3, 3, co, co)); blk['b1'] = rnd((co,))
        blk['w2'] = rnd((3, 3, co, co)); blk['b2'] = rnd((co,))
        params['blocks'].append(blk)
    return params


# --------------------------------------------------------------------------
# Pure-JAX reference (NCHW, f32 HIGHEST) for validation
# --------------------------------------------------------------------------
def _ref_forward(params, x, hyper_params):
    def conv2d(x, w_kkio, b, dilation, padding):
        w = jnp.transpose(w_kkio, (3, 2, 0, 1))  # -> OIHW
        out = jax.lax.conv_general_dilated(
            x, w, window_strides=(1, 1),
            padding=((padding, padding), (padding, padding)),
            rhs_dilation=(dilation, dilation),
            dimension_numbers=('NCHW', 'OIHW', 'NCHW'), precision=_HI)
        return out + b[None, :, None, None]

    def conv1(x, w_io, b):
        return conv2d(x, w_io[None, None], b, 1, 0)

    def inorm(x):
        m = x.mean(axis=(2, 3), keepdims=True)
        v = ((x - m) ** 2).mean(axis=(2, 3), keepdims=True)
        return (x - m) * jax.lax.rsqrt(v + EPS)

    h = jax.nn.relu(inorm(conv1(x, params['conv1_1']['w'],
                                params['conv1_1']['b'])))
    for blk, (ci, co, d, res) in zip(params['blocks'],
                                     hyper_params['residual_layers']):
        xin = h
        if ci != co:
            xin = inorm(conv1(xin, blk['in_w'], blk['in_b']))
        y = jax.nn.relu(inorm(conv2d(xin, blk['w1'], blk['b1'], d, d)))
        y = inorm(conv2d(y, blk['w2'], blk['b2'], d, d))
        if res:
            y = y + xin
        h = jax.nn.relu(y)
    return conv2d(h, params['final']['w'], params['final']['b'], 1, 1)


# --------------------------------------------------------------------------
if __name__ == "__main__":
    hyper_params = {
        'residual_layers': [
            # (in_channels, out_channels, dilation, residual)
            (32, 32, 1, True),
            (32, 48, 2, True),   # exercises the 1x1 input_conv branch
            (48, 48, 4, False),  # exercises the no-residual branch
        ],
    }
    L = 16
    key = jax.random.PRNGKey(0)
    k_params, k_x = jax.random.split(key)
    params = init_params(k_params, hyper_params)
    x = jax.random.normal(k_x, (1, 441, L, L), jnp.float32)

    flat_w, cfg = prepare_params(params, hyper_params)
    fwd = jax.jit(functools.partial(dilation_model_forward, layer_cfg=cfg))
    out = jax.block_until_ready(fwd(flat_w, x))
    assert out.shape == (1, 10, L, L), out.shape

    # Validate against an f32/HIGHEST XLA reference.  Tolerance depends on
    # whether the matmuls ran in bf16 (real TPU) or f32.
    ref = _ref_forward(params, x, hyper_params)
    err = float(jnp.max(jnp.abs(out - ref)))
    scale = float(jnp.max(jnp.abs(ref)))
    tol = 8e-2 if _MM_DTYPE == jnp.bfloat16 else 1e-2
    assert err <= tol * max(scale, 1.0), (
        f"mismatch vs reference: max_err={err} (ref scale {scale})")

    print("KERNEL_OK")
</pallas_src>

<mosaic_0001>
module attributes {stable_mosaic.version = 11 : i64} {
  func.func @_fused_kernel(%arg0: memref<441x256xf32, #tpu.memory_space<vmem>>, %arg1: memref<9x256xf32, #tpu.memory_space<vmem>>, %arg2: memref<9x256xf32, #tpu.memory_space<vmem>>, %arg3: memref<9x256xf32, #tpu.memory_space<vmem>>, %arg4: memref<32x441xf32, #tpu.memory_space<vmem>>, %arg5: memref<32x1xf32, #tpu.memory_space<vmem>>, %arg6: memref<32x288xf32, #tpu.memory_space<vmem>>, %arg7: memref<32x1xf32, #tpu.memory_space<vmem>>, %arg8: memref<32x288xf32, #tpu.memory_space<vmem>>, %arg9: memref<32x1xf32, #tpu.memory_space<vmem>>, %arg10: memref<48x32xf32, #tpu.memory_space<vmem>>, %arg11: memref<48x1xf32, #tpu.memory_space<vmem>>, %arg12: memref<48x432xf32, #tpu.memory_space<vmem>>, %arg13: memref<48x1xf32, #tpu.memory_space<vmem>>, %arg14: memref<48x432xf32, #tpu.memory_space<vmem>>, %arg15: memref<48x1xf32, #tpu.memory_space<vmem>>, %arg16: memref<48x432xf32, #tpu.memory_space<vmem>>, %arg17: memref<48x1xf32, #tpu.memory_space<vmem>>, %arg18: memref<48x432xf32, #tpu.memory_space<vmem>>, %arg19: memref<48x1xf32, #tpu.memory_space<vmem>>, %arg20: memref<10x432xf32, #tpu.memory_space<vmem>>, %arg21: memref<10x1xf32, #tpu.memory_space<vmem>>, %arg22: memref<10x256xf32, #tpu.memory_space<vmem>>, %arg23: memref<432x256xf32, #tpu.memory_space<vmem>>) attributes {dimension_semantics = [], scalar_prefetch = 0 : i64, scratch_operands = 1 : i64, tpu.core_type = #tpu.core_type<tc>} {
    %c0 = arith.constant 0 : index
    %c0_0 = arith.constant 0 : index
    %0 = vector.load %arg4[%c0, %c0_0] : memref<32x441xf32, #tpu.memory_space<vmem>>, vector<32x441xf32>
    %c0_1 = arith.constant 0 : index
    %c0_2 = arith.constant 0 : index
    %1 = vector.load %arg0[%c0_1, %c0_2] : memref<441x256xf32, #tpu.memory_space<vmem>>, vector<441x256xf32>
    %cst = arith.constant dense<0.000000e+00> : vector<32x256xf32>
    %2 = tpu.matmul %0, %1, %cst {dimension_numbers = #tpu.dot_dimension_numbers<[1], [0], [0], [1], [0, 0, 1, 1], [], []>} : vector<32x441xf32>, vector<441x256xf32>, vector<32x256xf32> -> vector<32x256xf32>
    %c0_3 = arith.constant 0 : index
    %c0_4 = arith.constant 0 : index
    %3 = vector.load %arg5[%c0_3, %c0_4] : memref<32x1xf32, #tpu.memory_space<vmem>>, vector<32x1xf32>
    %4 = vector.broadcast %3 : vector<32x1xf32> to vector<32x256xf32>
    %5 = arith.addf %2, %4 : vector<32x256xf32>
    %cst_5 = arith.constant dense<0.000000e+00> : vector<32xf32>
    %6 = vector.multi_reduction <add>, %5, %cst_5 [1] : vector<32x256xf32> to vector<32xf32>
    %7 = vector.shape_cast %6 : vector<32xf32> to vector<32x1xf32>
    %cst_6 = arith.constant 3.906250e-03 : f32
    %8 = vector.broadcast %cst_6 : f32 to vector<32x1xf32>
    %9 = arith.mulf %7, %8 : vector<32x1xf32>
    %10 = vector.broadcast %9 : vector<32x1xf32> to vector<32x256xf32>
    %11 = arith.subf %5, %10 : vector<32x256xf32>
    %12 = arith.mulf %11, %11 : vector<32x256xf32>
    %cst_7 = arith.constant dense<0.000000e+00> : vector<32xf32>
    %13 = vector.multi_reduction <add>, %12, %cst_7 [1] : vector<32x256xf32> to vector<32xf32>
    %14 = vector.shape_cast %13 : vector<32xf32> to vector<32x1xf32>
    %cst_8 = arith.constant 3.906250e-03 : f32
    %15 = vector.broadcast %cst_8 : f32 to vector<32x1xf32>
    %16 = arith.mulf %14, %15 : vector<32x1xf32>
    %cst_9 = arith.constant 9.99999974E-6 : f32
    %17 = vector.broadcast %cst_9 : f32 to vector<32x1xf32>
    %18 = arith.addf %16, %17 : vector<32x1xf32>
    %19 = math.rsqrt %18 : vector<32x1xf32>
    %20 = vector.broadcast %19 : vector<32x1xf32> to vector<32x256xf32>
    %21 = arith.mulf %11, %20 : vector<32x256xf32>
    %cst_10 = arith.constant 0.000000e+00 : f32
    %22 = vector.broadcast %cst_10 : f32 to vector<32x256xf32>
    %23 = arith.maximumf %21, %22 : vector<32x256xf32>
    %24 = vector.extract_strided_slice %23 {offsets = [0, 239], sizes = [32, 17], strides = [1, 1]} : vector<32x256xf32> to vector<32x17xf32>
    %25 = vector.extract_strided_slice %23 {offsets = [0, 0], sizes = [32, 239], strides = [1, 1]} : vector<32x256xf32> to vector<32x239xf32>
    %26 = tpu.concatenate %24, %25 in 1 : vector<32x17xf32>, vector<32x239xf32> -> vector<32x256xf32>
    %c0_11 = arith.constant 0 : index
    %c0_12 = arith.constant 0 : index
    %27 = vector.load %arg1[%c0_11, %c0_12] : memref<9x256xf32, #tpu.memory_space<vmem>>, vector<1x256xf32>
    %28 = vector.broadcast %27 : vector<1x256xf32> to vector<32x256xf32>
    %29 = arith.mulf %26, %28 : vector<32x256xf32>
    %c0_13 = arith.constant 0 : index
    %c0_14 = arith.constant 0 : index
    %30 = vector.load %arg23[%c0_13, %c0_14] : memref<432x256xf32, #tpu.memory_space<vmem>>, vector<32x256xf32>
    tpu.vector_store %arg23[%c0_13, %c0_14], %29 {strides = array<i32>} : memref<432x256xf32, #tpu.memory_space<vmem>>, vector<32x256xf32>,
    %31 = vector.extract_strided_slice %23 {offsets = [0, 240], sizes = [32, 16], strides = [1, 1]} : vector<32x256xf32> to vector<32x16xf32>
    %32 = vector.extract_strided_slice %23 {offsets = [0, 0], sizes = [32, 240], strides = [1, 1]} : vector<32x256xf32> to vector<32x240xf32>
    %33 = tpu.concatenate %31, %32 in 1 : vector<32x16xf32>, vector<32x240xf32> -> vector<32x256xf32>
    %c1 = arith.constant 1 : index
    %c0_15 = arith.constant 0 : index
    %34 = vector.load %arg1[%c1, %c0_15] : memref<9x256xf32, #tpu.memory_space<vmem>>, vector<1x256xf32>
    %35 = vector.broadcast %34 : vector<1x256xf32> to vector<32x256xf32>
    %36 = arith.mulf %33, %35 : vector<32x256xf32>
    %c32 = arith.constant 32 : index
    %c0_16 = arith.constant 0 : index
    %37 = vector.load %arg23[%c32, %c0_16] : memref<432x256xf32, #tpu.memory_space<vmem>>, vector<32x256xf32>
    tpu.vector_store %arg23[%c32, %c0_16], %36 {strides = array<i32>} : memref<432x256xf32, #tpu.memory_space<vmem>>, vector<32x256xf32>,
    %38 = vector.extract_strided_slice %23 {offsets = [0, 241], sizes = [32, 15], strides = [1, 1]} : vector<32x256xf32> to vector<32x15xf32>
    %39 = vector.extract_strided_slice %23 {offsets = [0, 0], sizes = [32, 241], strides = [1, 1]} : vector<32x256xf32> to vector<32x241xf32>
    %40 = tpu.concatenate %38, %39 in 1 : vector<32x15xf32>, vector<32x241xf32> -> vector<32x256xf32>
    %c2 = arith.constant 2 : index
    %c0_17 = arith.constant 0 : index
    %41 = vector.load %arg1[%c2, %c0_17] : memref<9x256xf32, #tpu.memory_space<vmem>>, vector<1x256xf32>
    %42 = vector.broadcast %41 : vector<1x256xf32> to vector<32x256xf32>
    %43 = arith.mulf %40, %42 : vector<32x256xf32>
    %c64 = arith.constant 64 : index
    %c0_18 = arith.constant 0 : index
    %44 = vector.load %arg23[%c64, %c0_18] : memref<432x256xf32, #tpu.memory_space<vmem>>, vector<32x256xf32>
    tpu.vector_store %arg23[%c64, %c0_18], %43 {strides = array<i32>} : memref<432x256xf32, #tpu.memory_space<vmem>>, vector<32x256xf32>,
    %45 = vector.extract_strided_slice %23 {offsets = [0, 255], sizes = [32, 1], strides = [1, 1]} : vector<32x256xf32> to vector<32x1xf32>
    %46 = vector.extract_strided_slice %23 {offsets = [0, 0], sizes = [32, 255], strides = [1, 1]} : vector<32x256xf32> to vector<32x255xf32>
    %47 = tpu.concatenate %45, %46 in 1 : vector<32x1xf32>, vector<32x255xf32> -> vector<32x256xf32>
    %c3 = arith.constant 3 : index
    %c0_19 = arith.constant 0 : index
    %48 = vector.load %arg1[%c3, %c0_19] : memref<9x256xf32, #tpu.memory_space<vmem>>, vector<1x256xf32>
    %49 = vector.broadcast %48 : vector<1x256xf32> to vector<32x256xf32>
    %50 = arith.mulf %47, %49 : vector<32x256xf32>
    %c96 = arith.constant 96 : index
    %c0_20 = arith.constant 0 : index
    %51 = vector.load %arg23[%c96, %c0_20] : memref<432x256xf32, #tpu.memory_space<vmem>>, vector<32x256xf32>
    tpu.vector_store %arg23[%c96, %c0_20], %50 {strides = array<i32>} : memref<432x256xf32, #tpu.memory_space<vmem>>, vector<32x256xf32>,
    %c128 = arith.constant 128 : index
    %c0_21 = arith.constant 0 : index
    %52 = vector.load %arg23[%c128, %c0_21] : memref<432x256xf32, #tpu.memory_space<vmem>>, vector<32x256xf32>
    tpu.vector_store %arg23[%c128, %c0_21], %23 {strides = array<i32>} : memref<432x256xf32, #tpu.memory_space<vmem>>, vector<32x256xf32>,
    %53 = vector.extract_strided_slice %23 {offsets = [0, 1], sizes = [32, 255], strides = [1, 1]} : vector<32x256xf32> to vector<32x255xf32>
    %54 = vector.extract_strided_slice %23 {offsets = [0, 0], sizes = [32, 1], strides = [1, 1]} : vector<32x256xf32> to vector<32x1xf32>
    %55 = tpu.concatenate %53, %54 in 1 : vector<32x255xf32>, vector<32x1xf32> -> vector<32x256xf32>
    %c5 = arith.constant 5 : index
    %c0_22 = arith.constant 0 : index
    %56 = vector.load %arg1[%c5, %c0_22] : memref<9x256xf32, #tpu.memory_space<vmem>>, vector<1x256xf32>
    %57 = vector.broadcast %56 : vector<1x256xf32> to vector<32x256xf32>
    %58 = arith.mulf %55, %57 : vector<32x256xf32>
    %c160 = arith.constant 160 : index
    %c0_23 = arith.constant 0 : index
    %59 = vector.load %arg23[%c160, %c0_23] : memref<432x256xf32, #tpu.memory_space<vmem>>, vector<32x256xf32>
    tpu.vector_store %arg23[%c160, %c0_23], %58 {strides = array<i32>} : memref<432x256xf32, #tpu.memory_space<vmem>>, vector<32x256xf32>,
    %60 = vector.extract_strided_slice %23 {offsets = [0, 15], sizes = [32, 241], strides = [1, 1]} : vector<32x256xf32> to vector<32x241xf32>
    %61 = vector.extract_strided_slice %23 {offsets = [0, 0], sizes = [32, 15], strides = [1, 1]} : vector<32x256xf32> to vector<32x15xf32>
    %62 = tpu.concatenate %60, %61 in 1 : vector<32x241xf32>, vector<32x15xf32> -> vector<32x256xf32>
    %c6 = arith.constant 6 : index
    %c0_24 = arith.constant 0 : index
    %63 = vector.load %arg1[%c6, %c0_24] : memref<9x256xf32, #tpu.memory_space<vmem>>, vector<1x256xf32>
    %64 = vector.broadcast %63 : vector<1x256xf32> to vector<32x256xf32>
    %65 = arith.mulf %62, %64 : vector<32x256xf32>
    %c192 = arith.constant 192 : index
    %c0_25 = arith.constant 0 : index
    %66 = vector.load %arg23[%c192, %c0_25] : memref<432x256xf32, #tpu.memory_space<vmem>>, vector<32x256xf32>
    tpu.vector_store %arg23[%c192, %c0_25], %65 {strides = array<i32>} : memref<432x256xf32, #tpu.memory_space<vmem>>, vector<32x256xf32>,
    %67 = vector.extract_strided_slice %23 {offsets = [0, 16], sizes = [32, 240], strides = [1, 1]} : vector<32x256xf32> to vector<32x240xf32>
    %68 = vector.extract_strided_slice %23 {offsets = [0, 0], sizes = [32, 16], strides = [1, 1]} : vector<32x256xf32> to vector<32x16xf32>
    %69 = tpu.concatenate %67, %68 in 1 : vector<32x240xf32>, vector<32x16xf32> -> vector<32x256xf32>
    %c7 = arith.constant 7 : index
    %c0_26 = arith.constant 0 : index
    %70 = vector.load %arg1[%c7, %c0_26] : memref<9x256xf32, #tpu.memory_space<vmem>>, vector<1x256xf32>
    %71 = vector.broadcast %70 : vector<1x256xf32> to vector<32x256xf32>
    %72 = arith.mulf %69, %71 : vector<32x256xf32>
    %c224 = arith.constant 224 : index
    %c0_27 = arith.constant 0 : index
    %73 = vector.load %arg23[%c224, %c0_27] : memref<432x256xf32, #tpu.memory_space<vmem>>, vector<32x256xf32>
    tpu.vector_store %arg23[%c224, %c0_27], %72 {strides = array<i32>} : memref<432x256xf32, #tpu.memory_space<vmem>>, vector<32x256xf32>,
    %74 = vector.extract_strided_slice %23 {offsets = [0, 17], sizes = [32, 239], strides = [1, 1]} : vector<32x256xf32> to vector<32x239xf32>
    %75 = vector.extract_strided_slice %23 {offsets = [0, 0], sizes = [32, 17], strides = [1, 1]} : vector<32x256xf32> to vector<32x17xf32>
    %76 = tpu.concatenate %74, %75 in 1 : vector<32x239xf32>, vector<32x17xf32> -> vector<32x256xf32>
    %c8 = arith.constant 8 : index
    %c0_28 = arith.constant 0 : index
    %77 = vector.load %arg1[%c8, %c0_28] : memref<9x256xf32, #tpu.memory_space<vmem>>, vector<1x256xf32>
    %78 = vector.broadcast %77 : vector<1x256xf32> to vector<32x256xf32>
    %79 = arith.mulf %76, %78 : vector<32x256xf32>
    %c256 = arith.constant 256 : index
    %c0_29 = arith.constant 0 : index
    %80 = vector.load %arg23[%c256, %c0_29] : memref<432x256xf32, #tpu.memory_space<vmem>>, vector<32x256xf32>
    tpu.vector_store %arg23[%c256, %c0_29], %79 {strides = array<i32>} : memref<432x256xf32, #tpu.memory_space<vmem>>, vector<32x256xf32>,
    %c0_30 = arith.constant 0 : index
    %c0_31 = arith.constant 0 : index
    %81 = vector.load %arg6[%c0_30, %c0_31] : memref<32x288xf32, #tpu.memory_space<vmem>>, vector<32x288xf32>
    %c0_32 = arith.constant 0 : index
    %c0_33 = arith.constant 0 : index
    %82 = vector.load %arg23[%c0_32, %c0_33] : memref<432x256xf32, #tpu.memory_space<vmem>>, vector<288x256xf32>
    %cst_34 = arith.constant dense<0.000000e+00> : vector<32x256xf32>
    %83 = tpu.matmul %81, %82, %cst_34 {dimension_numbers = #tpu.dot_dimension_numbers<[1], [0], [0], [1], [0, 0, 1, 1], [], []>} : vector<32x288xf32>, vector<288x256xf32>, vector<32x256xf32> -> vector<32x256xf32>
    %c0_35 = arith.constant 0 : index
    %c0_36 = arith.constant 0 : index
    %84 = vector.load %arg7[%c0_35, %c0_36] : memref<32x1xf32, #tpu.memory_space<vmem>>, vector<32x1xf32>
    %85 = vector.broadcast %84 : vector<32x1xf32> to vector<32x256xf32>
    %86 = arith.addf %83, %85 : vector<32x256xf32>
    %cst_37 = arith.constant dense<0.000000e+00> : vector<32xf32>
    %87 = vector.multi_reduction <add>, %86, %cst_37 [1] : vector<32x256xf32> to vector<32xf32>
    %88 = vector.shape_cast %87 : vector<32xf32> to vector<32x1xf32>
    %cst_38 = arith.constant 3.906250e-03 : f32
    %89 = vector.broadcast %cst_38 : f32 to vector<32x1xf32>
    %90 = arith.mulf %88, %89 : vector<32x1xf32>
    %91 = vector.broadcast %90 : vector<32x1xf32> to vector<32x256xf32>
    %92 = arith.subf %86, %91 : vector<32x256xf32>
    %93 = arith.mulf %92, %92 : vector<32x256xf32>
    %cst_39 = arith.constant dense<0.000000e+00> : vector<32xf32>
    %94 = vector.multi_reduction <add>, %93, %cst_39 [1] : vector<32x256xf32> to vector<32xf32>
    %95 = vector.shape_cast %94 : vector<32xf32> to vector<32x1xf32>
    %cst_40 = arith.constant 3.906250e-03 : f32
    %96 = vector.broadcast %cst_40 : f32 to vector<32x1xf32>
    %97 = arith.mulf %95, %96 : vector<32x1xf32>
    %cst_41 = arith.constant 9.99999974E-6 : f32
    %98 = vector.broadcast %cst_41 : f32 to vector<32x1xf32>
    %99 = arith.addf %97, %98 : vector<32x1xf32>
    %100 = math.rsqrt %99 : vector<32x1xf32>
    %101 = vector.broadcast %100 : vector<32x1xf32> to vector<32x256xf32>
    %102 = arith.mulf %92, %101 : vector<32x256xf32>
    %cst_42 = arith.constant 0.000000e+00 : f32
    %103 = vector.broadcast %cst_42 : f32 to vector<32x256xf32>
    %104 = arith.maximumf %102, %103 : vector<32x256xf32>
    %105 = vector.extract_strided_slice %104 {offsets = [0, 239], sizes = [32, 17], strides = [1, 1]} : vector<32x256xf32> to vector<32x17xf32>
    %106 = vector.extract_strided_slice %104 {offsets = [0, 0], sizes = [32, 239], strides = [1, 1]} : vector<32x256xf32> to vector<32x239xf32>
    %107 = tpu.concatenate %105, %106 in 1 : vector<32x17xf32>, vector<32x239xf32> -> vector<32x256xf32>
    %c0_43 = arith.constant 0 : index
    %c0_44 = arith.constant 0 : index
    %108 = vector.load %arg1[%c0_43, %c0_44] : memref<9x256xf32, #tpu.memory_space<vmem>>, vector<1x256xf32>
    %109 = vector.broadcast %108 : vector<1x256xf32> to vector<32x256xf32>
    %110 = arith.mulf %107, %109 : vector<32x256xf32>
    %c0_45 = arith.constant 0 : index
    %c0_46 = arith.constant 0 : index
    %111 = vector.load %arg23[%c0_45, %c0_46] : memref<432x256xf32, #tpu.memory_space<vmem>>, vector<32x256xf32>
    tpu.vector_store %arg23[%c0_45, %c0_46], %110 {strides = array<i32>} : memref<432x256xf32, #tpu.memory_space<vmem>>, vector<32x256xf32>,
    %112 = vector.extract_strided_slice %104 {offsets = [0, 240], sizes = [32, 16], strides = [1, 1]} : vector<32x256xf32> to vector<32x16xf32>
    %113 = vector.extract_strided_slice %104 {offsets = [0, 0], sizes = [32, 240], strides = [1, 1]} : vector<32x256xf32> to vector<32x240xf32>
    %114 = tpu.concatenate %112, %113 in 1 : vector<32x16xf32>, vector<32x240xf32> -> vector<32x256xf32>
    %c1_47 = arith.constant 1 : index
    %c0_48 = arith.constant 0 : index
    %115 = vector.load %arg1[%c1_47, %c0_48] : memref<9x256xf32, #tpu.memory_space<vmem>>, vector<1x256xf32>
    %116 = vector.broadcast %115 : vector<1x256xf32> to vector<32x256xf32>
    %117 = arith.mulf %114, %116 : vector<32x256xf32>
    %c32_49 = arith.constant 32 : index
    %c0_50 = arith.constant 0 : index
    %118 = vector.load %arg23[%c32_49, %c0_50] : memref<432x256xf32, #tpu.memory_space<vmem>>, vector<32x256xf32>
    tpu.vector_store %arg23[%c32_49, %c0_50], %117 {strides = array<i32>} : memref<432x256xf32, #tpu.memory_space<vmem>>, vector<32x256xf32>,
    %119 = vector.extract_strided_slice %104 {offsets = [0, 241], sizes = [32, 15], strides = [1, 1]} : vector<32x256xf32> to vector<32x15xf32>
    %120 = vector.extract_strided_slice %104 {offsets = [0, 0], sizes = [32, 241], strides = [1, 1]} : vector<32x256xf32> to vector<32x241xf32>
    %121 = tpu.concatenate %119, %120 in 1 : vector<32x15xf32>, vector<32x241xf32> -> vector<32x256xf32>
    %c2_51 = arith.constant 2 : index
    %c0_52 = arith.constant 0 : index
    %122 = vector.load %arg1[%c2_51, %c0_52] : memref<9x256xf32, #tpu.memory_space<vmem>>, vector<1x256xf32>
    %123 = vector.broadcast %122 : vector<1x256xf32> to vector<32x256xf32>
    %124 = arith.mulf %121, %123 : vector<32x256xf32>
    %c64_53 = arith.constant 64 : index
    %c0_54 = arith.constant 0 : index
    %125 = vector.load %arg23[%c64_53, %c0_54] : memref<432x256xf32, #tpu.memory_space<vmem>>, vector<32x256xf32>
    tpu.vector_store %arg23[%c64_53, %c0_54], %124 {strides = array<i32>} : memref<432x256xf32, #tpu.memory_space<vmem>>, vector<32x256xf32>,
    %126 = vector.extract_strided_slice %104 {offsets = [0, 255], sizes = [32, 1], strides = [1, 1]} : vector<32x256xf32> to vector<32x1xf32>
    %127 = vector.extract_strided_slice %104 {offsets = [0, 0], sizes = [32, 255], strides = [1, 1]} : vector<32x256xf32> to vector<32x255xf32>
    %128 = tpu.concatenate %126, %127 in 1 : vector<32x1xf32>, vector<32x255xf32> -> vector<32x256xf32>
    %c3_55 = arith.constant 3 : index
    %c0_56 = arith.constant 0 : index
    %129 = vector.load %arg1[%c3_55, %c0_56] : memref<9x256xf32, #tpu.memory_space<vmem>>, vector<1x256xf32>
    %130 = vector.broadcast %129 : vector<1x256xf32> to vector<32x256xf32>
    %131 = arith.mulf %128, %130 : vector<32x256xf32>
    %c96_57 = arith.constant 96 : index
    %c0_58 = arith.constant 0 : index
    %132 = vector.load %arg23[%c96_57, %c0_58] : memref<432x256xf32, #tpu.memory_space<vmem>>, vector<32x256xf32>
    tpu.vector_store %arg23[%c96_57, %c0_58], %131 {strides = array<i32>} : memref<432x256xf32, #tpu.memory_space<vmem>>, vector<32x256xf32>,
    %c128_59 = arith.constant 128 : index
    %c0_60 = arith.constant 0 : index
    %133 = vector.load %arg23[%c128_59, %c0_60] : memref<432x256xf32, #tpu.memory_space<vmem>>, vector<32x256xf32>
    tpu.vector_store %arg23[%c128_59, %c0_60], %104 {strides = array<i32>} : memref<432x256xf32, #tpu.memory_space<vmem>>, vector<32x256xf32>,
    %134 = vector.extract_strided_slice %104 {offsets = [0, 1], sizes = [32, 255], strides = [1, 1]} : vector<32x256xf32> to vector<32x255xf32>
    %135 = vector.extract_strided_slice %104 {offsets = [0, 0], sizes = [32, 1], strides = [1, 1]} : vector<32x256xf32> to vector<32x1xf32>
    %136 = tpu.concatenate %134, %135 in 1 : vector<32x255xf32>, vector<32x1xf32> -> vector<32x256xf32>
    %c5_61 = arith.constant 5 : index
    %c0_62 = arith.constant 0 : index
    %137 = vector.load %arg1[%c5_61, %c0_62] : memref<9x256xf32, #tpu.memory_space<vmem>>, vector<1x256xf32>
    %138 = vector.broadcast %137 : vector<1x256xf32> to vector<32x256xf32>
    %139 = arith.mulf %136, %138 : vector<32x256xf32>
    %c160_63 = arith.constant 160 : index
    %c0_64 = arith.constant 0 : index
    %140 = vector.load %arg23[%c160_63, %c0_64] : memref<432x256xf32, #tpu.memory_space<vmem>>, vector<32x256xf32>
    tpu.vector_store %arg23[%c160_63, %c0_64], %139 {strides = array<i32>} : memref<432x256xf32, #tpu.memory_space<vmem>>, vector<32x256xf32>,
    %141 = vector.extract_strided_slice %104 {offsets = [0, 15], sizes = [32, 241], strides = [1, 1]} : vector<32x256xf32> to vector<32x241xf32>
    %142 = vector.extract_strided_slice %104 {offsets = [0, 0], sizes = [32, 15], strides = [1, 1]} : vector<32x256xf32> to vector<32x15xf32>
    %143 = tpu.concatenate %141, %142 in 1 : vector<32x241xf32>, vector<32x15xf32> -> vector<32x256xf32>
    %c6_65 = arith.constant 6 : index
    %c0_66 = arith.constant 0 : index
    %144 = vector.load %arg1[%c6_65, %c0_66] : memref<9x256xf32, #tpu.memory_space<vmem>>, vector<1x256xf32>
    %145 = vector.broadcast %144 : vector<1x256xf32> to vector<32x256xf32>
    %146 = arith.mulf %143, %145 : vector<32x256xf32>
    %c192_67 = arith.constant 192 : index
    %c0_68 = arith.constant 0 : index
    %147 = vector.load %arg23[%c192_67, %c0_68] : memref<432x256xf32, #tpu.memory_space<vmem>>, vector<32x256xf32>
    tpu.vector_store %arg23[%c192_67, %c0_68], %146 {strides = array<i32>} : memref<432x256xf32, #tpu.memory_space<vmem>>, vector<32x256xf32>,
    %148 = vector.extract_strided_slice %104 {offsets = [0, 16], sizes = [32, 240], strides = [1, 1]} : vector<32x256xf32> to vector<32x240xf32>
    %149 = vector.extract_strided_slice %104 {offsets = [0, 0], sizes = [32, 16], strides = [1, 1]} : vector<32x256xf32> to vector<32x16xf32>
    %150 = tpu.concatenate %148, %149 in 1 : vector<32x240xf32>, vector<32x16xf32> -> vector<32x256xf32>
    %c7_69 = arith.constant 7 : index
    %c0_70 = arith.constant 0 : index
    %151 = vector.load %arg1[%c7_69, %c0_70] : memref<9x256xf32, #tpu.memory_space<vmem>>, vector<1x256xf32>
    %152 = vector.broadcast %151 : vector<1x256xf32> to vector<32x256xf32>
    %153 = arith.mulf %150, %152 : vector<32x256xf32>
    %c224_71 = arith.constant 224 : index
    %c0_72 = arith.constant 0 : index
    %154 = vector.load %arg23[%c224_71, %c0_72] : memref<432x256xf32, #tpu.memory_space<vmem>>, vector<32x256xf32>
    tpu.vector_store %arg23[%c224_71, %c0_72], %153 {strides = array<i32>} : memref<432x256xf32, #tpu.memory_space<vmem>>, vector<32x256xf32>,
    %155 = vector.extract_strided_slice %104 {offsets = [0, 17], sizes = [32, 239], strides = [1, 1]} : vector<32x256xf32> to vector<32x239xf32>
    %156 = vector.extract_strided_slice %104 {offsets = [0, 0], sizes = [32, 17], strides = [1, 1]} : vector<32x256xf32> to vector<32x17xf32>
    %157 = tpu.concatenate %155, %156 in 1 : vector<32x239xf32>, vector<32x17xf32> -> vector<32x256xf32>
    %c8_73 = arith.constant 8 : index
    %c0_74 = arith.constant 0 : index
    %158 = vector.load %arg1[%c8_73, %c0_74] : memref<9x256xf32, #tpu.memory_space<vmem>>, vector<1x256xf32>
    %159 = vector.broadcast %158 : vector<1x256xf32> to vector<32x256xf32>
    %160 = arith.mulf %157, %159 : vector<32x256xf32>
    %c256_75 = arith.constant 256 : index
    %c0_76 = arith.constant 0 : index
    %161 = vector.load %arg23[%c256_75, %c0_76] : memref<432x256xf32, #tpu.memory_space<vmem>>, vector<32x256xf32>
    tpu.vector_store %arg23[%c256_75, %c0_76], %160 {strides = array<i32>} : memref<432x256xf32, #tpu.memory_space<vmem>>, vector<32x256xf32>,
    %c0_77 = arith.constant 0 : index
    %c0_78 = arith.constant 0 : index
    %162 = vector.load %arg8[%c0_77, %c0_78] : memref<32x288xf32, #tpu.memory_space<vmem>>, vector<32x288xf32>
    %c0_79 = arith.constant 0 : index
    %c0_80 = arith.constant 0 : index
    %163 = vector.load %arg23[%c0_79, %c0_80] : memref<432x256xf32, #tpu.memory_space<vmem>>, vector<288x256xf32>
    %cst_81 = arith.constant dense<0.000000e+00> : vector<32x256xf32>
    %164 = tpu.matmul %162, %163, %cst_81 {dimension_numbers = #tpu.dot_dimension_numbers<[1], [0], [0], [1], [0, 0, 1, 1], [], []>} : vector<32x288xf32>, vector<288x256xf32>, vector<32x256xf32> -> vector<32x256xf32>
    %c0_82 = arith.constant 0 : index
    %c0_83 = arith.constant 0 : index
    %165 = vector.load %arg9[%c0_82, %c0_83] : memref<32x1xf32, #tpu.memory_space<vmem>>, vector<32x1xf32>
    %166 = vector.broadcast %165 : vector<32x1xf32> to vector<32x256xf32>
    %167 = arith.addf %164, %166 : vector<32x256xf32>
    %cst_84 = arith.constant dense<0.000000e+00> : vector<32xf32>
    %168 = vector.multi_reduction <add>, %167, %cst_84 [1] : vector<32x256xf32> to vector<32xf32>
    %169 = vector.shape_cast %168 : vector<32xf32> to vector<32x1xf32>
    %cst_85 = arith.constant 3.906250e-03 : f32
    %170 = vector.broadcast %cst_85 : f32 to vector<32x1xf32>
    %171 = arith.mulf %169, %170 : vector<32x1xf32>
    %172 = vector.broadcast %171 : vector<32x1xf32> to vector<32x256xf32>
    %173 = arith.subf %167, %172 : vector<32x256xf32>
    %174 = arith.mulf %173, %173 : vector<32x256xf32>
    %cst_86 = arith.constant dense<0.000000e+00> : vector<32xf32>
    %175 = vector.multi_reduction <add>, %174, %cst_86 [1] : vector<32x256xf32> to vector<32xf32>
    %176 = vector.shape_cast %175 : vector<32xf32> to vector<32x1xf32>
    %cst_87 = arith.constant 3.906250e-03 : f32
    %177 = vector.broadcast %cst_87 : f32 to vector<32x1xf32>
    %178 = arith.mulf %176, %177 : vector<32x1xf32>
    %cst_88 = arith.constant 9.99999974E-6 : f32
    %179 = vector.broadcast %cst_88 : f32 to vector<32x1xf32>
    %180 = arith.addf %178, %179 : vector<32x1xf32>
    %181 = math.rsqrt %180 : vector<32x1xf32>
    %182 = vector.broadcast %181 : vector<32x1xf32> to vector<32x256xf32>
    %183 = arith.mulf %173, %182 : vector<32x256xf32>
    %184 = arith.addf %183, %23 : vector<32x256xf32>
    %cst_89 = arith.constant 0.000000e+00 : f32
    %185 = vector.broadcast %cst_89 : f32 to vector<32x256xf32>
    %186 = arith.maximumf %184, %185 : vector<32x256xf32>
    %c0_90 = arith.constant 0 : index
    %c0_91 = arith.constant 0 : index
    %187 = vector.load %arg10[%c0_90, %c0_91] : memref<48x32xf32, #tpu.memory_space<vmem>>, vector<48x32xf32>
    %cst_92 = arith.constant dense<0.000000e+00> : vector<48x256xf32>
    %188 = tpu.matmul %187, %186, %cst_92 {dimension_numbers = #tpu.dot_dimension_numbers<[1], [0], [0], [1], [0, 0, 1, 1], [], []>} : vector<48x32xf32>, vector<32x256xf32>, vector<48x256xf32> -> vector<48x256xf32>
    %c0_93 = arith.constant 0 : index
    %c0_94 = arith.constant 0 : index
    %189 = vector.load %arg11[%c0_93, %c0_94] : memref<48x1xf32, #tpu.memory_space<vmem>>, vector<48x1xf32>
    %190 = vector.broadcast %189 : vector<48x1xf32> to vector<48x256xf32>
    %191 = arith.addf %188, %190 : vector<48x256xf32>
    %cst_95 = arith.constant dense<0.000000e+00> : vector<48xf32>
    %192 = vector.multi_reduction <add>, %191, %cst_95 [1] : vector<48x256xf32> to vector<48xf32>
    %193 = vector.shape_cast %192 : vector<48xf32> to vector<48x1xf32>
    %cst_96 = arith.constant 3.906250e-03 : f32
    %194 = vector.broadcast %cst_96 : f32 to vector<48x1xf32>
    %195 = arith.mulf %193, %194 : vector<48x1xf32>
    %196 = vector.broadcast %195 : vector<48x1xf32> to vector<48x256xf32>
    %197 = arith.subf %191, %196 : vector<48x256xf32>
    %198 = arith.mulf %197, %197 : vector<48x256xf32>
    %cst_97 = arith.constant dense<0.000000e+00> : vector<48xf32>
    %199 = vector.multi_reduction <add>, %198, %cst_97 [1] : vector<48x256xf32> to vector<48xf32>
    %200 = vector.shape_cast %199 : vector<48xf32> to vector<48x1xf32>
    %cst_98 = arith.constant 3.906250e-03 : f32
    %201 = vector.broadcast %cst_98 : f32 to vector<48x1xf32>
    %202 = arith.mulf %200, %201 : vector<48x1xf32>
    %cst_99 = arith.constant 9.99999974E-6 : f32
    %203 = vector.broadcast %cst_99 : f32 to vector<48x1xf32>
    %204 = arith.addf %202, %203 : vector<48x1xf32>
    %205 = math.rsqrt %204 : vector<48x1xf32>
    %206 = vector.broadcast %205 : vector<48x1xf32> to vector<48x256xf32>
    %207 = arith.mulf %197, %206 : vector<48x256xf32>
    %208 = vector.extract_strided_slice %207 {offsets = [0, 222], sizes = [48, 34], strides = [1, 1]} : vector<48x256xf32> to vector<48x34xf32>
    %209 = vector.extract_strided_slice %207 {offsets = [0, 0], sizes = [48, 222], strides = [1, 1]} : vector<48x256xf32> to vector<48x222xf32>
    %210 = tpu.concatenate %208, %209 in 1 : vector<48x34xf32>, vector<48x222xf32> -> vector<48x256xf32>
    %c0_100 = arith.constant 0 : index
    %c0_101 = arith.constant 0 : index
    %211 = vector.load %arg2[%c0_100, %c0_101] : memref<9x256xf32, #tpu.memory_space<vmem>>, vector<1x256xf32>
    %212 = vector.broadcast %211 : vector<1x256xf32> to vector<48x256xf32>
    %213 = arith.mulf %210, %212 : vector<48x256xf32>
    %c0_102 = arith.constant 0 : index
    %c0_103 = arith.constant 0 : index
    %214 = vector.load %arg23[%c0_102, %c0_103] : memref<432x256xf32, #tpu.memory_space<vmem>>, vector<48x256xf32>
    tpu.vector_store %arg23[%c0_102, %c0_103], %213 {strides = array<i32>} : memref<432x256xf32, #tpu.memory_space<vmem>>, vector<48x256xf32>,
    %215 = vector.extract_strided_slice %207 {offsets = [0, 224], sizes = [48, 32], strides = [1, 1]} : vector<48x256xf32> to vector<48x32xf32>
    %216 = vector.extract_strided_slice %207 {offsets = [0, 0], sizes = [48, 224], strides = [1, 1]} : vector<48x256xf32> to vector<48x224xf32>
    %217 = tpu.concatenate %215, %216 in 1 : vector<48x32xf32>, vector<48x224xf32> -> vector<48x256xf32>
    %c1_104 = arith.constant 1 : index
    %c0_105 = arith.constant 0 : index
    %218 = vector.load %arg2[%c1_104, %c0_105] : memref<9x256xf32, #tpu.memory_space<vmem>>, vector<1x256xf32>
    %219 = vector.broadcast %218 : vector<1x256xf32> to vector<48x256xf32>
    %220 = arith.mulf %217, %219 : vector<48x256xf32>
    %c48 = arith.constant 48 : index
    %c0_106 = arith.constant 0 : index
    %221 = vector.load %arg23[%c48, %c0_106] : memref<432x256xf32, #tpu.memory_space<vmem>>, vector<48x256xf32>
    tpu.vector_store %arg23[%c48, %c0_106], %220 {strides = array<i32>} : memref<432x256xf32, #tpu.memory_space<vmem>>, vector<48x256xf32>,
    %222 = vector.extract_strided_slice %207 {offsets = [0, 226], sizes = [48, 30], strides = [1, 1]} : vector<48x256xf32> to vector<48x30xf32>
    %223 = vector.extract_strided_slice %207 {offsets = [0, 0], sizes = [48, 226], strides = [1, 1]} : vector<48x256xf32> to vector<48x226xf32>
    %224 = tpu.concatenate %222, %223 in 1 : vector<48x30xf32>, vector<48x226xf32> -> vector<48x256xf32>
    %c2_107 = arith.constant 2 : index
    %c0_108 = arith.constant 0 : index
    %225 = vector.load %arg2[%c2_107, %c0_108] : memref<9x256xf32, #tpu.memory_space<vmem>>, vector<1x256xf32>
    %226 = vector.broadcast %225 : vector<1x256xf32> to vector<48x256xf32>
    %227 = arith.mulf %224, %226 : vector<48x256xf32>
    %c96_109 = arith.constant 96 : index
    %c0_110 = arith.constant 0 : index
    %228 = vector.load %arg23[%c96_109, %c0_110] : memref<432x256xf32, #tpu.memory_space<vmem>>, vector<48x256xf32>
    tpu.vector_store %arg23[%c96_109, %c0_110], %227 {strides = array<i32>} : memref<432x256xf32, #tpu.memory_space<vmem>>, vector<48x256xf32>,
    %229 = vector.extract_strided_slice %207 {offsets = [0, 254], sizes = [48, 2], strides = [1, 1]} : vector<48x256xf32> to vector<48x2xf32>
    %230 = vector.extract_strided_slice %207 {offsets = [0, 0], sizes = [48, 254], strides = [1, 1]} : vector<48x256xf32> to vector<48x254xf32>
    %231 = tpu.concatenate %229, %230 in 1 : vector<48x2xf32>, vector<48x254xf32> -> vector<48x256xf32>
    %c3_111 = arith.constant 3 : index
    %c0_112 = arith.constant 0 : index
    %232 = vector.load %arg2[%c3_111, %c0_112] : memref<9x256xf32, #tpu.memory_space<vmem>>, vector<1x256xf32>
    %233 = vector.broadcast %232 : vector<1x256xf32> to vector<48x256xf32>
    %234 = arith.mulf %231, %233 : vector<48x256xf32>
    %c144 = arith.constant 144 : index
    %c0_113 = arith.constant 0 : index
    %235 = vector.load %arg23[%c144, %c0_113] : memref<432x256xf32, #tpu.memory_space<vmem>>, vector<48x256xf32>
    tpu.vector_store %arg23[%c144, %c0_113], %234 {strides = array<i32>} : memref<432x256xf32, #tpu.memory_space<vmem>>, vector<48x256xf32>,
    %c192_114 = arith.constant 192 : index
    %c0_115 = arith.constant 0 : index
    %236 = vector.load %arg23[%c192_114, %c0_115] : memref<432x256xf32, #tpu.memory_space<vmem>>, vector<48x256xf32>
    tpu.vector_store %arg23[%c192_114, %c0_115], %207 {strides = array<i32>} : memref<432x256xf32, #tpu.memory_space<vmem>>, vector<48x256xf32>,
    %237 = vector.extract_strided_slice %207 {offsets = [0, 2], sizes = [48, 254], strides = [1, 1]} : vector<48x256xf32> to vector<48x254xf32>
    %238 = vector.extract_strided_slice %207 {offsets = [0, 0], sizes = [48, 2], strides = [1, 1]} : vector<48x256xf32> to vector<48x2xf32>
    %239 = tpu.concatenate %237, %238 in 1 : vector<48x254xf32>, vector<48x2xf32> -> vector<48x256xf32>
    %c5_116 = arith.constant 5 : index
    %c0_117 = arith.constant 0 : index
    %240 = vector.load %arg2[%c5_116, %c0_117] : memref<9x256xf32, #tpu.memory_space<vmem>>, vector<1x256xf32>
    %241 = vector.broadcast %240 : vector<1x256xf32> to vector<48x256xf32>
    %242 = arith.mulf %239, %241 : vector<48x256xf32>
    %c240 = arith.constant 240 : index
    %c0_118 = arith.constant 0 : index
    %243 = vector.load %arg23[%c240, %c0_118] : memref<432x256xf32, #tpu.memory_space<vmem>>, vector<48x256xf32>
    tpu.vector_store %arg23[%c240, %c0_118], %242 {strides = array<i32>} : memref<432x256xf32, #tpu.memory_space<vmem>>, vector<48x256xf32>,
    %244 = vector.extract_strided_slice %207 {offsets = [0, 30], sizes = [48, 226], strides = [1, 1]} : vector<48x256xf32> to vector<48x226xf32>
    %245 = vector.extract_strided_slice %207 {offsets = [0, 0], sizes = [48, 30], strides = [1, 1]} : vector<48x256xf32> to vector<48x30xf32>
    %246 = tpu.concatenate %244, %245 in 1 : vector<48x226xf32>, vector<48x30xf32> -> vector<48x256xf32>
    %c6_119 = arith.constant 6 : index
    %c0_120 = arith.constant 0 : index
    %247 = vector.load %arg2[%c6_119, %c0_120] : memref<9x256xf32, #tpu.memory_space<vmem>>, vector<1x256xf32>
    %248 = vector.broadcast %247 : vector<1x256xf32> to vector<48x256xf32>
    %249 = arith.mulf %246, %248 : vector<48x256xf32>
    %c288 = arith.constant 288 : index
    %c0_121 = arith.constant 0 : index
    %250 = vector.load %arg23[%c288, %c0_121] : memref<432x256xf32, #tpu.memory_space<vmem>>, vector<48x256xf32>
    tpu.vector_store %arg23[%c288, %c0_121], %249 {strides = array<i32>} : memref<432x256xf32, #tpu.memory_space<vmem>>, vector<48x256xf32>,
    %251 = vector.extract_strided_slice %207 {offsets = [0, 32], sizes = [48, 224], strides = [1, 1]} : vector<48x256xf32> to vector<48x224xf32>
    %252 = vector.extract_strided_slice %207 {offsets = [0, 0], sizes = [48, 32], strides = [1, 1]} : vector<48x256xf32> to vector<48x32xf32>
    %253 = tpu.concatenate %251, %252 in 1 : vector<48x224xf32>, vector<48x32xf32> -> vector<48x256xf32>
    %c7_122 = arith.constant 7 : index
    %c0_123 = arith.constant 0 : index
    %254 = vector.load %arg2[%c7_122, %c0_123] : memref<9x256xf32, #tpu.memory_space<vmem>>, vector<1x256xf32>
    %255 = vector.broadcast %254 : vector<1x256xf32> to vector<48x256xf32>
    %256 = arith.mulf %253, %255 : vector<48x256xf32>
    %c336 = arith.constant 336 : index
    %c0_124 = arith.constant 0 : index
    %257 = vector.load %arg23[%c336, %c0_124] : memref<432x256xf32, #tpu.memory_space<vmem>>, vector<48x256xf32>
    tpu.vector_store %arg23[%c336, %c0_124], %256 {strides = array<i32>} : memref<432x256xf32, #tpu.memory_space<vmem>>, vector<48x256xf32>,
    %258 = vector.extract_strided_slice %207 {offsets = [0, 34], sizes = [48, 222], strides = [1, 1]} : vector<48x256xf32> to vector<48x222xf32>
    %259 = vector.extract_strided_slice %207 {offsets = [0, 0], sizes = [48, 34], strides = [1, 1]} : vector<48x256xf32> to vector<48x34xf32>
    %260 = tpu.concatenate %258, %259 in 1 : vector<48x222xf32>, vector<48x34xf32> -> vector<48x256xf32>
    %c8_125 = arith.constant 8 : index
    %c0_126 = arith.constant 0 : index
    %261 = vector.load %arg2[%c8_125, %c0_126] : memref<9x256xf32, #tpu.memory_space<vmem>>, vector<1x256xf32>
    %262 = vector.broadcast %261 : vector<1x256xf32> to vector<48x256xf32>
    %263 = arith.mulf %260, %262 : vector<48x256xf32>
    %c384 = arith.constant 384 : index
    %c0_127 = arith.constant 0 : index
    %264 = vector.load %arg23[%c384, %c0_127] : memref<432x256xf32, #tpu.memory_space<vmem>>, vector<48x256xf32>
    tpu.vector_store %arg23[%c384, %c0_127], %263 {strides = array<i32>} : memref<432x256xf32, #tpu.memory_space<vmem>>, vector<48x256xf32>,
    %c0_128 = arith.constant 0 : index
    %c0_129 = arith.constant 0 : index
    %265 = vector.load %arg12[%c0_128, %c0_129] : memref<48x432xf32, #tpu.memory_space<vmem>>, vector<48x432xf32>
    %c0_130 = arith.constant 0 : index
    %c0_131 = arith.constant 0 : index
    %266 = vector.load %arg23[%c0_130, %c0_131] : memref<432x256xf32, #tpu.memory_space<vmem>>, vector<432x256xf32>
    %cst_132 = arith.constant dense<0.000000e+00> : vector<48x256xf32>
    %267 = tpu.matmul %265, %266, %cst_132 {dimension_numbers = #tpu.dot_dimension_numbers<[1], [0], [0], [1], [0, 0, 1, 1], [], []>} : vector<48x432xf32>, vector<432x256xf32>, vector<48x256xf32> -> vector<48x256xf32>
    %c0_133 = arith.constant 0 : index
    %c0_134 = arith.constant 0 : index
    %268 = vector.load %arg13[%c0_133, %c0_134] : memref<48x1xf32, #tpu.memory_space<vmem>>, vector<48x1xf32>
    %269 = vector.broadcast %268 : vector<48x1xf32> to vector<48x256xf32>
    %270 = arith.addf %267, %269 : vector<48x256xf32>
    %cst_135 = arith.constant dense<0.000000e+00> : vector<48xf32>
    %271 = vector.multi_reduction <add>, %270, %cst_135 [1] : vector<48x256xf32> to vector<48xf32>
    %272 = vector.shape_cast %271 : vector<48xf32> to vector<48x1xf32>
    %cst_136 = arith.constant 3.906250e-03 : f32
    %273 = vector.broadcast %cst_136 : f32 to vector<48x1xf32>
    %274 = arith.mulf %272, %273 : vector<48x1xf32>
    %275 = vector.broadcast %274 : vector<48x1xf32> to vector<48x256xf32>
    %276 = arith.subf %270, %275 : vector<48x256xf32>
    %277 = arith.mulf %276, %276 : vector<48x256xf32>
    %cst_137 = arith.constant dense<0.000000e+00> : vector<48xf32>
    %278 = vector.multi_reduction <add>, %277, %cst_137 [1] : vector<48x256xf32> to vector<48xf32>
    %279 = vector.shape_cast %278 : vector<48xf32> to vector<48x1xf32>
    %cst_138 = arith.constant 3.906250e-03 : f32
    %280 = vector.broadcast %cst_138 : f32 to vector<48x1xf32>
    %281 = arith.mulf %279, %280 : vector<48x1xf32>
    %cst_139 = arith.constant 9.99999974E-6 : f32
    %282 = vector.broadcast %cst_139 : f32 to vector<48x1xf32>
    %283 = arith.addf %281, %282 : vector<48x1xf32>
    %284 = math.rsqrt %283 : vector<48x1xf32>
    %285 = vector.broadcast %284 : vector<48x1xf32> to vector<48x256xf32>
    %286 = arith.mulf %276, %285 : vector<48x256xf32>
    %cst_140 = arith.constant 0.000000e+00 : f32
    %287 = vector.broadcast %cst_140 : f32 to vector<48x256xf32>
    %288 = arith.maximumf %286, %287 : vector<48x256xf32>
    %289 = vector.extract_strided_slice %288 {offsets = [0, 222], sizes = [48, 34], strides = [1, 1]} : vector<48x256xf32> to vector<48x34xf32>
    %290 = vector.extract_strided_slice %288 {offsets = [0, 0], sizes = [48, 222], strides = [1, 1]} : vector<48x256xf32> to vector<48x222xf32>
    %291 = tpu.concatenate %289, %290 in 1 : vector<48x34xf32>, vector<48x222xf32> -> vector<48x256xf32>
    %c0_141 = arith.constant 0 : index
    %c0_142 = arith.constant 0 : index
    %292 = vector.load %arg2[%c0_141, %c0_142] : memref<9x256xf32, #tpu.memory_space<vmem>>, vector<1x256xf32>
    %293 = vector.broadcast %292 : vector<1x256xf32> to vector<48x256xf32>
    %294 = arith.mulf %291, %293 : vector<48x256xf32>
    %c0_143 = arith.constant 0 : index
    %c0_144 = arith.constant 0 : index
    %295 = vector.load %arg23[%c0_143, %c0_144] : memref<432x256xf32, #tpu.memory_space<vmem>>, vector<48x256xf32>
    tpu.vector_store %arg23[%c0_143, %c0_144], %294 {strides = array<i32>} : memref<432x256xf32, #tpu.memory_space<vmem>>, vector<48x256xf32>,
    %296 = vector.extract_strided_slice %288 {offsets = [0, 224], sizes = [48, 32], strides = [1, 1]} : vector<48x256xf32> to vector<48x32xf32>
    %297 = vector.extract_strided_slice %288 {offsets = [0, 0], sizes = [48, 224], strides = [1, 1]} : vector<48x256xf32> to vector<48x224xf32>
    %298 = tpu.concatenate %296, %297 in 1 : vector<48x32xf32>, vector<48x224xf32> -> vector<48x256xf32>
    %c1_145 = arith.constant 1 : index
    %c0_146 = arith.constant 0 : index
    %299 = vector.load %arg2[%c1_145, %c0_146] : memref<9x256xf32, #tpu.memory_space<vmem>>, vector<1x256xf32>
    %300 = vector.broadcast %299 : vector<1x256xf32> to vector<48x256xf32>
    %301 = arith.mulf %298, %300 : vector<48x256xf32>
    %c48_147 = arith.constant 48 : index
    %c0_148 = arith.constant 0 : index
    %302 = vector.load %arg23[%c48_147, %c0_148] : memref<432x256xf32, #tpu.memory_space<vmem>>, vector<48x256xf32>
    tpu.vector_store %arg23[%c48_147, %c0_148], %301 {strides = array<i32>} : memref<432x256xf32, #tpu.memory_space<vmem>>, vector<48x256xf32>,
    %303 = vector.extract_strided_slice %288 {offsets = [0, 226], sizes = [48, 30], strides = [1, 1]} : vector<48x256xf32> to vector<48x30xf32>
    %304 = vector.extract_strided_slice %288 {offsets = [0, 0], sizes = [48, 226], strides = [1, 1]} : vector<48x256xf32> to vector<48x226xf32>
    %305 = tpu.concatenate %303, %304 in 1 : vector<48x30xf32>, vector<48x226xf32> -> vector<48x256xf32>
    %c2_149 = arith.constant 2 : index
    %c0_150 = arith.constant 0 : index
    %306 = vector.load %arg2[%c2_149, %c0_150] : memref<9x256xf32, #tpu.memory_space<vmem>>, vector<1x256xf32>
    %307 = vector.broadcast %306 : vector<1x256xf32> to vector<48x256xf32>
    %308 = arith.mulf %305, %307 : vector<48x256xf32>
    %c96_151 = arith.constant 96 : index
    %c0_152 = arith.constant 0 : index
    %309 = vector.load %arg23[%c96_151, %c0_152] : memref<432x256xf32, #tpu.memory_space<vmem>>, vector<48x256xf32>
    tpu.vector_store %arg23[%c96_151, %c0_152], %308 {strides = array<i32>} : memref<432x256xf32, #tpu.memory_space<vmem>>, vector<48x256xf32>,
    %310 = vector.extract_strided_slice %288 {offsets = [0, 254], sizes = [48, 2], strides = [1, 1]} : vector<48x256xf32> to vector<48x2xf32>
    %311 = vector.extract_strided_slice %288 {offsets = [0, 0], sizes = [48, 254], strides = [1, 1]} : vector<48x256xf32> to vector<48x254xf32>
    %312 = tpu.concatenate %310, %311 in 1 : vector<48x2xf32>, vector<48x254xf32> -> vector<48x256xf32>
    %c3_153 = arith.constant 3 : index
    %c0_154 = arith.constant 0 : index
    %313 = vector.load %arg2[%c3_153, %c0_154] : memref<9x256xf32, #tpu.memory_space<vmem>>, vector<1x256xf32>
    %314 = vector.broadcast %313 : vector<1x256xf32> to vector<48x256xf32>
    %315 = arith.mulf %312, %314 : vector<48x256xf32>
    %c144_155 = arith.constant 144 : index
    %c0_156 = arith.constant 0 : index
    %316 = vector.load %arg23[%c144_155, %c0_156] : memref<432x256xf32, #tpu.memory_space<vmem>>, vector<48x256xf32>
    tpu.vector_store %arg23[%c144_155, %c0_156], %315 {strides = array<i32>} : memref<432x256xf32, #tpu.memory_space<vmem>>, vector<48x256xf32>,
    %c192_157 = arith.constant 192 : index
    %c0_158 = arith.constant 0 : index
    %317 = vector.load %arg23[%c192_157, %c0_158] : memref<432x256xf32, #tpu.memory_space<vmem>>, vector<48x256xf32>
    tpu.vector_store %arg23[%c192_157, %c0_158], %288 {strides = array<i32>} : memref<432x256xf32, #tpu.memory_space<vmem>>, vector<48x256xf32>,
    %318 = vector.extract_strided_slice %288 {offsets = [0, 2], sizes = [48, 254], strides = [1, 1]} : vector<48x256xf32> to vector<48x254xf32>
    %319 = vector.extract_strided_slice %288 {offsets = [0, 0], sizes = [48, 2], strides = [1, 1]} : vector<48x256xf32> to vector<48x2xf32>
    %320 = tpu.concatenate %318, %319 in 1 : vector<48x254xf32>, vector<48x2xf32> -> vector<48x256xf32>
    %c5_159 = arith.constant 5 : index
    %c0_160 = arith.constant 0 : index
    %321 = vector.load %arg2[%c5_159, %c0_160] : memref<9x256xf32, #tpu.memory_space<vmem>>, vector<1x256xf32>
    %322 = vector.broadcast %321 : vector<1x256xf32> to vector<48x256xf32>
    %323 = arith.mulf %320, %322 : vector<48x256xf32>
    %c240_161 = arith.constant 240 : index
    %c0_162 = arith.constant 0 : index
    %324 = vector.load %arg23[%c240_161, %c0_162] : memref<432x256xf32, #tpu.memory_space<vmem>>, vector<48x256xf32>
    tpu.vector_store %arg23[%c240_161, %c0_162], %323 {strides = array<i32>} : memref<432x256xf32, #tpu.memory_space<vmem>>, vector<48x256xf32>,
    %325 = vector.extract_strided_slice %288 {offsets = [0, 30], sizes = [48, 226], strides = [1, 1]} : vector<48x256xf32> to vector<48x226xf32>
    %326 = vector.extract_strided_slice %288 {offsets = [0, 0], sizes = [48, 30], strides = [1, 1]} : vector<48x256xf32> to vector<48x30xf32>
    %327 = tpu.concatenate %325, %326 in 1 : vector<48x226xf32>, vector<48x30xf32> -> vector<48x256xf32>
    %c6_163 = arith.constant 6 : index
    %c0_164 = arith.constant 0 : index
    %328 = vector.load %arg2[%c6_163, %c0_164] : memref<9x256xf32, #tpu.memory_space<vmem>>, vector<1x256xf32>
    %329 = vector.broadcast %328 : vector<1x256xf32> to vector<48x256xf32>
    %330 = arith.mulf %327, %329 : vector<48x256xf32>
    %c288_165 = arith.constant 288 : index
    %c0_166 = arith.constant 0 : index
    %331 = vector.load %arg23[%c288_165, %c0_166] : memref<432x256xf32, #tpu.memory_space<vmem>>, vector<48x256xf32>
    tpu.vector_store %arg23[%c288_165, %c0_166], %330 {strides = array<i32>} : memref<432x256xf32, #tpu.memory_space<vmem>>, vector<48x256xf32>,
    %332 = vector.extract_strided_slice %288 {offsets = [0, 32], sizes = [48, 224], strides = [1, 1]} : vector<48x256xf32> to vector<48x224xf32>
    %333 = vector.extract_strided_slice %288 {offsets = [0, 0], sizes = [48, 32], strides = [1, 1]} : vector<48x256xf32> to vector<48x32xf32>
    %334 = tpu.concatenate %332, %333 in 1 : vector<48x224xf32>, vector<48x32xf32> -> vector<48x256xf32>
    %c7_167 = arith.constant 7 : index
    %c0_168 = arith.constant 0 : index
    %335 = vector.load %arg2[%c7_167, %c0_168] : memref<9x256xf32, #tpu.memory_space<vmem>>, vector<1x256xf32>
    %336 = vector.broadcast %335 : vector<1x256xf32> to vector<48x256xf32>
    %337 = arith.mulf %334, %336 : vector<48x256xf32>
    %c336_169 = arith.constant 336 : index
    %c0_170 = arith.constant 0 : index
    %338 = vector.load %arg23[%c336_169, %c0_170] : memref<432x256xf32, #tpu.memory_space<vmem>>, vector<48x256xf32>
    tpu.vector_store %arg23[%c336_169, %c0_170], %337 {strides = array<i32>} : memref<432x256xf32, #tpu.memory_space<vmem>>, vector<48x256xf32>,
    %339 = vector.extract_strided_slice %288 {offsets = [0, 34], sizes = [48, 222], strides = [1, 1]} : vector<48x256xf32> to vector<48x222xf32>
    %340 = vector.extract_strided_slice %288 {offsets = [0, 0], sizes = [48, 34], strides = [1, 1]} : vector<48x256xf32> to vector<48x34xf32>
    %341 = tpu.concatenate %339, %340 in 1 : vector<48x222xf32>, vector<48x34xf32> -> vector<48x256xf32>
    %c8_171 = arith.constant 8 : index
    %c0_172 = arith.constant 0 : index
    %342 = vector.load %arg2[%c8_171, %c0_172] : memref<9x256xf32, #tpu.memory_space<vmem>>, vector<1x256xf32>
    %343 = vector.broadcast %342 : vector<1x256xf32> to vector<48x256xf32>
    %344 = arith.mulf %341, %343 : vector<48x256xf32>
    %c384_173 = arith.constant 384 : index
    %c0_174 = arith.constant 0 : index
    %345 = vector.load %arg23[%c384_173, %c0_174] : memref<432x256xf32, #tpu.memory_space<vmem>>, vector<48x256xf32>
    tpu.vector_store %arg23[%c384_173, %c0_174], %344 {strides = array<i32>} : memref<432x256xf32, #tpu.memory_space<vmem>>, vector<48x256xf32>,
    %c0_175 = arith.constant 0 : index
    %c0_176 = arith.constant 0 : index
    %346 = vector.load %arg14[%c0_175, %c0_176] : memref<48x432xf32, #tpu.memory_space<vmem>>, vector<48x432xf32>
    %c0_177 = arith.constant 0 : index
    %c0_178 = arith.constant 0 : index
    %347 = vector.load %arg23[%c0_177, %c0_178] : memref<432x256xf32, #tpu.memory_space<vmem>>, vector<432x256xf32>
    %cst_179 = arith.constant dense<0.000000e+00> : vector<48x256xf32>
    %348 = tpu.matmul %346, %347, %cst_179 {dimension_numbers = #tpu.dot_dimension_numbers<[1], [0], [0], [1], [0, 0, 1, 1], [], []>} : vector<48x432xf32>, vector<432x256xf32>, vector<48x256xf32> -> vector<48x256xf32>
    %c0_180 = arith.constant 0 : index
    %c0_181 = arith.constant 0 : index
    %349 = vector.load %arg15[%c0_180, %c0_181] : memref<48x1xf32, #tpu.memory_space<vmem>>, vector<48x1xf32>
    %350 = vector.broadcast %349 : vector<48x1xf32> to vector<48x256xf32>
    %351 = arith.addf %348, %350 : vector<48x256xf32>
    %cst_182 = arith.constant dense<0.000000e+00> : vector<48xf32>
    %352 = vector.multi_reduction <add>, %351, %cst_182 [1] : vector<48x256xf32> to vector<48xf32>
    %353 = vector.shape_cast %352 : vector<48xf32> to vector<48x1xf32>
    %cst_183 = arith.constant 3.906250e-03 : f32
    %354 = vector.broadcast %cst_183 : f32 to vector<48x1xf32>
    %355 = arith.mulf %353, %354 : vector<48x1xf32>
    %356 = vector.broadcast %355 : vector<48x1xf32> to vector<48x256xf32>
    %357 = arith.subf %351, %356 : vector<48x256xf32>
    %358 = arith.mulf %357, %357 : vector<48x256xf32>
    %cst_184 = arith.constant dense<0.000000e+00> : vector<48xf32>
    %359 = vector.multi_reduction <add>, %358, %cst_184 [1] : vector<48x256xf32> to vector<48xf32>
    %360 = vector.shape_cast %359 : vector<48xf32> to vector<48x1xf32>
    %cst_185 = arith.constant 3.906250e-03 : f32
    %361 = vector.broadcast %cst_185 : f32 to vector<48x1xf32>
    %362 = arith.mulf %360, %361 : vector<48x1xf32>
    %cst_186 = arith.constant 9.99999974E-6 : f32
    %363 = vector.broadcast %cst_186 : f32 to vector<48x1xf32>
    %364 = arith.addf %362, %363 : vector<48x1xf32>
    %365 = math.rsqrt %364 : vector<48x1xf32>
    %366 = vector.broadcast %365 : vector<48x1xf32> to vector<48x256xf32>
    %367 = arith.mulf %357, %366 : vector<48x256xf32>
    %368 = arith.addf %367, %207 : vector<48x256xf32>
    %cst_187 = arith.constant 0.000000e+00 : f32
    %369 = vector.broadcast %cst_187 : f32 to vector<48x256xf32>
    %370 = arith.maximumf %368, %369 : vector<48x256xf32>
    %371 = vector.extract_strided_slice %370 {offsets = [0, 188], sizes = [48, 68], strides = [1, 1]} : vector<48x256xf32> to vector<48x68xf32>
    %372 = vector.extract_strided_slice %370 {offsets = [0, 0], sizes = [48, 188], strides = [1, 1]} : vector<48x256xf32> to vector<48x188xf32>
    %373 = tpu.concatenate %371, %372 in 1 : vector<48x68xf32>, vector<48x188xf32> -> vector<48x256xf32>
    %c0_188 = arith.constant 0 : index
    %c0_189 = arith.constant 0 : index
    %374 = vector.load %arg3[%c0_188, %c0_189] : memref<9x256xf32, #tpu.memory_space<vmem>>, vector<1x256xf32>
    %375 = vector.broadcast %374 : vector<1x256xf32> to vector<48x256xf32>
    %376 = arith.mulf %373, %375 : vector<48x256xf32>
    %c0_190 = arith.constant 0 : index
    %c0_191 = arith.constant 0 : index
    %377 = vector.load %arg23[%c0_190, %c0_191] : memref<432x256xf32, #tpu.memory_space<vmem>>, vector<48x256xf32>
    tpu.vector_store %arg23[%c0_190, %c0_191], %376 {strides = array<i32>} : memref<432x256xf32, #tpu.memory_space<vmem>>, vector<48x256xf32>,
    %378 = vector.extract_strided_slice %370 {offsets = [0, 192], sizes = [48, 64], strides = [1, 1]} : vector<48x256xf32> to vector<48x64xf32>
    %379 = vector.extract_strided_slice %370 {offsets = [0, 0], sizes = [48, 192], strides = [1, 1]} : vector<48x256xf32> to vector<48x192xf32>
    %380 = tpu.concatenate %378, %379 in 1 : vector<48x64xf32>, vector<48x192xf32> -> vector<48x256xf32>
    %c1_192 = arith.constant 1 : index
    %c0_193 = arith.constant 0 : index
    %381 = vector.load %arg3[%c1_192, %c0_193] : memref<9x256xf32, #tpu.memory_space<vmem>>, vector<1x256xf32>
    %382 = vector.broadcast %381 : vector<1x256xf32> to vector<48x256xf32>
    %383 = arith.mulf %380, %382 : vector<48x256xf32>
    %c48_194 = arith.constant 48 : index
    %c0_195 = arith.constant 0 : index
    %384 = vector.load %arg23[%c48_194, %c0_195] : memref<432x256xf32, #tpu.memory_space<vmem>>, vector<48x256xf32>
    tpu.vector_store %arg23[%c48_194, %c0_195], %383 {strides = array<i32>} : memref<432x256xf32, #tpu.memory_space<vmem>>, vector<48x256xf32>,
    %385 = vector.extract_strided_slice %370 {offsets = [0, 196], sizes = [48, 60], strides = [1, 1]} : vector<48x256xf32> to vector<48x60xf32>
    %386 = vector.extract_strided_slice %370 {offsets = [0, 0], sizes = [48, 196], strides = [1, 1]} : vector<48x256xf32> to vector<48x196xf32>
    %387 = tpu.concatenate %385, %386 in 1 : vector<48x60xf32>, vector<48x196xf32> -> vector<48x256xf32>
    %c2_196 = arith.constant 2 : index
    %c0_197 = arith.constant 0 : index
    %388 = vector.load %arg3[%c2_196, %c0_197] : memref<9x256xf32, #tpu.memory_space<vmem>>, vector<1x256xf32>
    %389 = vector.broadcast %388 : vector<1x256xf32> to vector<48x256xf32>
    %390 = arith.mulf %387, %389 : vector<48x256xf32>
    %c96_198 = arith.constant 96 : index
    %c0_199 = arith.constant 0 : index
    %391 = vector.load %arg23[%c96_198, %c0_199] : memref<432x256xf32, #tpu.memory_space<vmem>>, vector<48x256xf32>
    tpu.vector_store %arg23[%c96_198, %c0_199], %390 {strides = array<i32>} : memref<432x256xf32, #tpu.memory_space<vmem>>, vector<48x256xf32>,
    %392 = vector.extract_strided_slice %370 {offsets = [0, 252], sizes = [48, 4], strides = [1, 1]} : vector<48x256xf32> to vector<48x4xf32>
    %393 = vector.extract_strided_slice %370 {offsets = [0, 0], sizes = [48, 252], strides = [1, 1]} : vector<48x256xf32> to vector<48x252xf32>
    %394 = tpu.concatenate %392, %393 in 1 : vector<48x4xf32>, vector<48x252xf32> -> vector<48x256xf32>
    %c3_200 = arith.constant 3 : index
    %c0_201 = arith.constant 0 : index
    %395 = vector.load %arg3[%c3_200, %c0_201] : memref<9x256xf32, #tpu.memory_space<vmem>>, vector<1x256xf32>
    %396 = vector.broadcast %395 : vector<1x256xf32> to vector<48x256xf32>
    %397 = arith.mulf %394, %396 : vector<48x256xf32>
    %c144_202 = arith.constant 144 : index
    %c0_203 = arith.constant 0 : index
    %398 = vector.load %arg23[%c144_202, %c0_203] : memref<432x256xf32, #tpu.memory_space<vmem>>, vector<48x256xf32>
    tpu.vector_store %arg23[%c144_202, %c0_203], %397 {strides = array<i32>} : memref<432x256xf32, #tpu.memory_space<vmem>>, vector<48x256xf32>,
    %c192_204 = arith.constant 192 : index
    %c0_205 = arith.constant 0 : index
    %399 = vector.load %arg23[%c192_204, %c0_205] : memref<432x256xf32, #tpu.memory_space<vmem>>, vector<48x256xf32>
    tpu.vector_store %arg23[%c192_204, %c0_205], %370 {strides = array<i32>} : memref<432x256xf32, #tpu.memory_space<vmem>>, vector<48x256xf32>,
    %400 = vector.extract_strided_slice %370 {offsets = [0, 4], sizes = [48, 252], strides = [1, 1]} : vector<48x256xf32> to vector<48x252xf32>
    %401 = vector.extract_strided_slice %370 {offsets = [0, 0], sizes = [48, 4], strides = [1, 1]} : vector<48x256xf32> to vector<48x4xf32>
    %402 = tpu.concatenate %400, %401 in 1 : vector<48x252xf32>, vector<48x4xf32> -> vector<48x256xf32>
    %c5_206 = arith.constant 5 : index
    %c0_207 = arith.constant 0 : index
    %403 = vector.load %arg3[%c5_206, %c0_207] : memref<9x256xf32, #tpu.memory_space<vmem>>, vector<1x256xf32>
    %404 = vector.broadcast %403 : vector<1x256xf32> to vector<48x256xf32>
    %405 = arith.mulf %402, %404 : vector<48x256xf32>
    %c240_208 = arith.constant 240 : index
    %c0_209 = arith.constant 0 : index
    %406 = vector.load %arg23[%c240_208, %c0_209] : memref<432x256xf32, #tpu.memory_space<vmem>>, vector<48x256xf32>
    tpu.vector_store %arg23[%c240_208, %c0_209], %405 {strides = array<i32>} : memref<432x256xf32, #tpu.memory_space<vmem>>, vector<48x256xf32>,
    %407 = vector.extract_strided_slice %370 {offsets = [0, 60], sizes = [48, 196], strides = [1, 1]} : vector<48x256xf32> to vector<48x196xf32>
    %408 = vector.extract_strided_slice %370 {offsets = [0, 0], sizes = [48, 60], strides = [1, 1]} : vector<48x256xf32> to vector<48x60xf32>
    %409 = tpu.concatenate %407, %408 in 1 : vector<48x196xf32>, vector<48x60xf32> -> vector<48x256xf32>
    %c6_210 = arith.constant 6 : index
    %c0_211 = arith.constant 0 : index
    %410 = vector.load %arg3[%c6_210, %c0_211] : memref<9x256xf32, #tpu.memory_space<vmem>>, vector<1x256xf32>
    %411 = vector.broadcast %410 : vector<1x256xf32> to vector<48x256xf32>
    %412 = arith.mulf %409, %411 : vector<48x256xf32>
    %c288_212 = arith.constant 288 : index
    %c0_213 = arith.constant 0 : index
    %413 = vector.load %arg23[%c288_212, %c0_213] : memref<432x256xf32, #tpu.memory_space<vmem>>, vector<48x256xf32>
    tpu.vector_store %arg23[%c288_212, %c0_213], %412 {strides = array<i32>} : memref<432x256xf32, #tpu.memory_space<vmem>>, vector<48x256xf32>,
    %414 = vector.extract_strided_slice %370 {offsets = [0, 64], sizes = [48, 192], strides = [1, 1]} : vector<48x256xf32> to vector<48x192xf32>
    %415 = vector.extract_strided_slice %370 {offsets = [0, 0], sizes = [48, 64], strides = [1, 1]} : vector<48x256xf32> to vector<48x64xf32>
    %416 = tpu.concatenate %414, %415 in 1 : vector<48x192xf32>, vector<48x64xf32> -> vector<48x256xf32>
    %c7_214 = arith.constant 7 : index
    %c0_215 = arith.constant 0 : index
    %417 = vector.load %arg3[%c7_214, %c0_215] : memref<9x256xf32, #tpu.memory_space<vmem>>, vector<1x256xf32>
    %418 = vector.broadcast %417 : vector<1x256xf32> to vector<48x256xf32>
    %419 = arith.mulf %416, %418 : vector<48x256xf32>
    %c336_216 = arith.constant 336 : index
    %c0_217 = arith.constant 0 : index
    %420 = vector.load %arg23[%c336_216, %c0_217] : memref<432x256xf32, #tpu.memory_space<vmem>>, vector<48x256xf32>
    tpu.vector_store %arg23[%c336_216, %c0_217], %419 {strides = array<i32>} : memref<432x256xf32, #tpu.memory_space<vmem>>, vector<48x256xf32>,
    %421 = vector.extract_strided_slice %370 {offsets = [0, 68], sizes = [48, 188], strides = [1, 1]} : vector<48x256xf32> to vector<48x188xf32>
    %422 = vector.extract_strided_slice %370 {offsets = [0, 0], sizes = [48, 68], strides = [1, 1]} : vector<48x256xf32> to vector<48x68xf32>
    %423 = tpu.concatenate %421, %422 in 1 : vector<48x188xf32>, vector<48x68xf32> -> vector<48x256xf32>
    %c8_218 = arith.constant 8 : index
    %c0_219 = arith.constant 0 : index
    %424 = vector.load %arg3[%c8_218, %c0_219] : memref<9x256xf32, #tpu.memory_space<vmem>>, vector<1x256xf32>
    %425 = vector.broadcast %424 : vector<1x256xf32> to vector<48x256xf32>
    %426 = arith.mulf %423, %425 : vector<48x256xf32>
    %c384_220 = arith.constant 384 : index
    %c0_221 = arith.constant 0 : index
    %427 = vector.load %arg23[%c384_220, %c0_221] : memref<432x256xf32, #tpu.memory_space<vmem>>, vector<48x256xf32>
    tpu.vector_store %arg23[%c384_220, %c0_221], %426 {strides = array<i32>} : memref<432x256xf32, #tpu.memory_space<vmem>>, vector<48x256xf32>,
    %c0_222 = arith.constant 0 : index
    %c0_223 = arith.constant 0 : index
    %428 = vector.load %arg16[%c0_222, %c0_223] : memref<48x432xf32, #tpu.memory_space<vmem>>, vector<48x432xf32>
    %c0_224 = arith.constant 0 : index
    %c0_225 = arith.constant 0 : index
    %429 = vector.load %arg23[%c0_224, %c0_225] : memref<432x256xf32, #tpu.memory_space<vmem>>, vector<432x256xf32>
    %cst_226 = arith.constant dense<0.000000e+00> : vector<48x256xf32>
    %430 = tpu.matmul %428, %429, %cst_226 {dimension_numbers = #tpu.dot_dimension_numbers<[1], [0], [0], [1], [0, 0, 1, 1], [], []>} : vector<48x432xf32>, vector<432x256xf32>, vector<48x256xf32> -> vector<48x256xf32>
    %c0_227 = arith.constant 0 : index
    %c0_228 = arith.constant 0 : index
    %431 = vector.load %arg17[%c0_227, %c0_228] : memref<48x1xf32, #tpu.memory_space<vmem>>, vector<48x1xf32>
    %432 = vector.broadcast %431 : vector<48x1xf32> to vector<48x256xf32>
    %433 = arith.addf %430, %432 : vector<48x256xf32>
    %cst_229 = arith.constant dense<0.000000e+00> : vector<48xf32>
    %434 = vector.multi_reduction <add>, %433, %cst_229 [1] : vector<48x256xf32> to vector<48xf32>
    %435 = vector.shape_cast %434 : vector<48xf32> to vector<48x1xf32>
    %cst_230 = arith.constant 3.906250e-03 : f32
    %436 = vector.broadcast %cst_230 : f32 to vector<48x1xf32>
    %437 = arith.mulf %435, %436 : vector<48x1xf32>
    %438 = vector.broadcast %437 : vector<48x1xf32> to vector<48x256xf32>
    %439 = arith.subf %433, %438 : vector<48x256xf32>
    %440 = arith.mulf %439, %439 : vector<48x256xf32>
    %cst_231 = arith.constant dense<0.000000e+00> : vector<48xf32>
    %441 = vector.multi_reduction <add>, %440, %cst_231 [1] : vector<48x256xf32> to vector<48xf32>
    %442 = vector.shape_cast %441 : vector<48xf32> to vector<48x1xf32>
    %cst_232 = arith.constant 3.906250e-03 : f32
    %443 = vector.broadcast %cst_232 : f32 to vector<48x1xf32>
    %444 = arith.mulf %442, %443 : vector<48x1xf32>
    %cst_233 = arith.constant 9.99999974E-6 : f32
    %445 = vector.broadcast %cst_233 : f32 to vector<48x1xf32>
    %446 = arith.addf %444, %445 : vector<48x1xf32>
    %447 = math.rsqrt %446 : vector<48x1xf32>
    %448 = vector.broadcast %447 : vector<48x1xf32> to vector<48x256xf32>
    %449 = arith.mulf %439, %448 : vector<48x256xf32>
    %cst_234 = arith.constant 0.000000e+00 : f32
    %450 = vector.broadcast %cst_234 : f32 to vector<48x256xf32>
    %451 = arith.maximumf %449, %450 : vector<48x256xf32>
    %452 = vector.extract_strided_slice %451 {offsets = [0, 188], sizes = [48, 68], strides = [1, 1]} : vector<48x256xf32> to vector<48x68xf32>
    %453 = vector.extract_strided_slice %451 {offsets = [0, 0], sizes = [48, 188], strides = [1, 1]} : vector<48x256xf32> to vector<48x188xf32>
    %454 = tpu.concatenate %452, %453 in 1 : vector<48x68xf32>, vector<48x188xf32> -> vector<48x256xf32>
    %c0_235 = arith.constant 0 : index
    %c0_236 = arith.constant 0 : index
    %455 = vector.load %arg3[%c0_235, %c0_236] : memref<9x256xf32, #tpu.memory_space<vmem>>, vector<1x256xf32>
    %456 = vector.broadcast %455 : vector<1x256xf32> to vector<48x256xf32>
    %457 = arith.mulf %454, %456 : vector<48x256xf32>
    %c0_237 = arith.constant 0 : index
    %c0_238 = arith.constant 0 : index
    %458 = vector.load %arg23[%c0_237, %c0_238] : memref<432x256xf32, #tpu.memory_space<vmem>>, vector<48x256xf32>
    tpu.vector_store %arg23[%c0_237, %c0_238], %457 {strides = array<i32>} : memref<432x256xf32, #tpu.memory_space<vmem>>, vector<48x256xf32>,
    %459 = vector.extract_strided_slice %451 {offsets = [0, 192], sizes = [48, 64], strides = [1, 1]} : vector<48x256xf32> to vector<48x64xf32>
    %460 = vector.extract_strided_slice %451 {offsets = [0, 0], sizes = [48, 192], strides = [1, 1]} : vector<48x256xf32> to vector<48x192xf32>
    %461 = tpu.concatenate %459, %460 in 1 : vector<48x64xf32>, vector<48x192xf32> -> vector<48x256xf32>
    %c1_239 = arith.constant 1 : index
    %c0_240 = arith.constant 0 : index
    %462 = vector.load %arg3[%c1_239, %c0_240] : memref<9x256xf32, #tpu.memory_space<vmem>>, vector<1x256xf32>
    %463 = vector.broadcast %462 : vector<1x256xf32> to vector<48x256xf32>
    %464 = arith.mulf %461, %463 : vector<48x256xf32>
    %c48_241 = arith.constant 48 : index
    %c0_242 = arith.constant 0 : index
    %465 = vector.load %arg23[%c48_241, %c0_242] : memref<432x256xf32, #tpu.memory_space<vmem>>, vector<48x256xf32>
    tpu.vector_store %arg23[%c48_241, %c0_242], %464 {strides = array<i32>} : memref<432x256xf32, #tpu.memory_space<vmem>>, vector<48x256xf32>,
    %466 = vector.extract_strided_slice %451 {offsets = [0, 196], sizes = [48, 60], strides = [1, 1]} : vector<48x256xf32> to vector<48x60xf32>
    %467 = vector.extract_strided_slice %451 {offsets = [0, 0], sizes = [48, 196], strides = [1, 1]} : vector<48x256xf32> to vector<48x196xf32>
    %468 = tpu.concatenate %466, %467 in 1 : vector<48x60xf32>, vector<48x196xf32> -> vector<48x256xf32>
    %c2_243 = arith.constant 2 : index
    %c0_244 = arith.constant 0 : index
    %469 = vector.load %arg3[%c2_243, %c0_244] : memref<9x256xf32, #tpu.memory_space<vmem>>, vector<1x256xf32>
    %470 = vector.broadcast %469 : vector<1x256xf32> to vector<48x256xf32>
    %471 = arith.mulf %468, %470 : vector<48x256xf32>
    %c96_245 = arith.constant 96 : index
    %c0_246 = arith.constant 0 : index
    %472 = vector.load %arg23[%c96_245, %c0_246] : memref<432x256xf32, #tpu.memory_space<vmem>>, vector<48x256xf32>
    tpu.vector_store %arg23[%c96_245, %c0_246], %471 {strides = array<i32>} : memref<432x256xf32, #tpu.memory_space<vmem>>, vector<48x256xf32>,
    %473 = vector.extract_strided_slice %451 {offsets = [0, 252], sizes = [48, 4], strides = [1, 1]} : vector<48x256xf32> to vector<48x4xf32>
    %474 = vector.extract_strided_slice %451 {offsets = [0, 0], sizes = [48, 252], strides = [1, 1]} : vector<48x256xf32> to vector<48x252xf32>
    %475 = tpu.concatenate %473, %474 in 1 : vector<48x4xf32>, vector<48x252xf32> -> vector<48x256xf32>
    %c3_247 = arith.constant 3 : index
    %c0_248 = arith.constant 0 : index
    %476 = vector.load %arg3[%c3_247, %c0_248] : memref<9x256xf32, #tpu.memory_space<vmem>>, vector<1x256xf32>
    %477 = vector.broadcast %476 : vector<1x256xf32> to vector<48x256xf32>
    %478 = arith.mulf %475, %477 : vector<48x256xf32>
    %c144_249 = arith.constant 144 : index
    %c0_250 = arith.constant 0 : index
    %479 = vector.load %arg23[%c144_249, %c0_250] : memref<432x256xf32, #tpu.memory_space<vmem>>, vector<48x256xf32>
    tpu.vector_store %arg23[%c144_249, %c0_250], %478 {strides = array<i32>} : memref<432x256xf32, #tpu.memory_space<vmem>>, vector<48x256xf32>,
    %c192_251 = arith.constant 192 : index
    %c0_252 = arith.constant 0 : index
    %480 = vector.load %arg23[%c192_251, %c0_252] : memref<432x256xf32, #tpu.memory_space<vmem>>, vector<48x256xf32>
    tpu.vector_store %arg23[%c192_251, %c0_252], %451 {strides = array<i32>} : memref<432x256xf32, #tpu.memory_space<vmem>>, vector<48x256xf32>,
    %481 = vector.extract_strided_slice %451 {offsets = [0, 4], sizes = [48, 252], strides = [1, 1]} : vector<48x256xf32> to vector<48x252xf32>
    %482 = vector.extract_strided_slice %451 {offsets = [0, 0], sizes = [48, 4], strides = [1, 1]} : vector<48x256xf32> to vector<48x4xf32>
    %483 = tpu.concatenate %481, %482 in 1 : vector<48x252xf32>, vector<48x4xf32> -> vector<48x256xf32>
    %c5_253 = arith.constant 5 : index
    %c0_254 = arith.constant 0 : index
    %484 = vector.load %arg3[%c5_253, %c0_254] : memref<9x256xf32, #tpu.memory_space<vmem>>, vector<1x256xf32>
    %485 = vector.broadcast %484 : vector<1x256xf32> to vector<48x256xf32>
    %486 = arith.mulf %483, %485 : vector<48x256xf32>
    %c240_255 = arith.constant 240 : index
    %c0_256 = arith.constant 0 : index
    %487 = vector.load %arg23[%c240_255, %c0_256] : memref<432x256xf32, #tpu.memory_space<vmem>>, vector<48x256xf32>
    tpu.vector_store %arg23[%c240_255, %c0_256], %486 {strides = array<i32>} : memref<432x256xf32, #tpu.memory_space<vmem>>, vector<48x256xf32>,
    %488 = vector.extract_strided_slice %451 {offsets = [0, 60], sizes = [48, 196], strides = [1, 1]} : vector<48x256xf32> to vector<48x196xf32>
    %489 = vector.extract_strided_slice %451 {offsets = [0, 0], sizes = [48, 60], strides = [1, 1]} : vector<48x256xf32> to vector<48x60xf32>
    %490 = tpu.concatenate %488, %489 in 1 : vector<48x196xf32>, vector<48x60xf32> -> vector<48x256xf32>
    %c6_257 = arith.constant 6 : index
    %c0_258 = arith.constant 0 : index
    %491 = vector.load %arg3[%c6_257, %c0_258] : memref<9x256xf32, #tpu.memory_space<vmem>>, vector<1x256xf32>
    %492 = vector.broadcast %491 : vector<1x256xf32> to vector<48x256xf32>
    %493 = arith.mulf %490, %492 : vector<48x256xf32>
    %c288_259 = arith.constant 288 : index
    %c0_260 = arith.constant 0 : index
    %494 = vector.load %arg23[%c288_259, %c0_260] : memref<432x256xf32, #tpu.memory_space<vmem>>, vector<48x256xf32>
    tpu.vector_store %arg23[%c288_259, %c0_260], %493 {strides = array<i32>} : memref<432x256xf32, #tpu.memory_space<vmem>>, vector<48x256xf32>,
    %495 = vector.extract_strided_slice %451 {offsets = [0, 64], sizes = [48, 192], strides = [1, 1]} : vector<48x256xf32> to vector<48x192xf32>
    %496 = vector.extract_strided_slice %451 {offsets = [0, 0], sizes = [48, 64], strides = [1, 1]} : vector<48x256xf32> to vector<48x64xf32>
    %497 = tpu.concatenate %495, %496 in 1 : vector<48x192xf32>, vector<48x64xf32> -> vector<48x256xf32>
    %c7_261 = arith.constant 7 : index
    %c0_262 = arith.constant 0 : index
    %498 = vector.load %arg3[%c7_261, %c0_262] : memref<9x256xf32, #tpu.memory_space<vmem>>, vector<1x256xf32>
    %499 = vector.broadcast %498 : vector<1x256xf32> to vector<48x256xf32>
    %500 = arith.mulf %497, %499 : vector<48x256xf32>
    %c336_263 = arith.constant 336 : index
    %c0_264 = arith.constant 0 : index
    %501 = vector.load %arg23[%c336_263, %c0_264] : memref<432x256xf32, #tpu.memory_space<vmem>>, vector<48x256xf32>
    tpu.vector_store %arg23[%c336_263, %c0_264], %500 {strides = array<i32>} : memref<432x256xf32, #tpu.memory_space<vmem>>, vector<48x256xf32>,
    %502 = vector.extract_strided_slice %451 {offsets = [0, 68], sizes = [48, 188], strides = [1, 1]} : vector<48x256xf32> to vector<48x188xf32>
    %503 = vector.extract_strided_slice %451 {offsets = [0, 0], sizes = [48, 68], strides = [1, 1]} : vector<48x256xf32> to vector<48x68xf32>
    %504 = tpu.concatenate %502, %503 in 1 : vector<48x188xf32>, vector<48x68xf32> -> vector<48x256xf32>
    %c8_265 = arith.constant 8 : index
    %c0_266 = arith.constant 0 : index
    %505 = vector.load %arg3[%c8_265, %c0_266] : memref<9x256xf32, #tpu.memory_space<vmem>>, vector<1x256xf32>
    %506 = vector.broadcast %505 : vector<1x256xf32> to vector<48x256xf32>
    %507 = arith.mulf %504, %506 : vector<48x256xf32>
    %c384_267 = arith.constant 384 : index
    %c0_268 = arith.constant 0 : index
    %508 = vector.load %arg23[%c384_267, %c0_268] : memref<432x256xf32, #tpu.memory_space<vmem>>, vector<48x256xf32>
    tpu.vector_store %arg23[%c384_267, %c0_268], %507 {strides = array<i32>} : memref<432x256xf32, #tpu.memory_space<vmem>>, vector<48x256xf32>,
    %c0_269 = arith.constant 0 : index
    %c0_270 = arith.constant 0 : index
    %509 = vector.load %arg18[%c0_269, %c0_270] : memref<48x432xf32, #tpu.memory_space<vmem>>, vector<48x432xf32>
    %c0_271 = arith.constant 0 : index
    %c0_272 = arith.constant 0 : index
    %510 = vector.load %arg23[%c0_271, %c0_272] : memref<432x256xf32, #tpu.memory_space<vmem>>, vector<432x256xf32>
    %cst_273 = arith.constant dense<0.000000e+00> : vector<48x256xf32>
    %511 = tpu.matmul %509, %510, %cst_273 {dimension_numbers = #tpu.dot_dimension_numbers<[1], [0], [0], [1], [0, 0, 1, 1], [], []>} : vector<48x432xf32>, vector<432x256xf32>, vector<48x256xf32> -> vector<48x256xf32>
    %c0_274 = arith.constant 0 : index
    %c0_275 = arith.constant 0 : index
    %512 = vector.load %arg19[%c0_274, %c0_275] : memref<48x1xf32, #tpu.memory_space<vmem>>, vector<48x1xf32>
    %513 = vector.broadcast %512 : vector<48x1xf32> to vector<48x256xf32>
    %514 = arith.addf %511, %513 : vector<48x256xf32>
    %cst_276 = arith.constant dense<0.000000e+00> : vector<48xf32>
    %515 = vector.multi_reduction <add>, %514, %cst_276 [1] : vector<48x256xf32> to vector<48xf32>
    %516 = vector.shape_cast %515 : vector<48xf32> to vector<48x1xf32>
    %cst_277 = arith.constant 3.906250e-03 : f32
    %517 = vector.broadcast %cst_277 : f32 to vector<48x1xf32>
    %518 = arith.mulf %516, %517 : vector<48x1xf32>
    %519 = vector.broadcast %518 : vector<48x1xf32> to vector<48x256xf32>
    %520 = arith.subf %514, %519 : vector<48x256xf32>
    %521 = arith.mulf %520, %520 : vector<48x256xf32>
    %cst_278 = arith.constant dense<0.000000e+00> : vector<48xf32>
    %522 = vector.multi_reduction <add>, %521, %cst_278 [1] : vector<48x256xf32> to vector<48xf32>
    %523 = vector.shape_cast %522 : vector<48xf32> to vector<48x1xf32>
    %cst_279 = arith.constant 3.906250e-03 : f32
    %524 = vector.broadcast %cst_279 : f32 to vector<48x1xf32>
    %525 = arith.mulf %523, %524 : vector<48x1xf32>
    %cst_280 = arith.constant 9.99999974E-6 : f32
    %526 = vector.broadcast %cst_280 : f32 to vector<48x1xf32>
    %527 = arith.addf %525, %526 : vector<48x1xf32>
    %528 = math.rsqrt %527 : vector<48x1xf32>
    %529 = vector.broadcast %528 : vector<48x1xf32> to vector<48x256xf32>
    %530 = arith.mulf %520, %529 : vector<48x256xf32>
    %cst_281 = arith.constant 0.000000e+00 : f32
    %531 = vector.broadcast %cst_281 : f32 to vector<48x256xf32>
    %532 = arith.maximumf %530, %531 : vector<48x256xf32>
    %533 = vector.extract_strided_slice %532 {offsets = [0, 239], sizes = [48, 17], strides = [1, 1]} : vector<48x256xf32> to vector<48x17xf32>
    %534 = vector.extract_strided_slice %532 {offsets = [0, 0], sizes = [48, 239], strides = [1, 1]} : vector<48x256xf32> to vector<48x239xf32>
    %535 = tpu.concatenate %533, %534 in 1 : vector<48x17xf32>, vector<48x239xf32> -> vector<48x256xf32>
    %c0_282 = arith.constant 0 : index
    %c0_283 = arith.constant 0 : index
    %536 = vector.load %arg1[%c0_282, %c0_283] : memref<9x256xf32, #tpu.memory_space<vmem>>, vector<1x256xf32>
    %537 = vector.broadcast %536 : vector<1x256xf32> to vector<48x256xf32>
    %538 = arith.mulf %535, %537 : vector<48x256xf32>
    %c0_284 = arith.constant 0 : index
    %c0_285 = arith.constant 0 : index
    %539 = vector.load %arg23[%c0_284, %c0_285] : memref<432x256xf32, #tpu.memory_space<vmem>>, vector<48x256xf32>
    tpu.vector_store %arg23[%c0_284, %c0_285], %538 {strides = array<i32>} : memref<432x256xf32, #tpu.memory_space<vmem>>, vector<48x256xf32>,
    %540 = vector.extract_strided_slice %532 {offsets = [0, 240], sizes = [48, 16], strides = [1, 1]} : vector<48x256xf32> to vector<48x16xf32>
    %541 = vector.extract_strided_slice %532 {offsets = [0, 0], sizes = [48, 240], strides = [1, 1]} : vector<48x256xf32> to vector<48x240xf32>
    %542 = tpu.concatenate %540, %541 in 1 : vector<48x16xf32>, vector<48x240xf32> -> vector<48x256xf32>
    %c1_286 = arith.constant 1 : index
    %c0_287 = arith.constant 0 : index
    %543 = vector.load %arg1[%c1_286, %c0_287] : memref<9x256xf32, #tpu.memory_space<vmem>>, vector<1x256xf32>
    %544 = vector.broadcast %543 : vector<1x256xf32> to vector<48x256xf32>
    %545 = arith.mulf %542, %544 : vector<48x256xf32>
    %c48_288 = arith.constant 48 : index
    %c0_289 = arith.constant 0 : index
    %546 = vector.load %arg23[%c48_288, %c0_289] : memref<432x256xf32, #tpu.memory_space<vmem>>, vector<48x256xf32>
    tpu.vector_store %arg23[%c48_288, %c0_289], %545 {strides = array<i32>} : memref<432x256xf32, #tpu.memory_space<vmem>>, vector<48x256xf32>,
    %547 = vector.extract_strided_slice %532 {offsets = [0, 241], sizes = [48, 15], strides = [1, 1]} : vector<48x256xf32> to vector<48x15xf32>
    %548 = vector.extract_strided_slice %532 {offsets = [0, 0], sizes = [48, 241], strides = [1, 1]} : vector<48x256xf32> to vector<48x241xf32>
    %549 = tpu.concatenate %547, %548 in 1 : vector<48x15xf32>, vector<48x241xf32> -> vector<48x256xf32>
    %c2_290 = arith.constant 2 : index
    %c0_291 = arith.constant 0 : index
    %550 = vector.load %arg1[%c2_290, %c0_291] : memref<9x256xf32, #tpu.memory_space<vmem>>, vector<1x256xf32>
    %551 = vector.broadcast %550 : vector<1x256xf32> to vector<48x256xf32>
    %552 = arith.mulf %549, %551 : vector<48x256xf32>
    %c96_292 = arith.constant 96 : index
    %c0_293 = arith.constant 0 : index
    %553 = vector.load %arg23[%c96_292, %c0_293] : memref<432x256xf32, #tpu.memory_space<vmem>>, vector<48x256xf32>
    tpu.vector_store %arg23[%c96_292, %c0_293], %552 {strides = array<i32>} : memref<432x256xf32, #tpu.memory_space<vmem>>, vector<48x256xf32>,
    %554 = vector.extract_strided_slice %532 {offsets = [0, 255], sizes = [48, 1], strides = [1, 1]} : vector<48x256xf32> to vector<48x1xf32>
    %555 = vector.extract_strided_slice %532 {offsets = [0, 0], sizes = [48, 255], strides = [1, 1]} : vector<48x256xf32> to vector<48x255xf32>
    %556 = tpu.concatenate %554, %555 in 1 : vector<48x1xf32>, vector<48x255xf32> -> vector<48x256xf32>
    %c3_294 = arith.constant 3 : index
    %c0_295 = arith.constant 0 : index
    %557 = vector.load %arg1[%c3_294, %c0_295] : memref<9x256xf32, #tpu.memory_space<vmem>>, vector<1x256xf32>
    %558 = vector.broadcast %557 : vector<1x256xf32> to vector<48x256xf32>
    %559 = arith.mulf %556, %558 : vector<48x256xf32>
    %c144_296 = arith.constant 144 : index
    %c0_297 = arith.constant 0 : index
    %560 = vector.load %arg23[%c144_296, %c0_297] : memref<432x256xf32, #tpu.memory_space<vmem>>, vector<48x256xf32>
    tpu.vector_store %arg23[%c144_296, %c0_297], %559 {strides = array<i32>} : memref<432x256xf32, #tpu.memory_space<vmem>>, vector<48x256xf32>,
    %c192_298 = arith.constant 192 : index
    %c0_299 = arith.constant 0 : index
    %561 = vector.load %arg23[%c192_298, %c0_299] : memref<432x256xf32, #tpu.memory_space<vmem>>, vector<48x256xf32>
    tpu.vector_store %arg23[%c192_298, %c0_299], %532 {strides = array<i32>} : memref<432x256xf32, #tpu.memory_space<vmem>>, vector<48x256xf32>,
    %562 = vector.extract_strided_slice %532 {offsets = [0, 1], sizes = [48, 255], strides = [1, 1]} : vector<48x256xf32> to vector<48x255xf32>
    %563 = vector.extract_strided_slice %532 {offsets = [0, 0], sizes = [48, 1], strides = [1, 1]} : vector<48x256xf32> to vector<48x1xf32>
    %564 = tpu.concatenate %562, %563 in 1 : vector<48x255xf32>, vector<48x1xf32> -> vector<48x256xf32>
    %c5_300 = arith.constant 5 : index
    %c0_301 = arith.constant 0 : index
    %565 = vector.load %arg1[%c5_300, %c0_301] : memref<9x256xf32, #tpu.memory_space<vmem>>, vector<1x256xf32>
    %566 = vector.broadcast %565 : vector<1x256xf32> to vector<48x256xf32>
    %567 = arith.mulf %564, %566 : vector<48x256xf32>
    %c240_302 = arith.constant 240 : index
    %c0_303 = arith.constant 0 : index
    %568 = vector.load %arg23[%c240_302, %c0_303] : memref<432x256xf32, #tpu.memory_space<vmem>>, vector<48x256xf32>
    tpu.vector_store %arg23[%c240_302, %c0_303], %567 {strides = array<i32>} : memref<432x256xf32, #tpu.memory_space<vmem>>, vector<48x256xf32>,
    %569 = vector.extract_strided_slice %532 {offsets = [0, 15], sizes = [48, 241], strides = [1, 1]} : vector<48x256xf32> to vector<48x241xf32>
    %570 = vector.extract_strided_slice %532 {offsets = [0, 0], sizes = [48, 15], strides = [1, 1]} : vector<48x256xf32> to vector<48x15xf32>
    %571 = tpu.concatenate %569, %570 in 1 : vector<48x241xf32>, vector<48x15xf32> -> vector<48x256xf32>
    %c6_304 = arith.constant 6 : index
    %c0_305 = arith.constant 0 : index
    %572 = vector.load %arg1[%c6_304, %c0_305] : memref<9x256xf32, #tpu.memory_space<vmem>>, vector<1x256xf32>
    %573 = vector.broadcast %572 : vector<1x256xf32> to vector<48x256xf32>
    %574 = arith.mulf %571, %573 : vector<48x256xf32>
    %c288_306 = arith.constant 288 : index
    %c0_307 = arith.constant 0 : index
    %575 = vector.load %arg23[%c288_306, %c0_307] : memref<432x256xf32, #tpu.memory_space<vmem>>, vector<48x256xf32>
    tpu.vector_store %arg23[%c288_306, %c0_307], %574 {strides = array<i32>} : memref<432x256xf32, #tpu.memory_space<vmem>>, vector<48x256xf32>,
    %576 = vector.extract_strided_slice %532 {offsets = [0, 16], sizes = [48, 240], strides = [1, 1]} : vector<48x256xf32> to vector<48x240xf32>
    %577 = vector.extract_strided_slice %532 {offsets = [0, 0], sizes = [48, 16], strides = [1, 1]} : vector<48x256xf32> to vector<48x16xf32>
    %578 = tpu.concatenate %576, %577 in 1 : vector<48x240xf32>, vector<48x16xf32> -> vector<48x256xf32>
    %c7_308 = arith.constant 7 : index
    %c0_309 = arith.constant 0 : index
    %579 = vector.load %arg1[%c7_308, %c0_309] : memref<9x256xf32, #tpu.memory_space<vmem>>, vector<1x256xf32>
    %580 = vector.broadcast %579 : vector<1x256xf32> to vector<48x256xf32>
    %581 = arith.mulf %578, %580 : vector<48x256xf32>
    %c336_310 = arith.constant 336 : index
    %c0_311 = arith.constant 0 : index
    %582 = vector.load %arg23[%c336_310, %c0_311] : memref<432x256xf32, #tpu.memory_space<vmem>>, vector<48x256xf32>
    tpu.vector_store %arg23[%c336_310, %c0_311], %581 {strides = array<i32>} : memref<432x256xf32, #tpu.memory_space<vmem>>, vector<48x256xf32>,
    %583 = vector.extract_strided_slice %532 {offsets = [0, 17], sizes = [48, 239], strides = [1, 1]} : vector<48x256xf32> to vector<48x239xf32>
    %584 = vector.extract_strided_slice %532 {offsets = [0, 0], sizes = [48, 17], strides = [1, 1]} : vector<48x256xf32> to vector<48x17xf32>
    %585 = tpu.concatenate %583, %584 in 1 : vector<48x239xf32>, vector<48x17xf32> -> vector<48x256xf32>
    %c8_312 = arith.constant 8 : index
    %c0_313 = arith.constant 0 : index
    %586 = vector.load %arg1[%c8_312, %c0_313] : memref<9x256xf32, #tpu.memory_space<vmem>>, vector<1x256xf32>
    %587 = vector.broadcast %586 : vector<1x256xf32> to vector<48x256xf32>
    %588 = arith.mulf %585, %587 : vector<48x256xf32>
    %c384_314 = arith.constant 384 : index
    %c0_315 = arith.constant 0 : index
    %589 = vector.load %arg23[%c384_314, %c0_315] : memref<432x256xf32, #tpu.memory_space<vmem>>, vector<48x256xf32>
    tpu.vector_store %arg23[%c384_314, %c0_315], %588 {strides = array<i32>} : memref<432x256xf32, #tpu.memory_space<vmem>>, vector<48x256xf32>,
    %c0_316 = arith.constant 0 : index
    %c0_317 = arith.constant 0 : index
    %590 = vector.load %arg20[%c0_316, %c0_317] : memref<10x432xf32, #tpu.memory_space<vmem>>, vector<10x432xf32>
    %c0_318 = arith.constant 0 : index
    %c0_319 = arith.constant 0 : index
    %591 = vector.load %arg23[%c0_318, %c0_319] : memref<432x256xf32, #tpu.memory_space<vmem>>, vector<432x256xf32>
    %cst_320 = arith.constant dense<0.000000e+00> : vector<10x256xf32>
    %592 = tpu.matmul %590, %591, %cst_320 {dimension_numbers = #tpu.dot_dimension_numbers<[1], [0], [0], [1], [0, 0, 1, 1], [], []>} : vector<10x432xf32>, vector<432x256xf32>, vector<10x256xf32> -> vector<10x256xf32>
    %c0_321 = arith.constant 0 : index
    %c0_322 = arith.constant 0 : index
    %593 = vector.load %arg21[%c0_321, %c0_322] : memref<10x1xf32, #tpu.memory_space<vmem>>, vector<10x1xf32>
    %594 = vector.broadcast %593 : vector<10x1xf32> to vector<10x256xf32>
    %595 = arith.addf %592, %594 : vector<10x256xf32>
    %c0_323 = arith.constant 0 : index
    %c0_324 = arith.constant 0 : index
    %596 = vector.load %arg22[%c0_323, %c0_324] : memref<10x256xf32, #tpu.memory_space<vmem>>, vector<10x256xf32>
    tpu.vector_store %arg22[%c0_323, %c0_324], %595 {strides = array<i32>} : memref<10x256xf32, #tpu.memory_space<vmem>>, vector<10x256xf32>,
    return
  }
}

</mosaic_0001>

<bundles_post_ra>
// kernel: dilation_model_forward.1
= control target key start
LH: loop header
LB: loop body
LE: loop exit
PB: predicated region body
PF: predicated region fallthrough
CT: control target
= control target key end

     0   :  { %v8489_v3 = vmov 0   ;;  %vm236_vm0 = vcmask 1040384   ;;  %vm223_vm1 = vcmask 465920   ;;  %s14060_s24 = smov 113   ;;  %s14058_s25 = smov 111   ;;  %vm718_vm2 = vcmask 7168   ;;  %s14026_s0 = inlined_call_operand.vmem [shape: f32[441,256], index: 0, kind: input, shape index: {}]   ;;  %s14027_s4 = inlined_call_operand.vmem [shape: f32[32,441], index: 4, kind: input, shape index: {}]   ;;  %s14028_s5 = inlined_call_operand.vmem [shape: f32[32,1], index: 5, kind: input, shape index: {}]   ;;  %s14029_s6 = inlined_call_operand.vmem [shape: f32[32,288], index: 6, kind: input, shape index: {}]   ;;  %s14030_s7 = inlined_call_operand.vmem [shape: f32[32,1], index: 7, kind: input, shape index: {}]   ;;  %s14031_s1 = inlined_call_operand.vmem [shape: f32[9,256], index: 1, kind: input, shape index: {}]   ;;  %s14032_s8 = inlined_call_operand.vmem [shape: f32[32,288], index: 8, kind: input, shape index: {}]   ;;  %s14033_s9 = inlined_call_operand.vmem [shape: f32[32,1], index: 9, kind: input, shape index: {}]   ;;  %s14034_s11 = inlined_call_operand.vmem [shape: f32[48,1], index: 11, kind: input, shape index: {}]   ;;  %s14035_s10 = inlined_call_operand.vmem [shape: f32[48,32], index: 10, kind: input, shape index: {}]   ;;  %s14036_s12 = inlined_call_operand.vmem [shape: f32[48,432], index: 12, kind: input, shape index: {}]   ;;  %s14037_s13 = inlined_call_operand.vmem [shape: f32[48,1], index: 13, kind: input, shape index: {}]   ;;  %s14038_s2 = inlined_call_operand.vmem [shape: f32[9,256], index: 2, kind: input, shape index: {}]   ;;  %s14039_s14 = inlined_call_operand.vmem [shape: f32[48,432], index: 14, kind: input, shape index: {}]   ;;  %s14040_s15 = inlined_call_operand.vmem [shape: f32[48,1], index: 15, kind: input, shape index: {}]   ;;  %s14041_s17 = inlined_call_operand.vmem [shape: f32[48,1], index: 17, kind: input, shape index: {}]   ;;  %s14042_s16 = inlined_call_operand.vmem [shape: f32[48,432], index: 16, kind: input, shape index: {}]   ;;  %s14043_s3 = inlined_call_operand.vmem [shape: f32[9,256], index: 3, kind: input, shape index: {}]   ;;  %s14044_s19 = inlined_call_operand.vmem [shape: f32[48,1], index: 19, kind: input, shape index: {}]   ;;  %s14045_s18 = inlined_call_operand.vmem [shape: f32[48,432], index: 18, kind: input, shape index: {}]   ;;  %s14046_s20 = inlined_call_operand.vmem [shape: f32[10,432], index: 20, kind: input, shape index: {}]   ;;  %s14047_s21 = inlined_call_operand.vmem [shape: f32[10,1], index: 21, kind: input, shape index: {}]   ;;  %s14048_s22 = inlined_call_operand.vmem [shape: f32[10,256], index: 22, kind: output, shape index: {}]  }
   0x1   :  { %14213 = sst [smem:[#allocation51_spill]] %s14026_s0  ;;  %8404 = vset.pattern.permute.xlu1 %v8489_v3  ;;  %8403 = vset.pattern.permute.xlu0 %v8489_v3  ;;  %vm652_vm3 = vcmask 121856   ;;  %vm586_vm4 = vcmask 130048   ;;  %vm521_vm5 = vcmask 138240   ;;  %vm920_vm6 = vcmask 916480   ;;  %s14231_s28 = smov 127  }
   0x2   :  { %14214 = sst [smem:[#allocation52_spill]] %s14027_s4  ;;  %s14070_s4 = smov 112   ;;  %vm854_vm7 = vcmask 924672   ;;  %vm788_vm8 = vcmask 1039360   ;;  %vm14132_vm9 = vcmask 908288   ;;  %vm1144_vm10 = vcmask 261120  }
   0x3   :  { %14215 = sst [smem:[#allocation53_spill]] %s14028_s5  ;;  %s14232_s30 = smov 111   ;;  %vm3496_vm11 = vcmask 392192   ;;  %vm2794_vm12 = vcmask 244736   ;;  %vm2612_vm13 = vcmask 277504   ;;  %vm3168_vm14 = vcmask 785408  }
   0x4   :  { %14216 = sst [smem:[#allocation54_spill]] %s14029_s6  ;;  %vm2984_vm15 = vcmask 1031168  }
   0x5   :  { %14217 = sst [smem:[#allocation55_spill]] %s14030_s7 }
   0x6   :  { %14218 = sst [smem:[#allocation56_spill]] %s14031_s1  ;;  %s14074_s1 = smov 16  }
   0x7   :  { %14219 = sst [smem:[#allocation57_spill]] %s14032_s8  ;;  %s14056_s8 = smov 127  }
   0x8   :  { %s14220_s29 = sld [smem:[#allocation51_spill]] }
   0x9   :  { %s14221_s23 = sld [smem:[#allocation52_spill]] }
   0xa   :  { %s14222_s6 = sld [smem:[#allocation53_spill]] }
   0xb   :  { %s14227_s27 = sld [smem:[#allocation54_spill]] }
   0xc   :  { %s14228_s7 = sld [smem:[#allocation55_spill]] }
   0xd   :  { %s14229_s0 = sld [smem:[#allocation56_spill]] }
   0xe   :  { %v118_v0 = vld [vmem:[%s14220_s29 + $0xf8] sm:$0xff]  ;;  %v117_v1 = vld [vmem:[%s14220_s29 + $0xf0] sm:$0xff]  ;;  %v116_v2 = vld [vmem:[%s14220_s29 + $0xe8] sm:$0xff]  ;;  %s14233_s26 = sld [smem:[#allocation57_spill]] }
   0xf   :  { %243 = vmatprep.subr.mxu0 %v118_v0  ;;  %v115_v4 = vld [vmem:[%s14220_s29 + $0xe0] sm:$0xff]  ;;  %v114_v5 = vld [vmem:[%s14220_s29 + $0xd8] sm:$0xff]  ;;  %v113_v6 = vld [vmem:[%s14220_s29 + $0xd0] sm:$0xff] }
  0x10   :  { %244 = vmatpush1.msra.mxu0 %v117_v1  ;;  %v112_v7 = vld [vmem:[%s14220_s29 + $0xc8] sm:$0xff]  ;;  %v111_v8 = vld [vmem:[%s14220_s29 + $0xc0] sm:$0xff]  ;;  %v182_v9 = vld [vmem:[%s14220_s29 + $0x2f8] sm:$0xff] }
  0x11   :  { %245 = vmatprep.subr.mxu0 %v116_v2  ;;  %v110_v10 = vld [vmem:[%s14220_s29 + $0xb8] sm:$0xff]  ;;  %332 = vmatprep.subr.mxu1 %v182_v9  ;;  %v181_v11 = vld [vmem:[%s14220_s29 + $0x2f0] sm:$0xff]  ;;  %v180_v13 = vld [vmem:[%s14220_s29 + $0x2e8] sm:$0xff] }
  0x12   :  { %246 = vmatpush1.msra.mxu0 %v115_v4  ;;  %v109_v12 = vld [vmem:[%s14220_s29 + $0xb0] sm:$0xff]  ;;  %333 = vmatpush1.msra.mxu1 %v181_v11  ;;  %v179_v14 = vld [vmem:[%s14220_s29 + $0x2e0] sm:$0xff]  ;;  %v108_v15 = vld [vmem:[%s14220_s29 + $0xa8] sm:$0xff] }
  0x13   :  { %247 = vmatprep.subr.mxu0 %v114_v5  ;;  %334 = vmatprep.subr.mxu1 %v180_v13  ;;  %v178_v16 = vld [vmem:[%s14220_s29 + $0x2d8] sm:$0xff]  ;;  %v107_v17 = vld [vmem:[%s14220_s29 + $0xa0] sm:$0xff]  ;;  %v177_v18 = vld [vmem:[%s14220_s29 + $0x2d0] sm:$0xff] }
  0x14   :  { %248 = vmatpush1.msra.mxu0 %v113_v6  ;;  %335 = vmatpush1.msra.mxu1 %v179_v14  ;;  %v176_v19 = vld [vmem:[%s14220_s29 + $0x2c8] sm:$0xff]  ;;  %v106_v20 = vld [vmem:[%s14220_s29 + $0x98] sm:$0xff]  ;;  %v175_v21 = vld [vmem:[%s14220_s29 + $0x2c0] sm:$0xff] }
  0x15   :  { %249 = vmatprep.subr.mxu0 %v112_v7  ;;  %336 = vmatprep.subr.mxu1 %v178_v16  ;;  %v105_v22 = vld [vmem:[%s14220_s29 + $0x90] sm:$0xff]  ;;  %v174_v23 = vld [vmem:[%s14220_s29 + $0x2b8] sm:$0xff]  ;;  %v104_v24 = vld [vmem:[%s14220_s29 + $0x88] sm:$0xff] }
  0x16   :  { %250 = vmatpush1.msra.mxu0 %v111_v8  ;;  %337 = vmatpush1.msra.mxu1 %v177_v18  ;;  %v173_v25 = vld [vmem:[%s14220_s29 + $0x2b0] sm:$0xff]  ;;  %v103_v26 = vld [vmem:[%s14220_s29 + $0x80] sm:$0xff]  ;;  %v172_v27 = vld [vmem:[%s14220_s29 + $0x2a8] sm:$0xff] }
  0x17   :  { %251 = vmatprep.subr.mxu0 %v110_v10  ;;  %338 = vmatprep.subr.mxu1 %v176_v19  ;;  %v102_v28 = vld [vmem:[%s14220_s29 + $0x78] sm:$0xff]  ;;  %v171_v29 = vld [vmem:[%s14220_s29 + $0x2a0] sm:$0xff]  ;;  %v101_v30 = vld [vmem:[%s14220_s29 + $0x70] sm:$0xff] }
  0x18   :  { %252 = vmatpush1.msra.mxu0 %v109_v12  ;;  %339 = vmatpush1.msra.mxu1 %v175_v21  ;;  %v170_v31 = vld [vmem:[%s14220_s29 + $0x298] sm:$0xff]  ;;  %v100_v32 = vld [vmem:[%s14220_s29 + $0x68] sm:$0xff]  ;;  %v169_v33 = vld [vmem:[%s14220_s29 + $0x290] sm:$0xff] }
  0x19   :  { %253 = vmatprep.subr.mxu0 %v108_v15  ;;  %340 = vmatprep.subr.mxu1 %v174_v23  ;;  %v99_v34 = vld [vmem:[%s14220_s29 + $0x60] sm:$0xff]  ;;  %v168_v35 = vld [vmem:[%s14220_s29 + $0x288] sm:$0xff]  ;;  %v98_v36 = vld [vmem:[%s14220_s29 + $0x58] sm:$0xff] }
  0x1a   :  { %254 = vmatpush1.msra.mxu0 %v107_v17  ;;  %341 = vmatpush1.msra.mxu1 %v173_v25  ;;  %v167_v37 = vld [vmem:[%s14220_s29 + $0x280] sm:$0xff]  ;;  %v97_v38 = vld [vmem:[%s14220_s29 + $0x50] sm:$0xff]  ;;  %v166_v39 = vld [vmem:[%s14220_s29 + $0x278] sm:$0xff] }
  0x1b   :  { %255 = vmatprep.subr.mxu0 %v106_v20  ;;  %342 = vmatprep.subr.mxu1 %v172_v27  ;;  %v96_v40 = vld [vmem:[%s14220_s29 + $0x48] sm:$0xff]  ;;  %v165_v41 = vld [vmem:[%s14220_s29 + $0x270] sm:$0xff]  ;;  %v95_v42 = vld [vmem:[%s14220_s29 + $0x40] sm:$0xff] }
  0x1c   :  { %256 = vmatpush1.msra.mxu0 %v105_v22  ;;  %343 = vmatpush1.msra.mxu1 %v171_v29  ;;  %v164_v43 = vld [vmem:[%s14220_s29 + $0x268] sm:$0xff]  ;;  %v94_v44 = vld [vmem:[%s14220_s29 + $0x38] sm:$0xff]  ;;  %v163_v45 = vld [vmem:[%s14220_s29 + $0x260] sm:$0xff] }
  0x1d   :  { %257 = vmatprep.subr.mxu0 %v104_v24  ;;  %344 = vmatprep.subr.mxu1 %v170_v31  ;;  %v93_v46 = vld [vmem:[%s14220_s29 + $0x30] sm:$0xff]  ;;  %v162_v47 = vld [vmem:[%s14220_s29 + $0x258] sm:$0xff]  ;;  %v92_v48 = vld [vmem:[%s14220_s29 + $0x28] sm:$0xff] }
  0x1e   :  { %258 = vmatpush1.msra.mxu0 %v103_v26  ;;  %345 = vmatpush1.msra.mxu1 %v169_v33  ;;  %v161_v49 = vld [vmem:[%s14220_s29 + $0x250] sm:$0xff]  ;;  %v91_v50 = vld [vmem:[%s14220_s29 + $0x20] sm:$0xff]  ;;  %v160_v51 = vld [vmem:[%s14220_s29 + $0x248] sm:$0xff] }
  0x1f   :  { %259 = vmatprep.subr.mxu0 %v102_v28  ;;  %346 = vmatprep.subr.mxu1 %v168_v35  ;;  %v90_v52 = vld [vmem:[%s14220_s29 + $0x18] sm:$0xff]  ;;  %v159_v53 = vld [vmem:[%s14220_s29 + $0x240] sm:$0xff]  ;;  %v89_v54 = vld [vmem:[%s14220_s29 + $0x10] sm:$0xff] }
  0x20   :  { %260 = vmatpush1.msra.mxu0 %v101_v30  ;;  %347 = vmatpush1.msra.mxu1 %v167_v37  ;;  %v158_v55 = vld [vmem:[%s14220_s29 + $0x238] sm:$0xff]  ;;  %v88_v56 = vld [vmem:[%s14220_s29 + $0x8] sm:$0xff]  ;;  %v157_v57 = vld [vmem:[%s14220_s29 + $0x230] sm:$0xff] }
  0x21   :  { %261 = vmatprep.subr.mxu0 %v100_v32  ;;  %348 = vmatprep.subr.mxu1 %v166_v39  ;;  %v87_v58 = vld [vmem:[%s14220_s29] sm:$0xff]  ;;  %v156_v59 = vld [vmem:[%s14220_s29 + $0x228] sm:$0xff]  ;;  %v150_v60 = vld [vmem:[%s14220_s29 + $0x1f8] sm:$0xff] }
  0x22   :  { %262 = vmatpush1.msra.mxu0 %v99_v34  ;;  %349 = vmatpush1.msra.mxu1 %v165_v41  ;;  %v155_v61 = vld [vmem:[%s14220_s29 + $0x220] sm:$0xff]  ;;  %v149_v62 = vld [vmem:[%s14220_s29 + $0x1f0] sm:$0xff]  ;;  %v154_v63 = vld [vmem:[%s14220_s29 + $0x218] sm:$0xff] }
  0x23   :  { %263 = vmatprep.subr.mxu0 %v98_v36  ;;  %350 = vmatprep.subr.mxu1 %v164_v43  ;;  %v148_v0 = vld [vmem:[%s14220_s29 + $0x1e8] sm:$0xff]  ;;  %v153_v1 = vld [vmem:[%s14220_s29 + $0x210] sm:$0xff]  ;;  %v147_v2 = vld [vmem:[%s14220_s29 + $0x1e0] sm:$0xff] }
  0x24   :  { %264 = vmatpush1.msra.mxu0 %v97_v38  ;;  %351 = vmatpush1.msra.mxu1 %v163_v45  ;;  %v152_v3 = vld [vmem:[%s14220_s29 + $0x208] sm:$0xff]  ;;  %v146_v4 = vld [vmem:[%s14220_s29 + $0x1d8] sm:$0xff]  ;;  %v151_v5 = vld [vmem:[%s14220_s29 + $0x200] sm:$0xff] }
  0x25   :  { %265 = vmatprep.subr.mxu0 %v96_v40  ;;  %352 = vmatprep.subr.mxu1 %v162_v47  ;;  %v145_v6 = vld [vmem:[%s14220_s29 + $0x1d0] sm:$0xff]  ;;  %v198_v7 = vld [vmem:[%s14220_s29 + $0x378] sm:$0x1]  ;;  %v144_v8 = vld [vmem:[%s14220_s29 + $0x1c8] sm:$0xff] }
  0x26   :  { %266 = vmatpush1.msra.mxu0 %v95_v42  ;;  %353 = vmatpush1.msra.mxu1 %v161_v49  ;;  %v197_v9 = vld [vmem:[%s14220_s29 + $0x370] sm:$0x1]  ;;  %v143_v10 = vld [vmem:[%s14220_s29 + $0x1c0] sm:$0xff]  ;;  %v196_v11 = vld [vmem:[%s14220_s29 + $0x368] sm:$0xff] }
  0x27   :  { %267 = vmatprep.subr.mxu0 %v94_v44  ;;  %354 = vmatprep.subr.mxu1 %v160_v51  ;;  %v142_v12 = vld [vmem:[%s14220_s29 + $0x1b8] sm:$0xff]  ;;  %v195_v13 = vld [vmem:[%s14220_s29 + $0x360] sm:$0xff]  ;;  %v141_v14 = vld [vmem:[%s14220_s29 + $0x1b0] sm:$0xff] }
  0x28   :  { %268 = vmatpush1.msra.mxu0 %v93_v46  ;;  %355 = vmatpush1.msra.mxu1 %v159_v53  ;;  %v194_v15 = vld [vmem:[%s14220_s29 + $0x358] sm:$0xff]  ;;  %v140_v16 = vld [vmem:[%s14220_s29 + $0x1a8] sm:$0xff]  ;;  %v193_v17 = vld [vmem:[%s14220_s29 + $0x350] sm:$0xff] }
  0x29   :  { %269 = vmatprep.subr.mxu0 %v92_v48  ;;  %356 = vmatprep.subr.mxu1 %v158_v55  ;;  %v139_v18 = vld [vmem:[%s14220_s29 + $0x1a0] sm:$0xff]  ;;  %v192_v19 = vld [vmem:[%s14220_s29 + $0x348] sm:$0xff]  ;;  %v138_v20 = vld [vmem:[%s14220_s29 + $0x198] sm:$0xff] }
  0x2a   :  { %270 = vmatpush1.msra.mxu0 %v91_v50  ;;  %357 = vmatpush1.msra.mxu1 %v157_v57  ;;  %v191_v21 = vld [vmem:[%s14220_s29 + $0x340] sm:$0xff]  ;;  %v137_v22 = vld [vmem:[%s14220_s29 + $0x190] sm:$0xff]  ;;  %v190_v23 = vld [vmem:[%s14220_s29 + $0x338] sm:$0xff] }
  0x2b   :  { %271 = vmatprep.subr.mxu0 %v90_v52  ;;  %358 = vmatprep.subr.mxu1 %v156_v59  ;;  %v136_v24 = vld [vmem:[%s14220_s29 + $0x188] sm:$0xff]  ;;  %v189_v25 = vld [vmem:[%s14220_s29 + $0x330] sm:$0xff]  ;;  %v135_v26 = vld [vmem:[%s14220_s29 + $0x180] sm:$0xff] }
  0x2c   :  { %272 = vmatpush1.msra.mxu0 %v89_v54  ;;  %359 = vmatpush1.msra.mxu1 %v155_v61  ;;  %v188_v27 = vld [vmem:[%s14220_s29 + $0x328] sm:$0xff]  ;;  %v134_v28 = vld [vmem:[%s14220_s29 + $0x178] sm:$0xff]  ;;  %v187_v29 = vld [vmem:[%s14220_s29 + $0x320] sm:$0xff] }
  0x2d   :  { %273 = vmatprep.subr.mxu0 %v88_v56  ;;  %360 = vmatprep.subr.mxu1 %v154_v63  ;;  %v133_v30 = vld [vmem:[%s14220_s29 + $0x170] sm:$0xff]  ;;  %v186_v31 = vld [vmem:[%s14220_s29 + $0x318] sm:$0xff]  ;;  %v132_v32 = vld [vmem:[%s14220_s29 + $0x168] sm:$0xff] }
  0x2e   :  { %274 = vmatpush1.msra.mxu0 %v87_v58  ;;  %361 = vmatpush1.msra.mxu1 %v153_v1  ;;  %v185_v33 = vld [vmem:[%s14220_s29 + $0x310] sm:$0xff]  ;;  %v131_v34 = vld [vmem:[%s14220_s29 + $0x160] sm:$0xff]  ;;  %v184_v35 = vld [vmem:[%s14220_s29 + $0x308] sm:$0xff] }
  0x2f   :  { %275 = vmatprep.subr.mxu0 %v150_v60  ;;  %362 = vmatprep.subr.mxu1 %v152_v3  ;;  %v130_v36 = vld [vmem:[%s14220_s29 + $0x158] sm:$0xff]  ;;  %v72_v37 = vld [vmem:[%s14221_s23 + $0x8] sm:$0xff]  ;;  %v129_v38 = vld [vmem:[%s14220_s29 + $0x150] sm:$0xff] }
  0x30   :  { %276 = vmatpush2.msra.mxu0 %v149_v62  ;;  %363 = vmatpush1.msra.mxu1 %v151_v5  ;;  %v183_v39 = vld [vmem:[%s14220_s29 + $0x300] sm:$0xff]  ;;  %v128_v40 = vld [vmem:[%s14220_s29 + $0x148] sm:$0xff]  ;;  %v74_v41 = vld [vmem:[%s14221_s23 + $0x18] sm:$0xff] }
  0x31   :  { %277 = vmatprep.subr.mxu0 %v148_v0  ;;  %8285 = vmatprep.subr.msk.mxu1 %vm236_vm0, %v198_v7  ;;  %v127_v42 = vld [vmem:[%s14220_s29 + $0x140] sm:$0xff]  ;;  %v73_v43 = vld [vmem:[%s14221_s23 + $0x10] sm:$0xff]  ;;  %v126_v44 = vld [vmem:[%s14220_s29 + $0x138] sm:$0xff] }
  0x32   :  { %278 = vmatpush2.msra.mxu0 %v147_v2  ;;  %8286 = vmatpush2.msk.msra.mxu1 %vm236_vm0, %v197_v9  ;;  %v78_v45 = vld [vmem:[%s14221_s23 + $0x38] sm:$0xff]  ;;  %v125_v46 = vld [vmem:[%s14220_s29 + $0x130] sm:$0xff]  ;;  %v200_v47 = vld [vmem:[%s14222_s6 + $0x8] sm:$0xff]  ;;  %vm3076_vm0 = vcmask 801792  }
  0x33   :  { %279 = vmatprep.subr.mxu0 %v146_v4  ;;  %382 = vmatprep.subr.mxu1 %v196_v11  ;;  %v124_v48 = vld [vmem:[%s14220_s29 + $0x128] sm:$0xff]  ;;  %v202_v49 = vld [vmem:[%s14222_s6 + $0x18] sm:$0xff]  ;;  %v123_v50 = vld [vmem:[%s14220_s29 + $0x120] sm:$0xff] }
  0x34   :  { %280 = vmatpush2.msra.mxu0 %v145_v6  ;;  %383 = vmatpush2.msra.mxu1 %v195_v13  ;;  %v77_v51 = vld [vmem:[%s14221_s23 + $0x30] sm:$0xff]  ;;  %v122_v52 = vld [vmem:[%s14220_s29 + $0x118] sm:$0xff]  ;;  %v199_v55 = vld [vmem:[%s14222_s6] sm:$0xff] }
  0x35   :  { %281 = vmatprep.subr.mxu0 %v144_v8  ;;  %384 = vmatprep.subr.mxu1 %v194_v15  ;;  %v82_v53 = vld [vmem:[%s14221_s23 + $0x58] sm:$0xff]  ;;  %v121_v54 = vld [vmem:[%s14220_s29 + $0x110] sm:$0xff]  ;;  %v120_v56 = vld [vmem:[%s14220_s29 + $0x108] sm:$0xff] }
  0x36   :  { %282 = vmatpush2.msra.mxu0 %v143_v10  ;;  %385 = vmatpush2.msra.mxu1 %v193_v17  ;;  %v201_v57 = vld [vmem:[%s14222_s6 + $0x10] sm:$0xff]  ;;  %v119_v58 = vld [vmem:[%s14220_s29 + $0x100] sm:$0xff]  ;;  %v86_v61 = vld [vmem:[%s14221_s23 + $0x78] sm:$0xff]  ;;  %s14076_s6 = smov 15   ;;  %s14072_s29 = smov 17  }
  0x37   :  { %283 = vmatprep.subr.mxu0 %v142_v12  ;;  %386 = vmatprep.subr.mxu1 %v192_v19  ;;  %v81_v59 = vld [vmem:[%s14221_s23 + $0x50] sm:$0xff]  ;;  %v71_v60 = vld [vmem:[%s14221_s23] sm:$0xff]  ;;  %v76_v62 = vld [vmem:[%s14221_s23 + $0x28] sm:$0xff] }
  0x38   :  { %284 = vmatpush2.msra.mxu0 %v141_v14  ;;  %387 = vmatpush2.msra.mxu1 %v191_v21  ;;  %v85_v63 = vld [vmem:[%s14221_s23 + $0x70] sm:$0xff]  ;;  %v75_v0 = vld [vmem:[%s14221_s23 + $0x20] sm:$0xff]  ;;  %v80_v1 = vld [vmem:[%s14221_s23 + $0x48] sm:$0xff] }
  0x39   :  { %285 = vmatprep.subr.mxu0 %v140_v16  ;;  %388 = vmatprep.subr.mxu1 %v190_v23  ;;  %v79_v2 = vld [vmem:[%s14221_s23 + $0x40] sm:$0xff]  ;;  %v84_v3 = vld [vmem:[%s14221_s23 + $0x68] sm:$0xff] }
  0x3a   :  { %286 = vmatpush2.msra.mxu0 %v139_v18  ;;  %389 = vmatpush2.msra.mxu1 %v189_v25  ;;  %v83_v4 = vld [vmem:[%s14221_s23 + $0x60] sm:$0xff]  ;;  %s14068_s23 = smov 1  }
  0x3b   :  { %287 = vmatprep.subr.mxu0 %v138_v20  ;;  %390 = vmatprep.subr.mxu1 %v188_v27 }
  0x3c   :  { %288 = vmatpush2.msra.mxu0 %v137_v22  ;;  %391 = vmatpush2.msra.mxu1 %v187_v29 }
  0x3d   :  { %289 = vmatprep.subr.mxu0 %v136_v24  ;;  %392 = vmatprep.subr.mxu1 %v186_v31 }
  0x3e   :  { %290 = vmatpush2.msra.mxu0 %v135_v26  ;;  %393 = vmatpush2.msra.mxu1 %v185_v33 }
  0x3f   :  { %291 = vmatprep.subr.mxu0 %v134_v28  ;;  %394 = vmatprep.subr.mxu1 %v184_v35 }
  0x40   :  { %292 = vmatpush2.msra.mxu0 %v133_v30  ;;  %307 = vmatprep.mubr.f32.mxu0 %v72_v37 }
  0x41   :  { %293 = vmatprep.subr.mxu0 %v132_v32  ;;  %395 = vmatpush2.msra.mxu1 %v183_v39 }
  0x42   :  { %294 = vmatpush2.msra.mxu0 %v131_v34  ;;  %8287 = vmatprep.mubr.msk.f32.mxu1 %vm223_vm1, %v74_v41 }
  0x43   :  { %295 = vmatprep.subr.mxu0 %v130_v36  ;;  %397 = vmatmul.mubr.f32.vlgmr.msra.gmra.mxu1 %v73_v43 }
  0x44   :  { %296 = vmatpush2.msra.mxu0 %v129_v38  ;;  %8288 = vmatprep.mubr.msk.f32.mxu1 %vm223_vm1, %v78_v45 }
  0x45   :  { %297 = vmatprep.subr.mxu0 %v128_v40  ;;  %210 = vperm.xlu1 %8404, %v200_v47  }
  0x46   :  { %298 = vmatpush2.msra.mxu0 %v127_v42  ;;  %220 = vperm.xlu0 %8403, %v202_v49  }
  0x47   :  { %299 = vmatprep.subr.mxu0 %v126_v44  ;;  %403 = vmatmul.mubr.f32.gmra.mxu1 %v77_v51 }
  0x48   :  { %300 = vmatpush2.msra.mxu0 %v125_v46  ;;  %8289 = vmatprep.mubr.msk.f32.mxu1 %vm223_vm1, %v82_v53 }
  0x49   :  { %301 = vmatprep.subr.mxu0 %v124_v48  ;;  %205 = vperm.xlu1 %8404, %v199_v55  }
  0x4a   :  { %302 = vmatpush2.msra.mxu0 %v123_v50  ;;  %215 = vperm.xlu0 %8403, %v201_v57  }
  0x4b   :  { %303 = vmatprep.subr.mxu0 %v122_v52  ;;  %409 = vmatmul.mubr.f32.gmra.mxu1 %v81_v59 }
  0x4c   :  { %304 = vmatpush2.msra.mxu0 %v121_v54  ;;  %8290 = vmatprep.mubr.msk.f32.mxu1 %vm223_vm1, %v86_v61  ;;  %vm2886_vm1 = vcmask 15360  }
  0x4d   :  { %305 = vmatprep.subr.mxu0 %v120_v56 }
  0x4e   :  { %306 = vmatpush2.msra.mxu0 %v119_v58 }
  0x4f   :  { %308 = vmatmul.mubr.f32.vlgmr.msra.gmra.mxu0 %v71_v60  ;;  %415 = vmatmul.mubr.f32.gmra.mxu1 %v85_v63 }
  0x50   :  { %313 = vmatprep.mubr.f32.mxu0 %v76_v62 }
  0x53   :  { %314 = vmatmul.mubr.f32.gmra.mxu0 %v75_v0 }
  0x54   :  { %319 = vmatprep.mubr.f32.mxu0 %v80_v1 }
  0x57   :  { %320 = vmatmul.mubr.f32.gmra.mxu0 %v79_v2 }
  0x58   :  { %325 = vmatprep.mubr.f32.mxu0 %v84_v3 }
  0x5b   :  { %326 = vmatmul.mubr.f32.gmra.mxu0 %v83_v4 }
  0xc0   :  { %v211_v20 = vpop.permute.xlu1 %210 }
  0xc1   :  { %v221_v8 = vpop.permute.xlu0 %220 }
  0xc4   :  { %v206_v35 = vpop.permute.xlu1 %205 }
  0xc5   :  { %v216_v15 = vpop.permute.xlu0 %215 }
 0x103   :  { %v398_v5 = vpop.f32.mrf.mxu1 }
 0x105   :  { %v400_v6 = vpop.f32.mrf.mxu1 }
 0x107   :  { %v404_v7 = vpop.f32.mrf.mxu1 }
 0x109   :  { %v406_v10 = vpop.f32.mrf.mxu1 }
 0x10b   :  { %v410_v13 = vpop.f32.mrf.mxu1 }
 0x10d   :  { %v412_v17 = vpop.f32.mrf.mxu1 }
 0x10f   :  { %v309_v9 = vpop.f32.mrf.mxu0  ;;  %v416_v23 = vpop.f32.mrf.mxu1 }
 0x110   :  { %v310_v39 = vadd.f32 %v309_v9, %v206_v35 }
 0x111   :  { %v311_v11 = vpop.f32.mrf.mxu0  ;;  %v418_v31 = vpop.f32.mrf.mxu1 }
 0x112   :  { %v312_v36 = vadd.f32 %v311_v11, %v206_v35  ;;  %v399_v43 = vadd.f32 %v398_v5, %v310_v39 }
 0x113   :  { %v315_v12 = vpop.f32.mrf.mxu0 }
 0x114   :  { %v316_v32 = vadd.f32 %v315_v12, %v211_v20  ;;  %v401_v41 = vadd.f32 %v400_v6, %v312_v36 }
 0x115   :  { %v317_v14 = vpop.f32.mrf.mxu0 }
 0x116   :  { %v318_v28 = vadd.f32 %v317_v14, %v211_v20  ;;  %v405_v40 = vadd.f32 %v404_v7, %v316_v32  ;;  %v421_v44 = vadd.f32 %v401_v41, %v399_v43 }
 0x117   :  { %v321_v16 = vpop.f32.mrf.mxu0 }
 0x118   :  { %v322_v18 = vadd.f32 %v321_v16, %v216_v15  ;;  %v407_v37 = vadd.f32 %v406_v10, %v318_v28 }
 0x119   :  { %v323_v19 = vpop.f32.mrf.mxu0 }
 0x11a   :  { %v324_v21 = vadd.f32 %v323_v19, %v216_v15  ;;  %v411_v24 = vadd.f32 %v410_v13, %v322_v18  ;;  %v424_v42 = vadd.f32 %v407_v37, %v405_v40 }
 0x11b   :  { %v327_v22 = vpop.f32.mrf.mxu0 }
 0x11c   :  { %v413_v25 = vadd.f32 %v412_v17, %v324_v21  ;;  %v328_v26 = vadd.f32 %v327_v22, %v221_v8 }
 0x11d   :  { %v329_v27 = vpop.f32.mrf.mxu0 }
 0x11e   :  { %v330_v29 = vadd.f32 %v329_v27, %v221_v8  ;;  %v427_v30 = vadd.f32 %v413_v25, %v411_v24  ;;  %v417_v33 = vadd.f32 %v416_v23, %v328_v26 }
 0x120   :  { %v419_v34 = vadd.f32 %v418_v31, %v330_v29  ;;  %428 = vadd.xlane.f32.xlu1 %v427_v30 }
 0x122   :  { %v430_v38 = vadd.f32 %v419_v34, %v417_v33 }
 0x124   :  { %431 = vadd.xlane.f32.xlu0 %v430_v38 }
 0x128   :  { %425 = vadd.xlane.f32.xlu0 %v424_v42 }
 0x12c   :  { %422 = vadd.xlane.f32.xlu0 %v421_v44 }
 0x1a9   :  { %v429_v45 = vpop.xlane.xlu1 %428 }
 0x1aa   :  { %v435_v46 = vmul.f32 0.00390625, %v429_v45 }
 0x1ac   :  { %v9027_v47 = vsub.f32 %v411_v24, %v435_v46  ;;  %v9029_v48 = vsub.f32 %v413_v25, %v435_v46  ;;  %v1123_v46 = vld [vmem:[%s14228_s7 + $0x18] sm:$0xff] }
 0x1ad   :  { %v432_v49 = vpop.xlane.xlu0 %431 }
 0x1ae   :  { %v449_v50 = vmul.f32 %v9027_v47, %v9027_v47  ;;  %v450_v51 = vmul.f32 %v9029_v48, %v9029_v48  ;;  %v436_v52 = vmul.f32 0.00390625, %v432_v49  ;;  %v1121_v49 = vld [vmem:[%s14228_s7 + $0x8] sm:$0xff] }
 0x1b0   :  { %v459_v53 = vadd.f32 %v450_v51, %v449_v50  ;;  %v9035_v56 = vsub.f32 %v417_v33, %v436_v52  ;;  %v9037_v57 = vsub.f32 %v419_v34, %v436_v52  ;;  %v1122_v52 = vld [vmem:[%s14228_s7 + $0x10] sm:$0xff] }
 0x1b1   :  { %v426_v54 = vpop.xlane.xlu0 %425 }
 0x1b2   :  { %v434_v55 = vmul.f32 0.00390625, %v426_v54  ;;  %460 = vadd.xlane.f32.xlu0 %v459_v53  ;;  %v451_v0 = vmul.f32 %v9035_v56, %v9035_v56  ;;  %v452_v4 = vmul.f32 %v9037_v57, %v9037_v57 }
 0x1b4   :  { %v439_v58 = vsub.f32 %v405_v40, %v434_v55  ;;  %v440_v59 = vsub.f32 %v407_v37, %v434_v55  ;;  %v462_v7 = vadd.f32 %v452_v4, %v451_v0  ;;  %v1120_v55 = vld [vmem:[%s14228_s7] sm:$0xff]  ;;  %v540_v4 = vlaneseq  ;;  %s14080_s7 = smov 94  }
 0x1b5   :  { %v423_v60 = vpop.xlane.xlu0 %422 }
 0x1b6   :  { %v433_v61 = vmul.f32 0.00390625, %v423_v60  ;;  %v447_v62 = vmul.f32 %v439_v58, %v439_v58  ;;  %v448_v63 = vmul.f32 %v440_v59, %v440_v59 }
 0x1b8   :  { %v437_v1 = vsub.f32 %v399_v43, %v433_v61  ;;  %v438_v2 = vsub.f32 %v401_v41, %v433_v61  ;;  %v456_v3 = vadd.f32 %v448_v63, %v447_v62  ;;  %v1037_v41 = vld [vmem:[%s14227_s27 + $0x8] sm:$0xff] }
 0x1b9   :  { %1221 = vmatprep.mubr.f32.mxu1 %v1037_v41 }
 0x1ba   :  { %457 = vadd.xlane.f32.xlu1 %v456_v3  ;;  %v445_v5 = vmul.f32 %v437_v1, %v437_v1  ;;  %v446_v6 = vmul.f32 %v438_v2, %v438_v2 }
 0x1bc   :  { %v453_v8 = vadd.f32 %v446_v6, %v445_v5 }
 0x1be   :  { %463 = vadd.xlane.f32.xlu1 %v462_v7  ;;  %454 = vadd.xlane.f32.xlu0 %v453_v8  ;;  %v541_v7 = vshrl.u32 %v540_v4, 7 }
 0x23b   :  { %v461_v9 = vpop.xlane.xlu0 %460 }
 0x23c   :  { %v467_v21 = vmul.f32 0.00390625, %v461_v9 }
 0x23e   :  { %v471_v22 = vadd.f32 1e-05, %v467_v21 }
 0x243   :  { %v458_v13 = vpop.xlane.xlu1 %457 }
 0x244   :  { %v466_v14 = vmul.f32 0.00390625, %v458_v13  ;;  %v9250_v13 = vsub.s32 1, %v541_v7 }
 0x246   :  { %v470_v15 = vadd.f32 1e-05, %v466_v14  ;;  %v8293_v14 = vld [vmem:[%s14229_s0 + $0x3] ss:$8 sm:$0x3] }
 0x247   :  { %v455_v10 = vpop.xlane.xlu0 %454  ;;  %v464_v28 = vpop.xlane.xlu1 %463 }
 0x248   :  { %v465_v11 = vmul.f32 0.00390625, %v455_v10  ;;  %v468_v29 = vmul.f32 0.00390625, %v464_v28  ;;  %v9244_v10 = vsub.s32 0, %v541_v7 }
 0x24a   :  { %v469_v12 = vadd.f32 1e-05, %v465_v11  ;;  %v472_v30 = vadd.f32 1e-05, %v468_v29 }
 0x24c   :  { %8405 = vrsqrt.f32 %v469_v12 }
 0x24d   :  { %8407 = vrsqrt.f32 %v470_v15  ;;  %v741_v15 = vrot.slane %v8293_v14, %v9244_v10 }
 0x24e   :  { %8409 = vrsqrt.f32 %v471_v22 }
 0x24f   :  { %8411 = vrsqrt.f32 %v472_v30 }
 0x259   :  { %v8406_v16 = vpop.eup %8405 }
 0x25a   :  { %v477_v17 = vmul.f32 %v8406_v16, %v437_v1  ;;  %v478_v18 = vmul.f32 %v8406_v16, %v438_v2  ;;  %v8408_v23 = vpop.eup %8407 }
 0x25b   :  { %v479_v24 = vmul.f32 %v8408_v23, %v439_v58  ;;  %v480_v25 = vmul.f32 %v8408_v23, %v440_v59  ;;  %v8410_v31 = vpop.eup %8409 }
 0x25c   :  { %v9043_v19 = vmax.f32 %v477_v17, 0.0  ;;  %v9045_v20 = vmax.f32 %v478_v18, 0.0  ;;  %v482_v32 = vmul.f32 %v8410_v31, %v9029_v48  ;;  %v481_v33 = vmul.f32 %v8410_v31, %v9027_v47  ;;  %v8412_v36 = vpop.eup %8411 }
 0x25d   :  { %v9063_v26 = vmax.f32 %v479_v24, 0.0  ;;  %v9065_v27 = vmax.f32 %v480_v25, 0.0  ;;  %v483_v37 = vmul.f32 %v8412_v36, %v9035_v56  ;;  %v484_v39 = vmul.f32 %v8412_v36, %v9037_v57 }
 0x25e   :  { %14223 = vst [vmem:[#allocation3_spill] sm:$0xff] %v9043_v19  ;;  %14224 = vst [vmem:[#allocation4_spill] sm:$0xff] %v9045_v20  ;;  %698 = vrot.lane.b32.xlu0 %v9045_v20, %s14068_s23  ;;  %710 = vrot.lane.b32.xlu1 %v9043_v19, %s14068_s23  ;;  %v9085_v34 = vmax.f32 %v482_v32, 0.0  ;;  %v9091_v35 = vmax.f32 %v481_v33, 0.0  ;;  %v745_v18 = vrot.slane %v8293_v14, %v9250_v13 }
 0x25f   :  { %14225 = vst [vmem:[#allocation5_spill] sm:$0xff] %v9063_v26  ;;  %14226 = vst [vmem:[#allocation6_spill] sm:$0xff] %v9065_v27  ;;  %v9106_v38 = vmax.f32 %v483_v37, 0.0  ;;  %v9117_v40 = vmax.f32 %v484_v39, 0.0 }
 0x260   :  { %v8292_v37 = vld [vmem:[%s14229_s0 + $0x2] ss:$8 sm:$0x3] }
 0x262   :  { %632 = vrot.lane.b32.xlu0 %v9045_v20, %s14076_s6  ;;  %644 = vrot.lane.b32.xlu1 %v9043_v19, %s14076_s6 }
 0x266   :  { %566 = vrot.lane.b32.xlu0 %v9045_v20, %s14074_s1  ;;  %578 = vrot.lane.b32.xlu1 %v9043_v19, %s14074_s1 }
 0x26a   :  { %497 = vrot.lane.b32.xlu0 %v9045_v20, %s14072_s29  ;;  %513 = vrot.lane.b32.xlu1 %v9043_v19, %s14072_s29 }
 0x26e   :  { %700 = vrot.lane.b32.xlu0 %v9065_v27, %s14068_s23  ;;  %712 = vrot.lane.b32.xlu1 %v9063_v26, %s14068_s23 }
 0x272   :  { %634 = vrot.lane.b32.xlu0 %v9065_v27, %s14076_s6  ;;  %646 = vrot.lane.b32.xlu1 %v9063_v26, %s14076_s6 }
 0x276   :  { %568 = vrot.lane.b32.xlu0 %v9065_v27, %s14074_s1  ;;  %580 = vrot.lane.b32.xlu1 %v9063_v26, %s14074_s1 }
 0x27a   :  { %499 = vrot.lane.b32.xlu0 %v9065_v27, %s14072_s29  ;;  %515 = vrot.lane.b32.xlu1 %v9063_v26, %s14072_s29 }
 0x27e   :  { %636 = vrot.lane.b32.xlu0 %v9085_v34, %s14076_s6  ;;  %702 = vrot.lane.b32.xlu1 %v9085_v34, %s14068_s23 }
 0x282   :  { %570 = vrot.lane.b32.xlu0 %v9085_v34, %s14074_s1  ;;  %714 = vrot.lane.b32.xlu1 %v9091_v35, %s14068_s23 }
 0x286   :  { %501 = vrot.lane.b32.xlu0 %v9085_v34, %s14072_s29  ;;  %648 = vrot.lane.b32.xlu1 %v9091_v35, %s14076_s6 }
 0x28a   :  { %912 = vrot.lane.b32.xlu0 %v9091_v35, %s14070_s4  ;;  %582 = vrot.lane.b32.xlu1 %v9091_v35, %s14074_s1 }
 0x28e   :  { %716 = vrot.lane.b32.xlu0 %v9106_v38, %s14068_s23  ;;  %517 = vrot.lane.b32.xlu1 %v9091_v35, %s14072_s29 }
 0x292   :  { %908 = vrot.lane.b32.xlu0 %v9063_v26, %s14070_s4  ;;  %914 = vrot.lane.b32.xlu1 %v9085_v34, %s14070_s4 }
 0x296   :  { %638 = vrot.lane.b32.xlu0 %v9117_v40, %s14076_s6  ;;  %704 = vrot.lane.b32.xlu1 %v9117_v40, %s14068_s23 }
 0x29a   :  { %904 = vrot.lane.b32.xlu0 %v9043_v19, %s14070_s4  ;;  %910 = vrot.lane.b32.xlu1 %v9065_v27, %s14070_s4 }
 0x29e   :  { %572 = vrot.lane.b32.xlu0 %v9117_v40, %s14074_s1  ;;  %650 = vrot.lane.b32.xlu1 %v9106_v38, %s14076_s6 }
 0x2a2   :  { %846 = vrot.lane.b32.xlu0 %v9091_v35, %s14060_s24  ;;  %906 = vrot.lane.b32.xlu1 %v9045_v20, %s14070_s4 }
 0x2a6   :  { %503 = vrot.lane.b32.xlu0 %v9117_v40, %s14072_s29  ;;  %584 = vrot.lane.b32.xlu1 %v9106_v38, %s14074_s1 }
 0x2aa   :  { %842 = vrot.lane.b32.xlu0 %v9063_v26, %s14060_s24  ;;  %848 = vrot.lane.b32.xlu1 %v9085_v34, %s14060_s24 }
 0x2ae   :  { %916 = vrot.lane.b32.xlu0 %v9106_v38, %s14070_s4  ;;  %519 = vrot.lane.b32.xlu1 %v9106_v38, %s14072_s29 }
 0x2b2   :  { %838 = vrot.lane.b32.xlu0 %v9043_v19, %s14060_s24  ;;  %844 = vrot.lane.b32.xlu1 %v9065_v27, %s14060_s24 }
 0x2b6   :  { %850 = vrot.lane.b32.xlu0 %v9106_v38, %s14060_s24  ;;  %918 = vrot.lane.b32.xlu1 %v9117_v40, %s14070_s4 }
 0x2ba   :  { %780 = vrot.lane.b32.xlu0 %v9091_v35, %s14056_s8  ;;  %840 = vrot.lane.b32.xlu1 %v9045_v20, %s14060_s24 }
 0x2be   :  { %784 = vrot.lane.b32.xlu0 %v9106_v38, %s14056_s8  ;;  %852 = vrot.lane.b32.xlu1 %v9117_v40, %s14060_s24  ;;  %s8508_s24 = smov 64  }
 0x2c2   :  { %776 = vrot.lane.b32.xlu0 %v9063_v26, %s14056_s8  ;;  %782 = vrot.lane.b32.xlu1 %v9085_v34, %s14056_s8 }
 0x2c6   :  { %772 = vrot.lane.b32.xlu0 %v9043_v19, %s14056_s8  ;;  %786 = vrot.lane.b32.xlu1 %v9117_v40, %s14056_s8 }
 0x2ca   :  { %978 = vrot.lane.b32.xlu0 %v9091_v35, %s14058_s25  ;;  %778 = vrot.lane.b32.xlu1 %v9065_v27, %s14056_s8 }
 0x2ce   :  { %982 = vrot.lane.b32.xlu0 %v9106_v38, %s14058_s25  ;;  %774 = vrot.lane.b32.xlu1 %v9045_v20, %s14056_s8  ;;  %s14078_s8 = smov 2  }
 0x2d0   :  { %v9182_v42 = vpop.permute.xlu0 %698  ;;  %v9184_v43 = vpop.permute.xlu1 %710 }
 0x2d1   :  { %v719_v36 = vsel %vm718_vm2, %v9184_v43, %v9182_v42  ;;  %v731_v41 = vsel %vm718_vm2, %v9182_v42, %v9184_v43 }
 0x2d2   :  { %974 = vrot.lane.b32.xlu0 %v9063_v26, %s14058_s25  ;;  %980 = vrot.lane.b32.xlu1 %v9085_v34, %s14058_s25 }
 0x2d4   :  { %v9190_v44 = vpop.permute.xlu0 %632  ;;  %v9192_v45 = vpop.permute.xlu1 %644 }
 0x2d6   :  { %970 = vrot.lane.b32.xlu0 %v9043_v19, %s14058_s25  ;;  %984 = vrot.lane.b32.xlu1 %v9117_v40, %s14058_s25 }
 0x2d8   :  { %v9201_v47 = vpop.permute.xlu0 %566  ;;  %v9203_v48 = vpop.permute.xlu1 %578 }
 0x2da   :  { %1141 = vperm.xlu0 %8403, %v1123_v46   ;;  %976 = vrot.lane.b32.xlu1 %v9065_v27, %s14058_s25 }
 0x2dc   :  { %v9210_v50 = vpop.permute.xlu0 %497  ;;  %v9212_v51 = vpop.permute.xlu1 %513 }
 0x2de   :  { %1131 = vperm.xlu0 %8403, %v1121_v49   ;;  %972 = vrot.lane.b32.xlu1 %v9045_v20, %s14058_s25  ;;  %s8501_s25 = smov 34  }
 0x2e0   :  { %v701_v53 = vpop.permute.xlu0 %700  ;;  %v713_v54 = vpop.permute.xlu1 %712 }
 0x2e1   :  { %v720_v29 = vsel %vm718_vm2, %v713_v54, %v701_v53  ;;  %v732_v30 = vsel %vm718_vm2, %v701_v53, %v713_v54 }
 0x2e2   :  { %1136 = vperm.xlu1 %8404, %v1122_v52   ;;  %v751_v46 = vmul.f32 %v745_v18, %v720_v29  ;;  %v750_v49 = vmul.f32 %v741_v15, %v732_v30  ;;  %v675_v52 = vrot.slane %v8292_v37, %v9244_v10 }
 0x2e4   :  { %v9222_v56 = vpop.permute.xlu0 %634  ;;  %v9224_v57 = vpop.permute.xlu1 %646 }
 0x2e6   :  { %1126 = vperm.xlu1 %8404, %v1120_v55   ;;  %v749_v55 = vmul.f32 %v745_v18, %v719_v36 }
 0x2e8   :  { %v9226_v58 = vpop.permute.xlu0 %568  ;;  %v9228_v59 = vpop.permute.xlu1 %580 }
 0x2ec   :  { %v9230_v60 = vpop.permute.xlu0 %499  ;;  %v9232_v61 = vpop.permute.xlu1 %515 }
 0x2f0   :  { %v637_v62 = vpop.permute.xlu0 %636  ;;  %v703_v63 = vpop.permute.xlu1 %702 }
 0x2f4   :  { %v9234_v0 = vpop.permute.xlu0 %570  ;;  %v715_v1 = vpop.permute.xlu1 %714 }
 0x2f5   :  { %v721_v21 = vsel %vm718_vm2, %v715_v1, %v703_v63  ;;  %v733_v24 = vsel %vm718_vm2, %v703_v63, %v715_v1  ;;  %v679_v63 = vrot.slane %v8292_v37, %v9250_v13  ;;  %v748_v1 = vmul.f32 %v741_v15, %v731_v41 }
 0x2f6   :  { %v753_v33 = vmul.f32 %v745_v18, %v721_v21  ;;  %v752_v39 = vmul.f32 %v741_v15, %v733_v24 }
 0x2f8   :  { %v9236_v2 = vpop.permute.xlu0 %501  ;;  %v649_v3 = vpop.permute.xlu1 %648 }
 0x2f9   :  { %v655_v4 = vsel %vm652_vm3, %v649_v3, %v637_v62  ;;  %v667_v43 = vsel %vm652_vm3, %v637_v62, %v649_v3  ;;  %v653_v62 = vsel %vm652_vm3, %v9192_v45, %v9190_v44  ;;  %v8291_v3 = vld [vmem:[%s14229_s0 + $0x1] ss:$8 sm:$0x3] }
 0x2fa   :  { %v609_v24 = vrot.slane %v8291_v3, %v9244_v10  ;;  %v683_v29 = vmul.f32 %v679_v63, %v653_v62  ;;  %v613_v30 = vrot.slane %v8291_v3, %v9250_v13  ;;  %v523_v62 = vsel %vm521_vm5, %v9232_v61, %v9230_v60 }
 0x2fb   :  { %v535_v3 = vsel %vm521_vm5, %v9230_v60, %v9232_v61 }
 0x2fc   :  { %v9238_v5 = vpop.permute.xlu0 %912  ;;  %v9240_v6 = vpop.permute.xlu1 %582 }
 0x2fd   :  { %v589_v36 = vsel %vm586_vm4, %v9240_v6, %v9234_v0  ;;  %v601_v37 = vsel %vm586_vm4, %v9234_v0, %v9240_v6  ;;  %v587_v0 = vsel %vm586_vm4, %v9203_v48, %v9201_v47  ;;  %v538_v6 = vld [vmem:[%s14229_s0] ss:$8 sm:$0x3] }
 0x300   :  { %v717_v8 = vpop.permute.xlu0 %716  ;;  %v9242_v9 = vpop.permute.xlu1 %517 }
 0x304   :  { %v9246_v11 = vpop.permute.xlu0 %908  ;;  %v9248_v12 = vpop.permute.xlu1 %914 }
 0x308   :  { %v639_v16 = vpop.permute.xlu0 %638  ;;  %v705_v17 = vpop.permute.xlu1 %704 }
 0x309   :  { %v722_v22 = vsel %vm718_vm2, %v717_v8, %v705_v17  ;;  %v734_v23 = vsel %vm718_vm2, %v705_v17, %v717_v8  ;;  %v654_v17 = vsel %vm652_vm3, %v9224_v57, %v9222_v56 }
 0x30a   :  { %v754_v25 = vmul.f32 %v741_v15, %v734_v23  ;;  %v755_v28 = vmul.f32 %v745_v18, %v722_v22  ;;  %v666_v15 = vsel %vm652_vm3, %v9222_v56, %v9224_v57  ;;  %v686_v22 = vmul.f32 %v675_v52, %v667_v43 }
 0x30b   :  { %v665_v56 = vsel %vm652_vm3, %v9190_v44, %v9192_v45  ;;  %v685_v57 = vmul.f32 %v679_v63, %v654_v17  ;;  %v684_v23 = vmul.f32 %v675_v52, %v666_v15  ;;  %v547_v43 = vrot.slane %v538_v6, %v9250_v13 }
 0x30c   :  { %v9263_v31 = vpop.permute.xlu0 %904  ;;  %1157 = vmatprep.subr.mxu1 %v755_v28  ;;  %v9265_v32 = vpop.permute.xlu1 %910  ;;  %v536_v17 = vsel %vm521_vm5, %v9236_v2, %v9242_v9 }
 0x30d   :  { %1158 = vmatpush1.msra.mxu1 %v754_v25  ;;  %v553_v60 = vmul.f32 %v547_v43, %v523_v62 }
 0x30e   :  { %1159 = vmatprep.subr.mxu1 %v753_v33  ;;  %v682_v33 = vmul.f32 %v675_v52, %v665_v56 }
 0x30f   :  { %1160 = vmatpush1.msra.mxu1 %v752_v39 }
 0x310   :  { %v573_v53 = vpop.permute.xlu0 %572  ;;  %1161 = vmatprep.subr.mxu1 %v751_v46  ;;  %v651_v54 = vpop.permute.xlu1 %650  ;;  %v588_v46 = vsel %vm586_vm4, %v9228_v59, %v9226_v58 }
 0x311   :  { %v656_v7 = vsel %vm652_vm3, %v651_v54, %v639_v16  ;;  %v668_v42 = vsel %vm652_vm3, %v639_v16, %v651_v54  ;;  %1162 = vmatpush1.msra.mxu1 %v750_v49  ;;  %v687_v16 = vmul.f32 %v679_v63, %v655_v4  ;;  %v600_v49 = vsel %vm586_vm4, %v9226_v58, %v9228_v59 }
 0x312   :  { %v688_v8 = vmul.f32 %v675_v52, %v668_v42  ;;  %1163 = vmatprep.subr.mxu1 %v749_v55  ;;  %v689_v14 = vmul.f32 %v679_v63, %v656_v7  ;;  %v621_v54 = vmul.f32 %v613_v30, %v589_v36  ;;  %v620_v55 = vmul.f32 %v609_v24, %v601_v37 }
 0x313   :  { %1164 = vmatpush1.msra.mxu1 %v748_v1  ;;  %v599_v58 = vsel %vm586_vm4, %v9201_v47, %v9203_v48  ;;  %v619_v59 = vmul.f32 %v613_v30, %v588_v46  ;;  %v618_v63 = vmul.f32 %v609_v24, %v600_v49  ;;  %v543_v1 = vrot.slane %v538_v6, %v9244_v10 }
 0x314   :  { %v9288_v18 = vpop.permute.xlu0 %846  ;;  %1165 = vmatprep.subr.mxu1 %v689_v14  ;;  %v9290_v21 = vpop.permute.xlu1 %906  ;;  %v617_v42 = vmul.f32 %v613_v30, %v587_v0  ;;  %v524_v14 = vsel %vm521_vm5, %v9242_v9, %v9236_v2  ;;  %v522_v2 = vsel %vm521_vm5, %v9212_v51, %v9210_v50  ;;  %v922_v46 = vsel %vm920_vm6, %v9246_v11, %v9265_v32 }
 0x315   :  { %1166 = vmatpush1.msra.mxu1 %v688_v8  ;;  %v616_v8 = vmul.f32 %v609_v24, %v599_v58  ;;  %v554_v9 = vmul.f32 %v543_v1, %v536_v17  ;;  %v552_v61 = vmul.f32 %v543_v1, %v535_v3 }
 0x316   :  { %1167 = vmatprep.subr.mxu1 %v687_v16 }
 0x317   :  { %1168 = vmatpush1.msra.mxu1 %v686_v22 }
 0x318   :  { %v504_v25 = vpop.permute.xlu0 %503  ;;  %1169 = vmatprep.subr.mxu1 %v685_v57  ;;  %v585_v28 = vpop.permute.xlu1 %584  ;;  %v555_v57 = vmul.f32 %v547_v43, %v524_v14 }
 0x319   :  { %v590_v44 = vsel %vm586_vm4, %v585_v28, %v573_v53  ;;  %v602_v45 = vsel %vm586_vm4, %v573_v53, %v585_v28  ;;  %1170 = vmatpush1.msra.mxu1 %v684_v23  ;;  %v8296_v23 = vld [vmem:[%s14229_s0 + $0x7] ss:$8 sm:$0x3] }
 0x31a   :  { %v622_v39 = vmul.f32 %v609_v24, %v602_v45  ;;  %1171 = vmatprep.subr.mxu1 %v683_v29  ;;  %v623_v41 = vmul.f32 %v613_v30, %v590_v44  ;;  %v534_v24 = vsel %vm521_vm5, %v9210_v50, %v9212_v51  ;;  %v551_v30 = vmul.f32 %v547_v43, %v522_v2 }
 0x31b   :  { %1172 = vmatpush1.msra.mxu1 %v682_v33  ;;  %v951_v33 = vrot.slane %v8296_v23, %v9250_v13  ;;  %v550_v36 = vmul.f32 %v543_v1, %v534_v24  ;;  %v939_v44 = vsel %vm920_vm6, %v9248_v12, %v9238_v5  ;;  %v923_v45 = vsel %vm920_vm6, %v9238_v5, %v9248_v12  ;;  %v8295_v12 = vld [vmem:[%s14229_s0 + $0x6] ss:$8 sm:$0x3] }
 0x31c   :  { %v9317_v52 = vpop.permute.xlu0 %842  ;;  %1173 = vmatprep.subr.mxu1 %v623_v41  ;;  %v9319_v53 = vpop.permute.xlu1 %848  ;;  %v938_v41 = vsel %vm920_vm6, %v9265_v32, %v9246_v11  ;;  %v937_v5 = vsel %vm920_vm6, %v9290_v21, %v9263_v31  ;;  %v881_v58 = vrot.slane %v8295_v12, %v9244_v10 }
 0x31d   :  { %1174 = vmatpush1.msra.mxu1 %v622_v39  ;;  %v959_v0 = vmul.f32 %v951_v33, %v939_v44  ;;  %v957_v11 = vmul.f32 %v951_v33, %v938_v41 }
 0x31e   :  { %1175 = vmatprep.subr.mxu1 %v621_v54 }
 0x31f   :  { %1176 = vmatpush1.msra.mxu1 %v620_v55  ;;  %v921_v55 = vsel %vm920_vm6, %v9263_v31, %v9290_v21 }
 0x320   :  { %v917_v4 = vpop.permute.xlu0 %916  ;;  %1177 = vmatprep.subr.mxu1 %v619_v59  ;;  %v520_v7 = vpop.permute.xlu1 %519 }
 0x321   :  { %v525_v47 = vsel %vm521_vm5, %v520_v7, %v504_v25  ;;  %v537_v48 = vsel %vm521_vm5, %v504_v25, %v520_v7  ;;  %1178 = vmatpush1.msra.mxu1 %v618_v63  ;;  %v947_v25 = vrot.slane %v8296_v23, %v9244_v10 }
 0x322   :  { %v556_v15 = vmul.f32 %v543_v1, %v537_v48  ;;  %1179 = vmatprep.subr.mxu1 %v617_v42  ;;  %v557_v16 = vmul.f32 %v547_v43, %v525_v47  ;;  %v955_v1 = vmul.f32 %v951_v33, %v937_v5  ;;  %v873_v42 = vsel %vm854_vm7, %v9319_v53, %v9288_v18 }
 0x323   :  { %1180 = vmatpush1.msra.mxu1 %v616_v8  ;;  %v958_v6 = vmul.f32 %v947_v25, %v923_v45  ;;  %v956_v32 = vmul.f32 %v947_v25, %v922_v46  ;;  %v954_v7 = vmul.f32 %v947_v25, %v921_v55  ;;  %v857_v43 = vsel %vm854_vm7, %v9288_v18, %v9319_v53  ;;  %v8294_v18 = vld [vmem:[%s14229_s0 + $0x5] ss:$8 sm:$0x3] }
 0x324   :  { %v9346_v22 = vpop.permute.xlu0 %838  ;;  %1181 = vmatprep.subr.mxu1 %v557_v16  ;;  %v845_v56 = vpop.permute.xlu1 %844  ;;  %v892_v62 = vmul.f32 %v881_v58, %v857_v43  ;;  %v819_v24 = vrot.slane %v8294_v18, %v9250_v13 }
 0x325   :  { %1182 = vmatpush1.msra.mxu1 %v556_v15  ;;  %v872_v47 = vsel %vm854_vm7, %v845_v56, %v9317_v52  ;;  %v856_v48 = vsel %vm854_vm7, %v9317_v52, %v845_v56  ;;  %v815_v56 = vrot.slane %v8294_v18, %v9244_v10 }
 0x326   :  { %1183 = vmatprep.subr.mxu1 %v555_v57  ;;  %v890_v52 = vmul.f32 %v881_v58, %v856_v48 }
 0x327   :  { %1184 = vmatpush1.msra.mxu1 %v554_v9 }
 0x328   :  { %v851_v28 = vpop.permute.xlu0 %850  ;;  %1185 = vmatprep.subr.mxu1 %v553_v60  ;;  %v919_v29 = vpop.permute.xlu1 %918 }
 0x329   :  { %v924_v50 = vsel %vm920_vm6, %v917_v4, %v919_v29  ;;  %v940_v51 = vsel %vm920_vm6, %v919_v29, %v917_v4  ;;  %1186 = vmatpush1.msra.mxu1 %v552_v61  ;;  %v885_v4 = vrot.slane %v8295_v12, %v9250_v13  ;;  %v8297_v12 = vld [vmem:[%s14229_s0 + $0x10] ss:$8 sm:$0x3] }
 0x32a   :  { %v960_v37 = vmul.f32 %v947_v25, %v924_v50  ;;  %1187 = vmatprep.subr.mxu1 %v551_v30  ;;  %v961_v39 = vmul.f32 %v951_v33, %v940_v51 }
 0x32b   :  { %1188 = vmatpush1.msra.mxu1 %v550_v36  ;;  %v893_v16 = vmul.f32 %v885_v4, %v873_v42  ;;  %v891_v57 = vmul.f32 %v885_v4, %v872_v47 }
 0x32c   :  { %v781_v49 = vpop.permute.xlu0 %780  ;;  %1189 = vmatprep.subr.mxu1 %v961_v39  ;;  %v841_v54 = vpop.permute.xlu1 %840 }
 0x32d   :  { %1190 = vmatpush2.msra.mxu1 %v960_v37  ;;  %v871_v3 = vsel %vm854_vm7, %v841_v54, %v9346_v22  ;;  %v855_v53 = vsel %vm854_vm7, %v9346_v22, %v841_v54 }
 0x32e   :  { %1191 = vmatprep.subr.mxu1 %v959_v0  ;;  %v889_v23 = vmul.f32 %v885_v4, %v871_v3  ;;  %v888_v60 = vmul.f32 %v881_v58, %v855_v53  ;;  %v1043_v3 = vld [vmem:[%s14227_s27 + $0x38] sm:$0xff] }
 0x32f   :  { %1192 = vmatpush2.msra.mxu1 %v958_v6 }
 0x330   :  { %v785_v59 = vpop.permute.xlu0 %784  ;;  %1193 = vmatprep.subr.mxu1 %v957_v11  ;;  %v853_v63 = vpop.permute.xlu1 %852 }
 0x331   :  { %v858_v31 = vsel %vm854_vm7, %v851_v28, %v853_v63  ;;  %v874_v21 = vsel %vm854_vm7, %v853_v63, %v851_v28  ;;  %1194 = vmatpush2.msra.mxu1 %v956_v32  ;;  %v1013_v63 = vrot.slane %v8297_v12, %v9244_v10 }
 0x332   :  { %v894_v8 = vmul.f32 %v881_v58, %v858_v31  ;;  %1195 = vmatprep.subr.mxu1 %v955_v1  ;;  %v895_v14 = vmul.f32 %v885_v4, %v874_v21  ;;  %v1036_v4 = vld [vmem:[%s14227_s27] sm:$0xff] }
 0x333   :  { %1196 = vmatpush2.msra.mxu1 %v954_v7  ;;  %v1040_v21 = vld [vmem:[%s14227_s27 + $0x20] sm:$0xff] }
 0x334   :  { %v777_v17 = vpop.permute.xlu0 %776  ;;  %1197 = vmatprep.subr.mxu1 %v895_v14  ;;  %v783_v15 = vpop.permute.xlu1 %782 }
 0x335   :  { %1198 = vmatpush2.msra.mxu1 %v894_v8  ;;  %v807_v61 = vsel %vm788_vm8, %v783_v15, %v781_v49  ;;  %v791_v28 = vsel %vm788_vm8, %v781_v49, %v783_v15 }
 0x336   :  { %1199 = vmatprep.subr.mxu1 %v893_v16  ;;  %v827_v36 = vmul.f32 %v819_v24, %v807_v61  ;;  %v826_v44 = vmul.f32 %v815_v56, %v791_v28  ;;  %v1041_v61 = vld [vmem:[%s14227_s27 + $0x28] sm:$0xff] }
 0x337   :  { %1200 = vmatpush2.msra.mxu1 %v892_v62 }
 0x338   :  { %v773_v2 = vpop.permute.xlu0 %772  ;;  %1201 = vmatprep.subr.mxu1 %v891_v57  ;;  %v787_v9 = vpop.permute.xlu1 %786 }
 0x339   :  { %v792_v25 = vsel %vm788_vm8, %v785_v59, %v787_v9  ;;  %v808_v22 = vsel %vm788_vm8, %v787_v9, %v785_v59  ;;  %1202 = vmatpush2.msra.mxu1 %v890_v52  ;;  %v1017_v59 = vrot.slane %v8297_v12, %v9250_v13  ;;  %v1046_v9 = vld [vmem:[%s14227_s27 + $0x50] sm:$0xff] }
 0x33a   :  { %v828_v29 = vmul.f32 %v815_v56, %v792_v25  ;;  %1203 = vmatprep.subr.mxu1 %v889_v23  ;;  %v829_v30 = vmul.f32 %v819_v24, %v808_v22  ;;  %v1045_v23 = vld [vmem:[%s14227_s27 + $0x48] sm:$0xff]  ;;  %v1044_v25 = vld [vmem:[%s14227_s27 + $0x40] sm:$0xff]  ;;  %v1047_v22 = vld [vmem:[%s14227_s27 + $0x58] sm:$0xff] }
 0x33b   :  { %1204 = vmatpush2.msra.mxu1 %v888_v60  ;;  %v1038_v60 = vld [vmem:[%s14227_s27 + $0x10] sm:$0xff] }
 0x33c   :  { %1205 = vmatprep.subr.mxu1 %v829_v30  ;;  %v779_v33 = vpop.permute.xlu1 %778  ;;  %v979_v45 = vpop.permute.xlu0 %978 }
 0x33d   :  { %v790_v50 = vsel %vm788_vm8, %v777_v17, %v779_v33  ;;  %v806_v51 = vsel %vm788_vm8, %v779_v33, %v777_v17  ;;  %1206 = vmatpush2.msra.mxu1 %v828_v29  ;;  %v1039_v17 = vld [vmem:[%s14227_s27 + $0x18] sm:$0xff] }
 0x33e   :  { %v824_v37 = vmul.f32 %v815_v56, %v790_v50  ;;  %1207 = vmatprep.subr.mxu1 %v827_v36  ;;  %v825_v39 = vmul.f32 %v819_v24, %v806_v51 }
 0x33f   :  { %1208 = vmatpush2.msra.mxu1 %v826_v44 }
 0x340   :  { %1209 = vmatprep.subr.mxu1 %v825_v39  ;;  %v775_v41 = vpop.permute.xlu1 %774  ;;  %v983_v6 = vpop.permute.xlu0 %982 }
 0x341   :  { %v789_v46 = vsel %vm788_vm8, %v773_v2, %v775_v41  ;;  %v805_v49 = vsel %vm788_vm8, %v775_v41, %v773_v2  ;;  %1210 = vmatpush2.msra.mxu1 %v824_v37  ;;  %v1042_v2 = vld [vmem:[%s14227_s27 + $0x30] sm:$0xff]  ;;  %s14230_s27 = smov 113  }
 0x342   :  { %v822_v54 = vmul.f32 %v815_v56, %v789_v46  ;;  %v823_v0 = vmul.f32 %v819_v24, %v805_v49  ;;  %v14062_v24 = vmov 0.0  }
 0x344   :  { %1211 = vmatprep.subr.mxu1 %v823_v0  ;;  %v981_v5 = vpop.permute.xlu1 %980  ;;  %v975_v32 = vpop.permute.xlu0 %974 }
 0x345   :  { %1212 = vmatpush2.msra.mxu1 %v822_v54  ;;  %v1005_v1 = vsel %vm14132_vm9, %v981_v5, %v979_v45  ;;  %v989_v7 = vsel %vm14132_vm9, %v979_v45, %v981_v5 }
 0x346   :  { %1213 = vmatprep.subr.mxu1 %v9117_v40  ;;  %v1025_v47 = vmul.f32 %v1017_v59, %v1005_v1  ;;  %v1024_v48 = vmul.f32 %v1013_v63, %v989_v7 }
 0x347   :  { %1214 = vmatpush2.msra.mxu1 %v9106_v38 }
 0x348   :  { %1215 = vmatprep.subr.mxu1 %v9085_v34  ;;  %v985_v55 = vpop.permute.xlu1 %984  ;;  %v971_v15 = vpop.permute.xlu0 %970 }
 0x349   :  { %v1006_v11 = vsel %vm14132_vm9, %v985_v55, %v983_v6  ;;  %1216 = vmatpush2.msra.mxu1 %v9091_v35  ;;  %v990_v58 = vsel %vm14132_vm9, %v983_v6, %v985_v55 }
 0x34a   :  { %1217 = vmatprep.subr.mxu1 %v9065_v27  ;;  %v1027_v31 = vmul.f32 %v1017_v59, %v1006_v11  ;;  %v1026_v43 = vmul.f32 %v1013_v63, %v990_v58 }
 0x34b   :  { %1218 = vmatpush2.msra.mxu1 %v9063_v26 }
 0x34c   :  { %1219 = vmatprep.subr.mxu1 %v9045_v20  ;;  %v977_v42 = vpop.permute.xlu1 %976 }
 0x34d   :  { %v1004_v8 = vsel %vm14132_vm9, %v977_v42, %v975_v32  ;;  %1220 = vmatpush2.msra.mxu1 %v9043_v19  ;;  %v988_v14 = vsel %vm14132_vm9, %v975_v32, %v977_v42 }
 0x34e   :  { %1222 = vmatmul.mubr.f32.vlgmr.msra.gmra.mxu1 %v1036_v4  ;;  %1270 = vmatprep.subr.mxu1 %v1027_v31  ;;  %v1023_v62 = vmul.f32 %v1017_v59, %v1004_v8  ;;  %v1022_v18 = vmul.f32 %v1013_v63, %v988_v14 }
 0x34f   :  { %1271 = vmatpush1.msra.mxu1 %v1026_v43  ;;  %1227 = vmatprep.mubr.f32.mxu1 %v1040_v21 }
 0x350   :  { %1272 = vmatprep.subr.mxu1 %v1025_v47  ;;  %v973_v16 = vpop.permute.xlu1 %972 }
 0x351   :  { %v987_v53 = vsel %vm14132_vm9, %v971_v15, %v973_v16  ;;  %v1003_v57 = vsel %vm14132_vm9, %v973_v16, %v971_v15  ;;  %1273 = vmatpush1.msra.mxu1 %v1024_v48 }
 0x352   :  { %v1020_v52 = vmul.f32 %v1013_v63, %v987_v53  ;;  %1228 = vmatmul.mubr.f32.gmra.mxu1 %v1039_v17  ;;  %1274 = vmatprep.subr.mxu1 %v1023_v62  ;;  %v1021_v56 = vmul.f32 %v1017_v59, %v1003_v57 }
 0x353   :  { %1275 = vmatpush1.msra.mxu1 %v1022_v18  ;;  %1233 = vmatprep.mubr.f32.mxu1 %v1043_v3 }
 0x354   :  { %1276 = vmatprep.subr.mxu1 %v1021_v56 }
 0x355   :  { %1277 = vmatpush1.msra.mxu1 %v1020_v52  ;;  %v1142_v46 = vpop.permute.xlu0 %1141 }
 0x356   :  { %1234 = vmatmul.mubr.f32.gmra.mxu1 %v1042_v2 }
 0x357   :  { %1239 = vmatprep.mubr.f32.mxu1 %v1046_v9 }
 0x359   :  { %v1132_v63 = vpop.permute.xlu0 %1131 }
 0x35a   :  { %1240 = vmatmul.mubr.f32.gmra.mxu1 %v1045_v23 }
 0x35b   :  { %1310 = vmatprep.mubr.f32.mxu1 %v14062_v24 }
 0x35d   :  { %v1137_v49 = vpop.permute.xlu1 %1136 }
 0x35e   :  { %8298 = vmatmul.mubr.msk.f32.vlgmr.msra.gmra.mxu1 %vm1144_vm10, %v1038_v60 }
 0x35f   :  { %1316 = vmatprep.mubr.f32.mxu1 %v14062_v24 }
 0x361   :  { %v1127_v8 = vpop.permute.xlu1 %1126 }
 0x362   :  { %8299 = vmatmul.mubr.msk.f32.gmra.mxu1 %vm1144_vm10, %v1041_v61 }
 0x363   :  { %1322 = vmatprep.mubr.f32.mxu1 %v14062_v24 }
 0x366   :  { %8300 = vmatmul.mubr.msk.f32.gmra.mxu1 %vm1144_vm10, %v1044_v25 }
 0x367   :  { %1328 = vmatprep.mubr.f32.mxu1 %v14062_v24 }
 0x36a   :  { %8301 = vmatmul.mubr.msk.f32.gmra.mxu1 %vm1144_vm10, %v1047_v22 }
 0x36b   :  { %2208 = vmatprep.mubr.f32.mxu1 %v14062_v24 }
 0x40e   :  { %v1223_v28 = vpop.f32.mrf.mxu1 }
 0x40f   :  { %v1224_v48 = vadd.f32 %v1223_v28, %v1127_v8 }
 0x410   :  { %v1225_v29 = vpop.f32.mrf.mxu1 }
 0x411   :  { %v1226_v14 = vadd.f32 %v1225_v29, %v1127_v8 }
 0x412   :  { %v1229_v30 = vpop.f32.mrf.mxu1 }
 0x413   :  { %v1230_v31 = vadd.f32 %v1229_v30, %v1132_v63 }
 0x414   :  { %v1231_v33 = vpop.f32.mrf.mxu1 }
 0x415   :  { %v1232_v4 = vadd.f32 %v1231_v33, %v1132_v63 }
 0x416   :  { %v1235_v36 = vpop.f32.mrf.mxu1 }
 0x417   :  { %v1236_v0 = vadd.f32 %v1235_v36, %v1137_v49 }
 0x418   :  { %v1237_v44 = vpop.f32.mrf.mxu1 }
 0x419   :  { %v1238_v6 = vadd.f32 %v1237_v44, %v1137_v49 }
 0x41a   :  { %v1241_v50 = vpop.f32.mrf.mxu1 }
 0x41b   :  { %v1242_v32 = vadd.f32 %v1241_v50, %v1142_v46 }
 0x41c   :  { %v1243_v51 = vpop.f32.mrf.mxu1 }
 0x41d   :  { %v1244_v58 = vadd.f32 %v1243_v51, %v1142_v46 }
 0x41e   :  { %v1312_v45 = vpop.f32.mrf.mxu1 }
 0x41f   :  { %v1313_v16 = vadd.f32 %v1312_v45, %v1224_v48 }
 0x420   :  { %v1314_v37 = vpop.f32.mrf.mxu1 }
 0x421   :  { %v1315_v17 = vadd.f32 %v1314_v37, %v1226_v14 }
 0x422   :  { %v1318_v39 = vpop.f32.mrf.mxu1 }
 0x423   :  { %v1319_v47 = vadd.f32 %v1318_v39, %v1230_v31  ;;  %v1335_v62 = vadd.f32 %v1315_v17, %v1313_v16 }
 0x424   :  { %v1320_v41 = vpop.f32.mrf.mxu1 }
 0x425   :  { %v1321_v21 = vadd.f32 %v1320_v41, %v1232_v4 }
 0x426   :  { %v1324_v54 = vpop.f32.mrf.mxu1 }
 0x427   :  { %v1325_v12 = vadd.f32 %v1324_v54, %v1236_v0  ;;  %v1338_v15 = vadd.f32 %v1321_v21, %v1319_v47 }
 0x428   :  { %v1326_v5 = vpop.f32.mrf.mxu1 }
 0x429   :  { %v1327_v55 = vadd.f32 %v1326_v5, %v1238_v6 }
 0x42a   :  { %v1330_v11 = vpop.f32.mrf.mxu1 }
 0x42b   :  { %v1341_v59 = vadd.f32 %v1327_v55, %v1325_v12  ;;  %v1331_v7 = vadd.f32 %v1330_v11, %v1242_v32 }
 0x42c   :  { %v1332_v1 = vpop.f32.mrf.mxu1 }
 0x42d   :  { %v1333_v42 = vadd.f32 %v1332_v1, %v1244_v58  ;;  %1342 = vadd.xlane.f32.xlu1 %v1341_v59 }
 0x42f   :  { %v1344_v43 = vadd.f32 %v1333_v42, %v1331_v7 }
 0x431   :  { %1345 = vadd.xlane.f32.xlu0 %v1344_v43 }
 0x435   :  { %1339 = vadd.xlane.f32.xlu0 %v1338_v15 }
 0x439   :  { %1336 = vadd.xlane.f32.xlu0 %v1335_v62 }
 0x4b6   :  { %v1343_v3 = vpop.xlane.xlu1 %1342 }
 0x4b7   :  { %v1349_v18 = vmul.f32 0.00390625, %v1343_v3 }
 0x4b9   :  { %v9476_v53 = vsub.f32 %v1325_v12, %v1349_v18  ;;  %v9478_v57 = vsub.f32 %v1327_v55, %v1349_v18 }
 0x4ba   :  { %v1346_v52 = vpop.xlane.xlu0 %1345 }
 0x4bb   :  { %v1363_v56 = vmul.f32 %v9476_v53, %v9476_v53  ;;  %v1364_v2 = vmul.f32 %v9478_v57, %v9478_v57  ;;  %v1350_v9 = vmul.f32 0.00390625, %v1346_v52 }
 0x4bd   :  { %v1373_v23 = vadd.f32 %v1364_v2, %v1363_v56  ;;  %v9484_v25 = vsub.f32 %v1331_v7, %v1350_v9  ;;  %v9486_v22 = vsub.f32 %v1333_v42, %v1350_v9 }
 0x4be   :  { %v1340_v60 = vpop.xlane.xlu0 %1339 }
 0x4bf   :  { %v1348_v61 = vmul.f32 0.00390625, %v1340_v60  ;;  %1374 = vadd.xlane.f32.xlu0 %v1373_v23  ;;  %v1365_v50 = vmul.f32 %v9484_v25, %v9484_v25  ;;  %v1366_v39 = vmul.f32 %v9486_v22, %v9486_v22  ;;  %v1936_v60 = vld [vmem:[%s14233_s26 + $0x8] sm:$0xff] }
 0x4c0   :  { %2119 = vmatprep.mubr.f32.mxu0 %v1936_v60 }
 0x4c1   :  { %v1353_v28 = vsub.f32 %v1319_v47, %v1348_v61  ;;  %v1354_v29 = vsub.f32 %v1321_v21, %v1348_v61  ;;  %v1376_v49 = vadd.f32 %v1366_v39, %v1365_v50 }
 0x4c2   :  { %v1337_v30 = vpop.xlane.xlu0 %1336 }
 0x4c3   :  { %v1347_v33 = vmul.f32 0.00390625, %v1337_v30  ;;  %v1361_v36 = vmul.f32 %v1353_v28, %v1353_v28  ;;  %v1362_v44 = vmul.f32 %v1354_v29, %v1354_v29  ;;  %v2020_v30 = vld [vmem:[%s14033_s9 + $0x8] sm:$0xff] }
 0x4c5   :  { %v1351_v51 = vsub.f32 %v1313_v16, %v1347_v33  ;;  %v1352_v45 = vsub.f32 %v1315_v17, %v1347_v33  ;;  %v1370_v37 = vadd.f32 %v1362_v44, %v1361_v36  ;;  %v2021_v44 = vld [vmem:[%s14033_s9 + $0x10] sm:$0xff] }
 0x4c7   :  { %1371 = vadd.xlane.f32.xlu1 %v1370_v37  ;;  %v1359_v41 = vmul.f32 %v1351_v51, %v1351_v51  ;;  %v1360_v46 = vmul.f32 %v1352_v45, %v1352_v45 }
 0x4c9   :  { %v1367_v54 = vadd.f32 %v1360_v46, %v1359_v41 }
 0x4cb   :  { %1377 = vadd.xlane.f32.xlu1 %v1376_v49  ;;  %1368 = vadd.xlane.f32.xlu0 %v1367_v54 }
 0x548   :  { %v1375_v0 = vpop.xlane.xlu0 %1374 }
 0x549   :  { %v1381_v7 = vmul.f32 0.00390625, %v1375_v0 }
 0x54b   :  { %v1385_v31 = vadd.f32 1e-05, %v1381_v7 }
 0x550   :  { %v1372_v55 = vpop.xlane.xlu1 %1371 }
 0x551   :  { %v1380_v11 = vmul.f32 0.00390625, %v1372_v55 }
 0x553   :  { %v1384_v32 = vadd.f32 1e-05, %v1380_v11 }
 0x554   :  { %v1369_v6 = vpop.xlane.xlu0 %1368  ;;  %v1378_v47 = vpop.xlane.xlu1 %1377 }
 0x555   :  { %v1379_v5 = vmul.f32 0.00390625, %v1369_v6  ;;  %v1382_v48 = vmul.f32 0.00390625, %v1378_v47 }
 0x557   :  { %v1383_v12 = vadd.f32 1e-05, %v1379_v5  ;;  %v1386_v17 = vadd.f32 1e-05, %v1382_v48 }
 0x558   :  { %v8304_v48 = vld [vmem:[%s14229_s0 + $0x3] ss:$8 sm:$0x3] }
 0x559   :  { %8413 = vrsqrt.f32 %v1383_v12 }
 0x55a   :  { %8415 = vrsqrt.f32 %v1384_v32 }
 0x55b   :  { %8417 = vrsqrt.f32 %v1385_v31 }
 0x55c   :  { %8419 = vrsqrt.f32 %v1386_v17  ;;  %v1648_v17 = vrot.slane %v8304_v48, %v9244_v10 }
 0x566   :  { %v8414_v58 = vpop.eup %8413 }
 0x567   :  { %v1391_v59 = vmul.f32 %v8414_v58, %v1351_v51  ;;  %v1392_v63 = vmul.f32 %v8414_v58, %v1352_v45  ;;  %v8416_v42 = vpop.eup %8415  ;;  %v2019_v45 = vld [vmem:[%s14033_s9] sm:$0xff] }
 0x568   :  { %v1393_v21 = vmul.f32 %v8416_v42, %v1353_v28  ;;  %v1394_v43 = vmul.f32 %v8416_v42, %v1354_v29  ;;  %v8418_v15 = vpop.eup %8417 }
 0x569   :  { %v9492_v1 = vmax.f32 %v1391_v59, 0.0  ;;  %v9494_v4 = vmax.f32 %v1392_v63, 0.0  ;;  %v1396_v16 = vmul.f32 %v8418_v15, %v9478_v57  ;;  %v1395_v62 = vmul.f32 %v8418_v15, %v9476_v53  ;;  %v8420_v57 = vpop.eup %8419 }
 0x56a   :  { %v9516_v8 = vmax.f32 %v1393_v21, 0.0  ;;  %v9518_v14 = vmax.f32 %v1394_v43, 0.0  ;;  %v1397_v53 = vmul.f32 %v8420_v57, %v9484_v25  ;;  %v1398_v56 = vmul.f32 %v8420_v57, %v9486_v22  ;;  %v2022_v22 = vld [vmem:[%s14033_s9 + $0x18] sm:$0xff]  ;;  %s8504_s9 = smov 98  }
 0x56b   :  { %1607 = vrot.lane.b32.xlu0 %v9494_v4, %s14068_s23  ;;  %1619 = vrot.lane.b32.xlu1 %v9492_v1, %s14068_s23  ;;  %v9542_v3 = vmax.f32 %v1396_v16, 0.0  ;;  %v9548_v18 = vmax.f32 %v1395_v62, 0.0  ;;  %v1652_v62 = vrot.slane %v8304_v48, %v9250_v13 }
 0x56c   :  { %v9563_v52 = vmax.f32 %v1397_v53, 0.0  ;;  %v9574_v2 = vmax.f32 %v1398_v56, 0.0 }
 0x56f   :  { %1543 = vrot.lane.b32.xlu0 %v9494_v4, %s14076_s6  ;;  %1555 = vrot.lane.b32.xlu1 %v9492_v1, %s14076_s6 }
 0x573   :  { %1479 = vrot.lane.b32.xlu0 %v9494_v4, %s14074_s1  ;;  %1491 = vrot.lane.b32.xlu1 %v9492_v1, %s14074_s1 }
 0x577   :  { %1411 = vrot.lane.b32.xlu0 %v9494_v4, %s14072_s29  ;;  %1427 = vrot.lane.b32.xlu1 %v9492_v1, %s14072_s29 }
 0x57b   :  { %1807 = vrot.lane.b32.xlu0 %v9492_v1, %s14070_s4  ;;  %1809 = vrot.lane.b32.xlu1 %v9494_v4, %s14070_s4 }
 0x57f   :  { %1609 = vrot.lane.b32.xlu0 %v9518_v14, %s14068_s23  ;;  %1621 = vrot.lane.b32.xlu1 %v9516_v8, %s14068_s23 }
 0x583   :  { %1545 = vrot.lane.b32.xlu0 %v9518_v14, %s14076_s6  ;;  %1557 = vrot.lane.b32.xlu1 %v9516_v8, %s14076_s6 }
 0x587   :  { %1481 = vrot.lane.b32.xlu0 %v9518_v14, %s14074_s1  ;;  %1493 = vrot.lane.b32.xlu1 %v9516_v8, %s14074_s1 }
 0x58b   :  { %1413 = vrot.lane.b32.xlu0 %v9518_v14, %s14072_s29  ;;  %1429 = vrot.lane.b32.xlu1 %v9516_v8, %s14072_s29 }
 0x58f   :  { %1811 = vrot.lane.b32.xlu0 %v9516_v8, %s14070_s4  ;;  %1813 = vrot.lane.b32.xlu1 %v9518_v14, %s14070_s4 }
 0x593   :  { %1547 = vrot.lane.b32.xlu0 %v9542_v3, %s14076_s6  ;;  %1611 = vrot.lane.b32.xlu1 %v9542_v3, %s14068_s23 }
 0x597   :  { %1483 = vrot.lane.b32.xlu0 %v9542_v3, %s14074_s1  ;;  %1623 = vrot.lane.b32.xlu1 %v9548_v18, %s14068_s23 }
 0x59b   :  { %1415 = vrot.lane.b32.xlu0 %v9542_v3, %s14072_s29  ;;  %1559 = vrot.lane.b32.xlu1 %v9548_v18, %s14076_s6 }
 0x59f   :  { %1815 = vrot.lane.b32.xlu0 %v9548_v18, %s14070_s4  ;;  %1495 = vrot.lane.b32.xlu1 %v9548_v18, %s14074_s1 }
 0x5a3   :  { %1431 = vrot.lane.b32.xlu1 %v9548_v18, %s14072_s29  ;;  %1625 = vrot.lane.b32.xlu0 %v9563_v52, %s14068_s23 }
 0x5a7   :  { %1817 = vrot.lane.b32.xlu1 %v9542_v3, %s14070_s4  ;;  %1751 = vrot.lane.b32.xlu0 %v9548_v18, %s14230_s27 }
 0x5ab   :  { %1613 = vrot.lane.b32.xlu1 %v9574_v2, %s14068_s23  ;;  %1549 = vrot.lane.b32.xlu0 %v9574_v2, %s14076_s6  ;;  %s8502_s23 = smov 96  }
 0x5af   :  { %1753 = vrot.lane.b32.xlu1 %v9542_v3, %s14230_s27  ;;  %1747 = vrot.lane.b32.xlu0 %v9516_v8, %s14230_s27 }
 0x5b3   :  { %1561 = vrot.lane.b32.xlu1 %v9563_v52, %s14076_s6  ;;  %1485 = vrot.lane.b32.xlu0 %v9574_v2, %s14074_s1  ;;  %s8510_s6 = smov 124  }
 0x5b7   :  { %1749 = vrot.lane.b32.xlu1 %v9518_v14, %s14230_s27  ;;  %1743 = vrot.lane.b32.xlu0 %v9492_v1, %s14230_s27 }
 0x5bb   :  { %1497 = vrot.lane.b32.xlu1 %v9563_v52, %s14074_s1  ;;  %1417 = vrot.lane.b32.xlu0 %v9574_v2, %s14072_s29  ;;  %s8511_s1 = smov 4  }
 0x5bf   :  { %1745 = vrot.lane.b32.xlu1 %v9494_v4, %s14230_s27  ;;  %1687 = vrot.lane.b32.xlu0 %v9548_v18, %s14231_s28 }
 0x5c3   :  { %1433 = vrot.lane.b32.xlu1 %v9563_v52, %s14072_s29  ;;  %1819 = vrot.lane.b32.xlu0 %v9563_v52, %s14070_s4  ;;  %s8500_s29 = smov 32  }
 0x5c7   :  { %1689 = vrot.lane.b32.xlu1 %v9542_v3, %s14231_s28  ;;  %1683 = vrot.lane.b32.xlu0 %v9516_v8, %s14231_s28 }
 0x5cb   :  { %1821 = vrot.lane.b32.xlu1 %v9574_v2, %s14070_s4  ;;  %1755 = vrot.lane.b32.xlu0 %v9563_v52, %s14230_s27  ;;  %s8503_s4 = smov 126  }
 0x5cf   :  { %1685 = vrot.lane.b32.xlu1 %v9518_v14, %s14231_s28  ;;  %1679 = vrot.lane.b32.xlu0 %v9492_v1, %s14231_s28 }
 0x5d3   :  { %1757 = vrot.lane.b32.xlu1 %v9574_v2, %s14230_s27  ;;  %1691 = vrot.lane.b32.xlu0 %v9563_v52, %s14231_s28 }
 0x5d7   :  { %1681 = vrot.lane.b32.xlu1 %v9494_v4, %s14231_s28  ;;  %1879 = vrot.lane.b32.xlu0 %v9548_v18, %s14232_s30 }
 0x5db   :  { %1693 = vrot.lane.b32.xlu1 %v9574_v2, %s14231_s28  ;;  %1883 = vrot.lane.b32.xlu0 %v9563_v52, %s14232_s30 }
 0x5dd   :  { %v9628_v9 = vpop.permute.xlu0 %1607  ;;  %v9630_v23 = vpop.permute.xlu1 %1619 }
 0x5de   :  { %v1627_v20 = vsel %vm718_vm2, %v9630_v23, %v9628_v9 }
 0x5df   :  { %1881 = vrot.lane.b32.xlu1 %v9542_v3, %s14232_s30  ;;  %1875 = vrot.lane.b32.xlu0 %v9516_v8, %s14232_s30 }
 0x5e1   :  { %v9639_v61 = vpop.permute.xlu0 %1543  ;;  %v9641_v25 = vpop.permute.xlu1 %1555 }
 0x5e3   :  { %1885 = vrot.lane.b32.xlu1 %v9574_v2, %s14232_s30  ;;  %1871 = vrot.lane.b32.xlu0 %v9492_v1, %s14232_s30 }
 0x5e5   :  { %v9650_v28 = vpop.permute.xlu0 %1479  ;;  %v9652_v29 = vpop.permute.xlu1 %1491 }
 0x5e7   :  { %1877 = vrot.lane.b32.xlu1 %v9518_v14, %s14232_s30  ;;  %2040 = vperm.xlu0 %8403, %v2022_v22  }
 0x5e9   :  { %v9659_v33 = vpop.permute.xlu0 %1411  ;;  %v9661_v36 = vpop.permute.xlu1 %1427 }
 0x5eb   :  { %1873 = vrot.lane.b32.xlu1 %v9494_v4, %s14232_s30  ;;  %2030 = vperm.xlu0 %8403, %v2020_v30  }
 0x5ed   :  { %v9668_v50 = vpop.permute.xlu0 %1807  ;;  %v9670_v51 = vpop.permute.xlu1 %1809 }
 0x5ef   :  { %2035 = vperm.xlu1 %8404, %v2021_v44  }
 0x5f1   :  { %v1610_v37 = vpop.permute.xlu0 %1609  ;;  %v1622_v39 = vpop.permute.xlu1 %1621 }
 0x5f2   :  { %v1628_v44 = vsel %vm718_vm2, %v1622_v39, %v1610_v37 }
 0x5f3   :  { %2025 = vperm.xlu1 %8404, %v2019_v45   ;;  %v1640_v45 = vsel %vm718_vm2, %v1610_v37, %v1622_v39  ;;  %v1639_v37 = vsel %vm718_vm2, %v9628_v9, %v9630_v23  ;;  %v1658_v39 = vmul.f32 %v1652_v62, %v1628_v44 }
 0x5f4   :  { %v1655_v26 = vmul.f32 %v1648_v17, %v1639_v37 }
 0x5f5   :  { %v9675_v41 = vpop.permute.xlu0 %1545  ;;  %v9677_v46 = vpop.permute.xlu1 %1557 }
 0x5f9   :  { %v9679_v49 = vpop.permute.xlu0 %1481  ;;  %v9681_v54 = vpop.permute.xlu1 %1493 }
 0x5fd   :  { %v9683_v0 = vpop.permute.xlu0 %1413  ;;  %v9685_v6 = vpop.permute.xlu1 %1429 }
 0x601   :  { %v9687_v5 = vpop.permute.xlu0 %1811  ;;  %v9689_v12 = vpop.permute.xlu1 %1813 }
 0x605   :  { %v1548_v55 = vpop.permute.xlu0 %1547  ;;  %v1612_v11 = vpop.permute.xlu1 %1611 }
 0x609   :  { %v9691_v32 = vpop.permute.xlu0 %1483  ;;  %v1624_v58 = vpop.permute.xlu1 %1623 }
 0x60a   :  { %v1629_v57 = vsel %vm718_vm2, %v1624_v58, %v1612_v11  ;;  %v1641_v60 = vsel %vm718_vm2, %v1612_v11, %v1624_v58  ;;  %v8303_v11 = vld [vmem:[%s14229_s0 + $0x2] ss:$8 sm:$0x3] }
 0x60b   :  { %v1660_v48 = vmul.f32 %v1652_v62, %v1629_v57  ;;  %v1659_v58 = vmul.f32 %v1648_v17, %v1641_v60 }
 0x60d   :  { %v9693_v59 = vpop.permute.xlu0 %1415  ;;  %v1560_v63 = vpop.permute.xlu1 %1559 }
 0x60e   :  { %v1565_v60 = vsel %vm652_vm3, %v1560_v63, %v1548_v55  ;;  %v1577_v9 = vsel %vm652_vm3, %v1548_v55, %v1560_v63  ;;  %v8302_v55 = vld [vmem:[%s14229_s0 + $0x1] ss:$8 sm:$0x3] }
 0x611   :  { %v9695_v7 = vpop.permute.xlu0 %1815  ;;  %v9697_v42 = vpop.permute.xlu1 %1495 }
 0x615   :  { %v1626_v31 = vpop.permute.xlu0 %1625  ;;  %v9699_v21 = vpop.permute.xlu1 %1431 }
 0x619   :  { %v9701_v43 = vpop.permute.xlu0 %1751  ;;  %v9703_v47 = vpop.permute.xlu1 %1817 }
 0x61d   :  { %v1550_v15 = vpop.permute.xlu0 %1549  ;;  %v1614_v16 = vpop.permute.xlu1 %1613 }
 0x61e   :  { %v1630_v53 = vsel %vm718_vm2, %v1626_v31, %v1614_v16  ;;  %v1642_v56 = vsel %vm718_vm2, %v1614_v16, %v1626_v31  ;;  %v1657_v31 = vmul.f32 %v1648_v17, %v1640_v45  ;;  %v1584_v16 = vrot.slane %v8303_v11, %v9244_v10 }
 0x61f   :  { %v1661_v22 = vmul.f32 %v1648_v17, %v1642_v56  ;;  %v1662_v30 = vmul.f32 %v1652_v62, %v1630_v53  ;;  %v1656_v56 = vmul.f32 %v1652_v62, %v1627_v20  ;;  %v1564_v45 = vsel %vm652_vm3, %v9677_v46, %v9675_v41 }
 0x620   :  { %v1576_v20 = vsel %vm652_vm3, %v9675_v41, %v9677_v46  ;;  %v1595_v63 = vmul.f32 %v1584_v16, %v1577_v9 }
 0x621   :  { %v9716_v24 = vpop.permute.xlu0 %1747  ;;  %2055 = vmatprep.subr.mxu0 %v1662_v30  ;;  %v9718_v19 = vpop.permute.xlu1 %1753  ;;  %v1588_v30 = vrot.slane %v8303_v11, %v9250_v13  ;;  %v1593_v46 = vmul.f32 %v1584_v16, %v1576_v20 }
 0x622   :  { %2056 = vmatpush1.msra.mxu0 %v1661_v22 }
 0x623   :  { %2057 = vmatprep.subr.mxu0 %v1660_v48  ;;  %v1594_v41 = vmul.f32 %v1588_v30, %v1564_v45  ;;  %v1520_v48 = vrot.slane %v8302_v55, %v9244_v10 }
 0x624   :  { %2058 = vmatpush1.msra.mxu0 %v1659_v58 }
 0x625   :  { %v1486_v57 = vpop.permute.xlu0 %1485  ;;  %2059 = vmatprep.subr.mxu0 %v1658_v39  ;;  %v1562_v53 = vpop.permute.xlu1 %1561  ;;  %v1524_v39 = vrot.slane %v8302_v55, %v9250_v13 }
 0x626   :  { %v1566_v22 = vsel %vm652_vm3, %v1562_v53, %v1550_v15  ;;  %v1578_v27 = vsel %vm652_vm3, %v1550_v15, %v1562_v53  ;;  %2060 = vmatpush1.msra.mxu0 %v1657_v31  ;;  %v1596_v15 = vmul.f32 %v1588_v30, %v1565_v60  ;;  %v1501_v53 = vsel %vm586_vm4, %v9697_v42, %v9691_v32 }
 0x627   :  { %v1597_v23 = vmul.f32 %v1584_v16, %v1578_v27  ;;  %2061 = vmatprep.subr.mxu0 %v1656_v56  ;;  %v1598_v44 = vmul.f32 %v1588_v30, %v1566_v22  ;;  %v1563_v27 = vsel %vm652_vm3, %v9641_v25, %v9639_v61 }
 0x628   :  { %2062 = vmatpush1.msra.mxu0 %v1655_v26  ;;  %v1575_v26 = vsel %vm652_vm3, %v9639_v61, %v9641_v25  ;;  %v1592_v37 = vmul.f32 %v1588_v30, %v1563_v27  ;;  %v1513_v25 = vsel %vm586_vm4, %v9691_v32, %v9697_v42  ;;  %v1512_v30 = vsel %vm586_vm4, %v9679_v49, %v9681_v54  ;;  %v1451_v42 = vld [vmem:[%s14229_s0] ss:$8 sm:$0x3] }
 0x629   :  { %v9741_v17 = vpop.permute.xlu0 %1743  ;;  %2063 = vmatprep.subr.mxu0 %v1598_v44  ;;  %v9743_v62 = vpop.permute.xlu1 %1749  ;;  %v1591_v31 = vmul.f32 %v1584_v16, %v1575_v26  ;;  %v1500_v16 = vsel %vm586_vm4, %v9681_v54, %v9679_v49  ;;  %v1499_v32 = vsel %vm586_vm4, %v9652_v29, %v9650_v28  ;;  %v1531_v44 = vmul.f32 %v1520_v48, %v1513_v25 }
 0x62a   :  { %2064 = vmatpush1.msra.mxu0 %v1597_v23  ;;  %v1532_v23 = vmul.f32 %v1524_v39, %v1501_v53  ;;  %v1511_v49 = vsel %vm586_vm4, %v9650_v28, %v9652_v29  ;;  %v1530_v54 = vmul.f32 %v1524_v39, %v1500_v16  ;;  %v1529_v45 = vmul.f32 %v1520_v48, %v1512_v30 }
 0x62b   :  { %2065 = vmatprep.subr.mxu0 %v1596_v15  ;;  %v1456_v20 = vrot.slane %v1451_v42, %v9244_v10  ;;  %v1528_v55 = vmul.f32 %v1524_v39, %v1499_v32  ;;  %v1527_v26 = vmul.f32 %v1520_v48, %v1511_v49  ;;  %v1449_v29 = vsel %vm521_vm5, %v9693_v59, %v9699_v21 }
 0x62c   :  { %2066 = vmatpush1.msra.mxu0 %v1595_v63  ;;  %v1460_v63 = vrot.slane %v1451_v42, %v9250_v13  ;;  %v1841_v32 = vsel %vm920_vm6, %v9703_v47, %v9695_v7 }
 0x62d   :  { %v1418_v11 = vpop.permute.xlu0 %1417  ;;  %2067 = vmatprep.subr.mxu0 %v1594_v41  ;;  %v1498_v58 = vpop.permute.xlu1 %1497  ;;  %v1437_v41 = vsel %vm521_vm5, %v9699_v21, %v9693_v59  ;;  %v1435_v59 = vsel %vm521_vm5, %v9661_v36, %v9659_v33  ;;  %v8307_v21 = vld [vmem:[%s14229_s0 + $0x7] ss:$8 sm:$0x3] }
 0x62e   :  { %v1502_v56 = vsel %vm586_vm4, %v1498_v58, %v1486_v57  ;;  %v1514_v61 = vsel %vm586_vm4, %v1486_v57, %v1498_v58  ;;  %2068 = vmatpush1.msra.mxu0 %v1593_v46  ;;  %v1468_v53 = vmul.f32 %v1460_v63, %v1437_v41  ;;  %v1848_v25 = vrot.slane %v8307_v21, %v9244_v10 }
 0x62f   :  { %v1533_v60 = vmul.f32 %v1520_v48, %v1514_v61  ;;  %2069 = vmatprep.subr.mxu0 %v1592_v37  ;;  %v1534_v22 = vmul.f32 %v1524_v39, %v1502_v56  ;;  %v1436_v48 = vsel %vm521_vm5, %v9685_v6, %v9683_v0  ;;  %v1448_v39 = vsel %vm521_vm5, %v9683_v0, %v9685_v6 }
 0x630   :  { %2070 = vmatpush1.msra.mxu0 %v1591_v31  ;;  %v1467_v56 = vmul.f32 %v1456_v20, %v1449_v29  ;;  %v1447_v0 = vsel %vm521_vm5, %v9659_v33, %v9661_v36  ;;  %v1466_v6 = vmul.f32 %v1460_v63, %v1436_v48  ;;  %v1465_v61 = vmul.f32 %v1456_v20, %v1448_v39 }
 0x631   :  { %v9770_v9 = vpop.permute.xlu0 %1687  ;;  %2071 = vmatprep.subr.mxu0 %v1534_v22  ;;  %v9772_v57 = vpop.permute.xlu1 %1745  ;;  %v1464_v16 = vmul.f32 %v1460_v63, %v1435_v59  ;;  %v1852_v30 = vrot.slane %v8307_v21, %v9250_v13  ;;  %v1825_v36 = vsel %vm920_vm6, %v9695_v7, %v9703_v47  ;;  %v1839_v7 = vsel %vm920_vm6, %v9670_v51, %v9668_v50 }
 0x632   :  { %2072 = vmatpush1.msra.mxu0 %v1533_v60  ;;  %v1859_v47 = vmul.f32 %v1848_v25, %v1825_v36  ;;  %v1776_v59 = vsel %vm854_vm7, %v9743_v62, %v9716_v24  ;;  %v1760_v21 = vsel %vm854_vm7, %v9716_v24, %v9743_v62 }
 0x633   :  { %2073 = vmatprep.subr.mxu0 %v1532_v23  ;;  %v1463_v23 = vmul.f32 %v1456_v20, %v1447_v0 }
 0x634   :  { %2074 = vmatpush1.msra.mxu0 %v1531_v44 }
 0x635   :  { %v1820_v15 = vpop.permute.xlu0 %1819  ;;  %2075 = vmatprep.subr.mxu0 %v1530_v54  ;;  %v1434_v27 = vpop.permute.xlu1 %1433  ;;  %v1840_v54 = vsel %vm920_vm6, %v9689_v12, %v9687_v5 }
 0x636   :  { %v1438_v46 = vsel %vm521_vm5, %v1434_v27, %v1418_v11  ;;  %v1450_v28 = vsel %vm521_vm5, %v1418_v11, %v1434_v27  ;;  %2076 = vmatpush1.msra.mxu0 %v1529_v45  ;;  %v1824_v45 = vsel %vm920_vm6, %v9687_v5, %v9689_v12  ;;  %v1860_v27 = vmul.f32 %v1852_v30, %v1841_v32 }
 0x637   :  { %v1469_v58 = vmul.f32 %v1456_v20, %v1450_v28  ;;  %2077 = vmatprep.subr.mxu0 %v1528_v55  ;;  %v1470_v37 = vmul.f32 %v1460_v63, %v1438_v46  ;;  %v8306_v55 = vld [vmem:[%s14229_s0 + $0x6] ss:$8 sm:$0x3]  ;;  %v1823_v63 = vsel %vm920_vm6, %v9668_v50, %v9670_v51  ;;  %v1858_v5 = vmul.f32 %v1852_v30, %v1840_v54 }
 0x638   :  { %2078 = vmatpush1.msra.mxu0 %v1527_v26  ;;  %v1857_v12 = vmul.f32 %v1848_v25, %v1824_v45  ;;  %v1784_v26 = vrot.slane %v8306_v55, %v9244_v10  ;;  %v1856_v28 = vmul.f32 %v1852_v30, %v1839_v7  ;;  %v1788_v29 = vrot.slane %v8306_v55, %v9250_v13 }
 0x639   :  { %v9799_v31 = vpop.permute.xlu0 %1683  ;;  %2079 = vmatprep.subr.mxu0 %v1470_v37  ;;  %v9801_v11 = vpop.permute.xlu1 %1689  ;;  %v1777_v37 = vsel %vm854_vm7, %v9718_v19, %v9701_v43  ;;  %v1761_v51 = vsel %vm854_vm7, %v9701_v43, %v9718_v19  ;;  %v1775_v19 = vsel %vm854_vm7, %v9772_v57, %v9741_v17  ;;  %v8305_v43 = vld [vmem:[%s14229_s0 + $0x5] ss:$8 sm:$0x3] }
 0x63a   :  { %2080 = vmatpush1.msra.mxu0 %v1469_v58  ;;  %v1855_v58 = vmul.f32 %v1848_v25, %v1823_v63  ;;  %v1796_v0 = vmul.f32 %v1788_v29, %v1777_v37  ;;  %v1794_v24 = vmul.f32 %v1788_v29, %v1776_v59  ;;  %v1793_v62 = vmul.f32 %v1784_v26, %v1760_v21 }
 0x63b   :  { %2081 = vmatprep.subr.mxu0 %v1468_v53  ;;  %v1713_v32 = vsel %vm788_vm8, %v9801_v11, %v9770_v9 }
 0x63c   :  { %2082 = vmatpush1.msra.mxu0 %v1467_v56 }
 0x63d   :  { %v1756_v60 = vpop.permute.xlu0 %1755  ;;  %2083 = vmatprep.subr.mxu0 %v1466_v6  ;;  %v1822_v22 = vpop.permute.xlu1 %1821  ;;  %v1795_v6 = vmul.f32 %v1784_v26, %v1761_v51 }
 0x63e   :  { %v1826_v42 = vsel %vm920_vm6, %v1820_v15, %v1822_v22  ;;  %v1842_v33 = vsel %vm920_vm6, %v1822_v22, %v1820_v15  ;;  %2084 = vmatpush1.msra.mxu0 %v1465_v61  ;;  %v1759_v61 = vsel %vm854_vm7, %v9741_v17, %v9772_v57  ;;  %v1697_v57 = vsel %vm788_vm8, %v9770_v9, %v9801_v11  ;;  %v8308_v9 = vld [vmem:[%s14229_s0 + $0x10] ss:$8 sm:$0x3] }
 0x63f   :  { %v1861_v44 = vmul.f32 %v1848_v25, %v1826_v42  ;;  %2085 = vmatprep.subr.mxu0 %v1464_v16  ;;  %v1862_v49 = vmul.f32 %v1852_v30, %v1842_v33  ;;  %v1792_v16 = vmul.f32 %v1788_v29, %v1775_v19  ;;  %v1724_v30 = vrot.slane %v8305_v43, %v9250_v13  ;;  %v1937_v19 = vld [vmem:[%s14233_s26 + $0x10] sm:$0xff] }
 0x640   :  { %2086 = vmatpush1.msra.mxu0 %v1463_v23  ;;  %v1791_v23 = vmul.f32 %v1784_v26, %v1759_v61  ;;  %v1941_v61 = vld [vmem:[%s14233_s26 + $0x30] sm:$0xff] }
 0x641   :  { %v9828_v20 = vpop.permute.xlu0 %1679  ;;  %2087 = vmatprep.subr.mxu0 %v1862_v49  ;;  %v1686_v15 = vpop.permute.xlu1 %1685 }
 0x642   :  { %2088 = vmatpush2.msra.mxu0 %v1861_v44  ;;  %v1712_v44 = vsel %vm788_vm8, %v1686_v15, %v9799_v31  ;;  %v1696_v49 = vsel %vm788_vm8, %v9799_v31, %v1686_v15  ;;  %v1912_v31 = vrot.slane %v8308_v9, %v9244_v10 }
 0x643   :  { %2089 = vmatprep.subr.mxu0 %v1860_v27  ;;  %v1732_v27 = vmul.f32 %v1724_v30, %v1713_v32  ;;  %v1730_v55 = vmul.f32 %v1724_v30, %v1712_v44 }
 0x644   :  { %2090 = vmatpush2.msra.mxu0 %v1859_v47 }
 0x645   :  { %v1692_v41 = vpop.permute.xlu0 %1691  ;;  %2091 = vmatprep.subr.mxu0 %v1858_v5  ;;  %v1758_v46 = vpop.permute.xlu1 %1757 }
 0x646   :  { %v1762_v48 = vsel %vm854_vm7, %v1756_v60, %v1758_v46  ;;  %v1778_v50 = vsel %vm854_vm7, %v1758_v46, %v1756_v60  ;;  %2092 = vmatpush2.msra.mxu0 %v1857_v12  ;;  %v1720_v60 = vrot.slane %v8305_v43, %v9244_v10  ;;  %v1916_v12 = vrot.slane %v8308_v9, %v9250_v13 }
 0x647   :  { %v1797_v39 = vmul.f32 %v1784_v26, %v1762_v48  ;;  %2093 = vmatprep.subr.mxu0 %v1856_v28  ;;  %v1798_v53 = vmul.f32 %v1788_v29, %v1778_v50  ;;  %v14234_v43 = vmov 0.0  }
 0x648   :  { %2094 = vmatpush2.msra.mxu0 %v1855_v58  ;;  %v1731_v7 = vmul.f32 %v1720_v60, %v1697_v57  ;;  %v1729_v63 = vmul.f32 %v1720_v60, %v1696_v49 }
 0x649   :  { %2095 = vmatprep.subr.mxu0 %v1798_v53  ;;  %v1682_v56 = vpop.permute.xlu1 %1681  ;;  %v1880_v25 = vpop.permute.xlu0 %1879 }
 0x64a   :  { %2096 = vmatpush2.msra.mxu0 %v1797_v39  ;;  %v1711_v47 = vsel %vm788_vm8, %v1682_v56, %v9828_v20  ;;  %v1695_v11 = vsel %vm788_vm8, %v9828_v20, %v1682_v56 }
 0x64b   :  { %2097 = vmatprep.subr.mxu0 %v1796_v0  ;;  %v1728_v5 = vmul.f32 %v1724_v30, %v1711_v47  ;;  %v1727_v26 = vmul.f32 %v1720_v60, %v1695_v11 }
 0x64c   :  { %2098 = vmatpush2.msra.mxu0 %v1795_v6 }
 0x64d   :  { %2099 = vmatprep.subr.mxu0 %v1794_v24  ;;  %v1694_v22 = vpop.permute.xlu1 %1693  ;;  %v1884_v54 = vpop.permute.xlu0 %1883  ;;  %v1943_v24 = vld [vmem:[%s14233_s26 + $0x40] sm:$0xff] }
 0x64e   :  { %v1698_v42 = vsel %vm788_vm8, %v1692_v41, %v1694_v22  ;;  %v1714_v17 = vsel %vm788_vm8, %v1694_v22, %v1692_v41  ;;  %2100 = vmatpush2.msra.mxu0 %v1793_v62  ;;  %v1944_v62 = vld [vmem:[%s14233_s26 + $0x48] sm:$0xff] }
 0x64f   :  { %v1733_v33 = vmul.f32 %v1720_v60, %v1698_v42  ;;  %2101 = vmatprep.subr.mxu0 %v1792_v16  ;;  %v1734_v36 = vmul.f32 %v1724_v30, %v1714_v17  ;;  %v1946_v60 = vld [vmem:[%s14233_s26 + $0x58] sm:$0xff] }
 0x650   :  { %2102 = vmatpush2.msra.mxu0 %v1791_v23 }
 0x651   :  { %2103 = vmatprep.subr.mxu0 %v1734_v36  ;;  %v1882_v45 = vpop.permute.xlu1 %1881  ;;  %v1876_v20 = vpop.permute.xlu0 %1875 }
 0x652   :  { %2104 = vmatpush2.msra.mxu0 %v1733_v33  ;;  %v1905_v41 = vsel %vm14132_vm9, %v1882_v45, %v1880_v25  ;;  %v1889_v29 = vsel %vm14132_vm9, %v1880_v25, %v1882_v45  ;;  %v1945_v25 = vld [vmem:[%s14233_s26 + $0x50] sm:$0xff] }
 0x653   :  { %2105 = vmatprep.subr.mxu0 %v1732_v27  ;;  %v1924_v50 = vmul.f32 %v1916_v12, %v1905_v41  ;;  %v1923_v51 = vmul.f32 %v1912_v31, %v1889_v29 }
 0x654   :  { %2106 = vmatpush2.msra.mxu0 %v1731_v7 }
 0x655   :  { %2107 = vmatprep.subr.mxu0 %v1730_v55  ;;  %v1886_v15 = vpop.permute.xlu1 %1885 }
 0x656   :  { %v1890_v46 = vsel %vm14132_vm9, %v1884_v54, %v1886_v15  ;;  %v1906_v28 = vsel %vm14132_vm9, %v1886_v15, %v1884_v54  ;;  %2108 = vmatpush2.msra.mxu0 %v1729_v63 }
 0x657   :  { %v1925_v58 = vmul.f32 %v1912_v31, %v1890_v46  ;;  %2109 = vmatprep.subr.mxu0 %v1728_v5  ;;  %v1926_v37 = vmul.f32 %v1916_v12, %v1906_v28 }
 0x658   :  { %2110 = vmatpush2.msra.mxu0 %v1727_v26 }
 0x659   :  { %2111 = vmatprep.subr.mxu0 %v9574_v2  ;;  %2168 = vmatprep.subr.mxu1 %v1926_v37  ;;  %v1878_v48 = vpop.permute.xlu1 %1877  ;;  %v1872_v2 = vpop.permute.xlu0 %1871 }
 0x65a   :  { %v1888_v39 = vsel %vm14132_vm9, %v1876_v20, %v1878_v48  ;;  %v1904_v53 = vsel %vm14132_vm9, %v1878_v48, %v1876_v20  ;;  %2112 = vmatpush2.msra.mxu0 %v9563_v52  ;;  %2169 = vmatpush1.msra.mxu1 %v1925_v58 }
 0x65b   :  { %v1921_v59 = vmul.f32 %v1912_v31, %v1888_v39  ;;  %2113 = vmatprep.subr.mxu0 %v9542_v3  ;;  %2170 = vmatprep.subr.mxu1 %v1924_v50  ;;  %v1922_v21 = vmul.f32 %v1916_v12, %v1904_v53  ;;  %v1935_v3 = vld [vmem:[%s14233_s26] sm:$0xff] }
 0x65c   :  { %2114 = vmatpush2.msra.mxu0 %v9548_v18  ;;  %2171 = vmatpush1.msra.mxu1 %v1923_v51 }
 0x65d   :  { %2115 = vmatprep.subr.mxu0 %v9518_v14  ;;  %2172 = vmatprep.subr.mxu1 %v1922_v21  ;;  %v1874_v56 = vpop.permute.xlu1 %1873  ;;  %v1939_v14 = vld [vmem:[%s14233_s26 + $0x20] sm:$0xff] }
 0x65e   :  { %v1887_v0 = vsel %vm14132_vm9, %v1872_v2, %v1874_v56  ;;  %v1903_v6 = vsel %vm14132_vm9, %v1874_v56, %v1872_v2  ;;  %2116 = vmatpush2.msra.mxu0 %v9516_v8  ;;  %2173 = vmatpush1.msra.mxu1 %v1921_v59  ;;  %v1938_v8 = vld [vmem:[%s14233_s26 + $0x18] sm:$0xff]  ;;  %vm3260_vm9 = vcmask 769024  }
 0x65f   :  { %v1919_v52 = vmul.f32 %v1912_v31, %v1887_v0  ;;  %2117 = vmatprep.subr.mxu0 %v9494_v4  ;;  %v1920_v18 = vmul.f32 %v1916_v12, %v1903_v6  ;;  %v1942_v4 = vld [vmem:[%s14233_s26 + $0x38] sm:$0xff] }
 0x660   :  { %2118 = vmatpush2.msra.mxu0 %v9492_v1  ;;  %v1940_v1 = vld [vmem:[%s14233_s26 + $0x28] sm:$0xff]  ;;  %s14323_s26 = smov 94  }
 0x661   :  { %2120 = vmatmul.mubr.f32.vlgmr.msra.gmra.mxu0 %v1935_v3  ;;  %2174 = vmatprep.subr.mxu1 %v1920_v18 }
 0x662   :  { %2175 = vmatpush1.msra.mxu1 %v1919_v52  ;;  %2125 = vmatprep.mubr.f32.mxu0 %v1939_v14  ;;  %v2041_v57 = vpop.permute.xlu0 %2040 }
 0x663   :  { %8309 = vmatmul.mubr.msk.f32.vlgmr.msra.gmra.mxu1 %vm1144_vm10, %v1937_v19 }
 0x664   :  { %2214 = vmatprep.mubr.f32.mxu1 %v14234_v43 }
 0x665   :  { %2126 = vmatmul.mubr.f32.gmra.mxu0 %v1938_v8 }
 0x666   :  { %2131 = vmatprep.mubr.f32.mxu0 %v1942_v4  ;;  %v2031_v9 = vpop.permute.xlu0 %2030 }
 0x667   :  { %8310 = vmatmul.mubr.msk.f32.gmra.mxu1 %vm1144_vm10, %v1940_v1 }
 0x668   :  { %2220 = vmatprep.mubr.f32.mxu1 %v14234_v43 }
 0x669   :  { %2132 = vmatmul.mubr.f32.gmra.mxu0 %v1941_v61 }
 0x66a   :  { %2137 = vmatprep.mubr.f32.mxu0 %v1945_v25  ;;  %v2036_v33 = vpop.permute.xlu1 %2035 }
 0x66b   :  { %8311 = vmatmul.mubr.msk.f32.gmra.mxu1 %vm1144_vm10, %v1943_v24 }
 0x66c   :  { %2226 = vmatprep.mubr.f32.mxu1 %v14234_v43 }
 0x66d   :  { %2138 = vmatmul.mubr.f32.gmra.mxu0 %v1944_v62 }
 0x66e   :  { %v2026_v29 = vpop.permute.xlu1 %2025 }
 0x66f   :  { %8312 = vmatmul.mubr.msk.f32.gmra.mxu1 %vm1144_vm10, %v1946_v60 }
 0x670   :  { %2437 = vmatprep.mubr.f32.mxu1 %v14234_v43 }
 0x721   :  { %v2121_v22 = vpop.f32.mrf.mxu0 }
 0x722   :  { %v2122_v50 = vadd.f32 %v2121_v22, %v2026_v29 }
 0x723   :  { %v2123_v16 = vpop.f32.mrf.mxu0  ;;  %v2210_v30 = vpop.f32.mrf.mxu1 }
 0x724   :  { %v2124_v58 = vadd.f32 %v2123_v16, %v2026_v29  ;;  %v2211_v59 = vadd.f32 %v2210_v30, %v2122_v50 }
 0x725   :  { %v2127_v23 = vpop.f32.mrf.mxu0  ;;  %v2212_v32 = vpop.f32.mrf.mxu1 }
 0x726   :  { %v2128_v46 = vadd.f32 %v2127_v23, %v2031_v9  ;;  %v2213_v39 = vadd.f32 %v2212_v32, %v2124_v58 }
 0x727   :  { %v2129_v42 = vpop.f32.mrf.mxu0  ;;  %v2216_v17 = vpop.f32.mrf.mxu1 }
 0x728   :  { %v2130_v5 = vadd.f32 %v2129_v42, %v2031_v9  ;;  %v2217_v51 = vadd.f32 %v2216_v17, %v2128_v46  ;;  %v2233_v21 = vadd.f32 %v2213_v39, %v2211_v59 }
 0x729   :  { %v2133_v36 = vpop.f32.mrf.mxu0  ;;  %v2218_v44 = vpop.f32.mrf.mxu1 }
 0x72a   :  { %v2134_v49 = vadd.f32 %v2133_v36, %v2036_v33  ;;  %v2219_v37 = vadd.f32 %v2218_v44, %v2130_v5 }
 0x72b   :  { %v2135_v54 = vpop.f32.mrf.mxu0  ;;  %v2222_v45 = vpop.f32.mrf.mxu1 }
 0x72c   :  { %v2136_v27 = vadd.f32 %v2135_v54, %v2036_v33  ;;  %v2223_v11 = vadd.f32 %v2222_v45, %v2134_v49  ;;  %v2236_v53 = vadd.f32 %v2219_v37, %v2217_v51  ;;  %v2322_v49 = vld [vmem:[%s14034_s11 + $0x18] sm:$0xff]  ;;  %v2320_v54 = vld [vmem:[%s14034_s11 + $0x8] sm:$0xff]  ;;  %v2319_v45 = vld [vmem:[%s14034_s11] sm:$0xff] }
 0x72d   :  { %v2139_v7 = vpop.f32.mrf.mxu0  ;;  %v2224_v47 = vpop.f32.mrf.mxu1 }
 0x72e   :  { %v2140_v55 = vadd.f32 %v2139_v7, %v2041_v57  ;;  %v2225_v63 = vadd.f32 %v2224_v47, %v2136_v27  ;;  %v2321_v27 = vld [vmem:[%s14034_s11 + $0x10] sm:$0xff]  ;;  %v2323_v7 = vld [vmem:[%s14034_s11 + $0x20] sm:$0xff]  ;;  %v2324_v47 = vld [vmem:[%s14034_s11 + $0x28] sm:$0xff]  ;;  %s8509_s11 = smov 68  }
 0x72f   :  { %v2141_v31 = vpop.f32.mrf.mxu0  ;;  %v2228_v15 = vpop.f32.mrf.mxu1 }
 0x730   :  { %v2239_v12 = vadd.f32 %v2225_v63, %v2223_v11  ;;  %v2142_v26 = vadd.f32 %v2141_v31, %v2041_v57  ;;  %v2229_v28 = vadd.f32 %v2228_v15, %v2140_v55 }
 0x731   :  { %v2230_v41 = vpop.f32.mrf.mxu1 }
 0x732   :  { %v2231_v20 = vadd.f32 %v2230_v41, %v2142_v26  ;;  %2240 = vadd.xlane.f32.xlu1 %v2239_v12 }
 0x734   :  { %v2242_v48 = vadd.f32 %v2231_v20, %v2229_v28 }
 0x736   :  { %2243 = vadd.xlane.f32.xlu0 %v2242_v48 }
 0x73a   :  { %2237 = vadd.xlane.f32.xlu0 %v2236_v53 }
 0x73e   :  { %2234 = vadd.xlane.f32.xlu0 %v2233_v21 }
 0x7bb   :  { %v2241_v2 = vpop.xlane.xlu1 %2240 }
 0x7bc   :  { %v2247_v56 = vmul.f32 0.00390625, %v2241_v2 }
 0x7be   :  { %v2253_v0 = vsub.f32 %v2223_v11, %v2247_v56  ;;  %v2254_v6 = vsub.f32 %v2225_v63, %v2247_v56 }
 0x7bf   :  { %v2244_v3 = vpop.xlane.xlu0 %2243 }
 0x7c0   :  { %v2261_v52 = vmul.f32 %v2253_v0, %v2253_v0  ;;  %v2262_v18 = vmul.f32 %v2254_v6, %v2254_v6  ;;  %v2248_v14 = vmul.f32 0.00390625, %v2244_v3 }
 0x7c2   :  { %v2255_v19 = vsub.f32 %v2229_v28, %v2248_v14  ;;  %v2256_v8 = vsub.f32 %v2231_v20, %v2248_v14  ;;  %v2271_v4 = vadd.f32 %v2262_v18, %v2261_v52 }
 0x7c3   :  { %v2238_v1 = vpop.xlane.xlu0 %2237 }
 0x7c4   :  { %v2263_v61 = vmul.f32 %v2255_v19, %v2255_v19  ;;  %v2264_v25 = vmul.f32 %v2256_v8, %v2256_v8  ;;  %v2246_v24 = vmul.f32 0.00390625, %v2238_v1  ;;  %2272 = vadd.xlane.f32.xlu0 %v2271_v4 }
 0x7c6   :  { %v2251_v62 = vsub.f32 %v2217_v51, %v2246_v24  ;;  %v2252_v60 = vsub.f32 %v2219_v37, %v2246_v24  ;;  %v2274_v22 = vadd.f32 %v2264_v25, %v2263_v61  ;;  %v14238_v25 = vld [vmem:[#allocation3_spill] sm:$0xff] }
 0x7c7   :  { %v2235_v16 = vpop.xlane.xlu0 %2234 }
 0x7c8   :  { %v2259_v30 = vmul.f32 %v2251_v62, %v2251_v62  ;;  %v2260_v23 = vmul.f32 %v2252_v60, %v2252_v60  ;;  %v2245_v32 = vmul.f32 0.00390625, %v2235_v16  ;;  %2275 = vadd.xlane.f32.xlu1 %v2274_v22  ;;  %v2313_v22 = vld [vmem:[%s14035_s10] sm:$0xff]  ;;  %v2314_v16 = vld [vmem:[%s14035_s10 + $0x8] sm:$0xff] }
 0x7ca   :  { %v9944_v42 = vsub.f32 %v2211_v59, %v2245_v32  ;;  %v2250_v17 = vsub.f32 %v2213_v39, %v2245_v32  ;;  %v2268_v57 = vadd.f32 %v2260_v23, %v2259_v30  ;;  %v2315_v30 = vld [vmem:[%s14035_s10 + $0x10] sm:$0xff]  ;;  %v2316_v23 = vld [vmem:[%s14035_s10 + $0x18] sm:$0xff]  ;;  %v2317_v32 = vld [vmem:[%s14035_s10 + $0x20] sm:$0xff] }
 0x7cc   :  { %v2257_v33 = vmul.f32 %v9944_v42, %v9944_v42  ;;  %v2258_v36 = vmul.f32 %v2250_v17, %v2250_v17  ;;  %2269 = vadd.xlane.f32.xlu1 %v2268_v57 }
 0x7ce   :  { %v2265_v44 = vadd.f32 %v2258_v36, %v2257_v33 }
 0x7d0   :  { %2266 = vadd.xlane.f32.xlu0 %v2265_v44 }
 0x7dd   :  { %2342 = vperm.xlu1 %8404, %v2322_v49  }
 0x7e1   :  { %2332 = vperm.xlu1 %8404, %v2320_v54  }
 0x7e5   :  { %2327 = vperm.xlu1 %8404, %v2319_v45  }
 0x7e6   :  { %2337 = vperm.xlu0 %8403, %v2321_v27  }
 0x7e9   :  { %2347 = vperm.xlu1 %8404, %v2323_v7  }
 0x7ea   :  { %2352 = vperm.xlu0 %8403, %v2324_v47  }
 0x84d   :  { %v2273_v9 = vpop.xlane.xlu0 %2272 }
 0x84e   :  { %v2279_v11 = vmul.f32 0.00390625, %v2273_v9 }
 0x850   :  { %v2283_v55 = vadd.f32 1e-05, %v2279_v11 }
 0x851   :  { %v2276_v63 = vpop.xlane.xlu1 %2275 }
 0x852   :  { %8421 = vrsqrt.f32 %v2283_v55  ;;  %v2280_v31 = vmul.f32 0.00390625, %v2276_v63 }
 0x854   :  { %v2284_v15 = vadd.f32 1e-05, %v2280_v31 }
 0x855   :  { %v2270_v5 = vpop.xlane.xlu1 %2269 }
 0x856   :  { %8423 = vrsqrt.f32 %v2284_v15  ;;  %v2278_v12 = vmul.f32 0.00390625, %v2270_v5 }
 0x858   :  { %v2282_v26 = vadd.f32 1e-05, %v2278_v12 }
 0x859   :  { %v2267_v41 = vpop.xlane.xlu0 %2266 }
 0x85a   :  { %8425 = vrsqrt.f32 %v2282_v26  ;;  %v2277_v46 = vmul.f32 0.00390625, %v2267_v41 }
 0x85c   :  { %v2281_v28 = vadd.f32 1e-05, %v2277_v46 }
 0x85e   :  { %8427 = vrsqrt.f32 %v2281_v28 }
 0x85f   :  { %v8422_v20 = vpop.eup %8421 }
 0x860   :  { %v2294_v29 = vmul.f32 %v8422_v20, %v2254_v6  ;;  %v2293_v37 = vmul.f32 %v8422_v20, %v2253_v0  ;;  %v14235_v6 = vld [vmem:[#allocation6_spill] sm:$0xff]  ;;  %v14236_v0 = vld [vmem:[#allocation5_spill] sm:$0xff] }
 0x861   :  { %v2338_v47 = vpop.permute.xlu0 %2337 }
 0x862   :  { %v2302_v53 = vadd.f32 %v2294_v29, %v9085_v34  ;;  %v2301_v21 = vadd.f32 %v2293_v37, %v9091_v35  ;;  %v14237_v35 = vld [vmem:[#allocation4_spill] sm:$0xff] }
 0x863   :  { %v8424_v58 = vpop.eup %8423 }
 0x864   :  { %v2296_v48 = vmul.f32 %v8424_v58, %v2256_v8  ;;  %v2295_v50 = vmul.f32 %v8424_v58, %v2255_v19  ;;  %v2310_v18 = vmax.f32 %v2302_v53, 0.0 }
 0x866   :  { %v2304_v51 = vadd.f32 %v2296_v48, %v9117_v40  ;;  %v2303_v39 = vadd.f32 %v2295_v50, %v9106_v38  ;;  %v2309_v40 = vmax.f32 %v2301_v21, 0.0  ;;  %v2353_v50 = vpop.permute.xlu0 %2352 }
 0x867   :  { %v8426_v59 = vpop.eup %8425 }
 0x868   :  { %v2312_v2 = vmax.f32 %v2304_v51, 0.0  ;;  %v2311_v56 = vmax.f32 %v2303_v39, 0.0  ;;  %v2292_v3 = vmul.f32 %v8426_v59, %v2252_v60  ;;  %v2291_v52 = vmul.f32 %v8426_v59, %v2251_v62 }
 0x86a   :  { %2397 = vmatprep.subr.mxu1 %v2312_v2  ;;  %v2300_v14 = vadd.f32 %v2292_v3, %v14235_v6  ;;  %v2299_v8 = vadd.f32 %v2291_v52, %v14236_v0 }
 0x86b   :  { %v8428_v19 = vpop.eup %8427  ;;  %2398 = vmatpush1.msra.mxu1 %v2311_v56 }
 0x86c   :  { %2399 = vmatprep.subr.mxu1 %v2310_v18  ;;  %v2308_v38 = vmax.f32 %v2300_v14, 0.0  ;;  %v2307_v4 = vmax.f32 %v2299_v8, 0.0  ;;  %v2290_v34 = vmul.f32 %v8428_v19, %v2250_v17  ;;  %v2289_v1 = vmul.f32 %v8428_v19, %v9944_v42  ;;  %v2318_v42 = vld [vmem:[%s14035_s10 + $0x28] sm:$0xff]  ;;  %v2343_v17 = vpop.permute.xlu1 %2342  ;;  %s8499_s10 = smov 30  }
 0x86d   :  { %2400 = vmatpush1.msra.mxu1 %v2309_v40 }
 0x86e   :  { %2401 = vmatprep.subr.mxu1 %v2308_v38  ;;  %v2298_v61 = vadd.f32 %v2290_v34, %v14237_v35  ;;  %v2297_v24 = vadd.f32 %v2289_v1, %v14238_v25 }
 0x86f   :  { %2402 = vmatpush1.msra.mxu1 %v2307_v4 }
 0x870   :  { %v2306_v62 = vmax.f32 %v2298_v61, 0.0  ;;  %v2305_v60 = vmax.f32 %v2297_v24, 0.0  ;;  %v2333_v44 = vpop.permute.xlu1 %2332 }
 0x872   :  { %2403 = vmatprep.subr.mxu1 %v2306_v62 }
 0x873   :  { %2404 = vmatpush1.msra.mxu1 %v2305_v60 }
 0x874   :  { %8313 = vmatmul.mubr.msk.f32.vlgmr.msra.gmra.mxu1 %vm1144_vm10, %v2313_v22  ;;  %v2328_v31 = vpop.permute.xlu1 %2327 }
 0x875   :  { %2443 = vmatprep.mubr.f32.mxu1 %v14234_v43 }
 0x878   :  { %8314 = vmatmul.mubr.msk.f32.gmra.mxu1 %vm1144_vm10, %v2314_v16  ;;  %v2348_v29 = vpop.permute.xlu1 %2347 }
 0x879   :  { %2449 = vmatprep.mubr.f32.mxu1 %v14234_v43 }
 0x87c   :  { %8315 = vmatmul.mubr.msk.f32.gmra.mxu1 %vm1144_vm10, %v2315_v30 }
 0x87d   :  { %2455 = vmatprep.mubr.f32.mxu1 %v14234_v43 }
 0x880   :  { %8316 = vmatmul.mubr.msk.f32.gmra.mxu1 %vm1144_vm10, %v2316_v23 }
 0x881   :  { %2461 = vmatprep.mubr.f32.mxu1 %v14234_v43 }
 0x884   :  { %8317 = vmatmul.mubr.msk.f32.gmra.mxu1 %vm1144_vm10, %v2317_v32 }
 0x885   :  { %2467 = vmatprep.mubr.f32.mxu1 %v14234_v43 }
 0x888   :  { %8318 = vmatmul.mubr.msk.f32.gmra.mxu1 %vm1144_vm10, %v2318_v42 }
 0x934   :  { %v2439_v57 = vpop.f32.mrf.mxu1 }
 0x935   :  { %v2440_v20 = vadd.f32 %v2439_v57, %v2328_v31 }
 0x936   :  { %v2441_v33 = vpop.f32.mrf.mxu1 }
 0x937   :  { %v2442_v41 = vadd.f32 %v2441_v33, %v2328_v31 }
 0x938   :  { %v2445_v36 = vpop.f32.mrf.mxu1 }
 0x939   :  { %v2446_v54 = vadd.f32 %v2445_v36, %v2333_v44  ;;  %v2474_v37 = vadd.f32 %v2442_v41, %v2440_v20 }
 0x93a   :  { %v2447_v49 = vpop.f32.mrf.mxu1 }
 0x93b   :  { %v2448_v45 = vadd.f32 %v2447_v49, %v2333_v44 }
 0x93c   :  { %v2451_v27 = vpop.f32.mrf.mxu1 }
 0x93d   :  { %v2477_v7 = vadd.f32 %v2448_v45, %v2446_v54  ;;  %v2452_v11 = vadd.f32 %v2451_v27, %v2338_v47 }
 0x93e   :  { %v2453_v9 = vpop.f32.mrf.mxu1 }
 0x93f   :  { %v2454_v43 = vadd.f32 %v2453_v9, %v2338_v47  ;;  %2478 = vadd.xlane.f32.xlu0 %v2477_v7 }
 0x940   :  { %v2457_v55 = vpop.f32.mrf.mxu1 }
 0x941   :  { %v2480_v63 = vadd.f32 %v2454_v43, %v2452_v11  ;;  %v2458_v5 = vadd.f32 %v2457_v55, %v2343_v17 }
 0x942   :  { %v2459_v15 = vpop.f32.mrf.mxu1 }
 0x943   :  { %v2460_v12 = vadd.f32 %v2459_v15, %v2343_v17  ;;  %2481 = vadd.xlane.f32.xlu1 %v2480_v63 }
 0x944   :  { %v2463_v26 = vpop.f32.mrf.mxu1 }
 0x945   :  { %v2483_v46 = vadd.f32 %v2460_v12, %v2458_v5  ;;  %v2464_v39 = vadd.f32 %v2463_v26, %v2348_v29 }
 0x946   :  { %v2465_v28 = vpop.f32.mrf.mxu1 }
 0x947   :  { %2484 = vadd.xlane.f32.xlu0 %v2483_v46  ;;  %v2466_v48 = vadd.f32 %v2465_v28, %v2348_v29 }
 0x948   :  { %v2469_v58 = vpop.f32.mrf.mxu1 }
 0x949   :  { %v2470_v53 = vadd.f32 %v2469_v58, %v2353_v50  ;;  %v2486_v21 = vadd.f32 %v2466_v48, %v2464_v39 }
 0x94a   :  { %v2471_v51 = vpop.f32.mrf.mxu1 }
 0x94b   :  { %v2472_v59 = vadd.f32 %v2471_v51, %v2353_v50  ;;  %2475 = vadd.xlane.f32.xlu0 %v2474_v37 }
 0x94d   :  { %v2489_v2 = vadd.f32 %v2472_v59, %v2470_v53 }
 0x94f   :  { %2490 = vadd.xlane.f32.xlu1 %v2489_v2  ;;  %2487 = vadd.xlane.f32.xlu0 %v2486_v21 }
 0x9c8   :  { %v2479_v56 = vpop.xlane.xlu0 %2478 }
 0x9c9   :  { %v2493_v3 = vmul.f32 0.00390625, %v2479_v56 }
 0x9cb   :  { %v10004_v52 = vsub.f32 %v2446_v54, %v2493_v3  ;;  %v10006_v18 = vsub.f32 %v2448_v45, %v2493_v3 }
 0x9cc   :  { %v2482_v8 = vpop.xlane.xlu1 %2481 }
 0x9cd   :  { %v2512_v6 = vmul.f32 %v10004_v52, %v10004_v52  ;;  %v2513_v14 = vmul.f32 %v10006_v18, %v10006_v18  ;;  %v2494_v38 = vmul.f32 0.00390625, %v2482_v8 }
 0x9cf   :  { %v2525_v0 = vadd.f32 %v2513_v14, %v2512_v6  ;;  %v10020_v24 = vsub.f32 %v2452_v11, %v2494_v38  ;;  %v10022_v16 = vsub.f32 %v2454_v43, %v2494_v38 }
 0x9d0   :  { %v2485_v19 = vpop.xlane.xlu0 %2484 }
 0x9d1   :  { %v2495_v40 = vmul.f32 0.00390625, %v2485_v19  ;;  %2526 = vadd.xlane.f32.xlu1 %v2525_v0  ;;  %v2514_v33 = vmul.f32 %v10020_v24, %v10020_v24  ;;  %v2515_v49 = vmul.f32 %v10022_v16, %v10022_v16 }
 0x9d3   :  { %v10012_v4 = vsub.f32 %v2458_v5, %v2495_v40  ;;  %v10014_v34 = vsub.f32 %v2460_v12, %v2495_v40  ;;  %v2528_v55 = vadd.f32 %v2515_v49, %v2514_v33 }
 0x9d4   :  { %v2476_v1 = vpop.xlane.xlu0 %2475 }
 0x9d5   :  { %v2516_v35 = vmul.f32 %v10012_v4, %v10012_v4  ;;  %v2517_v61 = vmul.f32 %v10014_v34, %v10014_v34  ;;  %v2492_v25 = vmul.f32 0.00390625, %v2476_v1 }
 0x9d7   :  { %v2498_v62 = vsub.f32 %v2440_v20, %v2492_v25  ;;  %v2499_v60 = vsub.f32 %v2442_v41, %v2492_v25  ;;  %v2531_v22 = vadd.f32 %v2517_v61, %v2516_v35 }
 0x9d8   :  { %v2488_v30 = vpop.xlane.xlu0 %2487  ;;  %v2491_v23 = vpop.xlane.xlu1 %2490 }
 0x9d9   :  { %v2510_v32 = vmul.f32 %v2498_v62, %v2498_v62  ;;  %v2511_v42 = vmul.f32 %v2499_v60, %v2499_v60  ;;  %v2496_v17 = vmul.f32 0.00390625, %v2488_v30  ;;  %v2497_v57 = vmul.f32 0.00390625, %v2491_v23  ;;  %2532 = vadd.xlane.f32.xlu1 %v2531_v22 }
 0x9db   :  { %v10026_v36 = vsub.f32 %v2470_v53, %v2497_v57  ;;  %v10028_v44 = vsub.f32 %v2472_v59, %v2497_v57  ;;  %v10032_v54 = vsub.f32 %v2464_v39, %v2496_v17  ;;  %v10034_v45 = vsub.f32 %v2466_v48, %v2496_v17 }
 0x9dc   :  { %v2522_v27 = vadd.f32 %v2511_v42, %v2510_v32 }
 0x9dd   :  { %v2520_v7 = vmul.f32 %v10026_v36, %v10026_v36  ;;  %v2521_v47 = vmul.f32 %v10028_v44, %v10028_v44  ;;  %v2518_v11 = vmul.f32 %v10032_v54, %v10032_v54  ;;  %v2519_v43 = vmul.f32 %v10034_v45, %v10034_v45 }
 0x9de   :  { %2523 = vadd.xlane.f32.xlu0 %v2522_v27 }
 0x9df   :  { %v2537_v9 = vadd.f32 %v2521_v47, %v2520_v7  ;;  %v2534_v63 = vadd.f32 %v2519_v43, %v2518_v11 }
 0x9e1   :  { %2538 = vadd.xlane.f32.xlu1 %v2537_v9 }
 0x9e2   :  { %2529 = vadd.xlane.f32.xlu0 %v2528_v55 }
 0x9e6   :  { %2535 = vadd.xlane.f32.xlu0 %v2534_v63 }
 0xa5a   :  { %v2527_v12 = vpop.xlane.xlu1 %2526 }
 0xa5b   :  { %v2541_v41 = vmul.f32 0.00390625, %v2527_v12 }
 0xa5d   :  { %v2547_v20 = vadd.f32 1e-05, %v2541_v41 }
 0xa62   :  { %v2533_v53 = vpop.xlane.xlu1 %2532 }
 0xa63   :  { %v2543_v59 = vmul.f32 0.00390625, %v2533_v53  ;;  %v3463_v53 = vld [vmem:[%s14037_s13 + $0x18] sm:$0xff] }
 0xa65   :  { %v2549_v2 = vadd.f32 1e-05, %v2543_v59 }
 0xa67   :  { %v2524_v31 = vpop.xlane.xlu0 %2523 }
 0xa68   :  { %v2540_v15 = vmul.f32 0.00390625, %v2524_v31 }
 0xa6a   :  { %v2546_v5 = vadd.f32 1e-05, %v2540_v15  ;;  %v2539_v19 = vpop.xlane.xlu1 %2538 }
 0xa6b   :  { %v2530_v48 = vpop.xlane.xlu0 %2529  ;;  %v2545_v40 = vmul.f32 0.00390625, %v2539_v19 }
 0xa6c   :  { %8429 = vrsqrt.f32 %v2546_v5  ;;  %v2542_v50 = vmul.f32 0.00390625, %v2530_v48  ;;  %v3329_v48 = vld [vmem:[%s14036_s12 + $0x8] sm:$0xff] }
 0xa6d   :  { %8431 = vrsqrt.f32 %v2547_v20  ;;  %3579 = vmatprep.mubr.f32.mxu0 %v3329_v48 }
 0xa6e   :  { %v2548_v51 = vadd.f32 1e-05, %v2542_v50 }
 0xa70   :  { %8433 = vrsqrt.f32 %v2548_v51 }
 0xa71   :  { %8435 = vrsqrt.f32 %v2549_v2 }
 0xa79   :  { %v8430_v26 = vpop.eup %8429 }
 0xa7a   :  { %v10044_v46 = vmul.f32 %v8430_v26, %v2498_v62  ;;  %v10046_v28 = vmul.f32 %v8430_v26, %v2499_v60  ;;  %v8432_v29 = vpop.eup %8431 }
 0xa7b   :  { %v10073_v58 = vmul.f32 %v8432_v29, %v10004_v52  ;;  %v10076_v37 = vmul.f32 %v8432_v29, %v10006_v18  ;;  %v2536_v18 = vpop.xlane.xlu0 %2535 }
 0xa7c   :  { %14239 = vst [vmem:[#allocation6_spill] sm:$0xff] %v10044_v46  ;;  %14240 = vst [vmem:[#allocation5_spill] sm:$0xff] %v10046_v28  ;;  %2764 = vrot.lane.b32.xlu0 %v10046_v28, %s8499_s10  ;;  %2782 = vrot.lane.b32.xlu1 %v10044_v46, %s8499_s10  ;;  %v2544_v14 = vmul.f32 0.00390625, %v2536_v18 }
 0xa7d   :  { %14241 = vst [vmem:[#allocation4_spill] sm:$0xff] %v10073_v58  ;;  %14242 = vst [vmem:[#allocation3_spill] sm:$0xff] %v10076_v37  ;;  %v8434_v39 = vpop.eup %8433 }
 0xa7e   :  { %v10107_v21 = vmul.f32 %v8434_v39, %v10022_v16  ;;  %v10114_v56 = vmul.f32 %v8434_v39, %v10020_v24  ;;  %v8436_v3 = vpop.eup %8435  ;;  %v2550_v0 = vadd.f32 1e-05, %v2544_v14  ;;  %v3331_v39 = vld [vmem:[%s14036_s12 + $0x18] sm:$0xff] }
 0xa7f   :  { %v10137_v52 = vmul.f32 %v8436_v3, %v10012_v4  ;;  %v10144_v6 = vmul.f32 %v8436_v3, %v10014_v34  ;;  %v2551_v4 = vadd.f32 1e-05, %v2545_v40  ;;  %8326 = vmatprep.mubr.msk.f32.mxu1 %vm3496_vm11, %v3331_v39  ;;  %v3461_v3 = vld [vmem:[%s14037_s13 + $0x8] sm:$0xff] }
 0xa80   :  { %2673 = vrot.lane.b32.xlu0 %v10046_v28, %s8500_s29  ;;  %2691 = vrot.lane.b32.xlu1 %v10044_v46, %s8500_s29  ;;  %14243 = vst [vmem:[#allocation7_spill] sm:$0xff] %v10107_v21  ;;  %14244 = vst [vmem:[#allocation8_spill] sm:$0xff] %v10114_v56  ;;  %8437 = vrsqrt.f32 %v2550_v0  ;;  %v3465_v0 = vld [vmem:[%s14037_s13 + $0x28] sm:$0xff] }
 0xa81   :  { %14245 = vst [vmem:[#allocation9_spill] sm:$0xff] %v10137_v52  ;;  %14246 = vst [vmem:[#allocation10_spill] sm:$0xff] %v10144_v6  ;;  %8439 = vrsqrt.f32 %v2551_v4  ;;  %v8320_v4 = vld [vmem:[%s14038_s2 + $0x2] ss:$8 sm:$0x3] }
 0xa82   :  { %v10374_v48 = vrot.slane %v8320_v4, %v9244_v10 }
 0xa84   :  { %2576 = vrot.lane.b32.xlu0 %v10046_v28, %s8501_s25  ;;  %2600 = vrot.lane.b32.xlu1 %v10044_v46, %s8501_s25  ;;  %14261 = vst [vmem:[#allocation25_spill] sm:$0xff] %v10374_v48 }
 0xa88   :  { %3144 = vrot.lane.b32.xlu0 %v10044_v46, %s8502_s23  ;;  %3146 = vrot.lane.b32.xlu1 %v10046_v28, %s8502_s23 }
 0xa8c   :  { %2960 = vrot.lane.b32.xlu0 %v10044_v46, %s8503_s4  ;;  %2962 = vrot.lane.b32.xlu1 %v10046_v28, %s8503_s4 }
 0xa8d   :  { %v8438_v8 = vpop.eup %8437 }
 0xa8e   :  { %v10171_v38 = vmul.f32 %v8438_v8, %v10034_v45  ;;  %v10182_v34 = vmul.f32 %v8438_v8, %v10032_v54  ;;  %v8440_v60 = vpop.eup %8439  ;;  %v3462_v8 = vld [vmem:[%s14037_s13 + $0x10] sm:$0xff] }
 0xa8f   :  { %v10213_v22 = vmul.f32 %v8440_v60, %v10028_v44  ;;  %v10232_v42 = vmul.f32 %v8440_v60, %v10026_v36  ;;  %v3460_v60 = vld [vmem:[%s14037_s13] sm:$0xff] }
 0xa90   :  { %3052 = vrot.lane.b32.xlu0 %v10044_v46, %s8504_s9  ;;  %3054 = vrot.lane.b32.xlu1 %v10046_v28, %s8504_s9  ;;  %14247 = vst [vmem:[#allocation11_spill] sm:$0xff] %v10171_v38  ;;  %14248 = vst [vmem:[#allocation12_spill] sm:$0xff] %v10182_v34 }
 0xa91   :  { %14249 = vst [vmem:[#allocation13_spill] sm:$0xff] %v10213_v22  ;;  %14250 = vst [vmem:[#allocation14_spill] sm:$0xff] %v10232_v42 }
 0xa94   :  { %2766 = vrot.lane.b32.xlu0 %v10076_v37, %s8499_s10  ;;  %2784 = vrot.lane.b32.xlu1 %v10073_v58, %s8499_s10 }
 0xa98   :  { %2675 = vrot.lane.b32.xlu0 %v10076_v37, %s8500_s29  ;;  %2693 = vrot.lane.b32.xlu1 %v10073_v58, %s8500_s29 }
 0xa9c   :  { %2578 = vrot.lane.b32.xlu0 %v10076_v37, %s8501_s25  ;;  %2602 = vrot.lane.b32.xlu1 %v10073_v58, %s8501_s25 }
 0xaa0   :  { %3148 = vrot.lane.b32.xlu0 %v10073_v58, %s8502_s23  ;;  %3150 = vrot.lane.b32.xlu1 %v10076_v37, %s8502_s23 }
 0xaa4   :  { %2964 = vrot.lane.b32.xlu0 %v10073_v58, %s8503_s4  ;;  %2966 = vrot.lane.b32.xlu1 %v10076_v37, %s8503_s4 }
 0xaa8   :  { %3056 = vrot.lane.b32.xlu0 %v10073_v58, %s8504_s9  ;;  %3058 = vrot.lane.b32.xlu1 %v10076_v37, %s8504_s9 }
 0xaac   :  { %2858 = vrot.lane.b32.xlu0 %v10076_v37, %s14078_s8  ;;  %2876 = vrot.lane.b32.xlu1 %v10073_v58, %s14078_s8 }
 0xab0   :  { %2677 = vrot.lane.b32.xlu0 %v10107_v21, %s8500_s29  ;;  %2768 = vrot.lane.b32.xlu1 %v10107_v21, %s8499_s10 }
 0xab4   :  { %2580 = vrot.lane.b32.xlu0 %v10107_v21, %s8501_s25  ;;  %2786 = vrot.lane.b32.xlu1 %v10114_v56, %s8499_s10 }
 0xab8   :  { %3152 = vrot.lane.b32.xlu0 %v10114_v56, %s8502_s23  ;;  %2695 = vrot.lane.b32.xlu1 %v10114_v56, %s8500_s29 }
 0xabc   :  { %3060 = vrot.lane.b32.xlu0 %v10114_v56, %s8504_s9  ;;  %2604 = vrot.lane.b32.xlu1 %v10114_v56, %s8501_s25 }
 0xac0   :  { %2968 = vrot.lane.b32.xlu0 %v10114_v56, %s8503_s4  ;;  %3154 = vrot.lane.b32.xlu1 %v10107_v21, %s8502_s23 }
 0xac4   :  { %2860 = vrot.lane.b32.xlu0 %v10107_v21, %s14078_s8  ;;  %3062 = vrot.lane.b32.xlu1 %v10107_v21, %s8504_s9 }
 0xac8   :  { %2970 = vrot.lane.b32.xlu1 %v10107_v21, %s8503_s4  ;;  %2788 = vrot.lane.b32.xlu0 %v10137_v52, %s8499_s10 }
 0xacc   :  { %2878 = vrot.lane.b32.xlu1 %v10114_v56, %s14078_s8  ;;  %2679 = vrot.lane.b32.xlu0 %v10144_v6, %s8500_s29 }
 0xad0   :  { %2770 = vrot.lane.b32.xlu1 %v10144_v6, %s8499_s10  ;;  %2582 = vrot.lane.b32.xlu0 %v10144_v6, %s8501_s25 }
 0xad4   :  { %2697 = vrot.lane.b32.xlu1 %v10137_v52, %s8500_s29  ;;  %3156 = vrot.lane.b32.xlu0 %v10137_v52, %s8502_s23 }
 0xad8   :  { %2606 = vrot.lane.b32.xlu1 %v10137_v52, %s8501_s25  ;;  %3064 = vrot.lane.b32.xlu0 %v10137_v52, %s8504_s9 }
 0xadc   :  { %3158 = vrot.lane.b32.xlu1 %v10144_v6, %s8502_s23  ;;  %2972 = vrot.lane.b32.xlu0 %v10137_v52, %s8503_s4 }
 0xae0   :  { %3066 = vrot.lane.b32.xlu1 %v10144_v6, %s8504_s9  ;;  %2862 = vrot.lane.b32.xlu0 %v10144_v6, %s14078_s8 }
 0xae4   :  { %2974 = vrot.lane.b32.xlu1 %v10144_v6, %s8503_s4  ;;  %2681 = vrot.lane.b32.xlu0 %v10171_v38, %s8500_s29 }
 0xae8   :  { %2880 = vrot.lane.b32.xlu1 %v10137_v52, %s14078_s8  ;;  %2584 = vrot.lane.b32.xlu0 %v10171_v38, %s8501_s25 }
 0xaec   :  { %2699 = vrot.lane.b32.xlu1 %v10182_v34, %s8500_s29  ;;  %3160 = vrot.lane.b32.xlu0 %v10182_v34, %s8502_s23 }
 0xaee   :  { %v10188_v1 = vpop.permute.xlu0 %2764  ;;  %v10190_v35 = vpop.permute.xlu1 %2782 }
 0xaf0   :  { %2608 = vrot.lane.b32.xlu1 %v10182_v34, %s8501_s25  ;;  %3068 = vrot.lane.b32.xlu0 %v10182_v34, %s8504_s9 }
 0xaf2   :  { %v10196_v61 = vpop.permute.xlu0 %2673  ;;  %v10198_v25 = vpop.permute.xlu1 %2691 }
 0xaf4   :  { %3162 = vrot.lane.b32.xlu1 %v10171_v38, %s8502_s23  ;;  %2976 = vrot.lane.b32.xlu0 %v10182_v34, %s8503_s4 }
 0xaf6   :  { %v10204_v24 = vpop.permute.xlu0 %2576  ;;  %v10206_v62 = vpop.permute.xlu1 %2600 }
 0xaf8   :  { %3070 = vrot.lane.b32.xlu1 %v10171_v38, %s8504_s9  ;;  %2864 = vrot.lane.b32.xlu0 %v10171_v38, %s14078_s8 }
 0xafa   :  { %v10215_v16 = vpop.permute.xlu0 %3144  ;;  %v10217_v30 = vpop.permute.xlu1 %3146 }
 0xafc   :  { %2978 = vrot.lane.b32.xlu1 %v10171_v38, %s8503_s4  ;;  %2683 = vrot.lane.b32.xlu0 %v10213_v22, %s8500_s29 }
 0xafe   :  { %v10223_v23 = vpop.permute.xlu0 %2960  ;;  %v10225_v32 = vpop.permute.xlu1 %2962 }
 0xb00   :  { %2882 = vrot.lane.b32.xlu1 %v10182_v34, %s14078_s8  ;;  %3252 = vrot.lane.b32.xlu0 %v10182_v34, %s14080_s7 }
 0xb02   :  { %v10234_v17 = vpop.permute.xlu0 %3052  ;;  %v10236_v57 = vpop.permute.xlu1 %3054 }
 0xb04   :  { %2586 = vrot.lane.b32.xlu0 %v10213_v22, %s8501_s25  ;;  %2701 = vrot.lane.b32.xlu1 %v10232_v42, %s8500_s29 }
 0xb06   :  { %v10242_v33 = vpop.permute.xlu0 %2766  ;;  %v10244_v44 = vpop.permute.xlu1 %2784 }
 0xb08   :  { %3164 = vrot.lane.b32.xlu0 %v10232_v42, %s8502_s23  ;;  %3254 = vrot.lane.b32.xlu1 %v10171_v38, %s14080_s7 }
 0xb0a   :  { %v10250_v36 = vpop.permute.xlu0 %2675  ;;  %v10252_v49 = vpop.permute.xlu1 %2693 }
 0xb0c   :  { %2856 = vrot.lane.b32.xlu0 %v10046_v28, %s14078_s8  ;;  %2610 = vrot.lane.b32.xlu1 %v10232_v42, %s8501_s25 }
 0xb0e   :  { %v10258_v54 = vpop.permute.xlu0 %2578  ;;  %v10260_v45 = vpop.permute.xlu1 %2602 }
 0xb10   :  { %3248 = vrot.lane.b32.xlu0 %v10137_v52, %s14080_s7  ;;  %3166 = vrot.lane.b32.xlu1 %v10213_v22, %s8502_s23 }
 0xb12   :  { %v10266_v27 = vpop.permute.xlu0 %3148  ;;  %v10268_v7 = vpop.permute.xlu1 %3150 }
 0xb14   :  { %3072 = vrot.lane.b32.xlu0 %v10232_v42, %s8504_s9  ;;  %2874 = vrot.lane.b32.xlu1 %v10044_v46, %s14078_s8 }
 0xb16   :  { %v10274_v47 = vpop.permute.xlu0 %2964  ;;  %v10276_v9 = vpop.permute.xlu1 %2966 }
 0xb18   :  { %3244 = vrot.lane.b32.xlu0 %v10114_v56, %s14080_s7  ;;  %3250 = vrot.lane.b32.xlu1 %v10144_v6, %s14080_s7  ;;  %v2796_v56 = vsel %vm2794_vm12, %v10244_v44, %v10242_v33 }
 0xb1a   :  { %v10282_v11 = vpop.permute.xlu0 %3056  ;;  %v10284_v43 = vpop.permute.xlu1 %3058 }
 0xb1b   :  { %14251 = vst [vmem:[#allocation15_spill] sm:$0xff] %v10282_v11  ;;  %14252 = vst [vmem:[#allocation16_spill] sm:$0xff] %v10284_v43  ;;  %v2721_v11 = vsel %vm1144_vm10, %v10196_v61, %v10198_v25 }
 0xb1c   :  { %2772 = vrot.lane.b32.xlu0 %v10171_v38, %s8499_s10  ;;  %3074 = vrot.lane.b32.xlu1 %v10213_v22, %s8504_s9 }
 0xb1e   :  { %v10290_v55 = vpop.permute.xlu0 %2858  ;;  %v10292_v63 = vpop.permute.xlu1 %2876 }
 0xb1f   :  { %14253 = vst [vmem:[#allocation17_spill] sm:$0xff] %v10290_v55  ;;  %14254 = vst [vmem:[#allocation18_spill] sm:$0xff] %v10292_v63 }
 0xb20   :  { %2980 = vrot.lane.b32.xlu0 %v10232_v42, %s8503_s4  ;;  %3246 = vrot.lane.b32.xlu1 %v10107_v21, %s14080_s7  ;;  %v2814_v21 = vsel %vm2794_vm12, %v10242_v33, %v10244_v44 }
 0xb22   :  { %v10298_v31 = vpop.permute.xlu0 %2677  ;;  %v2769_v15 = vpop.permute.xlu1 %2768 }
 0xb24   :  { %2866 = vrot.lane.b32.xlu0 %v10213_v22, %s14078_s8  ;;  %2790 = vrot.lane.b32.xlu1 %v10182_v34, %s8499_s10  ;;  %v8323_v34 = vld [vmem:[%s14038_s2 + $0x6] ss:$8 sm:$0x3] }
 0xb25   :  { %v10501_v43 = vrot.slane %v8323_v34, %v9244_v10 }
 0xb26   :  { %v10304_v5 = vpop.permute.xlu0 %2580  ;;  %v2787_v12 = vpop.permute.xlu1 %2786 }
 0xb28   :  { %3256 = vrot.lane.b32.xlu0 %v10232_v42, %s14080_s7  ;;  %2982 = vrot.lane.b32.xlu1 %v10213_v22, %s8503_s4 }
 0xb2a   :  { %v10310_v26 = vpop.permute.xlu0 %3152  ;;  %v10312_v41 = vpop.permute.xlu1 %2695 }
 0xb2c   :  { %3240 = vrot.lane.b32.xlu0 %v10073_v58, %s14080_s7  ;;  %2884 = vrot.lane.b32.xlu1 %v10232_v42, %s14078_s8 }
 0xb2e   :  { %v10318_v20 = vpop.permute.xlu0 %3060  ;;  %v10320_v29 = vpop.permute.xlu1 %2604 }
 0xb2f   :  { %14255 = vst [vmem:[#allocation19_spill] sm:$0xff] %v10318_v20 }
 0xb30   :  { %2774 = vrot.lane.b32.xlu0 %v10213_v22, %s8499_s10  ;;  %3258 = vrot.lane.b32.xlu1 %v10213_v22, %s14080_s7 }
 0xb32   :  { %v10329_v50 = vpop.permute.xlu0 %2968  ;;  %v10331_v51 = vpop.permute.xlu1 %3154 }
 0xb33   :  { %14256 = vst [vmem:[#allocation20_spill] sm:$0xff] %v10329_v50 }
 0xb34   :  { %3236 = vrot.lane.b32.xlu0 %v10044_v46, %s14080_s7  ;;  %3242 = vrot.lane.b32.xlu1 %v10076_v37, %s14080_s7  ;;  %v2797_v46 = vsel %vm2794_vm12, %v2787_v12, %v2769_v15 }
 0xb36   :  { %v10344_v59 = vpop.permute.xlu0 %2860  ;;  %v10346_v2 = vpop.permute.xlu1 %3062 }
 0xb37   :  { %14257 = vst [vmem:[#allocation21_spill] sm:$0xff] %v10344_v59  ;;  %14258 = vst [vmem:[#allocation22_spill] sm:$0xff] %v10346_v2 }
 0xb38   :  { %3483 = vperm.xlu0 %8403, %v3463_v53   ;;  %2792 = vrot.lane.b32.xlu1 %v10232_v42, %s8499_s10 }
 0xb3a   :  { %v2789_v18 = vpop.permute.xlu0 %2788  ;;  %v10353_v14 = vpop.permute.xlu1 %2970 }
 0xb3b   :  { %14259 = vst [vmem:[#allocation23_spill] sm:$0xff] %v10353_v14 }
 0xb3c   :  { %3473 = vperm.xlu0 %8403, %v3461_v3   ;;  %3238 = vrot.lane.b32.xlu1 %v10046_v28, %s14080_s7  ;;  %v10379_v3 = vrot.slane %v8320_v4, %v9250_v13  ;;  %v3464_v4 = vld [vmem:[%s14037_s13 + $0x20] sm:$0xff] }
 0xb3e   :  { %v10363_v19 = vpop.permute.xlu0 %2679  ;;  %v10365_v40 = vpop.permute.xlu1 %2878  ;;  %14262 = vst [vmem:[#allocation26_spill] sm:$0xff] %v10379_v3  ;;  %v2835_v33 = vmul.f32 %v10379_v3, %v2796_v56 }
 0xb3f   :  { %14260 = vst [vmem:[#allocation24_spill] sm:$0xff] %v10365_v40 }
 0xb40   :  { %3493 = vperm.xlu0 %8403, %v3465_v0   ;;  %3478 = vperm.xlu1 %8404, %v3462_v8   ;;  %v2815_v8 = vsel %vm2794_vm12, %v2769_v15, %v2787_v12  ;;  %v2837_v12 = vmul.f32 %v10379_v3, %v2797_v46 }
 0xb42   :  { %v10376_v39 = vpop.permute.xlu0 %2582  ;;  %v2771_v53 = vpop.permute.xlu1 %2770 }
 0xb43   :  { %v2798_v28 = vsel %vm2794_vm12, %v2789_v18, %v2771_v53  ;;  %v2816_v0 = vsel %vm2794_vm12, %v2771_v53, %v2789_v18  ;;  %v2813_v53 = vsel %vm2794_vm12, %v10188_v1, %v10190_v35 }
 0xb44   :  { %v2838_v58 = vmul.f32 %v10374_v48, %v2816_v0  ;;  %3468 = vperm.xlu1 %8404, %v3460_v60   ;;  %v2839_v37 = vmul.f32 %v10379_v3, %v2798_v28  ;;  %v2795_v28 = vsel %vm2794_vm12, %v10190_v35, %v10188_v1  ;;  %v2836_v60 = vmul.f32 %v10374_v48, %v2815_v8 }
 0xb45   :  { %v2833_v0 = vmul.f32 %v10379_v3, %v2795_v28 }
 0xb46   :  { %v10396_v18 = vpop.permute.xlu0 %3156  ;;  %3515 = vmatprep.subr.mxu0 %v2839_v37  ;;  %v10398_v15 = vpop.permute.xlu1 %2697  ;;  %v2834_v37 = vmul.f32 %v10374_v48, %v2814_v21 }
 0xb47   :  { %3516 = vmatpush1.msra.mxu0 %v2838_v58  ;;  %v2832_v58 = vmul.f32 %v10374_v48, %v2813_v53 }
 0xb48   :  { %3488 = vperm.xlu1 %8404, %v3464_v4   ;;  %3517 = vmatprep.subr.mxu0 %v2837_v12 }
 0xb49   :  { %3518 = vmatpush1.msra.mxu0 %v2836_v60 }
 0xb4a   :  { %v10410_v44 = vpop.permute.xlu0 %3064  ;;  %3519 = vmatprep.subr.mxu0 %v2835_v33  ;;  %v10412_v46 = vpop.permute.xlu1 %2606 }
 0xb4b   :  { %3520 = vmatpush1.msra.mxu0 %v2834_v37 }
 0xb4c   :  { %3521 = vmatprep.subr.mxu0 %v2833_v0 }
 0xb4d   :  { %3522 = vmatpush1.msra.mxu0 %v2832_v58 }
 0xb4e   :  { %v10416_v1 = vpop.permute.xlu0 %2972  ;;  %v10418_v35 = vpop.permute.xlu1 %3158 }
 0xb4f   :  { %14263 = vst [vmem:[#allocation27_spill] sm:$0xff] %v10416_v1 }
 0xb52   :  { %v10420_v56 = vpop.permute.xlu0 %2862  ;;  %v10422_v21 = vpop.permute.xlu1 %3066 }
 0xb53   :  { %14264 = vst [vmem:[#allocation28_spill] sm:$0xff] %v10420_v56  ;;  %14265 = vst [vmem:[#allocation29_spill] sm:$0xff] %v10422_v21  ;;  %v2706_v21 = vsel %vm1144_vm10, %v10398_v15, %v10363_v19 }
 0xb56   :  { %v2682_v8 = vpop.permute.xlu0 %2681  ;;  %v10424_v4 = vpop.permute.xlu1 %2974 }
 0xb57   :  { %14266 = vst [vmem:[#allocation30_spill] sm:$0xff] %v10424_v4  ;;  %v2637_v4 = vld [vmem:[%s14038_s2] ss:$8 sm:$0x3] }
 0xb58   :  { %v10466_v40 = vrot.slane %v2637_v4, %v9244_v10 }
 0xb5a   :  { %v10426_v12 = vpop.permute.xlu0 %2584  ;;  %v10428_v60 = vpop.permute.xlu1 %2880 }
 0xb5b   :  { %14267 = vst [vmem:[#allocation31_spill] sm:$0xff] %v10428_v60  ;;  %v8319_v60 = vld [vmem:[%s14038_s2 + $0x1] ss:$8 sm:$0x3] }
 0xb5c   :  { %v2737_v59 = vrot.slane %v8319_v60, %v9250_v13 }
 0xb5e   :  { %v10430_v28 = vpop.permute.xlu0 %3160  ;;  %v2700_v53 = vpop.permute.xlu1 %2699 }
 0xb5f   :  { %v2707_v50 = vsel %vm1144_vm10, %v2700_v53, %v2682_v8  ;;  %v2725_v55 = vsel %vm1144_vm10, %v2682_v8, %v2700_v53 }
 0xb60   :  { %v2749_v53 = vmul.f32 %v2737_v59, %v2707_v50  ;;  %v2723_v50 = vsel %vm1144_vm10, %v10298_v31, %v10312_v41 }
 0xb62   :  { %v10432_v33 = vpop.permute.xlu0 %3068  ;;  %v10434_v37 = vpop.permute.xlu1 %2608 }
 0xb66   :  { %v10436_v0 = vpop.permute.xlu0 %2976  ;;  %v10438_v58 = vpop.permute.xlu1 %3162 }
 0xb67   :  { %14268 = vst [vmem:[#allocation32_spill] sm:$0xff] %v10436_v0  ;;  %v10460_v0 = vrot.slane %v8319_v60, %v9244_v10 }
 0xb6a   :  { %v10440_v3 = vpop.permute.xlu0 %2864  ;;  %v10442_v48 = vpop.permute.xlu1 %3070 }
 0xb6b   :  { %14269 = vst [vmem:[#allocation33_spill] sm:$0xff] %v10440_v3  ;;  %v8324_v3 = vld [vmem:[%s14038_s2 + $0x7] ss:$8 sm:$0x3] }
 0xb6c   :  { %v10481_v22 = vrot.slane %v8324_v3, %v9250_v13 }
 0xb6e   :  { %v2684_v56 = vpop.permute.xlu0 %2683  ;;  %v10444_v1 = vpop.permute.xlu1 %2978 }
 0xb6f   :  { %14270 = vst [vmem:[#allocation34_spill] sm:$0xff] %v10444_v1  ;;  %v8322_v1 = vld [vmem:[%s14038_s2 + $0x5] ss:$8 sm:$0x3] }
 0xb70   :  { %v10484_v60 = vrot.slane %v8322_v1, %v9244_v10 }
 0xb72   :  { %v10452_v52 = vpop.permute.xlu0 %3252  ;;  %v10454_v6 = vpop.permute.xlu1 %2882 }
 0xb73   :  { %14271 = vst [vmem:[#allocation35_spill] sm:$0xff] %v10452_v52  ;;  %14272 = vst [vmem:[#allocation36_spill] sm:$0xff] %v10454_v6  ;;  %v10470_v52 = vrot.slane %v2637_v4, %v9250_v13  ;;  %v10473_v6 = vrot.slane %v8324_v3, %v9244_v10  ;;  %v8321_v4 = vld [vmem:[%s14038_s2 + $0x3] ss:$8 sm:$0x3]  ;;  %v10495_v3 = vrot.slane %v8322_v1, %v9250_v13 }
 0xb74   :  { %v2724_v1 = vsel %vm1144_vm10, %v10363_v19, %v10398_v15  ;;  %v8325_v19 = vld [vmem:[%s14038_s2 + $0x10] ss:$8 sm:$0x3]  ;;  %v2747_v15 = vmul.f32 %v2737_v59, %v2706_v21 }
 0xb76   :  { %v10478_v38 = vpop.permute.xlu0 %2586  ;;  %v2702_v42 = vpop.permute.xlu1 %2701 }
 0xb77   :  { %v2708_v14 = vsel %vm1144_vm10, %v2702_v42, %v2684_v56  ;;  %v2726_v63 = vsel %vm1144_vm10, %v2684_v56, %v2702_v42  ;;  %v10507_v42 = vrot.slane %v8323_v34, %v9250_v13  ;;  %v2613_v34 = vsel %vm2612_vm13, %v10206_v62, %v10204_v24 }
 0xb78   :  { %v2750_v2 = vmul.f32 %v10460_v0, %v2726_v63  ;;  %v2751_v20 = vmul.f32 %v2737_v59, %v2708_v14  ;;  %v2703_v63 = vsel %vm1144_vm10, %v10198_v25, %v10196_v61  ;;  %v10513_v14 = vrot.slane %v8321_v4, %v9244_v10 }
 0xb79   :  { %v2631_v61 = vsel %vm2612_vm13, %v10204_v24, %v10206_v62  ;;  %v2705_v25 = vsel %vm1144_vm10, %v10312_v41, %v10298_v31  ;;  %v10538_v24 = vrot.slane %v8321_v4, %v9250_v13  ;;  %v3169_v62 = vsel %vm3168_vm14, %v10215_v16, %v10217_v30 }
 0xb7a   :  { %14273 = vst [vmem:[#allocation37_spill] sm:$0xff] %v10513_v14  ;;  %v3165_v56 = vpop.permute.xlu0 %3164  ;;  %3523 = vmatprep.subr.mxu0 %v2751_v20  ;;  %v10518_v8 = vpop.permute.xlu1 %3254  ;;  %v2748_v14 = vmul.f32 %v10460_v0, %v2725_v55  ;;  %v2740_v20 = vmul.f32 %v10460_v0, %v2721_v11  ;;  %v2704_v11 = vsel %vm1144_vm10, %v10252_v49, %v10250_v36 }
 0xb7b   :  { %14274 = vst [vmem:[#allocation38_spill] sm:$0xff] %v10518_v8  ;;  %3524 = vmatpush1.msra.mxu0 %v2750_v2  ;;  %v2746_v55 = vmul.f32 %v10460_v0, %v2724_v1  ;;  %v2741_v31 = vmul.f32 %v2737_v59, %v2703_v63  ;;  %v10548_v41 = vmul.f32 %v10466_v40, %v2631_v61 }
 0xb7c   :  { %3525 = vmatprep.subr.mxu0 %v2749_v53  ;;  %v2722_v2 = vsel %vm1144_vm10, %v10250_v36, %v10252_v49  ;;  %v2745_v53 = vmul.f32 %v2737_v59, %v2705_v25  ;;  %v10556_v8 = vmul.f32 %v10470_v52, %v2613_v34  ;;  %v2744_v63 = vmul.f32 %v10460_v0, %v2723_v50 }
 0xb7d   :  { %3526 = vmatpush1.msra.mxu0 %v2748_v14  ;;  %v10561_v14 = vsel %vm3168_vm14, %v10217_v30, %v10215_v16  ;;  %v10565_v1 = vrot.slane %v8325_v19, %v9244_v10  ;;  %v10568_v36 = vrot.slane %v8325_v19, %v9250_v13  ;;  %v10571_v49 = vmul.f32 %v10473_v6, %v3169_v62 }
 0xb7e   :  { %v10553_v21 = vpop.permute.xlu0 %2856  ;;  %3527 = vmatprep.subr.mxu0 %v2747_v15  ;;  %v2611_v4 = vpop.permute.xlu1 %2610  ;;  %v10576_v34 = vsel %vm2984_vm15, %v10223_v23, %v10225_v32  ;;  %v10581_v16 = vsel %vm2984_vm15, %v10225_v32, %v10223_v23  ;;  %v2743_v30 = vmul.f32 %v2737_v59, %v2704_v11  ;;  %v2742_v61 = vmul.f32 %v10460_v0, %v2722_v2 }
 0xb7f   :  { %3528 = vmatpush1.msra.mxu0 %v2746_v55  ;;  %v2614_v25 = vsel %vm2612_vm13, %v10260_v45, %v10258_v54  ;;  %v10590_v50 = vsel %vm2612_vm13, %v10258_v54, %v10260_v45  ;;  %v2618_v19 = vsel %vm2612_vm13, %v2611_v4, %v10478_v38  ;;  %v2615_v23 = vsel %vm2612_vm13, %v10320_v29, %v10304_v5 }
 0xb80   :  { %3529 = vmatprep.subr.mxu0 %v2745_v53  ;;  %v2633_v32 = vsel %vm2612_vm13, %v10304_v5, %v10320_v29  ;;  %v2617_v59 = vsel %vm2612_vm13, %v10434_v37, %v10426_v12  ;;  %v2636_v54 = vsel %vm2612_vm13, %v10478_v38, %v2611_v4  ;;  %v2635_v15 = vsel %vm2612_vm13, %v10426_v12, %v10434_v37 }
 0xb81   :  { %3530 = vmatpush1.msra.mxu0 %v2744_v63  ;;  %v3197_v62 = vsel %vm3168_vm14, %v10438_v58, %v10430_v28  ;;  %v3173_v38 = vsel %vm3168_vm14, %v10430_v28, %v10438_v58  ;;  %v2660_v55 = vmul.f32 %v10470_v52, %v2618_v19  ;;  %v2616_v37 = vsel %vm2612_vm13, %v10412_v46, %v10376_v39 }
 0xb82   :  { %v10605_v45 = vpop.permute.xlu0 %3248  ;;  %3531 = vmatprep.subr.mxu0 %v2743_v30  ;;  %v3167_v0 = vpop.permute.xlu1 %3166  ;;  %v3196_v2 = vsel %vm3168_vm14, %v10418_v35, %v10396_v18  ;;  %v2659_v28 = vmul.f32 %v10466_v40, %v2636_v54  ;;  %v3172_v58 = vsel %vm3168_vm14, %v10396_v18, %v10418_v35  ;;  %v2658_v53 = vmul.f32 %v10470_v52, %v2617_v59 }
 0xb83   :  { %v3174_v5 = vsel %vm3168_vm14, %v3165_v56, %v3167_v0  ;;  %v3198_v29 = vsel %vm3168_vm14, %v3167_v0, %v3165_v56  ;;  %3532 = vmatpush1.msra.mxu0 %v2742_v61  ;;  %v2634_v56 = vsel %vm2612_vm13, %v10376_v39, %v10412_v46  ;;  %v3221_v39 = vmul.f32 %v10481_v22, %v3197_v62 }
 0xb84   :  { %v3222_v11 = vmul.f32 %v10473_v6, %v3174_v5  ;;  %3533 = vmatprep.subr.mxu0 %v2741_v31  ;;  %v3223_v12 = vmul.f32 %v10481_v22, %v3198_v29  ;;  %v3195_v46 = vsel %vm3168_vm14, %v10331_v51, %v10310_v26  ;;  %v2657_v63 = vmul.f32 %v10466_v40, %v2635_v15 }
 0xb85   :  { %3534 = vmatpush1.msra.mxu0 %v2740_v20  ;;  %v3220_v20 = vmul.f32 %v10473_v6, %v3173_v38  ;;  %v3171_v18 = vsel %vm3168_vm14, %v10310_v26, %v10331_v51  ;;  %v2656_v35 = vmul.f32 %v10470_v52, %v2616_v37  ;;  %v3219_v30 = vmul.f32 %v10481_v22, %v3196_v2  ;;  %v14275_v37 = vld [vmem:[#allocation29_spill] sm:$0xff] }
 0xb86   :  { %v3073_v31 = vpop.permute.xlu0 %3072  ;;  %3535 = vmatprep.subr.mxu0 %v2660_v55  ;;  %3616 = vmatprep.subr.mxu1 %v3223_v12  ;;  %v10634_v4 = vpop.permute.xlu1 %2874  ;;  %v3194_v61 = vsel %vm3168_vm14, %v10268_v7, %v10266_v27  ;;  %v2655_v19 = vmul.f32 %v10466_v40, %v2634_v56  ;;  %v3218_v59 = vmul.f32 %v10473_v6, %v3172_v58  ;;  %v14276_v58 = vld [vmem:[#allocation16_spill] sm:$0xff] }
 0xb87   :  { %3536 = vmatpush1.msra.mxu0 %v2659_v28  ;;  %3617 = vmatpush1.msra.mxu1 %v3222_v11  ;;  %v3170_v26 = vsel %vm3168_vm14, %v10266_v27, %v10268_v7  ;;  %v2654_v0 = vmul.f32 %v10470_v52, %v2615_v23  ;;  %v3217_v15 = vmul.f32 %v10481_v22, %v3195_v46 }
 0xb88   :  { %3537 = vmatprep.subr.mxu0 %v2658_v53  ;;  %3618 = vmatprep.subr.mxu1 %v3221_v39  ;;  %v3010_v62 = vsel %vm2984_vm15, %v10276_v9, %v10274_v47  ;;  %v2653_v5 = vmul.f32 %v10466_v40, %v2633_v32  ;;  %v3216_v29 = vmul.f32 %v10473_v6, %v3171_v18  ;;  %v14279_v53 = vld [vmem:[#allocation22_spill] sm:$0xff] }
 0xb89   :  { %3538 = vmatpush1.msra.mxu0 %v2657_v63  ;;  %3619 = vmatpush1.msra.mxu1 %v3220_v20  ;;  %v2652_v27 = vmul.f32 %v10470_v52, %v2614_v25  ;;  %v3215_v7 = vmul.f32 %v10481_v22, %v3194_v61  ;;  %v3213_v23 = vmul.f32 %v10481_v22, %v10561_v14  ;;  %v14280_v63 = vld [vmem:[#allocation17_spill] sm:$0xff]  ;;  %v14281_v20 = vld [vmem:[#allocation18_spill] sm:$0xff]  ;;  %v14282_v61 = vld [vmem:[#allocation23_spill] sm:$0xff] }
 0xb8a   :  { %v10656_v51 = vpop.permute.xlu0 %3244  ;;  %3539 = vmatprep.subr.mxu0 %v2656_v35  ;;  %3620 = vmatprep.subr.mxu1 %v3219_v30  ;;  %v10658_v54 = vpop.permute.xlu1 %3250  ;;  %v3028_v38 = vmul.f32 %v10484_v60, %v10576_v34  ;;  %v2651_v11 = vmul.f32 %v10466_v40, %v10590_v50  ;;  %v3214_v32 = vmul.f32 %v10473_v6, %v3170_v26 }
 0xb8b   :  { %3540 = vmatpush1.msra.mxu0 %v2655_v19  ;;  %3621 = vmatpush1.msra.mxu1 %v3218_v59  ;;  %v2986_v52 = vsel %vm2984_vm15, %v10274_v47, %v10276_v9  ;;  %v3031_v14 = vmul.f32 %v10495_v3, %v3010_v62  ;;  %v3029_v34 = vmul.f32 %v10495_v3, %v10581_v16  ;;  %v14283_v19 = vld [vmem:[#allocation20_spill] sm:$0xff] }
 0xb8c   :  { %3541 = vmatprep.subr.mxu0 %v2654_v0  ;;  %3622 = vmatprep.subr.mxu1 %v3217_v15  ;;  %v3105_v6 = vsel %vm3076_vm0, %v10442_v48, %v10432_v33  ;;  %v3081_v47 = vsel %vm3076_vm0, %v10432_v33, %v10442_v48  ;;  %v3077_v55 = vsel %vm3076_vm0, %v10234_v17, %v10236_v57  ;;  %v14284_v15 = vld [vmem:[#allocation13_spill] sm:$0xff] }
 0xb8d   :  { %3542 = vmatpush1.msra.mxu0 %v2653_v5  ;;  %3623 = vmatpush1.msra.mxu1 %v3216_v29  ;;  %v3030_v12 = vmul.f32 %v10484_v60, %v2986_v52  ;;  %v3104_v56 = vsel %vm3076_vm0, %v14275_v37, %v10410_v44  ;;  %v3101_v48 = vsel %vm3076_vm0, %v10236_v57, %v10234_v17  ;;  %v14287_v52 = vld [vmem:[#allocation11_spill] sm:$0xff] }
 0xb8e   :  { %v10679_v25 = vpop.permute.xlu0 %2772  ;;  %3543 = vmatprep.subr.mxu0 %v2652_v27  ;;  %3624 = vmatprep.subr.mxu1 %v3215_v7  ;;  %v3075_v22 = vpop.permute.xlu1 %3074  ;;  %v3080_v33 = vsel %vm3076_vm0, %v10410_v44, %v14275_v37  ;;  %v3129_v28 = vmul.f32 %v10507_v42, %v3105_v6  ;;  %v3128_v57 = vmul.f32 %v10501_v43, %v3081_v47  ;;  %v14285_v7 = vld [vmem:[#allocation14_spill] sm:$0xff] }
 0xb8f   :  { %v3082_v40 = vsel %vm3076_vm0, %v3073_v31, %v3075_v22  ;;  %v3106_v50 = vsel %vm3076_vm0, %v3075_v22, %v3073_v31  ;;  %3544 = vmatpush1.msra.mxu0 %v2651_v11  ;;  %3625 = vmatpush1.msra.mxu1 %v3214_v32  ;;  %v14278_v31 = vld [vmem:[#allocation19_spill] sm:$0xff]  ;;  %v3127_v46 = vmul.f32 %v10507_v42, %v3104_v56  ;;  %v14286_v11 = vld [vmem:[#allocation37_spill] sm:$0xff] }
 0xb90   :  { %v3130_v9 = vmul.f32 %v10501_v43, %v3082_v40  ;;  %3545 = vmatprep.subr.mxu0 %v10556_v8  ;;  %3626 = vmatprep.subr.mxu1 %v3213_v23  ;;  %v3131_v16 = vmul.f32 %v10507_v42, %v3106_v50  ;;  %v3103_v17 = vsel %vm3076_vm0, %v14279_v53, %v14278_v31  ;;  %v14290_v50 = vld [vmem:[#allocation24_spill] sm:$0xff] }
 0xb91   :  { %3546 = vmatpush1.msra.mxu0 %v10548_v41  ;;  %3627 = vmatpush1.msra.mxu1 %v10571_v49  ;;  %v14277_v41 = vld [vmem:[#allocation15_spill] sm:$0xff]  ;;  %v3079_v39 = vsel %vm3076_vm0, %v14278_v31, %v14279_v53  ;;  %v2888_v18 = vsel %vm2886_vm1, %v14281_v20, %v14280_v63  ;;  %v2906_v35 = vsel %vm2886_vm1, %v14280_v63, %v14281_v20  ;;  %v14300_v20 = vld [vmem:[#allocation8_spill] sm:$0xff] }
 0xb92   :  { %v2981_v8 = vpop.permute.xlu0 %2980  ;;  %3547 = vmatprep.subr.mxu0 %v3031_v14  ;;  %3628 = vmatprep.subr.mxu1 %v3131_v16  ;;  %v10710_v2 = vpop.permute.xlu1 %3246  ;;  %v3078_v49 = vsel %vm3076_vm0, %v14277_v41, %v14276_v58  ;;  %v3102_v44 = vsel %vm3076_vm0, %v14276_v58, %v14277_v41  ;;  %v3126_v30 = vmul.f32 %v10501_v43, %v3080_v33  ;;  %v14292_v16 = vld [vmem:[#allocation32_spill] sm:$0xff]  ;;  %v14295_v58 = vld [vmem:[#allocation30_spill] sm:$0xff]  ;;  %v14296_v41 = vld [vmem:[#allocation27_spill] sm:$0xff] }
 0xb93   :  { %3548 = vmatpush2.msra.mxu0 %v3030_v12  ;;  %3629 = vmatpush1.msra.mxu1 %v3130_v9  ;;  %v2987_v59 = vsel %vm2984_vm15, %v14283_v19, %v14282_v61  ;;  %v3011_v26 = vsel %vm2984_vm15, %v14282_v61, %v14283_v19  ;;  %v3125_v5 = vmul.f32 %v10507_v42, %v3103_v17  ;;  %v14293_v12 = vld [vmem:[#allocation10_spill] sm:$0xff]  ;;  %v14297_v17 = vld [vmem:[#allocation7_spill] sm:$0xff] }
 0xb94   :  { %3549 = vmatprep.subr.mxu0 %v3029_v34  ;;  %3630 = vmatprep.subr.mxu1 %v3129_v28  ;;  %v3120_v29 = vmul.f32 %v10501_v43, %v3077_v55  ;;  %v3124_v27 = vmul.f32 %v10501_v43, %v3079_v39  ;;  %v3121_v23 = vmul.f32 %v10507_v42, %v3101_v48  ;;  %v14288_v34 = vld [vmem:[#allocation12_spill] sm:$0xff]  ;;  %v14294_v28 = vld [vmem:[#allocation9_spill] sm:$0xff]  ;;  %v14299_v39 = vld [vmem:[#allocation31_spill] sm:$0xff] }
 0xb95   :  { %3550 = vmatpush2.msra.mxu0 %v3028_v38  ;;  %3631 = vmatpush1.msra.mxu1 %v3128_v57  ;;  %v3122_v38 = vmul.f32 %v10501_v43, %v3078_v49  ;;  %v10750_v32 = vmul.f32 %v14286_v11, %v2906_v35  ;;  %v3123_v22 = vmul.f32 %v10507_v42, %v3102_v44  ;;  %v14289_v43 = vld [vmem:[#allocation21_spill] sm:$0xff]  ;;  %v14291_v42 = vld [vmem:[#allocation34_spill] sm:$0xff]  ;;  %v14303_v19 = vld [vmem:[#allocation3_spill] sm:$0xff] }
 0xb96   :  { %v2867_v0 = vpop.permute.xlu0 %2866  ;;  %3551 = vmatprep.subr.mxu0 %v14284_v15  ;;  %3632 = vmatprep.subr.mxu1 %v3127_v46  ;;  %v10741_v62 = vpop.permute.xlu1 %2790  ;;  %v10755_v14 = vmul.f32 %v10484_v60, %v2987_v59  ;;  %v3033_v6 = vmul.f32 %v10495_v3, %v3011_v26  ;;  %v10760_v40 = vmul.f32 %v10538_v24, %v2888_v18  ;;  %v14301_v35 = vld [vmem:[#allocation33_spill] sm:$0xff] }
 0xb97   :  { %3552 = vmatpush2.msra.mxu0 %v14285_v7  ;;  %3633 = vmatpush1.msra.mxu1 %v3126_v30  ;;  %v2889_v47 = vsel %vm2886_vm1, %v14290_v50, %v14289_v43  ;;  %v10768_v9 = vsel %vm2886_vm1, %v14289_v43, %v14290_v50  ;;  %v2989_v55 = vsel %vm2984_vm15, %v14292_v16, %v14291_v42  ;;  %v14302_v30 = vld [vmem:[#allocation36_spill] sm:$0xff] }
 0xb98   :  { %3553 = vmatprep.subr.mxu0 %v14287_v52  ;;  %3634 = vmatprep.subr.mxu1 %v3125_v5  ;;  %v3013_v56 = vsel %vm2984_vm15, %v14291_v42, %v14292_v16  ;;  %v2988_v49 = vsel %vm2984_vm15, %v14296_v41, %v14295_v58  ;;  %v3012_v44 = vsel %vm2984_vm15, %v14295_v58, %v14296_v41  ;;  %v14308_v41 = vld [vmem:[#allocation38_spill] sm:$0xff] }
 0xb99   :  { %3554 = vmatpush2.msra.mxu0 %v14288_v34  ;;  %3635 = vmatpush1.msra.mxu1 %v3124_v27  ;;  %v3036_v18 = vmul.f32 %v10484_v60, %v2989_v55  ;;  %v2891_v61 = vsel %vm2886_vm1, %v14302_v30, %v14301_v35  ;;  %v3037_v26 = vmul.f32 %v10495_v3, %v3013_v56  ;;  %v14306_v55 = vld [vmem:[#allocation6_spill] sm:$0xff] }
 0xb9a   :  { %3555 = vmatprep.subr.mxu0 %v14293_v12  ;;  %3636 = vmatprep.subr.mxu1 %v3123_v22  ;;  %v2983_v37 = vpop.permute.xlu1 %2982  ;;  %v3257_v31 = vpop.permute.xlu0 %3256  ;;  %v2909_v5 = vsel %vm2886_vm1, %v14301_v35, %v14302_v30  ;;  %v14305_v22 = vld [vmem:[#allocation5_spill] sm:$0xff]  ;;  %v3035_v50 = vmul.f32 %v10495_v3, %v3012_v44  ;;  %v3034_v42 = vmul.f32 %v10484_v60, %v2988_v49  ;;  %v4706_v12 = vld [vmem:[%s14040_s15 + $0x28] sm:$0xff] }
 0xb9b   :  { %v2990_v48 = vsel %vm2984_vm15, %v2981_v8, %v2983_v37  ;;  %v3014_v33 = vsel %vm2984_vm15, %v2983_v37, %v2981_v8  ;;  %3556 = vmatpush2.msra.mxu0 %v14294_v28  ;;  %3637 = vmatpush1.msra.mxu1 %v3122_v38  ;;  %v14298_v8 = vld [vmem:[#allocation28_spill] sm:$0xff]  ;;  %v2932_v37 = vmul.f32 %v14286_v11, %v2909_v5 }
 0xb9c   :  { %v3038_v53 = vmul.f32 %v10484_v60, %v2990_v48  ;;  %3557 = vmatprep.subr.mxu0 %v14297_v17  ;;  %3638 = vmatprep.subr.mxu1 %v3121_v23  ;;  %v3039_v57 = vmul.f32 %v10495_v3, %v3014_v33  ;;  %v2890_v46 = vsel %vm2886_vm1, %v14299_v39, %v14298_v8  ;;  %v14304_v23 = vld [vmem:[#allocation4_spill] sm:$0xff]  ;;  %v14307_v3 = vld [vmem:[#allocation35_spill] sm:$0xff] }
 0xb9d   :  { %v2908_v63 = vsel %vm2886_vm1, %v14298_v8, %v14299_v39  ;;  %3558 = vmatpush2.msra.mxu0 %v14300_v20  ;;  %3639 = vmatpush1.msra.mxu1 %v3120_v29  ;;  %v2933_v33 = vmul.f32 %v10538_v24, %v2891_v61  ;;  %v2931_v58 = vmul.f32 %v10538_v24, %v2890_v46  ;;  %v8333_v17 = vld [vmem:[%s14038_s2 + $0x2] ss:$8 sm:$0x3] }
 0xb9e   :  { %3559 = vmatprep.subr.mxu0 %v14303_v19  ;;  %3640 = vmatprep.subr.mxu1 %v3039_v57  ;;  %v2885_v59 = vpop.permute.xlu1 %2884  ;;  %v2930_v16 = vmul.f32 %v14286_v11, %v2908_v63  ;;  %v3241_v56 = vpop.permute.xlu0 %3240  ;;  %v3289_v60 = vsel %vm3260_vm9, %v14308_v41, %v14307_v3  ;;  %v2887_v8 = vsel %vm2886_vm1, %v10634_v4, %v10553_v21 }
 0xb9f   :  { %v2892_v27 = vsel %vm2886_vm1, %v2885_v59, %v2867_v0  ;;  %v2910_v29 = vsel %vm2886_vm1, %v2867_v0, %v2885_v59  ;;  %3560 = vmatpush2.msra.mxu0 %v14304_v23  ;;  %3641 = vmatpush1.msra.mxu1 %v3038_v53  ;;  %v2929_v0 = vmul.f32 %v10538_v24, %v2889_v47 }
 0xba0   :  { %v2934_v38 = vmul.f32 %v14286_v11, %v2910_v29  ;;  %3561 = vmatprep.subr.mxu0 %v14305_v22  ;;  %3642 = vmatprep.subr.mxu1 %v3037_v26  ;;  %v2935_v43 = vmul.f32 %v10538_v24, %v2892_v27  ;;  %v3265_v47 = vsel %vm3260_vm9, %v14307_v3, %v14308_v41  ;;  %v14309_v29 = vld [vmem:[#allocation25_spill] sm:$0xff]  ;;  %v3335_v41 = vld [vmem:[%s14036_s12 + $0x38] sm:$0xff] }
 0xba1   :  { %3562 = vmatpush2.msra.mxu0 %v14306_v55  ;;  %3643 = vmatpush1.msra.mxu1 %v3036_v18  ;;  %v3288_v39 = vsel %vm3260_vm9, %v10658_v54, %v10605_v45  ;;  %v3263_v46 = vsel %vm3260_vm9, %v10656_v51, %v10710_v2  ;;  %v3312_v18 = vmul.f32 %v10565_v1, %v3265_v47  ;;  %v3330_v3 = vld [vmem:[%s14036_s12 + $0x10] sm:$0xff]  ;;  %v3341_v47 = vld [vmem:[%s14036_s12 + $0x68] sm:$0xff] }
 0xba2   :  { %3563 = vmatprep.subr.mxu0 %v2935_v43  ;;  %3644 = vmatprep.subr.mxu1 %v3035_v50  ;;  %v3259_v48 = vpop.permute.xlu1 %3258  ;;  %v3311_v35 = vmul.f32 %v10568_v36, %v3288_v39  ;;  %v2925_v30 = vmul.f32 %v10538_v24, %v2887_v8  ;;  %v2817_v26 = vsel %vm2794_vm12, %v10679_v25, %v10741_v62  ;;  %v3340_v8 = vld [vmem:[%s14036_s12 + $0x60] sm:$0xff]  ;;  %v3342_v39 = vld [vmem:[%s14036_s12 + $0x70] sm:$0xff] }
 0xba3   :  { %v3266_v49 = vsel %vm3260_vm9, %v3257_v31, %v3259_v48  ;;  %v3290_v53 = vsel %vm3260_vm9, %v3259_v48, %v3257_v31  ;;  %3564 = vmatpush2.msra.mxu0 %v2934_v38  ;;  %3645 = vmatpush1.msra.mxu1 %v3034_v42  ;;  %v2905_v31 = vsel %vm2886_vm1, %v10553_v21, %v10634_v4 }
 0xba4   :  { %v3314_v57 = vmul.f32 %v10565_v1, %v3266_v49  ;;  %3565 = vmatprep.subr.mxu0 %v2933_v33  ;;  %3646 = vmatprep.subr.mxu1 %v3033_v6  ;;  %v3315_v44 = vmul.f32 %v10568_v36, %v3290_v53  ;;  %v3264_v6 = vsel %vm3260_vm9, %v10605_v45, %v10658_v54  ;;  %v2775_v54 = vpop.permute.xlu0 %2774  ;;  %v3339_v49 = vld [vmem:[%s14036_s12 + $0x58] sm:$0xff]  ;;  %v3336_v53 = vld [vmem:[%s14036_s12 + $0x40] sm:$0xff] }
 0xba5   :  { %3566 = vmatpush2.msra.mxu0 %v2932_v37  ;;  %3647 = vmatpush1.msra.mxu1 %v10755_v14  ;;  %v3313_v21 = vmul.f32 %v10568_v36, %v3289_v60  ;;  %v2928_v4 = vmul.f32 %v14286_v11, %v10768_v9  ;;  %v3287_v14 = vsel %vm3260_vm9, %v10710_v2, %v10656_v51  ;;  %v3334_v60 = vld [vmem:[%s14036_s12 + $0x30] sm:$0xff] }
 0xba6   :  { %3567 = vmatprep.subr.mxu0 %v2931_v58  ;;  %3668 = vmatprep.subr.mxu1 %v3315_v44  ;;  %v3243_v63 = vpop.permute.xlu1 %3242  ;;  %v2924_v45 = vmul.f32 %v14286_v11, %v2905_v31  ;;  %v3310_v61 = vmul.f32 %v10565_v1, %v3264_v6  ;;  %v3308_v9 = vmul.f32 %v10565_v1, %v3263_v46  ;;  %v3333_v58 = vld [vmem:[%s14036_s12 + $0x28] sm:$0xff]  ;;  %v3343_v44 = vld [vmem:[%s14036_s12 + $0x78] sm:$0xff]  ;;  %v3344_v46 = vld [vmem:[%s14036_s12 + $0x80] sm:$0xff] }
 0xba7   :  { %3568 = vmatpush2.msra.mxu0 %v2930_v16  ;;  %3669 = vmatpush2.msra.mxu1 %v3314_v57  ;;  %v3286_v59 = vsel %vm3260_vm9, %v3243_v63, %v3241_v56  ;;  %v2799_v51 = vsel %vm2794_vm12, %v10741_v62, %v10679_v25  ;;  %v3262_v2 = vsel %vm3260_vm9, %v3241_v56, %v3243_v63  ;;  %v3328_v56 = vld [vmem:[%s14036_s12] sm:$0xff]  ;;  %v3338_v57 = vld [vmem:[%s14036_s12 + $0x50] sm:$0xff]  ;;  %v3345_v31 = vld [vmem:[%s14036_s12 + $0x88] sm:$0xff] }
 0xba8   :  { %3569 = vmatprep.subr.mxu0 %v2929_v0  ;;  %3670 = vmatprep.subr.mxu1 %v3313_v21  ;;  %v3309_v24 = vmul.f32 %v10568_v36, %v3287_v14  ;;  %v3307_v50 = vmul.f32 %v10568_v36, %v3286_v59  ;;  %v3306_v42 = vmul.f32 %v10565_v1, %v3262_v2  ;;  %v3237_v25 = vpop.permute.xlu0 %3236  ;;  %v3347_v6 = vld [vmem:[%s14036_s12 + $0x98] sm:$0xff]  ;;  %v3349_v63 = vld [vmem:[%s14036_s12 + $0xa8] sm:$0xff]  ;;  %v3346_v21 = vld [vmem:[%s14036_s12 + $0x90] sm:$0xff] }
 0xba9   :  { %3570 = vmatpush2.msra.mxu0 %v2928_v4  ;;  %3671 = vmatpush2.msra.mxu1 %v3312_v18  ;;  %v3351_v4 = vld [vmem:[%s14036_s12 + $0xb8] sm:$0xff]  ;;  %v3348_v18 = vld [vmem:[%s14036_s12 + $0xa0] sm:$0xff]  ;;  %v3350_v14 = vld [vmem:[%s14036_s12 + $0xb0] sm:$0xff]  ;;  %v11321_v23 = vrot.slane %v8333_v17, %v9244_v10  ;;  %v11326_v22 = vrot.slane %v8333_v17, %v9250_v13 }
 0xbaa   :  { %3571 = vmatprep.subr.mxu0 %v10760_v40  ;;  %3672 = vmatprep.subr.mxu1 %v3311_v35  ;;  %v2793_v11 = vpop.permute.xlu1 %2792  ;;  %v14310_v40 = vld [vmem:[#allocation26_spill] sm:$0xff]  ;;  %v4705_v17 = vld [vmem:[%s14040_s15 + $0x20] sm:$0xff] }
 0xbab   :  { %v2800_v5 = vsel %vm2794_vm12, %v2793_v11, %v2775_v54  ;;  %v2818_v27 = vsel %vm2794_vm12, %v2775_v54, %v2793_v11  ;;  %3572 = vmatpush2.msra.mxu0 %v10750_v32  ;;  %3673 = vmatpush2.msra.mxu1 %v3310_v61  ;;  %v2841_v16 = vmul.f32 %v14310_v40, %v2799_v51 }
 0xbac   :  { %v2842_v38 = vmul.f32 %v14309_v29, %v2818_v27  ;;  %3573 = vmatprep.subr.mxu0 %v2925_v30  ;;  %3674 = vmatprep.subr.mxu1 %v3309_v24  ;;  %v2843_v43 = vmul.f32 %v14310_v40, %v2800_v5  ;;  %v2840_v32 = vmul.f32 %v14309_v29, %v2817_v26 }
 0xbad   :  { %3574 = vmatpush2.msra.mxu0 %v2924_v45  ;;  %3675 = vmatpush2.msra.mxu1 %v3308_v9  ;;  %14335 = vst [vmem:[#allocation25_spill] sm:$0xff] %v11321_v23  ;;  %14336 = vst [vmem:[#allocation26_spill] sm:$0xff] %v11326_v22 }
 0xbae   :  { %3575 = vmatprep.subr.mxu0 %v2843_v43  ;;  %3676 = vmatprep.subr.mxu1 %v3307_v50  ;;  %v3239_v62 = vpop.permute.xlu1 %3238 }
 0xbaf   :  { %v3261_v0 = vsel %vm3260_vm9, %v3237_v25, %v3239_v62  ;;  %v3285_v37 = vsel %vm3260_vm9, %v3239_v62, %v3237_v25  ;;  %3576 = vmatpush2.msra.mxu0 %v2842_v38  ;;  %3677 = vmatpush2.msra.mxu1 %v3306_v42 }
 0xbb0   :  { %v3304_v48 = vmul.f32 %v10565_v1, %v3261_v0  ;;  %3577 = vmatprep.subr.mxu0 %v2841_v16  ;;  %v3305_v33 = vmul.f32 %v10568_v36, %v3285_v37  ;;  %v3332_v1 = vld [vmem:[%s14036_s12 + $0x20] sm:$0xff]  ;;  %v3337_v36 = vld [vmem:[%s14036_s12 + $0x48] sm:$0xff]  ;;  %s14315_s12 = smov 2  }
 0xbb1   :  { %3578 = vmatpush2.msra.mxu0 %v2840_v32 }
 0xbb2   :  { %3580 = vmatmul.mubr.f32.vlgmr.msra.gmra.mxu0 %v3328_v56  ;;  %3678 = vmatprep.subr.mxu1 %v3305_v33 }
 0xbb3   :  { %3679 = vmatpush2.msra.mxu1 %v3304_v48  ;;  %3585 = vmatprep.mubr.f32.mxu0 %v3333_v58  ;;  %v3484_v45 = vpop.permute.xlu0 %3483 }
 0xbb4   :  { %3681 = vmatmul.mubr.f32.vlgmr.msra.gmra.mxu1 %v3330_v3 }
 0xbb5   :  { %8327 = vmatprep.mubr.msk.f32.mxu1 %vm3496_vm11, %v3335_v41 }
 0xbb6   :  { %3586 = vmatmul.mubr.f32.gmra.mxu0 %v3332_v1 }
 0xbb7   :  { %3591 = vmatprep.mubr.f32.mxu0 %v3337_v36  ;;  %v3474_v61 = vpop.permute.xlu0 %3473 }
 0xbb8   :  { %3687 = vmatmul.mubr.f32.gmra.mxu1 %v3334_v60 }
 0xbb9   :  { %8328 = vmatprep.mubr.msk.f32.mxu1 %vm3496_vm11, %v3339_v49 }
 0xbba   :  { %3592 = vmatmul.mubr.f32.gmra.mxu0 %v3336_v53 }
 0xbbb   :  { %3597 = vmatprep.mubr.f32.mxu0 %v3341_v47  ;;  %v3479_v51 = vpop.permute.xlu1 %3478 }
 0xbbc   :  { %3693 = vmatmul.mubr.f32.gmra.mxu1 %v3338_v57 }
 0xbbd   :  { %8329 = vmatprep.mubr.msk.f32.mxu1 %vm3496_vm11, %v3343_v44 }
 0xbbe   :  { %3598 = vmatmul.mubr.f32.gmra.mxu0 %v3340_v8  ;;  %v3494_v8 = vpop.permute.xlu0 %3493 }
 0xbbf   :  { %3603 = vmatprep.mubr.f32.mxu0 %v3345_v31  ;;  %v3469_v42 = vpop.permute.xlu1 %3468 }
 0xbc0   :  { %3699 = vmatmul.mubr.f32.gmra.mxu1 %v3342_v39 }
 0xbc1   :  { %8330 = vmatprep.mubr.msk.f32.mxu1 %vm3496_vm11, %v3347_v6 }
 0xbc2   :  { %3604 = vmatmul.mubr.f32.gmra.mxu0 %v3344_v46 }
 0xbc3   :  { %3609 = vmatprep.mubr.f32.mxu0 %v3349_v63  ;;  %v3489_v60 = vpop.permute.xlu1 %3488 }
 0xbc4   :  { %3705 = vmatmul.mubr.f32.gmra.mxu1 %v3346_v21 }
 0xbc5   :  { %8331 = vmatprep.mubr.msk.f32.mxu1 %vm3496_vm11, %v3351_v4 }
 0xbc6   :  { %3610 = vmatmul.mubr.f32.gmra.mxu0 %v3348_v18 }
 0xbc8   :  { %3711 = vmatmul.mubr.f32.gmra.mxu1 %v3350_v14 }
 0xc72   :  { %v3581_v54 = vpop.f32.mrf.mxu0 }
 0xc73   :  { %v3582_v49 = vadd.f32 %v3581_v54, %v3469_v42 }
 0xc74   :  { %v3583_v35 = vpop.f32.mrf.mxu0  ;;  %v3682_v30 = vpop.f32.mrf.mxu1 }
 0xc75   :  { %v3584_v58 = vadd.f32 %v3583_v35, %v3469_v42  ;;  %v3683_v21 = vadd.f32 %v3682_v30, %v3582_v49 }
 0xc76   :  { %v3587_v9 = vpop.f32.mrf.mxu0  ;;  %v3684_v59 = vpop.f32.mrf.mxu1 }
 0xc77   :  { %v3588_v2 = vadd.f32 %v3587_v9, %v3474_v61  ;;  %v3685_v31 = vadd.f32 %v3684_v59, %v3584_v58 }
 0xc78   :  { %v3589_v11 = vpop.f32.mrf.mxu0  ;;  %v3688_v24 = vpop.f32.mrf.mxu1 }
 0xc79   :  { %v3590_v26 = vadd.f32 %v3589_v11, %v3474_v61  ;;  %v3689_v29 = vadd.f32 %v3688_v24, %v3588_v2  ;;  %v3717_v35 = vadd.f32 %v3685_v31, %v3683_v21 }
 0xc7a   :  { %v3593_v5 = vpop.f32.mrf.mxu0  ;;  %v3690_v27 = vpop.f32.mrf.mxu1 }
 0xc7b   :  { %v3594_v38 = vadd.f32 %v3593_v5, %v3479_v51  ;;  %v3691_v40 = vadd.f32 %v3690_v27, %v3590_v26 }
 0xc7c   :  { %v3595_v43 = vpop.f32.mrf.mxu0  ;;  %v3694_v50 = vpop.f32.mrf.mxu1 }
 0xc7d   :  { %v3720_v25 = vadd.f32 %v3691_v40, %v3689_v29  ;;  %v3596_v62 = vadd.f32 %v3595_v43, %v3479_v51  ;;  %v3695_v0 = vadd.f32 %v3694_v50, %v3594_v38 }
 0xc7e   :  { %v3599_v16 = vpop.f32.mrf.mxu0  ;;  %v3696_v32 = vpop.f32.mrf.mxu1 }
 0xc7f   :  { %v3600_v37 = vadd.f32 %v3599_v16, %v3484_v45  ;;  %v3697_v56 = vadd.f32 %v3696_v32, %v3596_v62  ;;  %3721 = vadd.xlane.f32.xlu0 %v3720_v25 }
 0xc80   :  { %v3601_v48 = vpop.f32.mrf.mxu0  ;;  %v3700_v33 = vpop.f32.mrf.mxu1 }
 0xc81   :  { %v3723_v3 = vadd.f32 %v3697_v56, %v3695_v0  ;;  %v3602_v41 = vadd.f32 %v3601_v48, %v3484_v45  ;;  %v3701_v53 = vadd.f32 %v3700_v33, %v3600_v37 }
 0xc82   :  { %v3605_v1 = vpop.f32.mrf.mxu0  ;;  %v3702_v36 = vpop.f32.mrf.mxu1 }
 0xc83   :  { %v3703_v47 = vadd.f32 %v3702_v36, %v3602_v41  ;;  %3724 = vadd.xlane.f32.xlu1 %v3723_v3  ;;  %v3606_v4 = vadd.f32 %v3605_v1, %v3489_v60 }
 0xc84   :  { %v3607_v57 = vpop.f32.mrf.mxu0  ;;  %v3706_v44 = vpop.f32.mrf.mxu1 }
 0xc85   :  { %v3726_v39 = vadd.f32 %v3703_v47, %v3701_v53  ;;  %v3608_v6 = vadd.f32 %v3607_v57, %v3489_v60  ;;  %v3707_v51 = vadd.f32 %v3706_v44, %v3606_v4 }
 0xc86   :  { %v3611_v46 = vpop.f32.mrf.mxu0  ;;  %v3708_v63 = vpop.f32.mrf.mxu1 }
 0xc87   :  { %v3612_v18 = vadd.f32 %v3611_v46, %v3494_v8  ;;  %3727 = vadd.xlane.f32.xlu0 %v3726_v39  ;;  %v3709_v61 = vadd.f32 %v3708_v63, %v3608_v6 }
 0xc88   :  { %v3613_v14 = vpop.f32.mrf.mxu0  ;;  %v3712_v45 = vpop.f32.mrf.mxu1 }
 0xc89   :  { %v3614_v54 = vadd.f32 %v3613_v14, %v3494_v8  ;;  %v3713_v2 = vadd.f32 %v3712_v45, %v3612_v18  ;;  %v3729_v24 = vadd.f32 %v3709_v61, %v3707_v51 }
 0xc8a   :  { %v3714_v9 = vpop.f32.mrf.mxu1 }
 0xc8b   :  { %v3715_v11 = vadd.f32 %v3714_v9, %v3614_v54  ;;  %3718 = vadd.xlane.f32.xlu0 %v3717_v35 }
 0xc8d   :  { %v3732_v59 = vadd.f32 %v3715_v11, %v3713_v2 }
 0xc8f   :  { %3733 = vadd.xlane.f32.xlu1 %v3732_v59  ;;  %3730 = vadd.xlane.f32.xlu0 %v3729_v24 }
 0xd08   :  { %v3722_v26 = vpop.xlane.xlu0 %3721 }
 0xd09   :  { %v3736_v5 = vmul.f32 0.00390625, %v3722_v26 }
 0xd0b   :  { %v10951_v30 = vsub.f32 %v3689_v29, %v3736_v5  ;;  %v10953_v27 = vsub.f32 %v3691_v40, %v3736_v5 }
 0xd0c   :  { %v3725_v42 = vpop.xlane.xlu1 %3724 }
 0xd0d   :  { %v3755_v38 = vmul.f32 %v10951_v30, %v10951_v30  ;;  %v3756_v43 = vmul.f32 %v10953_v27, %v10953_v27  ;;  %v3737_v16 = vmul.f32 0.00390625, %v3725_v42 }
 0xd0f   :  { %v3768_v50 = vadd.f32 %v3756_v43, %v3755_v38  ;;  %v10967_v58 = vsub.f32 %v3695_v0, %v3737_v16  ;;  %v10969_v36 = vsub.f32 %v3697_v56, %v3737_v16 }
 0xd10   :  { %v3728_v25 = vpop.xlane.xlu0 %3727 }
 0xd11   :  { %v3738_v62 = vmul.f32 0.00390625, %v3728_v25  ;;  %3769 = vadd.xlane.f32.xlu1 %v3768_v50  ;;  %v3757_v8 = vmul.f32 %v10967_v58, %v10967_v58  ;;  %v3758_v0 = vmul.f32 %v10969_v36, %v10969_v36 }
 0xd13   :  { %v10959_v32 = vsub.f32 %v3701_v53, %v3738_v62  ;;  %v10961_v37 = vsub.f32 %v3703_v47, %v3738_v62  ;;  %v3771_v45 = vadd.f32 %v3758_v0, %v3757_v8 }
 0xd14   :  { %v3719_v29 = vpop.xlane.xlu0 %3718 }
 0xd15   :  { %v3759_v40 = vmul.f32 %v10959_v32, %v10959_v32  ;;  %v3760_v48 = vmul.f32 %v10961_v37, %v10961_v37  ;;  %v3735_v33 = vmul.f32 0.00390625, %v3719_v29 }
 0xd17   :  { %v3741_v3 = vsub.f32 %v3683_v21, %v3735_v33  ;;  %v3742_v41 = vsub.f32 %v3685_v31, %v3735_v33  ;;  %v3774_v1 = vadd.f32 %v3760_v48, %v3759_v40 }
 0xd18   :  { %v3731_v60 = vpop.xlane.xlu0 %3730  ;;  %v3734_v49 = vpop.xlane.xlu1 %3733 }
 0xd19   :  { %v3753_v53 = vmul.f32 %v3741_v3, %v3741_v3  ;;  %v3754_v47 = vmul.f32 %v3742_v41, %v3742_v41  ;;  %v3739_v57 = vmul.f32 0.00390625, %v3731_v60  ;;  %v3740_v44 = vmul.f32 0.00390625, %v3734_v49  ;;  %3775 = vadd.xlane.f32.xlu1 %v3774_v1 }
 0xd1b   :  { %v10973_v39 = vsub.f32 %v3713_v2, %v3740_v44  ;;  %v10975_v6 = vsub.f32 %v3715_v11, %v3740_v44  ;;  %v10979_v31 = vsub.f32 %v3707_v51, %v3739_v57  ;;  %v10981_v56 = vsub.f32 %v3709_v61, %v3739_v57 }
 0xd1c   :  { %v3765_v46 = vadd.f32 %v3754_v47, %v3753_v53 }
 0xd1d   :  { %v3763_v63 = vmul.f32 %v10973_v39, %v10973_v39  ;;  %v3764_v21 = vmul.f32 %v10975_v6, %v10975_v6  ;;  %v3761_v18 = vmul.f32 %v10979_v31, %v10979_v31  ;;  %v3762_v14 = vmul.f32 %v10981_v56, %v10981_v56 }
 0xd1e   :  { %3766 = vadd.xlane.f32.xlu0 %v3765_v46 }
 0xd1f   :  { %v3780_v4 = vadd.f32 %v3764_v21, %v3763_v63  ;;  %v3777_v35 = vadd.f32 %v3762_v14, %v3761_v18 }
 0xd21   :  { %3781 = vadd.xlane.f32.xlu1 %v3780_v4 }
 0xd22   :  { %3772 = vadd.xlane.f32.xlu0 %v3771_v45 }
 0xd26   :  { %3778 = vadd.xlane.f32.xlu0 %v3777_v35 }
 0xd9a   :  { %v3770_v51 = vpop.xlane.xlu1 %3769 }
 0xd9b   :  { %v3784_v2 = vmul.f32 0.00390625, %v3770_v51 }
 0xd9d   :  { %v3790_v26 = vadd.f32 1e-05, %v3784_v2 }
 0xda2   :  { %v3776_v40 = vpop.xlane.xlu1 %3775 }
 0xda3   :  { %v3786_v48 = vmul.f32 0.00390625, %v3776_v40 }
 0xda7   :  { %v3767_v61 = vpop.xlane.xlu0 %3766 }
 0xda8   :  { %v3783_v54 = vmul.f32 0.00390625, %v3767_v61 }
 0xdaa   :  { %v3789_v9 = vadd.f32 1e-05, %v3783_v54  ;;  %v3782_v8 = vpop.xlane.xlu1 %3781 }
 0xdab   :  { %v3773_v25 = vpop.xlane.xlu0 %3772  ;;  %v3788_v0 = vmul.f32 0.00390625, %v3782_v8 }
 0xdac   :  { %8441 = vrsqrt.f32 %v3789_v9  ;;  %v3785_v29 = vmul.f32 0.00390625, %v3773_v25 }
 0xdad   :  { %8443 = vrsqrt.f32 %v3790_v26  ;;  %v3794_v63 = vadd.f32 1e-05, %v3788_v0 }
 0xdaf   :  { %v3779_v49 = vpop.xlane.xlu0 %3778 }
 0xdb0   :  { %v3787_v57 = vmul.f32 0.00390625, %v3779_v49 }
 0xdb9   :  { %v8442_v11 = vpop.eup %8441 }
 0xdba   :  { %v3801_v24 = vmul.f32 %v8442_v11, %v3741_v3  ;;  %v3802_v59 = vmul.f32 %v8442_v11, %v3742_v41  ;;  %v8444_v43 = vpop.eup %8443  ;;  %v3792_v3 = vadd.f32 1e-05, %v3786_v48 }
 0xdbb   :  { %v3803_v50 = vmul.f32 %v8444_v43, %v10951_v30  ;;  %v3804_v42 = vmul.f32 %v8444_v43, %v10953_v27  ;;  %v3791_v30 = vadd.f32 1e-05, %v3785_v29 }
 0xdbc   :  { %v10991_v5 = vmax.f32 %v3801_v24, 0.0  ;;  %v10993_v38 = vmax.f32 %v3802_v59, 0.0 }
 0xdbd   :  { %v11021_v62 = vmax.f32 %v3803_v50, 0.0  ;;  %v11023_v16 = vmax.f32 %v3804_v42, 0.0  ;;  %8445 = vrsqrt.f32 %v3791_v30 }
 0xdbe   :  { %14311 = vst [vmem:[#allocation29_spill] sm:$0xff] %v10991_v5  ;;  %14312 = vst [vmem:[#allocation16_spill] sm:$0xff] %v10993_v38  ;;  %4017 = vrot.lane.b32.xlu0 %v10993_v38, %s8499_s10  ;;  %4035 = vrot.lane.b32.xlu1 %v10991_v5, %s8499_s10  ;;  %8447 = vrsqrt.f32 %v3792_v3 }
 0xdbf   :  { %14313 = vst [vmem:[#allocation15_spill] sm:$0xff] %v11021_v62  ;;  %14314 = vst [vmem:[#allocation19_spill] sm:$0xff] %v11023_v16 }
 0xdc2   :  { %3927 = vrot.lane.b32.xlu0 %v10993_v38, %s8500_s29  ;;  %3945 = vrot.lane.b32.xlu1 %v10991_v5, %s8500_s29 }
 0xdc6   :  { %3831 = vrot.lane.b32.xlu0 %v10993_v38, %s8501_s25  ;;  %3855 = vrot.lane.b32.xlu1 %v10991_v5, %s8501_s25 }
 0xdca   :  { %4389 = vrot.lane.b32.xlu0 %v10991_v5, %s8502_s23  ;;  %4391 = vrot.lane.b32.xlu1 %v10993_v38, %s8502_s23  ;;  %v8446_v27 = vpop.eup %8445 }
 0xdcb   :  { %v3806_v33 = vmul.f32 %v8446_v27, %v10969_v36  ;;  %v3805_v41 = vmul.f32 %v8446_v27, %v10967_v58  ;;  %v8448_v58 = vpop.eup %8447 }
 0xdcc   :  { %v3807_v36 = vmul.f32 %v8448_v58, %v10959_v32  ;;  %v3808_v53 = vmul.f32 %v8448_v58, %v10961_v37  ;;  %v3793_v32 = vadd.f32 1e-05, %v3787_v57 }
 0xdcd   :  { %v11055_v1 = vmax.f32 %v3806_v33, 0.0  ;;  %v11061_v60 = vmax.f32 %v3805_v41, 0.0 }
 0xdce   :  { %4209 = vrot.lane.b32.xlu0 %v10991_v5, %s8503_s4  ;;  %4211 = vrot.lane.b32.xlu1 %v10993_v38, %s8503_s4  ;;  %v11085_v47 = vmax.f32 %v3807_v36, 0.0  ;;  %v11091_v44 = vmax.f32 %v3808_v53, 0.0  ;;  %8449 = vrsqrt.f32 %v3793_v32 }
 0xdcf   :  { %14316 = vst [vmem:[#allocation22_spill] sm:$0xff] %v11055_v1  ;;  %14317 = vst [vmem:[#allocation17_spill] sm:$0xff] %v11061_v60  ;;  %8451 = vrsqrt.f32 %v3794_v63 }
 0xdd0   :  { %14318 = vst [vmem:[#allocation18_spill] sm:$0xff] %v11085_v47  ;;  %14319 = vst [vmem:[#allocation23_spill] sm:$0xff] %v11091_v44 }
 0xdd2   :  { %4299 = vrot.lane.b32.xlu0 %v10991_v5, %s8504_s9  ;;  %4301 = vrot.lane.b32.xlu1 %v10993_v38, %s8504_s9 }
 0xdd6   :  { %4019 = vrot.lane.b32.xlu0 %v11023_v16, %s8499_s10  ;;  %4037 = vrot.lane.b32.xlu1 %v11021_v62, %s8499_s10 }
 0xdda   :  { %3929 = vrot.lane.b32.xlu0 %v11023_v16, %s8500_s29  ;;  %3947 = vrot.lane.b32.xlu1 %v11021_v62, %s8500_s29 }
 0xddb   :  { %v8450_v37 = vpop.eup %8449 }
 0xddc   :  { %v3810_v46 = vmul.f32 %v8450_v37, %v10981_v56  ;;  %v3809_v4 = vmul.f32 %v8450_v37, %v10979_v31  ;;  %v8452_v35 = vpop.eup %8451 }
 0xddd   :  { %v3812_v61 = vmul.f32 %v8452_v35, %v10975_v6  ;;  %v3811_v6 = vmul.f32 %v8452_v35, %v10973_v39 }
 0xdde   :  { %3833 = vrot.lane.b32.xlu0 %v11023_v16, %s8501_s25  ;;  %3857 = vrot.lane.b32.xlu1 %v11021_v62, %s8501_s25  ;;  %v11118_v21 = vmax.f32 %v3810_v46, 0.0  ;;  %v11129_v56 = vmax.f32 %v3809_v4, 0.0  ;;  %v4570_v4 = vld [vmem:[%s14039_s14 + $0x8] sm:$0xff] }
 0xddf   :  { %v11160_v51 = vmax.f32 %v3812_v61, 0.0  ;;  %v11179_v26 = vmax.f32 %v3811_v6, 0.0  ;;  %4819 = vmatprep.mubr.f32.mxu1 %v4570_v4  ;;  %v4572_v6 = vld [vmem:[%s14039_s14 + $0x18] sm:$0xff] }
 0xde0   :  { %14320 = vst [vmem:[#allocation20_spill] sm:$0xff] %v11118_v21  ;;  %14321 = vst [vmem:[#allocation37_spill] sm:$0xff] %v11129_v56  ;;  %8339 = vmatprep.mubr.msk.f32.mxu0 %vm3496_vm11, %v4572_v6  ;;  %v4704_v4 = vld [vmem:[%s14040_s15 + $0x18] sm:$0xff]  ;;  %v4702_v6 = vld [vmem:[%s14040_s15 + $0x8] sm:$0xff] }
 0xde1   :  { %14322 = vst [vmem:[#allocation21_spill] sm:$0xff] %v11160_v51  ;;  %14324 = vst [vmem:[#allocation24_spill] sm:$0xff] %v11179_v26 }
 0xde2   :  { %4393 = vrot.lane.b32.xlu0 %v11021_v62, %s8502_s23  ;;  %4395 = vrot.lane.b32.xlu1 %v11023_v16, %s8502_s23 }
 0xde6   :  { %4213 = vrot.lane.b32.xlu0 %v11021_v62, %s8503_s4  ;;  %4215 = vrot.lane.b32.xlu1 %v11023_v16, %s8503_s4 }
 0xdea   :  { %4303 = vrot.lane.b32.xlu0 %v11021_v62, %s8504_s9  ;;  %4305 = vrot.lane.b32.xlu1 %v11023_v16, %s8504_s9 }
 0xdee   :  { %4109 = vrot.lane.b32.xlu0 %v11023_v16, %s14315_s12  ;;  %4127 = vrot.lane.b32.xlu1 %v11021_v62, %s14315_s12 }
 0xdf2   :  { %3931 = vrot.lane.b32.xlu0 %v11055_v1, %s8500_s29  ;;  %4021 = vrot.lane.b32.xlu1 %v11055_v1, %s8499_s10 }
 0xdf6   :  { %3835 = vrot.lane.b32.xlu0 %v11055_v1, %s8501_s25  ;;  %4039 = vrot.lane.b32.xlu1 %v11061_v60, %s8499_s10 }
 0xdfa   :  { %4397 = vrot.lane.b32.xlu0 %v11061_v60, %s8502_s23  ;;  %3949 = vrot.lane.b32.xlu1 %v11061_v60, %s8500_s29 }
 0xdfe   :  { %4307 = vrot.lane.b32.xlu0 %v11061_v60, %s8504_s9  ;;  %3859 = vrot.lane.b32.xlu1 %v11061_v60, %s8501_s25 }
 0xe02   :  { %4217 = vrot.lane.b32.xlu0 %v11061_v60, %s8503_s4  ;;  %4399 = vrot.lane.b32.xlu1 %v11055_v1, %s8502_s23 }
 0xe06   :  { %4111 = vrot.lane.b32.xlu0 %v11055_v1, %s14315_s12  ;;  %4309 = vrot.lane.b32.xlu1 %v11055_v1, %s8504_s9 }
 0xe0a   :  { %4219 = vrot.lane.b32.xlu1 %v11055_v1, %s8503_s4  ;;  %4041 = vrot.lane.b32.xlu0 %v11085_v47, %s8499_s10 }
 0xe0e   :  { %4129 = vrot.lane.b32.xlu1 %v11061_v60, %s14315_s12  ;;  %3933 = vrot.lane.b32.xlu0 %v11091_v44, %s8500_s29 }
 0xe12   :  { %4023 = vrot.lane.b32.xlu1 %v11091_v44, %s8499_s10  ;;  %3837 = vrot.lane.b32.xlu0 %v11091_v44, %s8501_s25 }
 0xe16   :  { %3951 = vrot.lane.b32.xlu1 %v11085_v47, %s8500_s29  ;;  %4401 = vrot.lane.b32.xlu0 %v11085_v47, %s8502_s23 }
 0xe1a   :  { %3861 = vrot.lane.b32.xlu1 %v11085_v47, %s8501_s25  ;;  %4311 = vrot.lane.b32.xlu0 %v11085_v47, %s8504_s9 }
 0xe1e   :  { %4403 = vrot.lane.b32.xlu1 %v11091_v44, %s8502_s23  ;;  %4221 = vrot.lane.b32.xlu0 %v11085_v47, %s8503_s4 }
 0xe22   :  { %4313 = vrot.lane.b32.xlu1 %v11091_v44, %s8504_s9  ;;  %4113 = vrot.lane.b32.xlu0 %v11091_v44, %s14315_s12 }
 0xe26   :  { %4223 = vrot.lane.b32.xlu1 %v11091_v44, %s8503_s4  ;;  %3935 = vrot.lane.b32.xlu0 %v11118_v21, %s8500_s29 }
 0xe2a   :  { %4131 = vrot.lane.b32.xlu1 %v11085_v47, %s14315_s12  ;;  %3839 = vrot.lane.b32.xlu0 %v11118_v21, %s8501_s25 }
 0xe2e   :  { %3953 = vrot.lane.b32.xlu1 %v11129_v56, %s8500_s29  ;;  %4405 = vrot.lane.b32.xlu0 %v11129_v56, %s8502_s23 }
 0xe30   :  { %v11135_v18 = vpop.permute.xlu0 %4017  ;;  %v11137_v14 = vpop.permute.xlu1 %4035 }
 0xe32   :  { %3863 = vrot.lane.b32.xlu1 %v11129_v56, %s8501_s25  ;;  %4315 = vrot.lane.b32.xlu0 %v11129_v56, %s8504_s9 }
 0xe34   :  { %v11143_v31 = vpop.permute.xlu0 %3927  ;;  %v11145_v45 = vpop.permute.xlu1 %3945 }
 0xe36   :  { %4407 = vrot.lane.b32.xlu1 %v11118_v21, %s8502_s23  ;;  %4225 = vrot.lane.b32.xlu0 %v11129_v56, %s8503_s4 }
 0xe38   :  { %v11152_v54 = vpop.permute.xlu0 %3831  ;;  %v11154_v9 = vpop.permute.xlu1 %3855 }
 0xe3a   :  { %4317 = vrot.lane.b32.xlu1 %v11118_v21, %s8504_s9  ;;  %4115 = vrot.lane.b32.xlu0 %v11118_v21, %s14315_s12 }
 0xe3c   :  { %v11162_v2 = vpop.permute.xlu0 %4389  ;;  %v11164_v11 = vpop.permute.xlu1 %4391 }
 0xe3e   :  { %4227 = vrot.lane.b32.xlu1 %v11118_v21, %s8503_s4  ;;  %3937 = vrot.lane.b32.xlu0 %v11160_v51, %s8500_s29 }
 0xe40   :  { %v11171_v24 = vpop.permute.xlu0 %4209  ;;  %v11173_v59 = vpop.permute.xlu1 %4211 }
 0xe42   :  { %4133 = vrot.lane.b32.xlu1 %v11129_v56, %s14315_s12  ;;  %4495 = vrot.lane.b32.xlu0 %v11129_v56, %s14323_s26 }
 0xe44   :  { %v11181_v43 = vpop.permute.xlu0 %4299  ;;  %v11183_v50 = vpop.permute.xlu1 %4301 }
 0xe46   :  { %3841 = vrot.lane.b32.xlu0 %v11160_v51, %s8501_s25  ;;  %3955 = vrot.lane.b32.xlu1 %v11179_v26, %s8500_s29 }
 0xe48   :  { %v11189_v39 = vpop.permute.xlu0 %4019  ;;  %v11191_v42 = vpop.permute.xlu1 %4037 }
 0xe4a   :  { %4409 = vrot.lane.b32.xlu0 %v11179_v26, %s8502_s23  ;;  %4497 = vrot.lane.b32.xlu1 %v11118_v21, %s14323_s26 }
 0xe4c   :  { %v11197_v25 = vpop.permute.xlu0 %3929  ;;  %v11199_v29 = vpop.permute.xlu1 %3947 }
 0xe4e   :  { %4107 = vrot.lane.b32.xlu0 %v10993_v38, %s14315_s12  ;;  %3865 = vrot.lane.b32.xlu1 %v11179_v26, %s8501_s25 }
 0xe50   :  { %v11205_v30 = vpop.permute.xlu0 %3833  ;;  %v11207_v27 = vpop.permute.xlu1 %3857 }
 0xe52   :  { %4491 = vrot.lane.b32.xlu0 %v11085_v47, %s14323_s26  ;;  %4411 = vrot.lane.b32.xlu1 %v11160_v51, %s8502_s23 }
 0xe54   :  { %v11213_v40 = vpop.permute.xlu0 %4393  ;;  %v11215_v48 = vpop.permute.xlu1 %4395 }
 0xe56   :  { %4319 = vrot.lane.b32.xlu0 %v11179_v26, %s8504_s9  ;;  %4125 = vrot.lane.b32.xlu1 %v10991_v5, %s14315_s12 }
 0xe58   :  { %v11221_v33 = vpop.permute.xlu0 %4213  ;;  %v11223_v3 = vpop.permute.xlu1 %4215 }
 0xe5a   :  { %4487 = vrot.lane.b32.xlu0 %v11061_v60, %s14323_s26  ;;  %4493 = vrot.lane.b32.xlu1 %v11091_v44, %s14323_s26  ;;  %v4048_v60 = vsel %vm2794_vm12, %v11191_v42, %v11189_v39  ;;  %v3891_v44 = vld [vmem:[%s14038_s2] ss:$8 sm:$0x3] }
 0xe5c   :  { %v11229_v41 = vpop.permute.xlu0 %4303  ;;  %v11231_v58 = vpop.permute.xlu1 %4305 }
 0xe5d   :  { %14325 = vst [vmem:[#allocation34_spill] sm:$0xff] %v11229_v41  ;;  %14326 = vst [vmem:[#allocation32_spill] sm:$0xff] %v11231_v58  ;;  %v3975_v41 = vsel %vm1144_vm10, %v11143_v31, %v11145_v45 }
 0xe5e   :  { %4025 = vrot.lane.b32.xlu0 %v11118_v21, %s8499_s10  ;;  %4321 = vrot.lane.b32.xlu1 %v11160_v51, %s8504_s9 }
 0xe60   :  { %v11237_v36 = vpop.permute.xlu0 %4109  ;;  %v11239_v49 = vpop.permute.xlu1 %4127 }
 0xe61   :  { %14327 = vst [vmem:[#allocation30_spill] sm:$0xff] %v11237_v36  ;;  %14328 = vst [vmem:[#allocation27_spill] sm:$0xff] %v11239_v49 }
 0xe62   :  { %4229 = vrot.lane.b32.xlu0 %v11179_v26, %s8503_s4  ;;  %4489 = vrot.lane.b32.xlu1 %v11055_v1, %s14323_s26  ;;  %v4066_v1 = vsel %vm2794_vm12, %v11189_v39, %v11191_v42  ;;  %v4086_v39 = vmul.f32 %v11326_v22, %v4048_v60 }
 0xe64   :  { %v11245_v53 = vpop.permute.xlu0 %3931  ;;  %v4022_v57 = vpop.permute.xlu1 %4021 }
 0xe66   :  { %4117 = vrot.lane.b32.xlu0 %v11160_v51, %s14315_s12  ;;  %4043 = vrot.lane.b32.xlu1 %v11129_v56, %s8499_s10 }
 0xe68   :  { %v11251_v32 = vpop.permute.xlu0 %3835  ;;  %v4040_v37 = vpop.permute.xlu1 %4039 }
 0xe6a   :  { %4499 = vrot.lane.b32.xlu0 %v11179_v26, %s14323_s26  ;;  %4231 = vrot.lane.b32.xlu1 %v11160_v51, %s8503_s4 }
 0xe6c   :  { %v11257_v8 = vpop.permute.xlu0 %4397  ;;  %v11259_v0 = vpop.permute.xlu1 %3949 }
 0xe6e   :  { %4483 = vrot.lane.b32.xlu0 %v11021_v62, %s14323_s26  ;;  %4135 = vrot.lane.b32.xlu1 %v11179_v26, %s14315_s12  ;;  %s14441_s12 = smov 17  }
 0xe70   :  { %v11265_v46 = vpop.permute.xlu0 %4307  ;;  %v11267_v63 = vpop.permute.xlu1 %3859 }
 0xe71   :  { %14329 = vst [vmem:[#allocation28_spill] sm:$0xff] %v11265_v46 }
 0xe72   :  { %4027 = vrot.lane.b32.xlu0 %v11160_v51, %s8499_s10  ;;  %4501 = vrot.lane.b32.xlu1 %v11160_v51, %s14323_s26 }
 0xe74   :  { %v11276_v35 = vpop.permute.xlu0 %4217  ;;  %v11278_v61 = vpop.permute.xlu1 %4399 }
 0xe75   :  { %14330 = vst [vmem:[#allocation31_spill] sm:$0xff] %v11276_v35  ;;  %v8334_v35 = vld [vmem:[%s14038_s2 + $0x3] ss:$8 sm:$0x3] }
 0xe76   :  { %4479 = vrot.lane.b32.xlu0 %v10991_v5, %s14323_s26  ;;  %4485 = vrot.lane.b32.xlu1 %v11023_v16, %s14323_s26  ;;  %v4049_v5 = vsel %vm2794_vm12, %v4040_v37, %v4022_v57 }
 0xe78   :  { %v11291_v7 = vpop.permute.xlu0 %4111  ;;  %v11293_v15 = vpop.permute.xlu1 %4309 }
 0xe79   :  { %14331 = vst [vmem:[#allocation33_spill] sm:$0xff] %v11291_v7  ;;  %14332 = vst [vmem:[#allocation36_spill] sm:$0xff] %v11293_v15  ;;  %v8336_v7 = vld [vmem:[%s14038_s2 + $0x6] ss:$8 sm:$0x3] }
 0xe7a   :  { %4724 = vperm.xlu0 %8403, %v4704_v4   ;;  %4045 = vrot.lane.b32.xlu1 %v11179_v26, %s8499_s10  ;;  %v4703_v4 = vld [vmem:[%s14040_s15 + $0x10] sm:$0xff]  ;;  %v11423_v26 = vrot.slane %v3891_v44, %v9250_v13  ;;  %v11445_v58 = vrot.slane %v8336_v7, %v9244_v10 }
 0xe7c   :  { %v4042_v34 = vpop.permute.xlu0 %4041  ;;  %v11300_v52 = vpop.permute.xlu1 %4219 }
 0xe7d   :  { %14333 = vst [vmem:[#allocation35_spill] sm:$0xff] %v11300_v52 }
 0xe7e   :  { %4714 = vperm.xlu0 %8403, %v4702_v6   ;;  %4481 = vrot.lane.b32.xlu1 %v10993_v38, %s14323_s26  ;;  %v4701_v6 = vld [vmem:[%s14040_s15] sm:$0xff] }
 0xe80   :  { %v11310_v28 = vpop.permute.xlu0 %3933  ;;  %v11312_v20 = vpop.permute.xlu1 %4129 }
 0xe81   :  { %14334 = vst [vmem:[#allocation38_spill] sm:$0xff] %v11312_v20 }
 0xe82   :  { %4734 = vperm.xlu0 %8403, %v4706_v12   ;;  %4719 = vperm.xlu1 %8404, %v4703_v4   ;;  %v4067_v4 = vsel %vm2794_vm12, %v4022_v57, %v4040_v37  ;;  %v4088_v57 = vmul.f32 %v11326_v22, %v4049_v5 }
 0xe83   :  { %v4087_v37 = vmul.f32 %v11321_v23, %v4067_v4 }
 0xe84   :  { %v11323_v19 = vpop.permute.xlu0 %3837  ;;  %v4024_v55 = vpop.permute.xlu1 %4023 }
 0xe85   :  { %v4050_v38 = vsel %vm2794_vm12, %v4042_v34, %v4024_v55  ;;  %v4068_v12 = vsel %vm2794_vm12, %v4024_v55, %v4042_v34 }
 0xe86   :  { %v4089_v62 = vmul.f32 %v11321_v23, %v4068_v12  ;;  %4709 = vperm.xlu1 %8404, %v4701_v6   ;;  %v4090_v16 = vmul.f32 %v11326_v22, %v4050_v38  ;;  %v4047_v38 = vsel %vm2794_vm12, %v11137_v14, %v11135_v18  ;;  %v4065_v6 = vsel %vm2794_vm12, %v11135_v18, %v11137_v14 }
 0xe87   :  { %v4084_v12 = vmul.f32 %v11326_v22, %v4047_v38 }
 0xe88   :  { %v11343_v34 = vpop.permute.xlu0 %4401  ;;  %4755 = vmatprep.subr.mxu1 %v4090_v16  ;;  %v11345_v55 = vpop.permute.xlu1 %3951  ;;  %v4085_v16 = vmul.f32 %v11321_v23, %v4066_v1 }
 0xe89   :  { %4756 = vmatpush1.msra.mxu1 %v4089_v62  ;;  %v4083_v62 = vmul.f32 %v11321_v23, %v4065_v6 }
 0xe8a   :  { %4729 = vperm.xlu1 %8404, %v4705_v17   ;;  %4757 = vmatprep.subr.mxu1 %v4088_v57 }
 0xe8b   :  { %4758 = vmatpush1.msra.mxu1 %v4087_v37 }
 0xe8c   :  { %v11357_v42 = vpop.permute.xlu0 %4311  ;;  %4759 = vmatprep.subr.mxu1 %v4086_v39  ;;  %v11359_v5 = vpop.permute.xlu1 %3861 }
 0xe8d   :  { %4760 = vmatpush1.msra.mxu1 %v4085_v16 }
 0xe8e   :  { %4761 = vmatprep.subr.mxu1 %v4084_v12 }
 0xe8f   :  { %4762 = vmatpush1.msra.mxu1 %v4083_v62 }
 0xe90   :  { %v11363_v18 = vpop.permute.xlu0 %4221  ;;  %v11365_v14 = vpop.permute.xlu1 %4403 }
 0xe91   :  { %14337 = vst [vmem:[#allocation39_spill] sm:$0xff] %v11363_v18 }
 0xe94   :  { %v11367_v60 = vpop.permute.xlu0 %4113  ;;  %v11369_v1 = vpop.permute.xlu1 %4313 }
 0xe95   :  { %14338 = vst [vmem:[#allocation40_spill] sm:$0xff] %v11367_v60  ;;  %14339 = vst [vmem:[#allocation41_spill] sm:$0xff] %v11369_v1  ;;  %v3960_v1 = vsel %vm1144_vm10, %v11345_v55, %v11310_v28 }
 0xe98   :  { %v3936_v4 = vpop.permute.xlu0 %3935  ;;  %v11371_v17 = vpop.permute.xlu1 %4223 }
 0xe99   :  { %14340 = vst [vmem:[#allocation42_spill] sm:$0xff] %v11371_v17 }
 0xe9c   :  { %v11373_v57 = vpop.permute.xlu0 %3839  ;;  %v11375_v37 = vpop.permute.xlu1 %4131 }
 0xe9d   :  { %14341 = vst [vmem:[#allocation43_spill] sm:$0xff] %v11375_v37  ;;  %v8332_v37 = vld [vmem:[%s14038_s2 + $0x1] ss:$8 sm:$0x3] }
 0xe9e   :  { %v3990_v20 = vrot.slane %v8332_v37, %v9250_v13 }
 0xea0   :  { %v11377_v38 = vpop.permute.xlu0 %4405  ;;  %v3954_v6 = vpop.permute.xlu1 %3953 }
 0xea1   :  { %v3961_v52 = vsel %vm1144_vm10, %v3954_v6, %v3936_v4  ;;  %v3979_v15 = vsel %vm1144_vm10, %v3936_v4, %v3954_v6 }
 0xea4   :  { %v11379_v39 = vpop.permute.xlu0 %4315  ;;  %v11381_v16 = vpop.permute.xlu1 %3863 }
 0xea8   :  { %v11383_v12 = vpop.permute.xlu0 %4225  ;;  %v11385_v62 = vpop.permute.xlu1 %4407 }
 0xea9   :  { %14342 = vst [vmem:[#allocation44_spill] sm:$0xff] %v11383_v12  ;;  %v8335_v12 = vld [vmem:[%s14038_s2 + $0x5] ss:$8 sm:$0x3] }
 0xeac   :  { %v11387_v22 = vpop.permute.xlu0 %4115  ;;  %v11389_v23 = vpop.permute.xlu1 %4317 }
 0xead   :  { %14343 = vst [vmem:[#allocation45_spill] sm:$0xff] %v11387_v22  ;;  %v8337_v22 = vld [vmem:[%s14038_s2 + $0x7] ss:$8 sm:$0x3] }
 0xeae   :  { %v11426_v51 = vrot.slane %v8337_v22, %v9250_v13 }
 0xeb0   :  { %v3938_v60 = vpop.permute.xlu0 %3937  ;;  %v11391_v18 = vpop.permute.xlu1 %4227 }
 0xeb1   :  { %14344 = vst [vmem:[#allocation46_spill] sm:$0xff] %v11391_v18  ;;  %v3986_v18 = vrot.slane %v8332_v37, %v9244_v10  ;;  %v11429_v37 = vrot.slane %v8335_v12, %v9244_v10 }
 0xeb4   :  { %v11396_v17 = vpop.permute.xlu0 %4495  ;;  %v11398_v47 = vpop.permute.xlu1 %4133 }
 0xeb5   :  { %14345 = vst [vmem:[#allocation47_spill] sm:$0xff] %v11396_v17  ;;  %14346 = vst [vmem:[#allocation48_spill] sm:$0xff] %v11398_v47  ;;  %v11412_v17 = vrot.slane %v3891_v44, %v9244_v10  ;;  %v11415_v47 = vrot.slane %v8337_v22, %v9244_v10  ;;  %v11439_v22 = vrot.slane %v8335_v12, %v9250_v13 }
 0xeb6   :  { %v4002_v12 = vmul.f32 %v3990_v20, %v3961_v52  ;;  %v8338_v52 = vld [vmem:[%s14038_s2 + $0x10] ss:$8 sm:$0x3]  ;;  %s14445_s2 = smov 1  }
 0xeb8   :  { %v11420_v56 = vpop.permute.xlu0 %3841  ;;  %v3956_v21 = vpop.permute.xlu1 %3955 }
 0xeb9   :  { %v3962_v49 = vsel %vm1144_vm10, %v3956_v21, %v3938_v60  ;;  %v3980_v36 = vsel %vm1144_vm10, %v3938_v60, %v3956_v21  ;;  %v11451_v21 = vrot.slane %v8336_v7, %v9250_v13  ;;  %v3978_v60 = vsel %vm1144_vm10, %v11310_v28, %v11345_v55 }
 0xeba   :  { %v4003_v44 = vmul.f32 %v3986_v18, %v3980_v36  ;;  %v4004_v46 = vmul.f32 %v3990_v20, %v3962_v49  ;;  %v3957_v36 = vsel %vm1144_vm10, %v11145_v45, %v11143_v31  ;;  %v11457_v49 = vrot.slane %v8334_v35, %v9244_v10 }
 0xebb   :  { %v3867_v7 = vsel %vm2612_vm13, %v11154_v9, %v11152_v54  ;;  %v3885_v31 = vsel %vm2612_vm13, %v11152_v54, %v11154_v9  ;;  %v3959_v45 = vsel %vm1144_vm10, %v11259_v0, %v11245_v53  ;;  %v3993_v28 = vmul.f32 %v3986_v18, %v3975_v41 }
 0xebc   :  { %14347 = vst [vmem:[#allocation49_spill] sm:$0xff] %v11457_v49  ;;  %v4410_v4 = vpop.permute.xlu0 %4409  ;;  %4763 = vmatprep.subr.mxu1 %v4004_v46  ;;  %v11462_v6 = vpop.permute.xlu1 %4497  ;;  %v4001_v49 = vmul.f32 %v3986_v18, %v3979_v15  ;;  %v3977_v46 = vsel %vm1144_vm10, %v11245_v53, %v11259_v0  ;;  %v4000_v55 = vmul.f32 %v3990_v20, %v3960_v1 }
 0xebd   :  { %14348 = vst [vmem:[#allocation50_spill] sm:$0xff] %v11462_v6  ;;  %4764 = vmatpush1.msra.mxu1 %v4003_v44  ;;  %v11480_v6 = vrot.slane %v8334_v35, %v9250_v13  ;;  %v4413_v54 = vsel %vm3168_vm14, %v11162_v2, %v11164_v11  ;;  %v3958_v15 = vsel %vm1144_vm10, %v11199_v29, %v11197_v25 }
 0xebe   :  { %4765 = vmatprep.subr.mxu1 %v4002_v12  ;;  %v3999_v9 = vmul.f32 %v3986_v18, %v3978_v60  ;;  %v3994_v41 = vmul.f32 %v3990_v20, %v3957_v36  ;;  %v11489_v53 = vmul.f32 %v11412_v17, %v3885_v31  ;;  %v3976_v0 = vsel %vm1144_vm10, %v11197_v25, %v11199_v29 }
 0xebf   :  { %4766 = vmatpush1.msra.mxu1 %v4001_v49  ;;  %v3998_v44 = vmul.f32 %v3990_v20, %v3959_v45  ;;  %v11497_v12 = vmul.f32 %v11423_v26, %v3867_v7  ;;  %v11502_v49 = vsel %vm3168_vm14, %v11164_v11, %v11162_v2  ;;  %v3997_v36 = vmul.f32 %v3986_v18, %v3977_v46 }
 0xec0   :  { %v11494_v35 = vpop.permute.xlu0 %4107  ;;  %4767 = vmatprep.subr.mxu1 %v4000_v55  ;;  %v3866_v1 = vpop.permute.xlu1 %3865  ;;  %v11505_v60 = vrot.slane %v8338_v52, %v9244_v10  ;;  %v11508_v25 = vrot.slane %v8338_v52, %v9250_v13  ;;  %v11511_v29 = vmul.f32 %v11415_v47, %v4413_v54  ;;  %v11516_v7 = vsel %vm2984_vm15, %v11171_v24, %v11173_v59 }
 0xec1   :  { %4768 = vmatpush1.msra.mxu1 %v3999_v9  ;;  %v11521_v2 = vsel %vm2984_vm15, %v11173_v59, %v11171_v24  ;;  %v3996_v11 = vmul.f32 %v3990_v20, %v3958_v15  ;;  %v3995_v31 = vmul.f32 %v3986_v18, %v3976_v0  ;;  %v3868_v45 = vsel %vm2612_vm13, %v11207_v27, %v11205_v30 }
 0xec2   :  { %4769 = vmatprep.subr.mxu1 %v3998_v44  ;;  %v11529_v46 = vsel %vm2612_vm13, %v11205_v30, %v11207_v27  ;;  %v3872_v52 = vsel %vm2612_vm13, %v3866_v1, %v11420_v56  ;;  %v3869_v24 = vsel %vm2612_vm13, %v11267_v63, %v11251_v32  ;;  %v3887_v20 = vsel %vm2612_vm13, %v11251_v32, %v11267_v63 }
 0xec3   :  { %4770 = vmatpush1.msra.mxu1 %v3997_v36  ;;  %v3871_v59 = vsel %vm2612_vm13, %v11381_v16, %v11373_v57  ;;  %v3890_v30 = vsel %vm2612_vm13, %v11420_v56, %v3866_v1  ;;  %v3889_v55 = vsel %vm2612_vm13, %v11373_v57, %v11381_v16  ;;  %v4441_v54 = vsel %vm3168_vm14, %v11385_v62, %v11377_v38 }
 0xec4   :  { %v11544_v27 = vpop.permute.xlu0 %4491  ;;  %4771 = vmatprep.subr.mxu1 %v3996_v11  ;;  %v4412_v18 = vpop.permute.xlu1 %4411  ;;  %v4417_v56 = vsel %vm3168_vm14, %v11377_v38, %v11385_v62  ;;  %v3914_v9 = vmul.f32 %v11423_v26, %v3872_v52  ;;  %v3870_v16 = vsel %vm2612_vm13, %v11359_v5, %v11323_v19  ;;  %v4440_v0 = vsel %vm3168_vm14, %v11365_v14, %v11343_v34 }
 0xec5   :  { %v4418_v32 = vsel %vm3168_vm14, %v4410_v4, %v4412_v18  ;;  %v4442_v63 = vsel %vm3168_vm14, %v4412_v18, %v4410_v4  ;;  %4772 = vmatpush1.msra.mxu1 %v3995_v31  ;;  %v3888_v4 = vsel %vm2612_vm13, %v11323_v19, %v11359_v5  ;;  %v3913_v38 = vmul.f32 %v11412_v17, %v3890_v30 }
 0xec6   :  { %v4465_v15 = vmul.f32 %v11415_v47, %v4418_v32  ;;  %4773 = vmatprep.subr.mxu1 %v3994_v41  ;;  %v4466_v57 = vmul.f32 %v11426_v51, %v4442_v63  ;;  %v4416_v62 = vsel %vm3168_vm14, %v11343_v34, %v11365_v14  ;;  %v3912_v44 = vmul.f32 %v11423_v26, %v3871_v59 }
 0xec7   :  { %4774 = vmatpush1.msra.mxu1 %v3993_v28  ;;  %v4464_v19 = vmul.f32 %v11426_v51, %v4441_v54  ;;  %v4439_v5 = vsel %vm3168_vm14, %v11278_v61, %v11257_v8  ;;  %v3911_v36 = vmul.f32 %v11412_v17, %v3889_v55  ;;  %v4463_v28 = vmul.f32 %v11415_v47, %v4417_v56 }
 0xec8   :  { %v4320_v41 = vpop.permute.xlu0 %4319  ;;  %4775 = vmatprep.subr.mxu1 %v3914_v9  ;;  %4856 = vmatprep.subr.mxu0 %v4466_v57  ;;  %v11573_v1 = vpop.permute.xlu1 %4125  ;;  %v4415_v34 = vsel %vm3168_vm14, %v11257_v8, %v11278_v61  ;;  %v3910_v14 = vmul.f32 %v11423_v26, %v3870_v16  ;;  %v4462_v11 = vmul.f32 %v11426_v51, %v4440_v0  ;;  %v14349_v16 = vld [vmem:[#allocation41_spill] sm:$0xff]  ;;  %vm5210_vm10 = vcmask 523264  }
 0xec9   :  { %4776 = vmatpush1.msra.mxu1 %v3913_v38  ;;  %4857 = vmatpush1.msra.mxu0 %v4465_v15  ;;  %v4438_v31 = vsel %vm3168_vm14, %v11215_v48, %v11213_v40  ;;  %v3909_v52 = vmul.f32 %v11412_v17, %v3888_v4  ;;  %v4461_v59 = vmul.f32 %v11415_v47, %v4416_v62  ;;  %v14350_v62 = vld [vmem:[#allocation32_spill] sm:$0xff]  ;;  %vm5492_vm13 = vcmask 1014784  }
 0xeca   :  { %4777 = vmatprep.subr.mxu1 %v3912_v44  ;;  %4858 = vmatprep.subr.mxu0 %v4464_v19  ;;  %v4414_v8 = vsel %vm3168_vm14, %v11213_v40, %v11215_v48  ;;  %v3908_v18 = vmul.f32 %v11423_v26, %v3869_v24  ;;  %v4460_v55 = vmul.f32 %v11426_v51, %v4439_v5  ;;  %v14353_v44 = vld [vmem:[#allocation36_spill] sm:$0xff]  ;;  %vm5394_vm14 = vcmask 31744  }
 0xecb   :  { %4778 = vmatpush1.msra.mxu1 %v3911_v36  ;;  %4859 = vmatpush1.msra.mxu0 %v4463_v28  ;;  %v4258_v54 = vsel %vm2984_vm15, %v11223_v3, %v11221_v33  ;;  %v3907_v32 = vmul.f32 %v11412_v17, %v3887_v20  ;;  %v4459_v63 = vmul.f32 %v11415_v47, %v4415_v34  ;;  %v14354_v36 = vld [vmem:[#allocation30_spill] sm:$0xff]  ;;  %v14355_v28 = vld [vmem:[#allocation27_spill] sm:$0xff] }
 0xecc   :  { %v11595_v61 = vpop.permute.xlu0 %4487  ;;  %4779 = vmatprep.subr.mxu1 %v3910_v14  ;;  %4860 = vmatprep.subr.mxu0 %v4462_v11  ;;  %v11597_v30 = vpop.permute.xlu1 %4493  ;;  %v3906_v40 = vmul.f32 %v11423_v26, %v3868_v45  ;;  %v4458_v48 = vmul.f32 %v11426_v51, %v4438_v31  ;;  %v4456_v24 = vmul.f32 %v11426_v51, %v11502_v49  ;;  %v14356_v31 = vld [vmem:[#allocation35_spill] sm:$0xff] }
 0xecd   :  { %4780 = vmatpush1.msra.mxu1 %v3909_v52  ;;  %4861 = vmatpush1.msra.mxu0 %v4461_v59  ;;  %v4275_v56 = vmul.f32 %v11429_v37, %v11516_v7  ;;  %v3905_v15 = vmul.f32 %v11412_v17, %v11529_v46  ;;  %v4457_v20 = vmul.f32 %v11415_v47, %v4414_v8  ;;  %v14357_v52 = vld [vmem:[#allocation31_spill] sm:$0xff] }
 0xece   :  { %4781 = vmatprep.subr.mxu1 %v3908_v18  ;;  %4862 = vmatprep.subr.mxu0 %v4460_v55  ;;  %v4234_v9 = vsel %vm2984_vm15, %v11221_v33, %v11223_v3  ;;  %v4278_v51 = vmul.f32 %v11439_v22, %v4258_v54  ;;  %v4276_v49 = vmul.f32 %v11439_v22, %v11521_v2  ;;  %v14358_v55 = vld [vmem:[#allocation21_spill] sm:$0xff] }
 0xecf   :  { %4782 = vmatpush1.msra.mxu1 %v3907_v32  ;;  %4863 = vmatpush1.msra.mxu0 %v4459_v63  ;;  %v4351_v47 = vsel %vm3076_vm0, %v11389_v23, %v11379_v39  ;;  %v4327_v33 = vsel %vm3076_vm0, %v11379_v39, %v11389_v23  ;;  %v4323_v46 = vsel %vm3076_vm0, %v11181_v43, %v11183_v50 }
 0xed0   :  { %v11618_v26 = vpop.permute.xlu0 %4025  ;;  %4783 = vmatprep.subr.mxu1 %v3906_v40  ;;  %4864 = vmatprep.subr.mxu0 %v4458_v48  ;;  %v4322_v45 = vpop.permute.xlu1 %4321  ;;  %v4277_v57 = vmul.f32 %v11429_v37, %v4234_v9  ;;  %v4350_v4 = vsel %vm3076_vm0, %v14349_v16, %v11357_v42  ;;  %v4347_v23 = vsel %vm3076_vm0, %v11183_v50, %v11181_v43  ;;  %v14359_v48 = vld [vmem:[#allocation24_spill] sm:$0xff] }
 0xed1   :  { %v4328_v17 = vsel %vm3076_vm0, %v4320_v41, %v4322_v45  ;;  %v4352_v7 = vsel %vm3076_vm0, %v4322_v45, %v4320_v41  ;;  %4784 = vmatpush1.msra.mxu1 %v3905_v15  ;;  %4865 = vmatpush1.msra.mxu0 %v4457_v20  ;;  %v4326_v39 = vsel %vm3076_vm0, %v11357_v42, %v14349_v16  ;;  %v14351_v41 = vld [vmem:[#allocation34_spill] sm:$0xff]  ;;  %v14360_v15 = vld [vmem:[#allocation49_spill] sm:$0xff]  ;;  %v14361_v9 = vld [vmem:[#allocation20_spill] sm:$0xff] }
 0xed2   :  { %v4375_v3 = vmul.f32 %v11445_v58, %v4328_v17  ;;  %4785 = vmatprep.subr.mxu1 %v11497_v12  ;;  %4866 = vmatprep.subr.mxu0 %v4456_v24  ;;  %v4376_v2 = vmul.f32 %v11451_v21, %v4352_v7  ;;  %v4374_v38 = vmul.f32 %v11451_v21, %v4351_v47  ;;  %v14364_v7 = vld [vmem:[#allocation38_spill] sm:$0xff] }
 0xed3   :  { %4786 = vmatpush1.msra.mxu1 %v11489_v53  ;;  %4867 = vmatpush1.msra.mxu0 %v11511_v29  ;;  %v4324_v53 = vsel %vm3076_vm0, %v14351_v41, %v14350_v62  ;;  %v14352_v29 = vld [vmem:[#allocation28_spill] sm:$0xff]  ;;  %v4373_v43 = vmul.f32 %v11445_v58, %v4327_v33  ;;  %v4348_v50 = vsel %vm3076_vm0, %v14350_v62, %v14351_v41  ;;  %v14369_v62 = vld [vmem:[#allocation42_spill] sm:$0xff]  ;;  %v14370_v41 = vld [vmem:[#allocation39_spill] sm:$0xff] }
 0xed4   :  { %v4230_v12 = vpop.permute.xlu0 %4229  ;;  %4787 = vmatprep.subr.mxu1 %v4278_v51  ;;  %4868 = vmatprep.subr.mxu0 %v4376_v2  ;;  %v11649_v0 = vpop.permute.xlu1 %4489  ;;  %v4349_v19 = vsel %vm3076_vm0, %v14353_v44, %v14352_v29  ;;  %v4325_v42 = vsel %vm3076_vm0, %v14352_v29, %v14353_v44  ;;  %v4372_v5 = vmul.f32 %v11451_v21, %v4350_v4  ;;  %v14366_v2 = vld [vmem:[#allocation44_spill] sm:$0xff] }
 0xed5   :  { %4788 = vmatpush2.msra.mxu1 %v4277_v57  ;;  %4869 = vmatpush1.msra.mxu0 %v4375_v3  ;;  %v4138_v34 = vsel %vm2886_vm1, %v14355_v28, %v14354_v36  ;;  %v4156_v14 = vsel %vm2886_vm1, %v14354_v36, %v14355_v28  ;;  %v4371_v11 = vmul.f32 %v11445_v58, %v4326_v39  ;;  %v14367_v57 = vld [vmem:[#allocation23_spill] sm:$0xff]  ;;  %v14374_v28 = vld [vmem:[#allocation17_spill] sm:$0xff] }
 0xed6   :  { %4789 = vmatprep.subr.mxu1 %v4276_v49  ;;  %4870 = vmatprep.subr.mxu0 %v4374_v38  ;;  %v4235_v59 = vsel %vm2984_vm15, %v14357_v52, %v14356_v31  ;;  %v4259_v8 = vsel %vm2984_vm15, %v14356_v31, %v14357_v52  ;;  %v4370_v32 = vmul.f32 %v11451_v21, %v4349_v19  ;;  %v14362_v49 = vld [vmem:[#allocation37_spill] sm:$0xff]  ;;  %v14368_v38 = vld [vmem:[#allocation18_spill] sm:$0xff]  ;;  %v14377_v52 = vld [vmem:[#allocation19_spill] sm:$0xff] }
 0xed7   :  { %4790 = vmatpush2.msra.mxu1 %v4275_v56  ;;  %4871 = vmatpush1.msra.mxu0 %v4373_v43  ;;  %v4365_v63 = vmul.f32 %v11445_v58, %v4323_v46  ;;  %v4369_v40 = vmul.f32 %v11445_v58, %v4325_v42  ;;  %v4366_v24 = vmul.f32 %v11451_v21, %v4347_v23  ;;  %v14371_v19 = vld [vmem:[#allocation22_spill] sm:$0xff]  ;;  %v14373_v42 = vld [vmem:[#allocation43_spill] sm:$0xff] }
 0xed8   :  { %v4118_v18 = vpop.permute.xlu0 %4117  ;;  %4791 = vmatprep.subr.mxu1 %v14358_v55  ;;  %4872 = vmatprep.subr.mxu0 %v4372_v5  ;;  %v11680_v54 = vpop.permute.xlu1 %4043  ;;  %v4367_v56 = vmul.f32 %v11445_v58, %v4324_v53  ;;  %v11689_v20 = vmul.f32 %v14360_v15, %v4156_v14  ;;  %v4368_v45 = vmul.f32 %v11451_v21, %v4348_v50  ;;  %v14363_v58 = vld [vmem:[#allocation33_spill] sm:$0xff]  ;;  %v14365_v21 = vld [vmem:[#allocation46_spill] sm:$0xff] }
 0xed9   :  { %4792 = vmatpush2.msra.mxu1 %v14359_v48  ;;  %4873 = vmatpush1.msra.mxu0 %v4371_v11  ;;  %v11694_v51 = vmul.f32 %v11429_v37, %v4235_v59  ;;  %v4280_v47 = vmul.f32 %v11439_v22, %v4259_v8  ;;  %v11699_v17 = vmul.f32 %v11480_v6, %v4138_v34  ;;  %v14375_v14 = vld [vmem:[#allocation45_spill] sm:$0xff]  ;;  %v14376_v11 = vld [vmem:[#allocation48_spill] sm:$0xff] }
 0xeda   :  { %4793 = vmatprep.subr.mxu1 %v14361_v9  ;;  %4874 = vmatprep.subr.mxu0 %v4370_v32  ;;  %v4139_v33 = vsel %vm2886_vm1, %v14364_v7, %v14363_v58  ;;  %v11707_v3 = vsel %vm2886_vm1, %v14363_v58, %v14364_v7  ;;  %v4237_v46 = vsel %vm2984_vm15, %v14366_v2, %v14365_v21  ;;  %v14380_v58 = vld [vmem:[#allocation29_spill] sm:$0xff] }
 0xedb   :  { %4794 = vmatpush2.msra.mxu1 %v14362_v49  ;;  %4875 = vmatpush1.msra.mxu0 %v4369_v40  ;;  %v4261_v4 = vsel %vm2984_vm15, %v14365_v21, %v14366_v2  ;;  %v4236_v53 = vsel %vm2984_vm15, %v14370_v41, %v14369_v62  ;;  %v4260_v50 = vsel %vm2984_vm15, %v14369_v62, %v14370_v41  ;;  %v14378_v40 = vld [vmem:[#allocation15_spill] sm:$0xff] }
 0xedc   :  { %4795 = vmatprep.subr.mxu1 %v14367_v57  ;;  %4876 = vmatprep.subr.mxu0 %v4368_v45  ;;  %v4232_v16 = vpop.permute.xlu1 %4231  ;;  %v4500_v29 = vpop.permute.xlu0 %4499  ;;  %v4283_v34 = vmul.f32 %v11429_v37, %v4237_v46  ;;  %v4141_v31 = vsel %vm2886_vm1, %v14376_v11, %v14375_v14  ;;  %v4284_v8 = vmul.f32 %v11439_v22, %v4261_v4 }
 0xedd   :  { %v4238_v23 = vsel %vm2984_vm15, %v4230_v12, %v4232_v16  ;;  %v4262_v39 = vsel %vm2984_vm15, %v4232_v16, %v4230_v12  ;;  %4796 = vmatpush2.msra.mxu1 %v14368_v38  ;;  %4877 = vmatpush1.msra.mxu0 %v4367_v56  ;;  %v14372_v12 = vld [vmem:[#allocation40_spill] sm:$0xff]  ;;  %v4159_v55 = vsel %vm2886_vm1, %v14375_v14, %v14376_v11  ;;  %v14382_v16 = vld [vmem:[#allocation50_spill] sm:$0xff] }
 0xede   :  { %v4285_v44 = vmul.f32 %v11429_v37, %v4238_v23  ;;  %4797 = vmatprep.subr.mxu1 %v14371_v19  ;;  %4878 = vmatprep.subr.mxu0 %v4366_v24  ;;  %v4286_v43 = vmul.f32 %v11439_v22, %v4262_v39  ;;  %v4140_v5 = vsel %vm2886_vm1, %v14373_v42, %v14372_v12  ;;  %v14379_v24 = vld [vmem:[#allocation16_spill] sm:$0xff] }
 0xedf   :  { %v4158_v36 = vsel %vm2886_vm1, %v14372_v12, %v14373_v42  ;;  %4798 = vmatpush2.msra.mxu1 %v14374_v28  ;;  %4879 = vmatpush1.msra.mxu0 %v4365_v63  ;;  %v4282_v9 = vmul.f32 %v11439_v22, %v4260_v50  ;;  %v4281_v45 = vmul.f32 %v11429_v37, %v4236_v53  ;;  %v14381_v22 = vld [vmem:[#allocation47_spill] sm:$0xff] }
 0xee0   :  { %4799 = vmatprep.subr.mxu1 %v14377_v52  ;;  %4880 = vmatprep.subr.mxu0 %v4286_v43  ;;  %v4136_v59 = vpop.permute.xlu1 %4135  ;;  %v4179_v49 = vmul.f32 %v14360_v15, %v4158_v36  ;;  %v4181_v7 = vmul.f32 %v14360_v15, %v4159_v55  ;;  %v4484_v21 = vpop.permute.xlu0 %4483  ;;  %v4182_v46 = vmul.f32 %v11480_v6, %v4141_v31 }
 0xee1   :  { %v4142_v32 = vsel %vm2886_vm1, %v4136_v59, %v4118_v18  ;;  %v4160_v63 = vsel %vm2886_vm1, %v4118_v18, %v4136_v59  ;;  %4800 = vmatpush2.msra.mxu1 %v14378_v40  ;;  %4881 = vmatpush1.msra.mxu0 %v4285_v44  ;;  %v4178_v18 = vmul.f32 %v11480_v6, %v4139_v33 }
 0xee2   :  { %v4183_v48 = vmul.f32 %v14360_v15, %v4160_v63  ;;  %4801 = vmatprep.subr.mxu1 %v14379_v24  ;;  %4882 = vmatprep.subr.mxu0 %v4284_v8  ;;  %v4184_v56 = vmul.f32 %v11480_v6, %v4142_v32  ;;  %v4180_v57 = vmul.f32 %v11480_v6, %v4140_v5  ;;  %v4569_v32 = vld [vmem:[%s14039_s14] sm:$0xff]  ;;  %v4571_v24 = vld [vmem:[%s14039_s14 + $0x10] sm:$0xff] }
 0xee3   :  { %4802 = vmatpush2.msra.mxu1 %v14380_v58  ;;  %4883 = vmatpush1.msra.mxu0 %v4283_v34  ;;  %v4531_v37 = vsel %vm3260_vm9, %v14382_v16, %v14381_v22  ;;  %v4507_v33 = vsel %vm3260_vm9, %v14381_v22, %v14382_v16  ;;  %v4137_v62 = vsel %vm2886_vm1, %v11573_v1, %v11494_v35  ;;  %v14383_v34 = vld [vmem:[#allocation25_spill] sm:$0xff]  ;;  %v4582_v58 = vld [vmem:[%s14039_s14 + $0x68] sm:$0xff]  ;;  %v4585_v22 = vld [vmem:[%s14039_s14 + $0x80] sm:$0xff] }
 0xee4   :  { %4803 = vmatprep.subr.mxu1 %v4184_v56  ;;  %4884 = vmatprep.subr.mxu0 %v4282_v9  ;;  %v4502_v2 = vpop.permute.xlu1 %4501  ;;  %v4155_v41 = vsel %vm2886_vm1, %v11494_v35, %v11573_v1  ;;  %v4530_v53 = vsel %vm3260_vm9, %v11597_v30, %v11544_v27  ;;  %v4554_v35 = vmul.f32 %v11508_v25, %v4531_v37  ;;  %v4576_v56 = vld [vmem:[%s14039_s14 + $0x38] sm:$0xff]  ;;  %v4575_v9 = vld [vmem:[%s14039_s14 + $0x30] sm:$0xff]  ;;  %v4590_v16 = vld [vmem:[%s14039_s14 + $0xa8] sm:$0xff] }
 0xee5   :  { %v4508_v4 = vsel %vm3260_vm9, %v4500_v29, %v4502_v2  ;;  %v4532_v23 = vsel %vm3260_vm9, %v4502_v2, %v4500_v29  ;;  %4804 = vmatpush2.msra.mxu1 %v4183_v48  ;;  %4885 = vmatpush1.msra.mxu0 %v4281_v45  ;;  %v4505_v29 = vsel %vm3260_vm9, %v11595_v61, %v11649_v0  ;;  %v4574_v48 = vld [vmem:[%s14039_s14 + $0x28] sm:$0xff]  ;;  %v4580_v45 = vld [vmem:[%s14039_s14 + $0x58] sm:$0xff]  ;;  %v4587_v37 = vld [vmem:[%s14039_s14 + $0x90] sm:$0xff] }
 0xee6   :  { %v4555_v39 = vmul.f32 %v11505_v60, %v4508_v4  ;;  %4805 = vmatprep.subr.mxu1 %v4182_v46  ;;  %4886 = vmatprep.subr.mxu0 %v4280_v47  ;;  %v4556_v38 = vmul.f32 %v11508_v25, %v4532_v23  ;;  %v4506_v47 = vsel %vm3260_vm9, %v11544_v27, %v11597_v30  ;;  %v4028_v30 = vpop.permute.xlu0 %4027  ;;  %v4586_v2 = vld [vmem:[%s14039_s14 + $0x88] sm:$0xff]  ;;  %v4583_v46 = vld [vmem:[%s14039_s14 + $0x70] sm:$0xff]  ;;  %v4592_v4 = vld [vmem:[%s14039_s14 + $0xb8] sm:$0xff] }
 0xee7   :  { %4806 = vmatpush2.msra.mxu1 %v4181_v7  ;;  %4887 = vmatpush1.msra.mxu0 %v11694_v51  ;;  %v4177_v1 = vmul.f32 %v14360_v15, %v11707_v3  ;;  %v4553_v19 = vmul.f32 %v11505_v60, %v4507_v33  ;;  %v4529_v51 = vsel %vm3260_vm9, %v11649_v0, %v11595_v61  ;;  %v4584_v7 = vld [vmem:[%s14039_s14 + $0x78] sm:$0xff]  ;;  %v4589_v23 = vld [vmem:[%s14039_s14 + $0xa0] sm:$0xff]  ;;  %v4591_v33 = vld [vmem:[%s14039_s14 + $0xb0] sm:$0xff] }
 0xee8   :  { %4807 = vmatprep.subr.mxu1 %v4180_v57  ;;  %4908 = vmatprep.subr.mxu0 %v4556_v38  ;;  %v4486_v44 = vpop.permute.xlu1 %4485  ;;  %v4173_v27 = vmul.f32 %v14360_v15, %v4155_v41  ;;  %v4552_v43 = vmul.f32 %v11508_v25, %v4530_v53  ;;  %v4174_v50 = vmul.f32 %v11480_v6, %v4137_v62  ;;  %v4588_v57 = vld [vmem:[%s14039_s14 + $0x98] sm:$0xff] }
 0xee9   :  { %4808 = vmatpush2.msra.mxu1 %v4179_v49  ;;  %4909 = vmatpush2.msra.mxu0 %v4555_v39  ;;  %v4551_v12 = vmul.f32 %v11505_v60, %v4506_v47  ;;  %v4549_v3 = vmul.f32 %v11505_v60, %v4505_v29  ;;  %v4528_v42 = vsel %vm3260_vm9, %v4486_v44, %v4484_v21  ;;  %v4577_v49 = vld [vmem:[%s14039_s14 + $0x40] sm:$0xff] }
 0xeea   :  { %4809 = vmatprep.subr.mxu1 %v4178_v18  ;;  %4910 = vmatprep.subr.mxu0 %v4554_v35  ;;  %v4051_v61 = vsel %vm2794_vm12, %v11680_v54, %v11618_v26  ;;  %v4504_v0 = vsel %vm3260_vm9, %v4484_v21, %v4486_v44  ;;  %v4550_v6 = vmul.f32 %v11508_v25, %v4529_v51  ;;  %v4579_v18 = vld [vmem:[%s14039_s14 + $0x50] sm:$0xff]  ;;  %v4581_v21 = vld [vmem:[%s14039_s14 + $0x60] sm:$0xff] }
 0xeeb   :  { %4810 = vmatpush2.msra.mxu1 %v4177_v1  ;;  %4911 = vmatpush2.msra.mxu0 %v4553_v19  ;;  %v4069_v5 = vsel %vm2794_vm12, %v11618_v26, %v11680_v54  ;;  %v4548_v31 = vmul.f32 %v11508_v25, %v4528_v42  ;;  %v4547_v52 = vmul.f32 %v11505_v60, %v4504_v0  ;;  %v4480_v26 = vpop.permute.xlu0 %4479 }
 0xeec   :  { %4811 = vmatprep.subr.mxu1 %v11699_v17  ;;  %4912 = vmatprep.subr.mxu0 %v4552_v43  ;;  %v4046_v15 = vpop.permute.xlu1 %4045  ;;  %v14384_v17 = vld [vmem:[#allocation26_spill] sm:$0xff] }
 0xeed   :  { %v4052_v36 = vsel %vm2794_vm12, %v4046_v15, %v4028_v30  ;;  %v4070_v28 = vsel %vm2794_vm12, %v4028_v30, %v4046_v15  ;;  %4812 = vmatpush2.msra.mxu1 %v11689_v20  ;;  %4913 = vmatpush2.msra.mxu0 %v4551_v12  ;;  %v4092_v59 = vmul.f32 %v14384_v17, %v4051_v61  ;;  %vm5119_vm12 = vcmask 556032  }
 0xeee   :  { %v4093_v14 = vmul.f32 %v14383_v34, %v4070_v28  ;;  %4813 = vmatprep.subr.mxu1 %v4174_v50  ;;  %4914 = vmatprep.subr.mxu0 %v4550_v6  ;;  %v4094_v11 = vmul.f32 %v14384_v17, %v4052_v36  ;;  %v4091_v20 = vmul.f32 %v14383_v34, %v4069_v5 }
 0xeef   :  { %4814 = vmatpush2.msra.mxu1 %v4173_v27  ;;  %4915 = vmatpush2.msra.mxu0 %v4549_v3 }
 0xef0   :  { %4815 = vmatprep.subr.mxu1 %v4094_v11  ;;  %4916 = vmatprep.subr.mxu0 %v4548_v31  ;;  %v4482_v54 = vpop.permute.xlu1 %4481 }
 0xef1   :  { %v4503_v8 = vsel %vm3260_vm9, %v4480_v26, %v4482_v54  ;;  %v4527_v55 = vsel %vm3260_vm9, %v4482_v54, %v4480_v26  ;;  %4816 = vmatpush2.msra.mxu1 %v4093_v14  ;;  %4917 = vmatpush2.msra.mxu0 %v4547_v52  ;;  %vm5302_vm9 = vcmask 490496  }
 0xef2   :  { %v4545_v63 = vmul.f32 %v11505_v60, %v4503_v8  ;;  %4817 = vmatprep.subr.mxu1 %v4092_v59  ;;  %v4546_v40 = vmul.f32 %v11508_v25, %v4527_v55  ;;  %v4573_v60 = vld [vmem:[%s14039_s14 + $0x20] sm:$0xff]  ;;  %v4578_v25 = vld [vmem:[%s14039_s14 + $0x48] sm:$0xff]  ;;  %s8507_s14 = smov 60  }
 0xef3   :  { %4818 = vmatpush2.msra.mxu1 %v4091_v20 }
 0xef4   :  { %4820 = vmatmul.mubr.f32.vlgmr.msra.gmra.mxu1 %v4569_v32  ;;  %4918 = vmatprep.subr.mxu0 %v4546_v40 }
 0xef5   :  { %4919 = vmatpush2.msra.mxu0 %v4545_v63  ;;  %4825 = vmatprep.mubr.f32.mxu1 %v4574_v48  ;;  %v4725_v44 = vpop.permute.xlu0 %4724 }
 0xef6   :  { %4921 = vmatmul.mubr.f32.vlgmr.msra.gmra.mxu0 %v4571_v24 }
 0xef7   :  { %8340 = vmatprep.mubr.msk.f32.mxu0 %vm3496_vm11, %v4576_v56 }
 0xef8   :  { %4826 = vmatmul.mubr.f32.gmra.mxu1 %v4573_v60 }
 0xef9   :  { %4831 = vmatprep.mubr.f32.mxu1 %v4578_v25  ;;  %v4715_v3 = vpop.permute.xlu0 %4714 }
 0xefa   :  { %4927 = vmatmul.mubr.f32.gmra.mxu0 %v4575_v9 }
 0xefb   :  { %8341 = vmatprep.mubr.msk.f32.mxu0 %vm3496_vm11, %v4580_v45 }
 0xefc   :  { %4832 = vmatmul.mubr.f32.gmra.mxu1 %v4577_v49 }
 0xefd   :  { %4837 = vmatprep.mubr.f32.mxu1 %v4582_v58  ;;  %v4720_v35 = vpop.permute.xlu1 %4719  ;;  %v4735_v59 = vpop.permute.xlu0 %4734 }
 0xefe   :  { %4933 = vmatmul.mubr.f32.gmra.mxu0 %v4579_v18 }
 0xeff   :  { %8342 = vmatprep.mubr.msk.f32.mxu0 %vm3496_vm11, %v4584_v7 }
 0xf00   :  { %4838 = vmatmul.mubr.f32.gmra.mxu1 %v4581_v21 }
 0xf01   :  { %4843 = vmatprep.mubr.f32.mxu1 %v4586_v2  ;;  %v4710_v5 = vpop.permute.xlu1 %4709 }
 0xf02   :  { %4939 = vmatmul.mubr.f32.gmra.mxu0 %v4583_v46 }
 0xf03   :  { %8343 = vmatprep.mubr.msk.f32.mxu0 %vm3496_vm11, %v4588_v57 }
 0xf04   :  { %4844 = vmatmul.mubr.f32.gmra.mxu1 %v4585_v22 }
 0xf05   :  { %4849 = vmatprep.mubr.f32.mxu1 %v4590_v16  ;;  %v4730_v40 = vpop.permute.xlu1 %4729 }
 0xf06   :  { %4945 = vmatmul.mubr.f32.gmra.mxu0 %v4587_v37 }
 0xf07   :  { %8344 = vmatprep.mubr.msk.f32.mxu0 %vm3496_vm11, %v4592_v4 }
 0xf08   :  { %4850 = vmatmul.mubr.f32.gmra.mxu1 %v4589_v23 }
 0xf0a   :  { %4951 = vmatmul.mubr.f32.gmra.mxu0 %v4591_v33 }
 0xfb4   :  { %v4821_v39 = vpop.f32.mrf.mxu1 }
 0xfb5   :  { %v4822_v48 = vadd.f32 %v4821_v39, %v4710_v5 }
 0xfb6   :  { %v4823_v38 = vpop.f32.mrf.mxu1  ;;  %v4922_v62 = vpop.f32.mrf.mxu0 }
 0xfb7   :  { %v4824_v20 = vadd.f32 %v4823_v38, %v4710_v5  ;;  %v4923_v7 = vadd.f32 %v4922_v62, %v4822_v48 }
 0xfb8   :  { %v4827_v41 = vpop.f32.mrf.mxu1  ;;  %v4924_v53 = vpop.f32.mrf.mxu0 }
 0xfb9   :  { %v4828_v11 = vadd.f32 %v4827_v41, %v4715_v3  ;;  %v4925_v9 = vadd.f32 %v4924_v53, %v4824_v20 }
 0xfba   :  { %v4829_v47 = vpop.f32.mrf.mxu1  ;;  %v4928_v29 = vpop.f32.mrf.mxu0 }
 0xfbb   :  { %v4830_v36 = vadd.f32 %v4829_v47, %v4715_v3  ;;  %v4929_v24 = vadd.f32 %v4928_v29, %v4828_v11  ;;  %v4957_v57 = vadd.f32 %v4925_v9, %v4923_v7 }
 0xfbc   :  { %v4833_v1 = vpop.f32.mrf.mxu1  ;;  %v4930_v19 = vpop.f32.mrf.mxu0 }
 0xfbd   :  { %v4834_v51 = vadd.f32 %v4833_v1, %v4720_v35  ;;  %v4931_v8 = vadd.f32 %v4930_v19, %v4830_v36 }
 0xfbe   :  { %v4835_v27 = vpop.f32.mrf.mxu1  ;;  %v4934_v30 = vpop.f32.mrf.mxu0 }
 0xfbf   :  { %v4836_v43 = vadd.f32 %v4835_v27, %v4720_v35  ;;  %v4935_v42 = vadd.f32 %v4934_v30, %v4834_v51  ;;  %v4960_v45 = vadd.f32 %v4931_v8, %v4929_v24 }
 0xfc0   :  { %v4839_v50 = vpop.f32.mrf.mxu1  ;;  %v4936_v12 = vpop.f32.mrf.mxu0 }
 0xfc1   :  { %v4840_v61 = vadd.f32 %v4839_v50, %v4725_v44  ;;  %v4937_v0 = vadd.f32 %v4936_v12, %v4836_v43 }
 0xfc2   :  { %v4841_v15 = vpop.f32.mrf.mxu1  ;;  %v4940_v6 = vpop.f32.mrf.mxu0 }
 0xfc3   :  { %v4963_v28 = vadd.f32 %v4937_v0, %v4935_v42  ;;  %v4842_v34 = vadd.f32 %v4841_v15, %v4725_v44  ;;  %v4941_v31 = vadd.f32 %v4940_v6, %v4840_v61 }
 0xfc4   :  { %v4845_v14 = vpop.f32.mrf.mxu1  ;;  %v4942_v17 = vpop.f32.mrf.mxu0 }
 0xfc5   :  { %v4943_v52 = vadd.f32 %v4942_v17, %v4842_v34  ;;  %4964 = vadd.xlane.f32.xlu1 %v4963_v28  ;;  %v4846_v21 = vadd.f32 %v4845_v14, %v4730_v40 }
 0xfc6   :  { %v4847_v26 = vpop.f32.mrf.mxu1  ;;  %v4946_v54 = vpop.f32.mrf.mxu0 }
 0xfc7   :  { %v4966_v55 = vadd.f32 %v4943_v52, %v4941_v31  ;;  %v4848_v49 = vadd.f32 %v4847_v26, %v4730_v40  ;;  %v4947_v37 = vadd.f32 %v4946_v54, %v4846_v21  ;;  %v14386_v21 = vld [vmem:[#allocation6_spill] sm:$0xff] }
 0xfc8   :  { %v4851_v32 = vpop.f32.mrf.mxu1  ;;  %v4948_v63 = vpop.f32.mrf.mxu0 }
 0xfc9   :  { %v4852_v56 = vadd.f32 %v4851_v32, %v4735_v59  ;;  %4967 = vadd.xlane.f32.xlu0 %v4966_v55  ;;  %v4949_v22 = vadd.f32 %v4948_v63, %v4848_v49 }
 0xfca   :  { %v4853_v60 = vpop.f32.mrf.mxu1  ;;  %v4952_v25 = vpop.f32.mrf.mxu0 }
 0xfcb   :  { %v4854_v58 = vadd.f32 %v4853_v60, %v4735_v59  ;;  %v4953_v2 = vadd.f32 %v4952_v25, %v4852_v56  ;;  %v4969_v4 = vadd.f32 %v4949_v22, %v4947_v37 }
 0xfcc   :  { %v4954_v18 = vpop.f32.mrf.mxu0 }
 0xfcd   :  { %v4955_v46 = vadd.f32 %v4954_v18, %v4854_v58  ;;  %4961 = vadd.xlane.f32.xlu0 %v4960_v45  ;;  %v14385_v18 = vld [vmem:[#allocation5_spill] sm:$0xff] }
 0xfcf   :  { %v4972_v16 = vadd.f32 %v4955_v46, %v4953_v2 }
 0xfd1   :  { %4973 = vadd.xlane.f32.xlu1 %v4972_v16  ;;  %4958 = vadd.xlane.f32.xlu0 %v4957_v57 }
 0xfd5   :  { %4970 = vadd.xlane.f32.xlu0 %v4969_v4 }
0x104e   :  { %v4965_v23 = vpop.xlane.xlu1 %4964 }
0x104f   :  { %v4977_v33 = vmul.f32 0.00390625, %v4965_v23 }
0x1051   :  { %v11890_v39 = vsub.f32 %v4935_v42, %v4977_v33  ;;  %v11892_v38 = vsub.f32 %v4937_v0, %v4977_v33 }
0x1052   :  { %v4968_v41 = vpop.xlane.xlu0 %4967 }
0x1053   :  { %v4997_v62 = vmul.f32 %v11890_v39, %v11890_v39  ;;  %v4998_v53 = vmul.f32 %v11892_v38, %v11892_v38  ;;  %v4978_v47 = vmul.f32 0.00390625, %v4968_v41 }
0x1055   :  { %v5011_v29 = vadd.f32 %v4998_v53, %v4997_v62  ;;  %v11898_v1 = vsub.f32 %v4941_v31, %v4978_v47  ;;  %v11900_v19 = vsub.f32 %v4943_v52, %v4978_v47  ;;  %v14387_v53 = vld [vmem:[#allocation3_spill] sm:$0xff] }
0x1056   :  { %v4962_v44 = vpop.xlane.xlu0 %4961 }
0x1057   :  { %v4976_v35 = vmul.f32 0.00390625, %v4962_v44  ;;  %5012 = vadd.xlane.f32.xlu0 %v5011_v29  ;;  %v4999_v61 = vmul.f32 %v11898_v1, %v11898_v1  ;;  %v5000_v0 = vmul.f32 %v11900_v19, %v11900_v19  ;;  %v14388_v29 = vld [vmem:[#allocation4_spill] sm:$0xff] }
0x1059   :  { %v4983_v51 = vsub.f32 %v4929_v24, %v4976_v35  ;;  %v4984_v27 = vsub.f32 %v4931_v8, %v4976_v35  ;;  %v5014_v31 = vadd.f32 %v5000_v0, %v4999_v61  ;;  %v14389_v0 = vld [vmem:[#allocation7_spill] sm:$0xff] }
0x105a   :  { %v4959_v30 = vpop.xlane.xlu0 %4958  ;;  %v4974_v43 = vpop.xlane.xlu1 %4973 }
0x105b   :  { %v4995_v50 = vmul.f32 %v4983_v51, %v4983_v51  ;;  %v4996_v12 = vmul.f32 %v4984_v27, %v4984_v27  ;;  %v4975_v3 = vmul.f32 0.00390625, %v4959_v30  ;;  %v4980_v42 = vmul.f32 0.00390625, %v4974_v43 }
0x105d   :  { %v4981_v15 = vsub.f32 %v4923_v7, %v4975_v3  ;;  %v4982_v6 = vsub.f32 %v4925_v9, %v4975_v3  ;;  %v11906_v5 = vsub.f32 %v4953_v2, %v4980_v42  ;;  %v11908_v36 = vsub.f32 %v4955_v46, %v4980_v42 }
0x105e   :  { %v4971_v28 = vpop.xlane.xlu0 %4970  ;;  %v5008_v34 = vadd.f32 %v4996_v12, %v4995_v50 }
0x105f   :  { %v4993_v14 = vmul.f32 %v4981_v15, %v4981_v15  ;;  %v4994_v17 = vmul.f32 %v4982_v6, %v4982_v6  ;;  %v4979_v11 = vmul.f32 0.00390625, %v4971_v28  ;;  %v5003_v26 = vmul.f32 %v11906_v5, %v11906_v5 }
0x1060   :  { %5009 = vadd.xlane.f32.xlu1 %v5008_v34  ;;  %v5004_v54 = vmul.f32 %v11908_v36, %v11908_v36 }
0x1061   :  { %v5005_v52 = vadd.f32 %v4994_v17, %v4993_v14  ;;  %v11914_v59 = vsub.f32 %v4947_v37, %v4979_v11  ;;  %v11916_v20 = vsub.f32 %v4949_v22, %v4979_v11  ;;  %v14390_v14 = vld [vmem:[#allocation8_spill] sm:$0xff] }
0x1062   :  { %v5020_v63 = vadd.f32 %v5004_v54, %v5003_v26  ;;  %v14392_v26 = vld [vmem:[#allocation10_spill] sm:$0xff] }
0x1063   :  { %5006 = vadd.xlane.f32.xlu0 %v5005_v52  ;;  %v5001_v8 = vmul.f32 %v11914_v59, %v11914_v59  ;;  %v5002_v55 = vmul.f32 %v11916_v20, %v11916_v20 }
0x1064   :  { %5015 = vadd.xlane.f32.xlu1 %v5014_v31  ;;  %v14391_v31 = vld [vmem:[#allocation9_spill] sm:$0xff] }
0x1065   :  { %v5017_v32 = vadd.f32 %v5002_v55, %v5001_v8 }
0x1067   :  { %5018 = vadd.xlane.f32.xlu0 %v5017_v32  ;;  %v14393_v32 = vld [vmem:[#allocation11_spill] sm:$0xff] }
0x1068   :  { %5021 = vadd.xlane.f32.xlu1 %v5020_v63 }
0x10e0   :  { %v5013_v40 = vpop.xlane.xlu0 %5012 }
0x10e1   :  { %v5025_v46 = vmul.f32 0.00390625, %v5013_v40 }
0x10e3   :  { %v5031_v16 = vadd.f32 1e-05, %v5025_v46  ;;  %v5804_v46 = vld [vmem:[%s14041_s17 + $0x8] sm:$0xff] }
0x10e9   :  { %v5010_v60 = vpop.xlane.xlu1 %5009 }
0x10ea   :  { %v5024_v25 = vmul.f32 0.00390625, %v5010_v60 }
0x10ec   :  { %v5007_v48 = vpop.xlane.xlu0 %5006  ;;  %v5030_v9 = vadd.f32 1e-05, %v5024_v25  ;;  %v14395_v25 = vld [vmem:[#allocation13_spill] sm:$0xff] }
0x10ed   :  { %v5023_v24 = vmul.f32 0.00390625, %v5007_v48  ;;  %v5016_v4 = vpop.xlane.xlu1 %5015 }
0x10ee   :  { %v5026_v41 = vmul.f32 0.00390625, %v5016_v4 }
0x10ef   :  { %v5029_v56 = vadd.f32 1e-05, %v5023_v24 }
0x10f0   :  { %v5032_v62 = vadd.f32 1e-05, %v5026_v41 }
0x10f1   :  { %8453 = vrsqrt.f32 %v5029_v56  ;;  %v5022_v3 = vpop.xlane.xlu1 %5021  ;;  %v14394_v56 = vld [vmem:[#allocation12_spill] sm:$0xff] }
0x10f2   :  { %8455 = vrsqrt.f32 %v5030_v9  ;;  %v5028_v61 = vmul.f32 0.00390625, %v5022_v3 }
0x10f3   :  { %8457 = vrsqrt.f32 %v5031_v16  ;;  %v5674_v16 = vld [vmem:[%s14042_s16 + $0x18] sm:$0xff] }
0x10f4   :  { %8459 = vrsqrt.f32 %v5032_v62  ;;  %v5034_v28 = vadd.f32 1e-05, %v5028_v61  ;;  %8352 = vmatprep.mubr.msk.f32.mxu1 %vm3496_vm11, %v5674_v16 }
0x10fe   :  { %v8454_v45 = vpop.eup %8453 }
0x10ff   :  { %v5041_v49 = vmul.f32 %v8454_v45, %v4981_v15  ;;  %v5042_v58 = vmul.f32 %v8454_v45, %v4982_v6  ;;  %v8456_v37 = vpop.eup %8455 }
0x1100   :  { %v5043_v23 = vmul.f32 %v8456_v37, %v4983_v51  ;;  %v5044_v33 = vmul.f32 %v8456_v37, %v4984_v27  ;;  %v5019_v27 = vpop.xlane.xlu0 %5018  ;;  %v8458_v43 = vpop.eup %8457 }
0x1101   :  { %v5054_v7 = vadd.f32 %v5042_v58, %v14385_v18  ;;  %v5053_v2 = vadd.f32 %v5041_v49, %v14386_v21  ;;  %v5027_v30 = vmul.f32 0.00390625, %v5019_v27  ;;  %v5046_v50 = vmul.f32 %v8458_v43, %v11892_v38  ;;  %v8460_v6 = vpop.eup %8459  ;;  %v14396_v49 = vld [vmem:[#allocation14_spill] sm:$0xff] }
0x1102   :  { %v5056_v47 = vadd.f32 %v5044_v33, %v14387_v53  ;;  %v5055_v44 = vadd.f32 %v5043_v23, %v14388_v29  ;;  %v5045_v42 = vmul.f32 %v8458_v43, %v11890_v39  ;;  %v5047_v38 = vmul.f32 %v8460_v6, %v11898_v1  ;;  %v5808_v23 = vld [vmem:[%s14041_s17 + $0x28] sm:$0xff]  ;;  %v5805_v33 = vld [vmem:[%s14041_s17 + $0x10] sm:$0xff]  ;;  %v5803_v53 = vld [vmem:[%s14041_s17] sm:$0xff] }
0x1103   :  { %v11924_v57 = vmax.f32 %v5054_v7, 0.0  ;;  %v11926_v22 = vmax.f32 %v5053_v2, 0.0  ;;  %v5033_v12 = vadd.f32 1e-05, %v5027_v30  ;;  %v5058_v15 = vadd.f32 %v5046_v50, %v14389_v0  ;;  %v5672_v2 = vld [vmem:[%s14042_s16 + $0x8] sm:$0xff] }
0x1104   :  { %v11946_v35 = vmax.f32 %v5056_v47, 0.0  ;;  %v11948_v51 = vmax.f32 %v5055_v44, 0.0  ;;  %v5057_v17 = vadd.f32 %v5045_v42, %v14390_v14  ;;  %v5048_v39 = vmul.f32 %v8460_v6, %v11900_v19  ;;  %5921 = vmatprep.mubr.f32.mxu0 %v5672_v2  ;;  %v5807_v44 = vld [vmem:[%s14041_s17 + $0x20] sm:$0xff] }
0x1105   :  { %5272 = vrot.lane.b32.xlu0 %v11924_v57, %s8507_s14  ;;  %5290 = vrot.lane.b32.xlu1 %v11926_v22, %s8507_s14  ;;  %8461 = vrsqrt.f32 %v5033_v12  ;;  %v11970_v34 = vmax.f32 %v5058_v15, 0.0  ;;  %v5059_v52 = vadd.f32 %v5047_v38, %v14391_v31  ;;  %v8346_v31 = vld [vmem:[%s14043_s3 + $0x2] ss:$8 sm:$0x3] }
0x1106   :  { %8463 = vrsqrt.f32 %v5034_v28  ;;  %v11978_v11 = vmax.f32 %v5057_v17, 0.0  ;;  %v5060_v54 = vadd.f32 %v5048_v39, %v14392_v26 }
0x1107   :  { %v11985_v1 = vmax.f32 %v5059_v52, 0.0  ;;  %v12153_v52 = vrot.slane %v8346_v31, %v9244_v10 }
0x1108   :  { %v11993_v55 = vmax.f32 %v5060_v54, 0.0 }
0x1109   :  { %5180 = vrot.lane.b32.xlu0 %v11924_v57, %s8508_s24  ;;  %5198 = vrot.lane.b32.xlu1 %v11926_v22, %s8508_s24  ;;  %14397 = vst [vmem:[#allocation41_spill] sm:$0xff] %v12153_v52 }
0x110d   :  { %5083 = vrot.lane.b32.xlu0 %v11924_v57, %s8509_s11  ;;  %5107 = vrot.lane.b32.xlu1 %v11926_v22, %s8509_s11 }
0x1111   :  { %5468 = vrot.lane.b32.xlu0 %v11926_v22, %s8510_s6  ;;  %5470 = vrot.lane.b32.xlu1 %v11924_v57, %s8510_s6 }
0x1112   :  { %v8462_v8 = vpop.eup %8461 }
0x1113   :  { %v5050_v19 = vmul.f32 %v8462_v8, %v11916_v20  ;;  %v8464_v40 = vpop.eup %8463  ;;  %v5049_v48 = vmul.f32 %v8462_v8, %v11914_v59  ;;  %v12158_v8 = vrot.slane %v8346_v31, %v9250_v13 }
0x1114   :  { %v5052_v20 = vmul.f32 %v8464_v40, %v11908_v36  ;;  %v5051_v36 = vmul.f32 %v8464_v40, %v11906_v5  ;;  %v5806_v5 = vld [vmem:[%s14041_s17 + $0x18] sm:$0xff] }
0x1115   :  { %5274 = vrot.lane.b32.xlu0 %v11946_v35, %s8507_s14  ;;  %5292 = vrot.lane.b32.xlu1 %v11948_v51, %s8507_s14  ;;  %v5062_v63 = vadd.f32 %v5050_v19, %v14393_v32  ;;  %v5061_v60 = vadd.f32 %v5049_v48, %v14394_v56  ;;  %14398 = vst [vmem:[#allocation32_spill] sm:$0xff] %v12158_v8 }
0x1116   :  { %v5064_v9 = vadd.f32 %v5052_v20, %v14395_v25  ;;  %v5063_v58 = vadd.f32 %v5051_v36, %v14396_v49 }
0x1117   :  { %v12006_v24 = vmax.f32 %v5062_v63, 0.0  ;;  %v12019_v59 = vmax.f32 %v5061_v60, 0.0 }
0x1118   :  { %v12021_v45 = vmax.f32 %v5064_v9, 0.0  ;;  %v12032_v18 = vmax.f32 %v5063_v58, 0.0 }
0x1119   :  { %5182 = vrot.lane.b32.xlu0 %v11946_v35, %s8508_s24  ;;  %5200 = vrot.lane.b32.xlu1 %v11948_v51, %s8508_s24 }
0x111d   :  { %5085 = vrot.lane.b32.xlu0 %v11946_v35, %s8509_s11  ;;  %5109 = vrot.lane.b32.xlu1 %v11948_v51, %s8509_s11 }
0x1121   :  { %5472 = vrot.lane.b32.xlu0 %v11948_v51, %s8510_s6  ;;  %5474 = vrot.lane.b32.xlu1 %v11946_v35, %s8510_s6 }
0x1125   :  { %5184 = vrot.lane.b32.xlu0 %v11970_v34, %s8508_s24  ;;  %5276 = vrot.lane.b32.xlu1 %v11970_v34, %s8507_s14 }
0x1129   :  { %5087 = vrot.lane.b32.xlu0 %v11970_v34, %s8509_s11  ;;  %5294 = vrot.lane.b32.xlu1 %v11978_v11, %s8507_s14 }
0x112d   :  { %5202 = vrot.lane.b32.xlu1 %v11978_v11, %s8508_s24  ;;  %5296 = vrot.lane.b32.xlu0 %v11985_v1, %s8507_s14 }
0x1131   :  { %5111 = vrot.lane.b32.xlu1 %v11978_v11, %s8509_s11  ;;  %5186 = vrot.lane.b32.xlu0 %v11993_v55, %s8508_s24 }
0x1135   :  { %5278 = vrot.lane.b32.xlu1 %v11993_v55, %s8507_s14  ;;  %5089 = vrot.lane.b32.xlu0 %v11993_v55, %s8509_s11 }
0x1139   :  { %5204 = vrot.lane.b32.xlu1 %v11985_v1, %s8508_s24  ;;  %5188 = vrot.lane.b32.xlu0 %v12006_v24, %s8508_s24 }
0x113d   :  { %5113 = vrot.lane.b32.xlu1 %v11985_v1, %s8509_s11  ;;  %5091 = vrot.lane.b32.xlu0 %v12006_v24, %s8509_s11 }
0x1141   :  { %5206 = vrot.lane.b32.xlu1 %v12019_v59, %s8508_s24  ;;  %5190 = vrot.lane.b32.xlu0 %v12021_v45, %s8508_s24 }
0x1145   :  { %5115 = vrot.lane.b32.xlu1 %v12019_v59, %s8509_s11  ;;  %5484 = vrot.lane.b32.xlu0 %v12019_v59, %s8510_s6 }
0x1149   :  { %5372 = vrot.lane.b32.xlu0 %v12006_v24, %s8511_s1  ;;  %5208 = vrot.lane.b32.xlu1 %v12032_v18, %s8508_s24 }
0x114d   :  { %5093 = vrot.lane.b32.xlu0 %v12021_v45, %s8509_s11  ;;  %5486 = vrot.lane.b32.xlu1 %v12006_v24, %s8510_s6 }
0x1151   :  { %5480 = vrot.lane.b32.xlu0 %v11985_v1, %s8510_s6  ;;  %5390 = vrot.lane.b32.xlu1 %v12019_v59, %s8511_s1 }
0x1155   :  { %5370 = vrot.lane.b32.xlu0 %v11993_v55, %s8511_s1  ;;  %5117 = vrot.lane.b32.xlu1 %v12032_v18, %s8509_s11 }
0x1159   :  { %5476 = vrot.lane.b32.xlu0 %v11978_v11, %s8510_s6  ;;  %5482 = vrot.lane.b32.xlu1 %v11993_v55, %s8510_s6 }
0x115d   :  { %5368 = vrot.lane.b32.xlu0 %v11970_v34, %s8511_s1  ;;  %5388 = vrot.lane.b32.xlu1 %v11985_v1, %s8511_s1 }
0x1161   :  { %5280 = vrot.lane.b32.xlu0 %v12006_v24, %s8507_s14  ;;  %5478 = vrot.lane.b32.xlu1 %v11970_v34, %s8510_s6 }
0x1165   :  { %5488 = vrot.lane.b32.xlu0 %v12032_v18, %s8510_s6  ;;  %5386 = vrot.lane.b32.xlu1 %v11978_v11, %s8511_s1 }
0x1169   :  { %5374 = vrot.lane.b32.xlu0 %v12021_v45, %s8511_s1  ;;  %5298 = vrot.lane.b32.xlu1 %v12019_v59, %s8507_s14 }
0x116d   :  { %5366 = vrot.lane.b32.xlu0 %v11946_v35, %s8511_s1  ;;  %5490 = vrot.lane.b32.xlu1 %v12021_v45, %s8510_s6 }
0x1171   :  { %5282 = vrot.lane.b32.xlu0 %v12021_v45, %s8507_s14  ;;  %5392 = vrot.lane.b32.xlu1 %v12032_v18, %s8511_s1 }
0x1175   :  { %5364 = vrot.lane.b32.xlu0 %v11924_v57, %s8511_s1  ;;  %5384 = vrot.lane.b32.xlu1 %v11948_v51, %s8511_s1 }
0x1177   :  { %v12085_v7 = vpop.permute.xlu0 %5272  ;;  %v12087_v21 = vpop.permute.xlu1 %5290 }
0x1178   :  { %v12187_v49 = vsel %vm5302_vm9, %v12087_v21, %v12085_v7 }
0x1179   :  { %5826 = vperm.xlu0 %8403, %v5806_v5   ;;  %5300 = vrot.lane.b32.xlu1 %v12032_v18, %s8507_s14  ;;  %14405 = vst [vmem:[#allocation31_spill] sm:$0xff] %v12187_v49  ;;  %v12194_v5 = vsel %vm5302_vm9, %v12085_v7, %v12087_v21 }
0x117a   :  { %14406 = vst [vmem:[#allocation21_spill] sm:$0xff] %v12194_v5  ;;  %v5340_v7 = vmul.f32 %v12153_v52, %v12194_v5 }
0x117b   :  { %v12100_v37 = vpop.permute.xlu0 %5180  ;;  %v12102_v4 = vpop.permute.xlu1 %5198 }
0x117d   :  { %5816 = vperm.xlu0 %8403, %v5804_v46   ;;  %5382 = vrot.lane.b32.xlu1 %v11926_v22, %s8511_s1 }
0x117f   :  { %v12113_v41 = vpop.permute.xlu0 %5083  ;;  %v12115_v62 = vpop.permute.xlu1 %5107 }
0x1181   :  { %5836 = vperm.xlu0 %8403, %v5808_v23   ;;  %5821 = vperm.xlu1 %8404, %v5805_v33   ;;  %v5341_v33 = vmul.f32 %v12158_v8, %v12187_v49 }
0x1183   :  { %v12120_v47 = vpop.permute.xlu0 %5468  ;;  %v12122_v29 = vpop.permute.xlu1 %5470 }
0x1185   :  { %5811 = vperm.xlu1 %8404, %v5803_v53  }
0x1187   :  { %v5275_v27 = vpop.permute.xlu0 %5274  ;;  %v5293_v30 = vpop.permute.xlu1 %5292 }
0x1188   :  { %v12177_v56 = vsel %vm5302_vm9, %v5293_v30, %v5275_v27  ;;  %v12180_v60 = vsel %vm5302_vm9, %v5275_v27, %v5293_v30  ;;  %v8350_v27 = vld [vmem:[%s14043_s3 + $0x7] ss:$8 sm:$0x3] }
0x1189   :  { %5831 = vperm.xlu1 %8404, %v5807_v44   ;;  %14403 = vst [vmem:[#allocation27_spill] sm:$0xff] %v12177_v56  ;;  %14404 = vst [vmem:[#allocation35_spill] sm:$0xff] %v12180_v60  ;;  %v5343_v2 = vmul.f32 %v12158_v8, %v12177_v56  ;;  %v5342_v46 = vmul.f32 %v12153_v52, %v12180_v60  ;;  %v8345_v44 = vld [vmem:[%s14043_s3 + $0x1] ss:$8 sm:$0x3] }
0x118a   :  { %v5241_v31 = vrot.slane %v8345_v44, %v9244_v10 }
0x118b   :  { %v12127_v43 = vpop.permute.xlu0 %5182  ;;  %v12129_v50 = vpop.permute.xlu1 %5200 }
0x118f   :  { %v12131_v12 = vpop.permute.xlu0 %5085  ;;  %v12133_v3 = vpop.permute.xlu1 %5109 }
0x1193   :  { %v12135_v42 = vpop.permute.xlu0 %5472  ;;  %v12137_v61 = vpop.permute.xlu1 %5474 }
0x1197   :  { %v12139_v0 = vpop.permute.xlu0 %5184  ;;  %v5277_v15 = vpop.permute.xlu1 %5276 }
0x119b   :  { %v12141_v6 = vpop.permute.xlu0 %5087  ;;  %v5295_v38 = vpop.permute.xlu1 %5294 }
0x119c   :  { %v12161_v19 = vsel %vm5302_vm9, %v5295_v38, %v5277_v15  ;;  %v12170_v40 = vsel %vm5302_vm9, %v5277_v15, %v5295_v38  ;;  %v5144_v38 = vld [vmem:[%s14043_s3] ss:$8 sm:$0x3] }
0x119d   :  { %14399 = vst [vmem:[#allocation34_spill] sm:$0xff] %v12161_v19  ;;  %14402 = vst [vmem:[#allocation30_spill] sm:$0xff] %v12170_v40  ;;  %v5345_v36 = vmul.f32 %v12158_v8, %v12161_v19  ;;  %v5344_v58 = vmul.f32 %v12153_v52, %v12170_v40 }
0x119f   :  { %v5297_v28 = vpop.permute.xlu0 %5296  ;;  %v12143_v14 = vpop.permute.xlu1 %5202 }
0x11a3   :  { %v12145_v17 = vpop.permute.xlu0 %5186  ;;  %v12147_v39 = vpop.permute.xlu1 %5111 }
0x11a7   :  { %v12155_v26 = vpop.permute.xlu0 %5089  ;;  %v5279_v54 = vpop.permute.xlu1 %5278 }
0x11a8   :  { %v12164_v32 = vsel %vm5302_vm9, %v5297_v28, %v5279_v54  ;;  %v12167_v63 = vsel %vm5302_vm9, %v5279_v54, %v5297_v28  ;;  %v8349_v28 = vld [vmem:[%s14043_s3 + $0x6] ss:$8 sm:$0x3]  ;;  %v5603_v54 = vrot.slane %v8350_v27, %v9244_v10 }
0x11a9   :  { %14400 = vst [vmem:[#allocation28_spill] sm:$0xff] %v12164_v32  ;;  %14401 = vst [vmem:[#allocation36_spill] sm:$0xff] %v12167_v63  ;;  %v5346_v48 = vmul.f32 %v12153_v52, %v12167_v63  ;;  %v5347_v20 = vmul.f32 %v12158_v8, %v12164_v32  ;;  %v5212_v8 = vsel %vm5210_vm10, %v12129_v50, %v12127_v43 }
0x11aa   :  { %v5230_v32 = vsel %vm5210_vm10, %v12127_v43, %v12129_v50  ;;  %v12284_v50 = vrot.slane %v8349_v28, %v9250_v13 }
0x11ab   :  { %v5189_v25 = vpop.permute.xlu0 %5188  ;;  %5857 = vmatprep.subr.mxu0 %v5347_v20  ;;  %v5205_v9 = vpop.permute.xlu1 %5204  ;;  %v12230_v20 = vrot.slane %v8349_v28, %v9244_v10 }
0x11ac   :  { %5858 = vmatpush1.msra.mxu0 %v5346_v48  ;;  %v12227_v48 = vrot.slane %v5144_v38, %v9244_v10 }
0x11ad   :  { %5859 = vmatprep.subr.mxu0 %v5345_v36 }
0x11ae   :  { %5860 = vmatpush1.msra.mxu0 %v5344_v58 }
0x11af   :  { %v12200_v16 = vpop.permute.xlu0 %5091  ;;  %5861 = vmatprep.subr.mxu0 %v5343_v2  ;;  %v12202_v23 = vpop.permute.xlu1 %5113  ;;  %v12235_v2 = vrot.slane %v8345_v44, %v9250_v13  ;;  %v5229_v44 = vsel %vm5210_vm10, %v12100_v37, %v12102_v4 }
0x11b0   :  { %5862 = vmatpush1.msra.mxu0 %v5342_v46  ;;  %v12238_v46 = vrot.slane %v8350_v27, %v9250_v13  ;;  %v5214_v27 = vsel %vm5210_vm10, %v5205_v9, %v12145_v17 }
0x11b1   :  { %5863 = vmatprep.subr.mxu0 %v5341_v33 }
0x11b2   :  { %5864 = vmatpush1.msra.mxu0 %v5340_v7 }
0x11b3   :  { %v5191_v21 = vpop.permute.xlu0 %5190  ;;  %v5207_v53 = vpop.permute.xlu1 %5206 }
0x11b4   :  { %v5215_v33 = vsel %vm5210_vm10, %v5207_v53, %v5189_v25  ;;  %v5233_v7 = vsel %vm5210_vm10, %v5189_v25, %v5207_v53  ;;  %v5232_v25 = vsel %vm5210_vm10, %v12145_v17, %v5205_v9  ;;  %v12254_v53 = vrot.slane %v5144_v38, %v9250_v13 }
0x11b5   :  { %v5619_v40 = vmul.f32 %v12238_v46, %v5233_v7  ;;  %v5231_v17 = vsel %vm5210_vm10, %v12139_v0, %v12143_v14  ;;  %v5256_v9 = vmul.f32 %v5241_v31, %v5233_v7  ;;  %v5618_v38 = vmul.f32 %v5603_v54, %v5215_v33 }
0x11b6   :  { %v5254_v63 = vmul.f32 %v5241_v31, %v5232_v25  ;;  %v5252_v7 = vmul.f32 %v5241_v31, %v5231_v17 }
0x11b7   :  { %v12214_v30 = vpop.permute.xlu0 %5484  ;;  %v12216_v15 = vpop.permute.xlu1 %5115 }
0x11bb   :  { %v12232_v36 = vpop.permute.xlu0 %5372  ;;  %v5209_v58 = vpop.permute.xlu1 %5208 }
0x11bc   :  { %v5216_v49 = vsel %vm5210_vm10, %v5209_v58, %v5191_v21  ;;  %v5234_v5 = vsel %vm5210_vm10, %v5191_v21, %v5209_v58  ;;  %v5213_v21 = vsel %vm5210_vm10, %v12143_v14, %v12139_v0  ;;  %v5257_v58 = vmul.f32 %v12235_v2, %v5215_v33 }
0x11bd   :  { %v5258_v56 = vmul.f32 %v5241_v31, %v5234_v5  ;;  %v5620_v60 = vmul.f32 %v5603_v54, %v5216_v49  ;;  %v5259_v52 = vmul.f32 %v12235_v2, %v5216_v49  ;;  %v5621_v19 = vmul.f32 %v12238_v46, %v5234_v5 }
0x11be   :  { %v5616_v0 = vmul.f32 %v5603_v54, %v5214_v27  ;;  %v5211_v14 = vsel %vm5210_vm10, %v12102_v4, %v12100_v37  ;;  %v5615_v33 = vmul.f32 %v12238_v46, %v5231_v17  ;;  %v5614_v43 = vmul.f32 %v5603_v54, %v5213_v21 }
0x11bf   :  { %v5094_v49 = vpop.permute.xlu0 %5093  ;;  %5865 = vmatprep.subr.mxu0 %v5259_v52  ;;  %5958 = vmatprep.subr.mxu1 %v5621_v19  ;;  %v12259_v5 = vpop.permute.xlu1 %5486  ;;  %v5255_v52 = vmul.f32 %v12235_v2, %v5214_v27  ;;  %v5617_v19 = vmul.f32 %v12238_v46, %v5232_v25  ;;  %v5248_v27 = vmul.f32 %v5241_v31, %v5229_v44 }
0x11c0   :  { %5866 = vmatpush1.msra.mxu0 %v5258_v56  ;;  %5959 = vmatpush1.msra.mxu1 %v5620_v60  ;;  %v5253_v60 = vmul.f32 %v12235_v2, %v5213_v21  ;;  %v5251_v37 = vmul.f32 %v12235_v2, %v5212_v8  ;;  %v5613_v4 = vmul.f32 %v12238_v46, %v5230_v32 }
0x11c1   :  { %5867 = vmatprep.subr.mxu0 %v5257_v58  ;;  %5960 = vmatprep.subr.mxu1 %v5619_v40  ;;  %v5610_v25 = vmul.f32 %v5603_v54, %v5211_v14  ;;  %v5250_v58 = vmul.f32 %v5241_v31, %v5230_v32  ;;  %v5249_v17 = vmul.f32 %v12235_v2, %v5211_v14  ;;  %v8348_v32 = vld [vmem:[%s14043_s3 + $0x5] ss:$8 sm:$0x3] }
0x11c2   :  { %5868 = vmatpush1.msra.mxu0 %v5256_v9  ;;  %5961 = vmatpush1.msra.mxu1 %v5618_v38  ;;  %v5612_v9 = vmul.f32 %v5603_v54, %v5212_v8  ;;  %v5611_v38 = vmul.f32 %v12238_v46, %v5229_v44  ;;  %v5142_v8 = vsel %vm5119_vm12, %v12200_v16, %v12216_v15 }
0x11c3   :  { %v12277_v56 = vpop.permute.xlu0 %5480  ;;  %5869 = vmatprep.subr.mxu0 %v5255_v52  ;;  %5962 = vmatprep.subr.mxu1 %v5617_v19  ;;  %v12279_v40 = vpop.permute.xlu1 %5390  ;;  %v5123_v44 = vsel %vm5119_vm12, %v12202_v23, %v12155_v26 }
0x11c4   :  { %5870 = vmatpush1.msra.mxu0 %v5254_v63  ;;  %5963 = vmatpush1.msra.mxu1 %v5616_v0  ;;  %v5124_v63 = vsel %vm5119_vm12, %v12216_v15, %v12200_v16  ;;  %v12311_v15 = vrot.slane %v8348_v32, %v9244_v10 }
0x11c5   :  { %5871 = vmatprep.subr.mxu0 %v5253_v60  ;;  %5964 = vmatprep.subr.mxu1 %v5615_v33  ;;  %v5165_v14 = vmul.f32 %v12254_v53, %v5124_v63  ;;  %v12322_v60 = vrot.slane %v8348_v32, %v9250_v13  ;;  %v5122_v33 = vsel %vm5119_vm12, %v12147_v39, %v12141_v6 }
0x11c6   :  { %5872 = vmatpush1.msra.mxu0 %v5252_v7  ;;  %5965 = vmatpush1.msra.mxu1 %v5614_v43  ;;  %v5164_v7 = vmul.f32 %v12227_v48, %v5142_v8  ;;  %v5581_v43 = vmul.f32 %v12230_v20, %v5124_v63  ;;  %v5161_v63 = vmul.f32 %v12254_v53, %v5122_v33 }
0x11c7   :  { %v12291_v21 = vpop.permute.xlu0 %5370  ;;  %5873 = vmatprep.subr.mxu0 %v5251_v37  ;;  %5966 = vmatprep.subr.mxu1 %v5613_v4  ;;  %v5118_v28 = vpop.permute.xlu1 %5117  ;;  %v5121_v37 = vsel %vm5119_vm12, %v12133_v3, %v12131_v12 }
0x11c8   :  { %v5125_v31 = vsel %vm5119_vm12, %v5118_v28, %v5094_v49  ;;  %v5143_v54 = vsel %vm5119_vm12, %v5094_v49, %v5118_v28  ;;  %5874 = vmatpush1.msra.mxu0 %v5250_v58  ;;  %5967 = vmatpush1.msra.mxu1 %v5612_v9  ;;  %v5141_v49 = vsel %vm5119_vm12, %v12155_v26, %v12202_v23 }
0x11c9   :  { %v5166_v52 = vmul.f32 %v12227_v48, %v5143_v54  ;;  %v5583_v2 = vmul.f32 %v12230_v20, %v5125_v31  ;;  %5875 = vmatprep.subr.mxu0 %v5249_v17  ;;  %5968 = vmatprep.subr.mxu1 %v5611_v38  ;;  %v5167_v46 = vmul.f32 %v12254_v53, %v5125_v31 }
0x11ca   :  { %5876 = vmatpush1.msra.mxu0 %v5248_v27  ;;  %5969 = vmatpush1.msra.mxu1 %v5610_v25  ;;  %v5584_v16 = vmul.f32 %v12284_v50, %v5143_v54  ;;  %v5582_v26 = vmul.f32 %v12284_v50, %v5142_v8  ;;  %v5140_v23 = vsel %vm5119_vm12, %v12141_v6, %v12147_v39 }
0x11cb   :  { %v12316_v19 = vpop.permute.xlu0 %5476  ;;  %5877 = vmatprep.subr.mxu0 %v5167_v46  ;;  %v12318_v0 = vpop.permute.xlu1 %5482  ;;  %v5163_v27 = vmul.f32 %v12254_v53, %v5123_v44  ;;  %v5162_v4 = vmul.f32 %v12227_v48, %v5141_v49  ;;  %v5580_v25 = vmul.f32 %v12284_v50, %v5141_v49  ;;  %v5139_v6 = vsel %vm5119_vm12, %v12131_v12, %v12133_v3 }
0x11cc   :  { %5970 = vmatprep.subr.mxu1 %v5584_v16  ;;  %5878 = vmatpush1.msra.mxu0 %v5166_v52  ;;  %v5579_v39 = vmul.f32 %v12230_v20, %v5123_v44  ;;  %v5120_v28 = vsel %vm5119_vm12, %v12115_v62, %v12113_v41  ;;  %v5160_v17 = vmul.f32 %v12227_v48, %v5140_v23 }
0x11cd   :  { %5971 = vmatpush1.msra.mxu1 %v5583_v2  ;;  %5879 = vmatprep.subr.mxu0 %v5165_v14  ;;  %v5578_v12 = vmul.f32 %v12284_v50, %v5140_v23  ;;  %v5138_v3 = vsel %vm5119_vm12, %v12113_v41, %v12115_v62  ;;  %v5577_v38 = vmul.f32 %v12230_v20, %v5122_v33 }
0x11ce   :  { %5972 = vmatprep.subr.mxu1 %v5582_v26  ;;  %5880 = vmatpush1.msra.mxu0 %v5164_v7  ;;  %v5159_v32 = vmul.f32 %v12254_v53, %v5121_v37  ;;  %v5158_v8 = vmul.f32 %v12227_v48, %v5139_v6  ;;  %v5518_v31 = vsel %vm5492_vm13, %v12137_v61, %v12135_v42  ;;  %v8347_v7 = vld [vmem:[%s14043_s3 + $0x3] ss:$8 sm:$0x3] }
0x11cf   :  { %5973 = vmatpush1.msra.mxu1 %v5581_v43  ;;  %v12343_v58 = vpop.permute.xlu0 %5368  ;;  %5881 = vmatprep.subr.mxu0 %v5163_v27  ;;  %v12345_v9 = vpop.permute.xlu1 %5388  ;;  %v5576_v54 = vmul.f32 %v12284_v50, %v5139_v6  ;;  %v5575_v52 = vmul.f32 %v12230_v20, %v5121_v37  ;;  %v5494_v41 = vsel %vm5492_vm13, %v12135_v42, %v12137_v61 }
0x11d0   :  { %5974 = vmatprep.subr.mxu1 %v5580_v25  ;;  %5882 = vmatpush1.msra.mxu0 %v5162_v4  ;;  %v5157_v46 = vmul.f32 %v12254_v53, %v5120_v28  ;;  %v5156_v44 = vmul.f32 %v12227_v48, %v5138_v3  ;;  %v5517_v16 = vsel %vm5492_vm13, %v12122_v29, %v12120_v47 }
0x11d1   :  { %5975 = vmatpush1.msra.mxu1 %v5579_v39  ;;  %5883 = vmatprep.subr.mxu0 %v5161_v63  ;;  %v5574_v49 = vmul.f32 %v12284_v50, %v5138_v3  ;;  %v5573_v14 = vmul.f32 %v12230_v20, %v5120_v28  ;;  %v5493_v42 = vsel %vm5492_vm13, %v12120_v47, %v12122_v29 }
0x11d2   :  { %5976 = vmatprep.subr.mxu1 %v5578_v12  ;;  %5884 = vmatpush1.msra.mxu0 %v5160_v17  ;;  %v5539_v61 = vmul.f32 %v12322_v60, %v5518_v31  ;;  %v5538_v48 = vmul.f32 %v12311_v15, %v5494_v41  ;;  %v5537_v50 = vmul.f32 %v12322_v60, %v5517_v16  ;;  %v8351_v12 = vld [vmem:[%s14043_s3 + $0x10] ss:$8 sm:$0x3] }
0x11d3   :  { %5977 = vmatpush1.msra.mxu1 %v5577_v38  ;;  %v12367_v62 = vpop.permute.xlu0 %5280  ;;  %5885 = vmatprep.subr.mxu0 %v5159_v32  ;;  %v5479_v2 = vpop.permute.xlu1 %5478  ;;  %v5536_v20 = vmul.f32 %v12311_v15, %v5493_v42  ;;  %v5497_v26 = vsel %vm5492_vm13, %v12214_v30, %v12259_v5  ;;  %v12408_v43 = vrot.slane %v8347_v7, %v9244_v10 }
0x11d4   :  { %5978 = vmatprep.subr.mxu1 %v5576_v54  ;;  %5886 = vmatpush1.msra.mxu0 %v5158_v8  ;;  %v5417_v4 = vsel %vm5394_vm14, %v12232_v36, %v12279_v40  ;;  %v5519_v39 = vsel %vm5492_vm13, %v5479_v2, %v12316_v19 }
0x11d5   :  { %5979 = vmatpush1.msra.mxu1 %v5575_v52  ;;  %5887 = vmatprep.subr.mxu0 %v5157_v46  ;;  %v5541_v17 = vmul.f32 %v12322_v60, %v5519_v39  ;;  %v5440_v3 = vmul.f32 %v12408_v43, %v5417_v4  ;;  %v14415_v39 = vld [vmem:[#allocation21_spill] sm:$0xff] }
0x11d6   :  { %5980 = vmatprep.subr.mxu1 %v5574_v49  ;;  %5888 = vmatpush1.msra.mxu0 %v5156_v44 }
0x11d7   :  { %5981 = vmatpush1.msra.mxu1 %v5573_v14  ;;  %v5489_v53 = vpop.permute.xlu0 %5488  ;;  %5889 = vmatprep.subr.mxu0 %v5539_v61  ;;  %v12381_v33 = vpop.permute.xlu1 %5386 }
0x11d8   :  { %5890 = vmatpush2.msra.mxu0 %v5538_v48  ;;  %v5397_v38 = vsel %vm5394_vm14, %v12381_v33, %v12343_v58 }
0x11d9   :  { %5891 = vmatprep.subr.mxu0 %v5537_v50 }
0x11da   :  { %5892 = vmatpush2.msra.mxu0 %v5536_v20 }
0x11db   :  { %5893 = vmatprep.subr.mxu0 %v12021_v45  ;;  %v12386_v47 = vpop.permute.xlu1 %5298  ;;  %v5375_v29 = vpop.permute.xlu0 %5374  ;;  %v5521_v45 = vsel %vm5492_vm13, %v12259_v5, %v12214_v30  ;;  %v5544_v30 = vmul.f32 %v12311_v15, %v5497_v26  ;;  %v5399_v5 = vsel %vm5394_vm14, %v12279_v40, %v12232_v36  ;;  %v5495_v36 = vsel %vm5492_vm13, %v12316_v19, %v5479_v2 }
0x11dc   :  { %5894 = vmatpush2.msra.mxu0 %v12032_v18  ;;  %v5545_v37 = vmul.f32 %v12322_v60, %v5521_v45  ;;  %v5325_v2 = vsel %vm5302_vm9, %v12367_v62, %v12386_v47  ;;  %v5307_v16 = vsel %vm5302_vm9, %v12386_v47, %v12367_v62  ;;  %v14408_v45 = vld [vmem:[#allocation28_spill] sm:$0xff] }
0x11dd   :  { %5895 = vmatprep.subr.mxu0 %v12006_v24  ;;  %v5520_v24 = vsel %vm5492_vm13, %v12318_v0, %v12277_v56 }
0x11de   :  { %5896 = vmatpush2.msra.mxu0 %v12019_v59 }
0x11df   :  { %5897 = vmatprep.subr.mxu0 %v11993_v55  ;;  %v5491_v18 = vpop.permute.xlu1 %5490  ;;  %v5367_v25 = vpop.permute.xlu0 %5366 }
0x11e0   :  { %v5498_v23 = vsel %vm5492_vm13, %v5489_v53, %v5491_v18  ;;  %v5522_v59 = vsel %vm5492_vm13, %v5491_v18, %v5489_v53  ;;  %5898 = vmatpush2.msra.mxu0 %v11985_v1  ;;  %v12420_v1 = vrot.slane %v8347_v7, %v9250_v13  ;;  %v14407_v7 = vld [vmem:[#allocation36_spill] sm:$0xff] }
0x11e1   :  { %v5546_v27 = vmul.f32 %v12311_v15, %v5498_v23  ;;  %5899 = vmatprep.subr.mxu0 %v11970_v34  ;;  %v5547_v55 = vmul.f32 %v12322_v60, %v5522_v59  ;;  %v5496_v34 = vsel %vm5492_vm13, %v12277_v56, %v12318_v0  ;;  %v5398_v0 = vsel %vm5394_vm14, %v12345_v9, %v12291_v21  ;;  %v14410_v59 = vld [vmem:[#allocation30_spill] sm:$0xff] }
0x11e2   :  { %5900 = vmatpush2.msra.mxu0 %v11978_v11  ;;  %v5543_v11 = vmul.f32 %v12322_v60, %v5520_v24  ;;  %v5542_v40 = vmul.f32 %v12311_v15, %v5496_v34  ;;  %v5439_v60 = vmul.f32 %v12420_v1, %v5398_v0  ;;  %v5437_v52 = vmul.f32 %v12420_v1, %v5397_v38  ;;  %v14409_v24 = vld [vmem:[#allocation32_spill] sm:$0xff]  ;;  %v14414_v34 = vld [vmem:[#allocation27_spill] sm:$0xff] }
0x11e3   :  { %5901 = vmatprep.subr.mxu0 %v11946_v35  ;;  %5982 = vmatprep.subr.mxu1 %v5547_v55  ;;  %v5393_v6 = vpop.permute.xlu1 %5392  ;;  %v14411_v55 = vld [vmem:[#allocation34_spill] sm:$0xff]  ;;  %v5675_v0 = vld [vmem:[%s14042_s16 + $0x20] sm:$0xff] }
0x11e4   :  { %v5400_v63 = vsel %vm5394_vm14, %v5393_v6, %v5375_v29  ;;  %v5418_v28 = vsel %vm5394_vm14, %v5375_v29, %v5393_v6  ;;  %5902 = vmatpush2.msra.mxu0 %v11948_v51  ;;  %5983 = vmatpush1.msra.mxu1 %v5546_v27  ;;  %v5416_v51 = vsel %vm5394_vm14, %v12291_v21, %v12345_v9  ;;  %v5283_v9 = vpop.permute.xlu0 %5282  ;;  %v5683_v38 = vld [vmem:[%s14042_s16 + $0x60] sm:$0xff] }
0x11e5   :  { %v5442_v56 = vmul.f32 %v12408_v43, %v5418_v28  ;;  %5903 = vmatprep.subr.mxu0 %v11924_v57  ;;  %5984 = vmatprep.subr.mxu1 %v5545_v37  ;;  %v5443_v35 = vmul.f32 %v12420_v1, %v5400_v63  ;;  %v5441_v57 = vmul.f32 %v12420_v1, %v5399_v5  ;;  %v14412_v5 = vld [vmem:[#allocation41_spill] sm:$0xff]  ;;  %v5676_v28 = vld [vmem:[%s14042_s16 + $0x28] sm:$0xff] }
0x11e6   :  { %5904 = vmatpush2.msra.mxu0 %v11926_v22  ;;  %5985 = vmatpush1.msra.mxu1 %v5544_v30  ;;  %v5540_v22 = vmul.f32 %v12311_v15, %v5495_v36  ;;  %v5415_v21 = vsel %vm5394_vm14, %v12343_v58, %v12381_v33  ;;  %v5438_v32 = vmul.f32 %v12408_v43, %v5416_v51  ;;  %v14416_v36 = vld [vmem:[#allocation31_spill] sm:$0xff]  ;;  %v5680_v51 = vld [vmem:[%s14042_s16 + $0x48] sm:$0xff] }
0x11e7   :  { %5905 = vmatprep.subr.mxu0 %v5443_v35  ;;  %5986 = vmatprep.subr.mxu1 %v5543_v11  ;;  %v5385_v19 = vpop.permute.xlu1 %5384  ;;  %v5640_v15 = vrot.slane %v8351_v12, %v9244_v10  ;;  %v5644_v58 = vrot.slane %v8351_v12, %v9250_v13  ;;  %v5436_v41 = vmul.f32 %v12408_v43, %v5415_v21  ;;  %v5671_v11 = vld [vmem:[%s14042_s16] sm:$0xff]  ;;  %v5673_v35 = vld [vmem:[%s14042_s16 + $0x10] sm:$0xff]  ;;  %v5684_v12 = vld [vmem:[%s14042_s16 + $0x68] sm:$0xff] }
0x11e8   :  { %5906 = vmatpush2.msra.mxu0 %v5442_v56  ;;  %5987 = vmatpush1.msra.mxu1 %v5542_v40  ;;  %v5396_v8 = vsel %vm5394_vm14, %v5385_v19, %v5367_v25  ;;  %v5414_v31 = vsel %vm5394_vm14, %v5367_v25, %v5385_v19  ;;  %v5365_v48 = vpop.permute.xlu0 %5364  ;;  %v5348_v6 = vmul.f32 %v14412_v5, %v5325_v2  ;;  %v5678_v40 = vld [vmem:[%s14042_s16 + $0x38] sm:$0xff]  ;;  %v5677_v19 = vld [vmem:[%s14042_s16 + $0x30] sm:$0xff]  ;;  %v5688_v21 = vld [vmem:[%s14042_s16 + $0x88] sm:$0xff] }
0x11e9   :  { %5907 = vmatprep.subr.mxu0 %v5441_v57  ;;  %5988 = vmatprep.subr.mxu1 %v5541_v17  ;;  %v5435_v14 = vmul.f32 %v12420_v1, %v5396_v8  ;;  %v5434_v61 = vmul.f32 %v12408_v43, %v5414_v31  ;;  %v5656_v33 = vmul.f32 %v5644_v58, %v5325_v2  ;;  %v5682_v57 = vld [vmem:[%s14042_s16 + $0x58] sm:$0xff]  ;;  %v5679_v17 = vld [vmem:[%s14042_s16 + $0x40] sm:$0xff]  ;;  %v5692_v8 = vld [vmem:[%s14042_s16 + $0xa8] sm:$0xff] }
0x11ea   :  { %5908 = vmatpush2.msra.mxu0 %v5440_v3  ;;  %5989 = vmatpush1.msra.mxu1 %v5540_v22  ;;  %v5655_v50 = vmul.f32 %v5640_v15, %v5307_v16  ;;  %v5654_v26 = vmul.f32 %v5644_v58, %v14407_v7  ;;  %v5653_v18 = vmul.f32 %v5640_v15, %v14408_v45  ;;  %v5681_v3 = vld [vmem:[%s14042_s16 + $0x50] sm:$0xff]  ;;  %v5686_v22 = vld [vmem:[%s14042_s16 + $0x78] sm:$0xff] }
0x11eb   :  { %5909 = vmatprep.subr.mxu0 %v5439_v60  ;;  %v5301_v54 = vpop.permute.xlu1 %5300  ;;  %v5652_v27 = vmul.f32 %v5644_v58, %v14410_v59  ;;  %v5651_v30 = vmul.f32 %v5640_v15, %v14411_v55  ;;  %v5649_v25 = vmul.f32 %v5640_v15, %v14414_v34  ;;  %v5648_v63 = vmul.f32 %v5644_v58, %v14415_v39  ;;  %v5690_v60 = vld [vmem:[%s14042_s16 + $0x98] sm:$0xff] }
0x11ec   :  { %v5308_v46 = vsel %vm5302_vm9, %v5301_v54, %v5283_v9  ;;  %v5326_v44 = vsel %vm5302_vm9, %v5283_v9, %v5301_v54  ;;  %5910 = vmatpush2.msra.mxu0 %v5438_v32  ;;  %v5647_v56 = vmul.f32 %v5640_v15, %v14416_v36  ;;  %v5685_v9 = vld [vmem:[%s14042_s16 + $0x70] sm:$0xff]  ;;  %v5687_v32 = vld [vmem:[%s14042_s16 + $0x80] sm:$0xff]  ;;  %v5694_v31 = vld [vmem:[%s14042_s16 + $0xb8] sm:$0xff] }
0x11ed   :  { %v5657_v49 = vmul.f32 %v5640_v15, %v5308_v46  ;;  %5911 = vmatprep.subr.mxu0 %v5437_v52  ;;  %v5658_v42 = vmul.f32 %v5644_v58, %v5326_v44  ;;  %v5351_v23 = vmul.f32 %v14409_v24, %v5308_v46  ;;  %v5350_v37 = vmul.f32 %v14412_v5, %v5326_v44  ;;  %v5689_v15 = vld [vmem:[%s14042_s16 + $0x90] sm:$0xff]  ;;  %v5691_v54 = vld [vmem:[%s14042_s16 + $0xa0] sm:$0xff] }
0x11ee   :  { %5912 = vmatpush2.msra.mxu0 %v5436_v41  ;;  %v5693_v52 = vld [vmem:[%s14042_s16 + $0xb0] sm:$0xff] }
0x11ef   :  { %5913 = vmatprep.subr.mxu0 %v5435_v14  ;;  %6010 = vmatprep.subr.mxu1 %v5658_v42  ;;  %v5383_v53 = vpop.permute.xlu1 %5382 }
0x11f0   :  { %v5395_v20 = vsel %vm5394_vm14, %v5383_v53, %v5365_v48  ;;  %v5413_v29 = vsel %vm5394_vm14, %v5365_v48, %v5383_v53  ;;  %5914 = vmatpush2.msra.mxu0 %v5434_v61  ;;  %6011 = vmatpush2.msra.mxu1 %v5657_v49 }
0x11f1   :  { %v5432_v62 = vmul.f32 %v12408_v43, %v5413_v29  ;;  %6012 = vmatprep.subr.mxu1 %v5656_v33  ;;  %v5433_v47 = vmul.f32 %v12420_v1, %v5395_v20  ;;  %v5349_v43 = vmul.f32 %v14409_v24, %v5307_v16  ;;  %v14413_v1 = vld [vmem:[#allocation35_spill] sm:$0xff] }
0x11f2   :  { %6013 = vmatpush2.msra.mxu1 %v5655_v50  ;;  %v5650_v4 = vmul.f32 %v5644_v58, %v14413_v1 }
0x11f3   :  { %5915 = vmatprep.subr.mxu0 %v5433_v47  ;;  %6014 = vmatprep.subr.mxu1 %v5654_v26 }
0x11f4   :  { %5916 = vmatpush2.msra.mxu0 %v5432_v62  ;;  %6015 = vmatpush2.msra.mxu1 %v5653_v18  ;;  %v5827_v14 = vpop.permute.xlu0 %5826 }
0x11f5   :  { %5917 = vmatprep.subr.mxu0 %v5351_v23  ;;  %6016 = vmatprep.subr.mxu1 %v5652_v27 }
0x11f6   :  { %5918 = vmatpush2.msra.mxu0 %v5350_v37  ;;  %6017 = vmatpush2.msra.mxu1 %v5651_v30 }
0x11f7   :  { %5919 = vmatprep.subr.mxu0 %v5349_v43  ;;  %6018 = vmatprep.subr.mxu1 %v5650_v4 }
0x11f8   :  { %5920 = vmatpush2.msra.mxu0 %v5348_v6  ;;  %6019 = vmatpush2.msra.mxu1 %v5649_v25  ;;  %v5817_v47 = vpop.permute.xlu0 %5816 }
0x11f9   :  { %5922 = vmatmul.mubr.f32.vlgmr.msra.gmra.mxu0 %v5671_v11  ;;  %6020 = vmatprep.subr.mxu1 %v5648_v63 }
0x11fa   :  { %6021 = vmatpush2.msra.mxu1 %v5647_v56  ;;  %5927 = vmatprep.mubr.f32.mxu0 %v5676_v28 }
0x11fb   :  { %6023 = vmatmul.mubr.f32.vlgmr.msra.gmra.mxu1 %v5673_v35 }
0x11fc   :  { %8353 = vmatprep.mubr.msk.f32.mxu1 %vm3496_vm11, %v5678_v40  ;;  %v5822_v42 = vpop.permute.xlu1 %5821  ;;  %v5837_v25 = vpop.permute.xlu0 %5836 }
0x11fd   :  { %5928 = vmatmul.mubr.f32.gmra.mxu0 %v5675_v0 }
0x11fe   :  { %5933 = vmatprep.mubr.f32.mxu0 %v5680_v51 }
0x11ff   :  { %6029 = vmatmul.mubr.f32.gmra.mxu1 %v5677_v19 }
0x1200   :  { %8354 = vmatprep.mubr.msk.f32.mxu1 %vm3496_vm11, %v5682_v57  ;;  %v5812_v23 = vpop.permute.xlu1 %5811 }
0x1201   :  { %5934 = vmatmul.mubr.f32.gmra.mxu0 %v5679_v17 }
0x1202   :  { %5939 = vmatprep.mubr.f32.mxu0 %v5684_v12 }
0x1203   :  { %6035 = vmatmul.mubr.f32.gmra.mxu1 %v5681_v3 }
0x1204   :  { %8355 = vmatprep.mubr.msk.f32.mxu1 %vm3496_vm11, %v5686_v22  ;;  %v5832_v36 = vpop.permute.xlu1 %5831 }
0x1205   :  { %5940 = vmatmul.mubr.f32.gmra.mxu0 %v5683_v38 }
0x1206   :  { %5945 = vmatprep.mubr.f32.mxu0 %v5688_v21 }
0x1207   :  { %6041 = vmatmul.mubr.f32.gmra.mxu1 %v5685_v9 }
0x1208   :  { %8356 = vmatprep.mubr.msk.f32.mxu1 %vm3496_vm11, %v5690_v60 }
0x1209   :  { %5946 = vmatmul.mubr.f32.gmra.mxu0 %v5687_v32 }
0x120a   :  { %5951 = vmatprep.mubr.f32.mxu0 %v5692_v8 }
0x120b   :  { %6047 = vmatmul.mubr.f32.gmra.mxu1 %v5689_v15 }
0x120c   :  { %8357 = vmatprep.mubr.msk.f32.mxu1 %vm3496_vm11, %v5694_v31 }
0x120d   :  { %5952 = vmatmul.mubr.f32.gmra.mxu0 %v5691_v54 }
0x120f   :  { %6053 = vmatmul.mubr.f32.gmra.mxu1 %v5693_v52 }
0x12b9   :  { %v5923_v58 = vpop.f32.mrf.mxu0 }
0x12ba   :  { %v5924_v56 = vadd.f32 %v5923_v58, %v5812_v23 }
0x12bb   :  { %v5925_v41 = vpop.f32.mrf.mxu0  ;;  %v6024_v2 = vpop.f32.mrf.mxu1 }
0x12bc   :  { %v5926_v6 = vadd.f32 %v5925_v41, %v5812_v23  ;;  %v6025_v22 = vadd.f32 %v6024_v2, %v5924_v56 }
0x12bd   :  { %v5929_v46 = vpop.f32.mrf.mxu0  ;;  %v6026_v44 = vpop.f32.mrf.mxu1 }
0x12be   :  { %v5930_v37 = vadd.f32 %v5929_v46, %v5817_v47  ;;  %v6027_v19 = vadd.f32 %v6026_v44, %v5926_v6 }
0x12bf   :  { %v5931_v16 = vpop.f32.mrf.mxu0  ;;  %v6030_v49 = vpop.f32.mrf.mxu1 }
0x12c0   :  { %v5932_v59 = vadd.f32 %v5931_v16, %v5817_v47  ;;  %v6031_v35 = vadd.f32 %v6030_v49, %v5930_v37  ;;  %v6059_v60 = vadd.f32 %v6027_v19, %v6025_v22 }
0x12c1   :  { %v5935_v61 = vpop.f32.mrf.mxu0  ;;  %v6032_v48 = vpop.f32.mrf.mxu1 }
0x12c2   :  { %v5936_v53 = vadd.f32 %v5935_v61, %v5822_v42  ;;  %v6033_v11 = vadd.f32 %v6032_v48, %v5932_v59 }
0x12c3   :  { %v5937_v33 = vpop.f32.mrf.mxu0  ;;  %v6036_v50 = vpop.f32.mrf.mxu1 }
0x12c4   :  { %v5938_v20 = vadd.f32 %v5937_v33, %v5822_v42  ;;  %v6037_v7 = vadd.f32 %v6036_v50, %v5936_v53  ;;  %v6062_v57 = vadd.f32 %v6033_v11, %v6031_v35 }
0x12c5   :  { %v5941_v29 = vpop.f32.mrf.mxu0  ;;  %v6038_v62 = vpop.f32.mrf.mxu1 }
0x12c6   :  { %v5942_v26 = vadd.f32 %v5941_v29, %v5827_v14  ;;  %v6039_v45 = vadd.f32 %v6038_v62, %v5938_v20 }
0x12c7   :  { %v5943_v18 = vpop.f32.mrf.mxu0  ;;  %v6042_v24 = vpop.f32.mrf.mxu1 }
0x12c8   :  { %v6065_v27 = vadd.f32 %v6039_v45, %v6037_v7  ;;  %v5944_v55 = vadd.f32 %v5943_v18, %v5827_v14  ;;  %v6043_v43 = vadd.f32 %v6042_v24, %v5942_v26 }
0x12c9   :  { %v5947_v30 = vpop.f32.mrf.mxu0  ;;  %v6044_v5 = vpop.f32.mrf.mxu1 }
0x12ca   :  { %v6045_v1 = vadd.f32 %v6044_v5, %v5944_v55  ;;  %6066 = vadd.xlane.f32.xlu1 %v6065_v27  ;;  %v5948_v38 = vadd.f32 %v5947_v30, %v5832_v36 }
0x12cb   :  { %v5949_v4 = vpop.f32.mrf.mxu0  ;;  %v6048_v34 = vpop.f32.mrf.mxu1 }
0x12cc   :  { %v6068_v39 = vadd.f32 %v6045_v1, %v6043_v43  ;;  %v5950_v17 = vadd.f32 %v5949_v4, %v5832_v36  ;;  %v6049_v15 = vadd.f32 %v6048_v34, %v5948_v38 }
0x12cd   :  { %v5953_v63 = vpop.f32.mrf.mxu0  ;;  %v6050_v28 = vpop.f32.mrf.mxu1 }
0x12ce   :  { %v5954_v40 = vadd.f32 %v5953_v63, %v5837_v25  ;;  %6069 = vadd.xlane.f32.xlu0 %v6068_v39  ;;  %v6051_v32 = vadd.f32 %v6050_v28, %v5950_v17 }
0x12cf   :  { %v5955_v0 = vpop.f32.mrf.mxu0  ;;  %v6054_v51 = vpop.f32.mrf.mxu1 }
0x12d0   :  { %v5956_v12 = vadd.f32 %v5955_v0, %v5837_v25  ;;  %v6055_v21 = vadd.f32 %v6054_v51, %v5954_v40  ;;  %v6071_v31 = vadd.f32 %v6051_v32, %v6049_v15 }
0x12d1   :  { %v6056_v3 = vpop.f32.mrf.mxu1 }
0x12d2   :  { %v6057_v9 = vadd.f32 %v6056_v3, %v5956_v12  ;;  %6063 = vadd.xlane.f32.xlu0 %v6062_v57 }
0x12d4   :  { %v6074_v8 = vadd.f32 %v6057_v9, %v6055_v21 }
0x12d6   :  { %6075 = vadd.xlane.f32.xlu1 %v6074_v8  ;;  %6060 = vadd.xlane.f32.xlu0 %v6059_v60 }
0x12da   :  { %6072 = vadd.xlane.f32.xlu0 %v6071_v31 }
0x1353   :  { %v6067_v54 = vpop.xlane.xlu1 %6066 }
0x1354   :  { %v6079_v52 = vmul.f32 0.00390625, %v6067_v54 }
0x1356   :  { %v12566_v58 = vsub.f32 %v6037_v7, %v6079_v52  ;;  %v12568_v41 = vsub.f32 %v6039_v45, %v6079_v52 }
0x1357   :  { %v6070_v46 = vpop.xlane.xlu0 %6069 }
0x1358   :  { %v6099_v2 = vmul.f32 %v12566_v58, %v12566_v58  ;;  %v6100_v44 = vmul.f32 %v12568_v41, %v12568_v41  ;;  %v6080_v16 = vmul.f32 0.00390625, %v6070_v46 }
0x135a   :  { %v6113_v49 = vadd.f32 %v6100_v44, %v6099_v2  ;;  %v12574_v61 = vsub.f32 %v6043_v43, %v6080_v16  ;;  %v12576_v48 = vsub.f32 %v6045_v1, %v6080_v16 }
0x135b   :  { %v6064_v14 = vpop.xlane.xlu0 %6063 }
0x135c   :  { %v6078_v42 = vmul.f32 0.00390625, %v6064_v14  ;;  %6114 = vadd.xlane.f32.xlu0 %v6113_v49  ;;  %v6101_v26 = vmul.f32 %v12574_v61, %v12574_v61  ;;  %v6102_v45 = vmul.f32 %v12576_v48, %v12576_v48 }
0x135e   :  { %v6085_v53 = vsub.f32 %v6031_v35, %v6078_v42  ;;  %v6086_v33 = vsub.f32 %v6033_v11, %v6078_v42  ;;  %v6116_v43 = vadd.f32 %v6102_v45, %v6101_v26 }
0x135f   :  { %v6061_v50 = vpop.xlane.xlu0 %6060  ;;  %v6076_v20 = vpop.xlane.xlu1 %6075 }
0x1360   :  { %v6097_v29 = vmul.f32 %v6085_v53, %v6085_v53  ;;  %v6098_v62 = vmul.f32 %v6086_v33, %v6086_v33  ;;  %v6077_v47 = vmul.f32 0.00390625, %v6061_v50  ;;  %v6082_v7 = vmul.f32 0.00390625, %v6076_v20 }
0x1362   :  { %v6083_v18 = vsub.f32 %v6025_v22, %v6077_v47  ;;  %v6084_v24 = vsub.f32 %v6027_v19, %v6077_v47  ;;  %v12582_v23 = vsub.f32 %v6055_v21, %v6082_v7  ;;  %v12584_v59 = vsub.f32 %v6057_v9, %v6082_v7 }
0x1363   :  { %v6073_v27 = vpop.xlane.xlu0 %6072  ;;  %v6110_v55 = vadd.f32 %v6098_v62, %v6097_v29 }
0x1364   :  { %v6095_v30 = vmul.f32 %v6083_v18, %v6083_v18  ;;  %v6096_v5 = vmul.f32 %v6084_v24, %v6084_v24  ;;  %v6081_v37 = vmul.f32 0.00390625, %v6073_v27  ;;  %v6105_v4 = vmul.f32 %v12582_v23, %v12582_v23 }
0x1365   :  { %6111 = vadd.xlane.f32.xlu1 %v6110_v55  ;;  %v6106_v34 = vmul.f32 %v12584_v59, %v12584_v59 }
0x1366   :  { %v6107_v1 = vadd.f32 %v6096_v5, %v6095_v30  ;;  %v12590_v25 = vsub.f32 %v6049_v15, %v6081_v37  ;;  %v12592_v6 = vsub.f32 %v6051_v32, %v6081_v37  ;;  %v6750_v37 = vld [vmem:[%s14045_s18 + $0x8] sm:$0xff] }
0x1367   :  { %v6122_v28 = vadd.f32 %v6106_v34, %v6105_v4  ;;  %6999 = vmatprep.mubr.f32.mxu1 %v6750_v37 }
0x1368   :  { %6108 = vadd.xlane.f32.xlu0 %v6107_v1  ;;  %v6103_v11 = vmul.f32 %v12590_v25, %v12590_v25  ;;  %v6104_v39 = vmul.f32 %v12592_v6, %v12592_v6  ;;  %v6752_v1 = vld [vmem:[%s14045_s18 + $0x18] sm:$0xff] }
0x1369   :  { %6117 = vadd.xlane.f32.xlu1 %v6116_v43  ;;  %v6882_v43 = vld [vmem:[%s14044_s19 + $0x8] sm:$0xff]  ;;  %8365 = vmatprep.mubr.msk.f32.mxu0 %vm3496_vm11, %v6752_v1 }
0x136a   :  { %v6119_v63 = vadd.f32 %v6104_v39, %v6103_v11 }
0x136c   :  { %6120 = vadd.xlane.f32.xlu0 %v6119_v63  ;;  %v6881_v63 = vld [vmem:[%s14044_s19] sm:$0xff] }
0x136d   :  { %6123 = vadd.xlane.f32.xlu1 %v6122_v28 }
0x13e5   :  { %v6115_v36 = vpop.xlane.xlu0 %6114 }
0x13e6   :  { %v6127_v38 = vmul.f32 0.00390625, %v6115_v36 }
0x13e8   :  { %v6133_v21 = vadd.f32 1e-05, %v6127_v38 }
0x13ee   :  { %v6112_v0 = vpop.xlane.xlu1 %6111 }
0x13ef   :  { %v6126_v51 = vmul.f32 0.00390625, %v6112_v0 }
0x13f1   :  { %v6109_v56 = vpop.xlane.xlu0 %6108  ;;  %v6132_v19 = vadd.f32 1e-05, %v6126_v51 }
0x13f2   :  { %v6125_v35 = vmul.f32 0.00390625, %v6109_v56  ;;  %v6118_v60 = vpop.xlane.xlu1 %6117  ;;  %v6885_v56 = vld [vmem:[%s14044_s19 + $0x20] sm:$0xff] }
0x13f3   :  { %v6128_v15 = vmul.f32 0.00390625, %v6118_v60 }
0x13f4   :  { %v6131_v40 = vadd.f32 1e-05, %v6125_v35 }
0x13f5   :  { %v6134_v52 = vadd.f32 1e-05, %v6128_v15  ;;  %v6121_v46 = vpop.xlane.xlu0 %6120 }
0x13f6   :  { %8465 = vrsqrt.f32 %v6131_v40  ;;  %v6129_v2 = vmul.f32 0.00390625, %v6121_v46  ;;  %v6124_v14 = vpop.xlane.xlu1 %6123  ;;  %v8359_v46 = vld [vmem:[%s14043_s3 + $0x2] ss:$8 sm:$0x3] }
0x13f7   :  { %8467 = vrsqrt.f32 %v6132_v19 }
0x13f8   :  { %8469 = vrsqrt.f32 %v6133_v21  ;;  %v6135_v49 = vadd.f32 1e-05, %v6129_v2  ;;  %v12813_v2 = vrot.slane %v8359_v46, %v9244_v10 }
0x13f9   :  { %8471 = vrsqrt.f32 %v6134_v52 }
0x13fa   :  { %8473 = vrsqrt.f32 %v6135_v49  ;;  %14417 = vst [vmem:[#allocation24_spill] sm:$0xff] %v12813_v2  ;;  %v12818_v49 = vrot.slane %v8359_v46, %v9250_v13 }
0x13fc   :  { %14418 = vst [vmem:[#allocation49_spill] sm:$0xff] %v12818_v49 }
0x1403   :  { %v8466_v57 = vpop.eup %8465 }
0x1404   :  { %v6143_v17 = vmul.f32 %v8466_v57, %v6083_v18  ;;  %v6144_v12 = vmul.f32 %v8466_v57, %v6084_v24  ;;  %v8468_v9 = vpop.eup %8467 }
0x1405   :  { %v6145_v32 = vmul.f32 %v8468_v9, %v6085_v53  ;;  %v6146_v8 = vmul.f32 %v8468_v9, %v6086_v33  ;;  %v8470_v44 = vpop.eup %8469  ;;  %v6130_v33 = vmul.f32 0.00390625, %v6124_v14 }
0x1406   :  { %v12598_v3 = vmax.f32 %v6143_v17, 0.0  ;;  %v12600_v22 = vmax.f32 %v6144_v12, 0.0  ;;  %v6148_v16 = vmul.f32 %v8470_v44, %v12568_v41  ;;  %v6147_v42 = vmul.f32 %v8470_v44, %v12566_v58  ;;  %v8472_v50 = vpop.eup %8471 }
0x1407   :  { %v12618_v31 = vmax.f32 %v6145_v32, 0.0  ;;  %v12620_v54 = vmax.f32 %v6146_v8, 0.0  ;;  %v6149_v20 = vmul.f32 %v8472_v50, %v12574_v61  ;;  %v6136_v29 = vadd.f32 1e-05, %v6130_v33  ;;  %v8474_v61 = vpop.eup %8473 }
0x1408   :  { %6359 = vrot.lane.b32.xlu0 %v12600_v22, %s8507_s14  ;;  %6377 = vrot.lane.b32.xlu1 %v12598_v3, %s8507_s14  ;;  %v12640_v53 = vmax.f32 %v6148_v16, 0.0  ;;  %v12646_v41 = vmax.f32 %v6147_v42, 0.0  ;;  %v6150_v58 = vmul.f32 %v8472_v50, %v12576_v48  ;;  %v6152_v48 = vmul.f32 %v8474_v61, %v12592_v6  ;;  %v6883_v6 = vld [vmem:[%s14044_s19 + $0x10] sm:$0xff] }
0x1409   :  { %v12654_v62 = vmax.f32 %v6149_v20, 0.0  ;;  %8475 = vrsqrt.f32 %v6136_v29  ;;  %v6151_v45 = vmul.f32 %v8474_v61, %v12590_v25  ;;  %v6886_v25 = vld [vmem:[%s14044_s19 + $0x28] sm:$0xff] }
0x140a   :  { %v12660_v47 = vmax.f32 %v6150_v58, 0.0  ;;  %v12671_v7 = vmax.f32 %v6152_v48, 0.0 }
0x140b   :  { %v12683_v24 = vmax.f32 %v6151_v45, 0.0 }
0x140c   :  { %6269 = vrot.lane.b32.xlu0 %v12600_v22, %s8508_s24  ;;  %6287 = vrot.lane.b32.xlu1 %v12598_v3, %s8508_s24 }
0x1410   :  { %6173 = vrot.lane.b32.xlu0 %v12600_v22, %s8509_s11  ;;  %6197 = vrot.lane.b32.xlu1 %v12598_v3, %s8509_s11 }
0x1414   :  { %6551 = vrot.lane.b32.xlu0 %v12598_v3, %s8510_s6  ;;  %6553 = vrot.lane.b32.xlu1 %v12600_v22, %s8510_s6 }
0x1416   :  { %v8476_v26 = vpop.eup %8475 }
0x1417   :  { %v6154_v18 = vmul.f32 %v8476_v26, %v12584_v59  ;;  %v6153_v55 = vmul.f32 %v8476_v26, %v12582_v23  ;;  %v6884_v23 = vld [vmem:[%s14044_s19 + $0x18] sm:$0xff] }
0x1418   :  { %6361 = vrot.lane.b32.xlu0 %v12620_v54, %s8507_s14  ;;  %6379 = vrot.lane.b32.xlu1 %v12618_v31, %s8507_s14 }
0x1419   :  { %v12685_v27 = vmax.f32 %v6154_v18, 0.0  ;;  %v12696_v59 = vmax.f32 %v6153_v55, 0.0 }
0x141c   :  { %6271 = vrot.lane.b32.xlu0 %v12620_v54, %s8508_s24  ;;  %6289 = vrot.lane.b32.xlu1 %v12618_v31, %s8508_s24 }
0x1420   :  { %6175 = vrot.lane.b32.xlu0 %v12620_v54, %s8509_s11  ;;  %6199 = vrot.lane.b32.xlu1 %v12618_v31, %s8509_s11 }
0x1424   :  { %6555 = vrot.lane.b32.xlu0 %v12618_v31, %s8510_s6  ;;  %6557 = vrot.lane.b32.xlu1 %v12620_v54, %s8510_s6 }
0x1428   :  { %6273 = vrot.lane.b32.xlu0 %v12640_v53, %s8508_s24  ;;  %6363 = vrot.lane.b32.xlu1 %v12640_v53, %s8507_s14 }
0x142c   :  { %6177 = vrot.lane.b32.xlu0 %v12640_v53, %s8509_s11  ;;  %6381 = vrot.lane.b32.xlu1 %v12646_v41, %s8507_s14 }
0x1430   :  { %6291 = vrot.lane.b32.xlu1 %v12646_v41, %s8508_s24  ;;  %6383 = vrot.lane.b32.xlu0 %v12654_v62, %s8507_s14 }
0x1434   :  { %6201 = vrot.lane.b32.xlu1 %v12646_v41, %s8509_s11  ;;  %6275 = vrot.lane.b32.xlu0 %v12660_v47, %s8508_s24 }
0x1438   :  { %6365 = vrot.lane.b32.xlu1 %v12660_v47, %s8507_s14  ;;  %6179 = vrot.lane.b32.xlu0 %v12660_v47, %s8509_s11 }
0x143c   :  { %6293 = vrot.lane.b32.xlu1 %v12654_v62, %s8508_s24  ;;  %6277 = vrot.lane.b32.xlu0 %v12671_v7, %s8508_s24 }
0x1440   :  { %6203 = vrot.lane.b32.xlu1 %v12654_v62, %s8509_s11  ;;  %6181 = vrot.lane.b32.xlu0 %v12671_v7, %s8509_s11 }
0x1444   :  { %6295 = vrot.lane.b32.xlu1 %v12683_v24, %s8508_s24  ;;  %6279 = vrot.lane.b32.xlu0 %v12685_v27, %s8508_s24 }
0x1448   :  { %6205 = vrot.lane.b32.xlu1 %v12683_v24, %s8509_s11  ;;  %6567 = vrot.lane.b32.xlu0 %v12683_v24, %s8510_s6 }
0x144c   :  { %6457 = vrot.lane.b32.xlu0 %v12671_v7, %s8511_s1  ;;  %6297 = vrot.lane.b32.xlu1 %v12696_v59, %s8508_s24 }
0x1450   :  { %6183 = vrot.lane.b32.xlu0 %v12685_v27, %s8509_s11  ;;  %6569 = vrot.lane.b32.xlu1 %v12671_v7, %s8510_s6 }
0x1454   :  { %6563 = vrot.lane.b32.xlu0 %v12654_v62, %s8510_s6  ;;  %6475 = vrot.lane.b32.xlu1 %v12683_v24, %s8511_s1 }
0x1458   :  { %6455 = vrot.lane.b32.xlu0 %v12660_v47, %s8511_s1  ;;  %6207 = vrot.lane.b32.xlu1 %v12696_v59, %s8509_s11 }
0x145c   :  { %6559 = vrot.lane.b32.xlu0 %v12646_v41, %s8510_s6  ;;  %6565 = vrot.lane.b32.xlu1 %v12660_v47, %s8510_s6 }
0x1460   :  { %6453 = vrot.lane.b32.xlu0 %v12640_v53, %s8511_s1  ;;  %6473 = vrot.lane.b32.xlu1 %v12654_v62, %s8511_s1 }
0x1464   :  { %6367 = vrot.lane.b32.xlu0 %v12671_v7, %s8507_s14  ;;  %6561 = vrot.lane.b32.xlu1 %v12640_v53, %s8510_s6 }
0x1468   :  { %6571 = vrot.lane.b32.xlu0 %v12696_v59, %s8510_s6  ;;  %6471 = vrot.lane.b32.xlu1 %v12646_v41, %s8511_s1 }
0x146c   :  { %6459 = vrot.lane.b32.xlu0 %v12685_v27, %s8511_s1  ;;  %6385 = vrot.lane.b32.xlu1 %v12683_v24, %s8507_s14 }
0x1470   :  { %6451 = vrot.lane.b32.xlu0 %v12620_v54, %s8511_s1  ;;  %6573 = vrot.lane.b32.xlu1 %v12685_v27, %s8510_s6 }
0x1474   :  { %6369 = vrot.lane.b32.xlu0 %v12685_v27, %s8507_s14  ;;  %6477 = vrot.lane.b32.xlu1 %v12696_v59, %s8511_s1 }
0x1478   :  { %6449 = vrot.lane.b32.xlu0 %v12600_v22, %s8511_s1  ;;  %6469 = vrot.lane.b32.xlu1 %v12618_v31, %s8511_s1 }
0x147a   :  { %v12749_v30 = vpop.permute.xlu0 %6359  ;;  %v6378_v5 = vpop.permute.xlu1 %6377 }
0x147b   :  { %v12846_v18 = vsel %vm5302_vm9, %v6378_v5, %v12749_v30 }
0x147c   :  { %6904 = vperm.xlu0 %8403, %v6884_v23   ;;  %6387 = vrot.lane.b32.xlu1 %v12696_v59, %s8507_s14  ;;  %14425 = vst [vmem:[#allocation23_spill] sm:$0xff] %v12846_v18  ;;  %v12852_v23 = vsel %vm5302_vm9, %v12749_v30, %v6378_v5  ;;  %s14440_s14 = smov 16  }
0x147d   :  { %14426 = vst [vmem:[#allocation18_spill] sm:$0xff] %v12852_v23  ;;  %v6425_v30 = vmul.f32 %v12813_v2, %v12852_v23 }
0x147e   :  { %v12762_v4 = vpop.permute.xlu0 %6269  ;;  %v12764_v34 = vpop.permute.xlu1 %6287 }
0x1480   :  { %6894 = vperm.xlu0 %8403, %v6882_v43   ;;  %6467 = vrot.lane.b32.xlu1 %v12598_v3, %s8511_s1 }
0x1482   :  { %v12775_v11 = vpop.permute.xlu0 %6173  ;;  %v12777_v39 = vpop.permute.xlu1 %6197 }
0x1484   :  { %6914 = vperm.xlu0 %8403, %v6886_v25   ;;  %6899 = vperm.xlu1 %8404, %v6883_v6   ;;  %v6426_v6 = vmul.f32 %v12818_v49, %v12846_v18 }
0x1486   :  { %v12782_v28 = vpop.permute.xlu0 %6551  ;;  %v12784_v36 = vpop.permute.xlu1 %6553 }
0x1488   :  { %6889 = vperm.xlu1 %8404, %v6881_v63  }
0x148a   :  { %v6362_v35 = vpop.permute.xlu0 %6361  ;;  %v6380_v40 = vpop.permute.xlu1 %6379 }
0x148b   :  { %v12837_v58 = vsel %vm5302_vm9, %v6380_v40, %v6362_v35  ;;  %v12840_v61 = vsel %vm5302_vm9, %v6362_v35, %v6380_v40  ;;  %v8363_v35 = vld [vmem:[%s14043_s3 + $0x7] ss:$8 sm:$0x3] }
0x148c   :  { %6909 = vperm.xlu1 %8404, %v6885_v56   ;;  %14423 = vst [vmem:[#allocation46_spill] sm:$0xff] %v12837_v58  ;;  %14424 = vst [vmem:[#allocation44_spill] sm:$0xff] %v12840_v61  ;;  %v6428_v37 = vmul.f32 %v12818_v49, %v12837_v58  ;;  %v6427_v43 = vmul.f32 %v12813_v2, %v12840_v61  ;;  %v8358_v56 = vld [vmem:[%s14043_s3 + $0x1] ss:$8 sm:$0x3] }
0x148d   :  { %v6328_v46 = vrot.slane %v8358_v56, %v9244_v10 }
0x148e   :  { %v12789_v0 = vpop.permute.xlu0 %6271  ;;  %v12791_v51 = vpop.permute.xlu1 %6289 }
0x1492   :  { %v12793_v19 = vpop.permute.xlu0 %6175  ;;  %v12795_v57 = vpop.permute.xlu1 %6199 }
0x1496   :  { %v12797_v17 = vpop.permute.xlu0 %6555  ;;  %v12799_v12 = vpop.permute.xlu1 %6557 }
0x149a   :  { %v12801_v38 = vpop.permute.xlu0 %6273  ;;  %v6364_v21 = vpop.permute.xlu1 %6363 }
0x149e   :  { %v12803_v9 = vpop.permute.xlu0 %6177  ;;  %v6382_v60 = vpop.permute.xlu1 %6381 }
0x149f   :  { %v12821_v14 = vsel %vm5302_vm9, %v6382_v60, %v6364_v21  ;;  %v12830_v50 = vsel %vm5302_vm9, %v6364_v21, %v6382_v60  ;;  %v6233_v60 = vld [vmem:[%s14043_s3] ss:$8 sm:$0x3] }
0x14a0   :  { %14419 = vst [vmem:[#allocation20_spill] sm:$0xff] %v12821_v14  ;;  %14422 = vst [vmem:[#allocation38_spill] sm:$0xff] %v12830_v50  ;;  %v6430_v45 = vmul.f32 %v12818_v49, %v12821_v14  ;;  %v6429_v55 = vmul.f32 %v12813_v2, %v12830_v50 }
0x14a2   :  { %v6384_v32 = vpop.permute.xlu0 %6383  ;;  %v12805_v8 = vpop.permute.xlu1 %6291 }
0x14a6   :  { %v6276_v15 = vpop.permute.xlu0 %6275  ;;  %v12807_v52 = vpop.permute.xlu1 %6201 }
0x14aa   :  { %v12815_v44 = vpop.permute.xlu0 %6179  ;;  %v6366_v16 = vpop.permute.xlu1 %6365 }
0x14ab   :  { %v12824_v42 = vsel %vm5302_vm9, %v6384_v32, %v6366_v16  ;;  %v12827_v33 = vsel %vm5302_vm9, %v6366_v16, %v6384_v32  ;;  %v8362_v32 = vld [vmem:[%s14043_s3 + $0x6] ss:$8 sm:$0x3]  ;;  %v6682_v16 = vrot.slane %v8363_v35, %v9244_v10 }
0x14ac   :  { %14420 = vst [vmem:[#allocation37_spill] sm:$0xff] %v12824_v42  ;;  %14421 = vst [vmem:[#allocation33_spill] sm:$0xff] %v12827_v33  ;;  %v6431_v20 = vmul.f32 %v12813_v2, %v12827_v33  ;;  %v6432_v29 = vmul.f32 %v12818_v49, %v12824_v42  ;;  %v6300_v49 = vsel %vm5210_vm10, %v12791_v51, %v12789_v0 }
0x14ad   :  { %v6318_v42 = vsel %vm5210_vm10, %v12789_v0, %v12791_v51  ;;  %v12940_v51 = vrot.slane %v8362_v32, %v9250_v13 }
0x14ae   :  { %v6278_v48 = vpop.permute.xlu0 %6277  ;;  %6935 = vmatprep.subr.mxu1 %v6432_v29  ;;  %v6294_v26 = vpop.permute.xlu1 %6293  ;;  %v12888_v29 = vrot.slane %v8362_v32, %v9244_v10 }
0x14af   :  { %6936 = vmatpush1.msra.mxu1 %v6431_v20  ;;  %v12885_v20 = vrot.slane %v6233_v60, %v9244_v10  ;;  %v6320_v50 = vsel %vm5210_vm10, %v6276_v15, %v6294_v26 }
0x14b0   :  { %6937 = vmatprep.subr.mxu1 %v6430_v45  ;;  %v6341_v33 = vmul.f32 %v6328_v46, %v6320_v50 }
0x14b1   :  { %6938 = vmatpush1.msra.mxu1 %v6429_v55 }
0x14b2   :  { %v12858_v1 = vpop.permute.xlu0 %6181  ;;  %6939 = vmatprep.subr.mxu1 %v6428_v37  ;;  %v12860_v25 = vpop.permute.xlu1 %6203  ;;  %v12893_v37 = vrot.slane %v8358_v56, %v9250_v13  ;;  %v6317_v56 = vsel %vm5210_vm10, %v12762_v4, %v12764_v34 }
0x14b3   :  { %6940 = vmatpush1.msra.mxu1 %v6427_v43  ;;  %v12896_v43 = vrot.slane %v8363_v35, %v9250_v13  ;;  %v6302_v35 = vsel %vm5210_vm10, %v6294_v26, %v6276_v15  ;;  %v6319_v15 = vsel %vm5210_vm10, %v12801_v38, %v12805_v8 }
0x14b4   :  { %6941 = vmatprep.subr.mxu1 %v6426_v6 }
0x14b5   :  { %6942 = vmatpush1.msra.mxu1 %v6425_v30 }
0x14b6   :  { %v6280_v5 = vpop.permute.xlu0 %6279  ;;  %v6296_v63 = vpop.permute.xlu1 %6295 }
0x14b7   :  { %v6303_v6 = vsel %vm5210_vm10, %v6296_v63, %v6278_v48  ;;  %v6321_v30 = vsel %vm5210_vm10, %v6278_v48, %v6296_v63  ;;  %v12910_v48 = vrot.slane %v6233_v60, %v9250_v13 }
0x14b8   :  { %v6343_v26 = vmul.f32 %v6328_v46, %v6321_v30  ;;  %v6697_v60 = vmul.f32 %v6682_v16, %v6303_v6 }
0x14ba   :  { %v12872_v40 = vpop.permute.xlu0 %6567  ;;  %v12874_v21 = vpop.permute.xlu1 %6205 }
0x14be   :  { %v12890_v45 = vpop.permute.xlu0 %6457  ;;  %v6298_v55 = vpop.permute.xlu1 %6297 }
0x14bf   :  { %v6304_v18 = vsel %vm5210_vm10, %v6298_v55, %v6280_v5  ;;  %v6322_v23 = vsel %vm5210_vm10, %v6280_v5, %v6298_v55  ;;  %v6301_v5 = vsel %vm5210_vm10, %v12805_v8, %v12801_v38  ;;  %v6698_v55 = vmul.f32 %v12896_v43, %v6321_v30 }
0x14c0   :  { %v6345_v58 = vmul.f32 %v6328_v46, %v6322_v23  ;;  %v6699_v61 = vmul.f32 %v6682_v16, %v6304_v18  ;;  %v6346_v2 = vmul.f32 %v12893_v37, %v6304_v18  ;;  %v6700_v14 = vmul.f32 %v12896_v43, %v6322_v23 }
0x14c1   :  { %v6344_v23 = vmul.f32 %v12893_v37, %v6303_v6  ;;  %v6695_v38 = vmul.f32 %v6682_v16, %v6302_v35  ;;  %v6299_v8 = vsel %vm5210_vm10, %v12764_v34, %v12762_v4  ;;  %v6340_v6 = vmul.f32 %v12893_v37, %v6301_v5 }
0x14c2   :  { %v6184_v63 = vpop.permute.xlu0 %6183  ;;  %6943 = vmatprep.subr.mxu1 %v6346_v2  ;;  %7036 = vmatprep.subr.mxu0 %v6700_v14  ;;  %v12915_v18 = vpop.permute.xlu1 %6569  ;;  %v6342_v2 = vmul.f32 %v12893_v37, %v6302_v35  ;;  %v6696_v14 = vmul.f32 %v12896_v43, %v6320_v50  ;;  %v6694_v30 = vmul.f32 %v12896_v43, %v6319_v15 }
0x14c3   :  { %6944 = vmatpush1.msra.mxu1 %v6345_v58  ;;  %7037 = vmatpush1.msra.mxu0 %v6699_v61  ;;  %v6693_v0 = vmul.f32 %v6682_v16, %v6301_v5  ;;  %v6335_v50 = vmul.f32 %v6328_v46, %v6317_v56  ;;  %v6338_v4 = vmul.f32 %v12893_v37, %v6300_v49 }
0x14c4   :  { %6945 = vmatprep.subr.mxu1 %v6344_v23  ;;  %7038 = vmatprep.subr.mxu0 %v6698_v55  ;;  %v6339_v23 = vmul.f32 %v6328_v46, %v6319_v15  ;;  %v6692_v34 = vmul.f32 %v12896_v43, %v6318_v42  ;;  %v6689_v35 = vmul.f32 %v6682_v16, %v6299_v8 }
0x14c5   :  { %6946 = vmatpush1.msra.mxu1 %v6343_v26  ;;  %7039 = vmatpush1.msra.mxu0 %v6697_v60  ;;  %v6337_v55 = vmul.f32 %v6328_v46, %v6318_v42  ;;  %v6691_v26 = vmul.f32 %v6682_v16, %v6300_v49  ;;  %v6336_v15 = vmul.f32 %v12893_v37, %v6299_v8  ;;  %v8361_v42 = vld [vmem:[%s14043_s3 + $0x5] ss:$8 sm:$0x3] }
0x14c6   :  { %v12933_v58 = vpop.permute.xlu0 %6563  ;;  %6947 = vmatprep.subr.mxu1 %v6342_v2  ;;  %7040 = vmatprep.subr.mxu0 %v6696_v14  ;;  %v12935_v61 = vpop.permute.xlu1 %6475  ;;  %v6690_v60 = vmul.f32 %v12896_v43, %v6317_v56  ;;  %v6231_v49 = vsel %vm5119_vm12, %v12858_v1, %v12874_v21  ;;  %v6212_v56 = vsel %vm5119_vm12, %v12860_v25, %v12815_v44 }
0x14c7   :  { %6948 = vmatpush1.msra.mxu1 %v6341_v33  ;;  %7041 = vmatpush1.msra.mxu0 %v6695_v38  ;;  %v6213_v33 = vsel %vm5119_vm12, %v12874_v21, %v12858_v1  ;;  %v12967_v21 = vrot.slane %v8361_v42, %v9244_v10 }
0x14c8   :  { %6949 = vmatprep.subr.mxu1 %v6340_v6  ;;  %7042 = vmatprep.subr.mxu0 %v6694_v30  ;;  %v6254_v8 = vmul.f32 %v12910_v48, %v6213_v33  ;;  %v12978_v6 = vrot.slane %v8361_v42, %v9250_v13  ;;  %v6211_v30 = vsel %vm5119_vm12, %v12807_v52, %v12803_v9 }
0x14c9   :  { %6950 = vmatpush1.msra.mxu1 %v6339_v23  ;;  %7043 = vmatpush1.msra.mxu0 %v6693_v0  ;;  %v6253_v23 = vmul.f32 %v12885_v20, %v6231_v49  ;;  %v6661_v0 = vmul.f32 %v12888_v29, %v6213_v33  ;;  %v6250_v33 = vmul.f32 %v12910_v48, %v6211_v30 }
0x14ca   :  { %v12947_v5 = vpop.permute.xlu0 %6455  ;;  %6951 = vmatprep.subr.mxu1 %v6338_v4  ;;  %7044 = vmatprep.subr.mxu0 %v6692_v34  ;;  %v6208_v32 = vpop.permute.xlu1 %6207  ;;  %v6210_v4 = vsel %vm5119_vm12, %v12795_v57, %v12793_v19 }
0x14cb   :  { %v6214_v46 = vsel %vm5119_vm12, %v6208_v32, %v6184_v63  ;;  %v6232_v16 = vsel %vm5119_vm12, %v6184_v63, %v6208_v32  ;;  %6952 = vmatpush1.msra.mxu1 %v6337_v55  ;;  %7045 = vmatpush1.msra.mxu0 %v6691_v26  ;;  %v6230_v63 = vsel %vm5119_vm12, %v12815_v44, %v12860_v25 }
0x14cc   :  { %v6255_v2 = vmul.f32 %v12885_v20, %v6232_v16  ;;  %v6663_v37 = vmul.f32 %v12888_v29, %v6214_v46  ;;  %6953 = vmatprep.subr.mxu1 %v6336_v15  ;;  %7046 = vmatprep.subr.mxu0 %v6690_v60  ;;  %v6256_v43 = vmul.f32 %v12910_v48, %v6214_v46 }
0x14cd   :  { %6954 = vmatpush1.msra.mxu1 %v6335_v50  ;;  %7047 = vmatpush1.msra.mxu0 %v6689_v35  ;;  %v6664_v1 = vmul.f32 %v12940_v51, %v6232_v16  ;;  %v6662_v44 = vmul.f32 %v12940_v51, %v6231_v49  ;;  %v6229_v25 = vsel %vm5119_vm12, %v12803_v9, %v12807_v52 }
0x14ce   :  { %v12972_v14 = vpop.permute.xlu0 %6559  ;;  %6955 = vmatprep.subr.mxu1 %v6256_v43  ;;  %v12974_v38 = vpop.permute.xlu1 %6565  ;;  %v6252_v50 = vmul.f32 %v12910_v48, %v6212_v56  ;;  %v6251_v34 = vmul.f32 %v12885_v20, %v6230_v63  ;;  %v6660_v35 = vmul.f32 %v12940_v51, %v6230_v63  ;;  %v6228_v9 = vsel %vm5119_vm12, %v12793_v19, %v12795_v57 }
0x14cf   :  { %7048 = vmatprep.subr.mxu0 %v6664_v1  ;;  %6956 = vmatpush1.msra.mxu1 %v6255_v2  ;;  %v6659_v52 = vmul.f32 %v12888_v29, %v6212_v56  ;;  %v6209_v32 = vsel %vm5119_vm12, %v12777_v39, %v12775_v11  ;;  %v6249_v15 = vmul.f32 %v12885_v20, %v6229_v25 }
0x14d0   :  { %7049 = vmatpush1.msra.mxu0 %v6663_v37  ;;  %6957 = vmatprep.subr.mxu1 %v6254_v8  ;;  %v6658_v19 = vmul.f32 %v12940_v51, %v6229_v25  ;;  %v6227_v57 = vsel %vm5119_vm12, %v12775_v11, %v12777_v39  ;;  %v6657_v60 = vmul.f32 %v12888_v29, %v6211_v30 }
0x14d1   :  { %7050 = vmatprep.subr.mxu0 %v6662_v44  ;;  %6958 = vmatpush1.msra.mxu1 %v6253_v23  ;;  %v6248_v42 = vmul.f32 %v12910_v48, %v6210_v4  ;;  %v6247_v49 = vmul.f32 %v12885_v20, %v6228_v9  ;;  %v6600_v46 = vsel %vm5492_vm13, %v12799_v12, %v12797_v17  ;;  %v8360_v23 = vld [vmem:[%s14043_s3 + $0x3] ss:$8 sm:$0x3] }
0x14d2   :  { %7051 = vmatpush1.msra.mxu0 %v6661_v0  ;;  %v12999_v55 = vpop.permute.xlu0 %6453  ;;  %6959 = vmatprep.subr.mxu1 %v6252_v50  ;;  %v13001_v26 = vpop.permute.xlu1 %6473  ;;  %v6656_v16 = vmul.f32 %v12940_v51, %v6228_v9  ;;  %v6655_v2 = vmul.f32 %v12888_v29, %v6210_v4  ;;  %v6576_v11 = vsel %vm5492_vm13, %v12797_v17, %v12799_v12 }
0x14d3   :  { %7052 = vmatprep.subr.mxu0 %v6660_v35  ;;  %6960 = vmatpush1.msra.mxu1 %v6251_v34  ;;  %v6246_v43 = vmul.f32 %v12910_v48, %v6209_v32  ;;  %v6245_v56 = vmul.f32 %v12885_v20, %v6227_v57  ;;  %v6599_v1 = vsel %vm5492_vm13, %v12784_v36, %v12782_v28 }
0x14d4   :  { %7053 = vmatpush1.msra.mxu0 %v6659_v52  ;;  %6961 = vmatprep.subr.mxu1 %v6250_v33  ;;  %v6654_v63 = vmul.f32 %v12940_v51, %v6227_v57  ;;  %v6653_v8 = vmul.f32 %v12888_v29, %v6209_v32  ;;  %v6575_v17 = vsel %vm5492_vm13, %v12782_v28, %v12784_v36 }
0x14d5   :  { %7054 = vmatprep.subr.mxu0 %v6658_v19  ;;  %6962 = vmatpush1.msra.mxu1 %v6249_v15  ;;  %v6620_v12 = vmul.f32 %v12978_v6, %v6600_v46  ;;  %v6619_v20 = vmul.f32 %v12967_v21, %v6576_v11  ;;  %v6618_v51 = vmul.f32 %v12978_v6, %v6599_v1  ;;  %v8364_v19 = vld [vmem:[%s14043_s3 + $0x10] ss:$8 sm:$0x3]  ;;  %s14442_s3 = smov 112  }
0x14d6   :  { %7055 = vmatpush1.msra.mxu0 %v6657_v60  ;;  %v13023_v39 = vpop.permute.xlu0 %6367  ;;  %6963 = vmatprep.subr.mxu1 %v6248_v42  ;;  %v6562_v37 = vpop.permute.xlu1 %6561  ;;  %v6617_v29 = vmul.f32 %v12967_v21, %v6575_v17  ;;  %v6579_v44 = vsel %vm5492_vm13, %v12872_v40, %v12915_v18  ;;  %v6501_v34 = vsel %vm5394_vm14, %v12890_v45, %v12935_v61 }
0x14d7   :  { %7056 = vmatprep.subr.mxu0 %v6656_v16  ;;  %6964 = vmatpush1.msra.mxu1 %v6247_v49  ;;  %v6601_v52 = vsel %vm5492_vm13, %v6562_v37, %v12972_v14 }
0x14d8   :  { %7057 = vmatpush1.msra.mxu0 %v6655_v2  ;;  %6965 = vmatprep.subr.mxu1 %v6246_v43  ;;  %v6622_v15 = vmul.f32 %v12978_v6, %v6601_v52  ;;  %v14435_v52 = vld [vmem:[#allocation18_spill] sm:$0xff] }
0x14d9   :  { %7058 = vmatprep.subr.mxu0 %v6654_v63  ;;  %6966 = vmatpush1.msra.mxu1 %v6245_v56 }
0x14da   :  { %7059 = vmatpush1.msra.mxu0 %v6653_v8  ;;  %v6572_v48 = vpop.permute.xlu0 %6571  ;;  %6967 = vmatprep.subr.mxu1 %v6620_v12  ;;  %v13037_v30 = vpop.permute.xlu1 %6471 }
0x14db   :  { %6968 = vmatpush2.msra.mxu1 %v6619_v20  ;;  %v6481_v60 = vsel %vm5394_vm14, %v13037_v30, %v12999_v55 }
0x14dc   :  { %6969 = vmatprep.subr.mxu1 %v6618_v51 }
0x14dd   :  { %6970 = vmatpush2.msra.mxu1 %v6617_v29 }
0x14de   :  { %6971 = vmatprep.subr.mxu1 %v12685_v27  ;;  %v13042_v28 = vpop.permute.xlu1 %6385  ;;  %v6460_v36 = vpop.permute.xlu0 %6459  ;;  %v6603_v27 = vsel %vm5492_vm13, %v12915_v18, %v12872_v40  ;;  %v6625_v40 = vmul.f32 %v12967_v21, %v6579_v44  ;;  %v6483_v18 = vsel %vm5394_vm14, %v12935_v61, %v12890_v45  ;;  %v6577_v45 = vsel %vm5492_vm13, %v12972_v14, %v6562_v37 }
0x14df   :  { %6972 = vmatpush2.msra.mxu1 %v12696_v59  ;;  %v6626_v4 = vmul.f32 %v12978_v6, %v6603_v27  ;;  %v6411_v37 = vsel %vm5302_vm9, %v13023_v39, %v13042_v28  ;;  %v6393_v1 = vsel %vm5302_vm9, %v13042_v28, %v13023_v39  ;;  %v14428_v27 = vld [vmem:[#allocation37_spill] sm:$0xff] }
0x14e0   :  { %6973 = vmatprep.subr.mxu1 %v12671_v7  ;;  %v6602_v7 = vsel %vm5492_vm13, %v12974_v38, %v12933_v58 }
0x14e1   :  { %6974 = vmatpush2.msra.mxu1 %v12683_v24  ;;  %v13064_v24 = vrot.slane %v8360_v23, %v9244_v10 }
0x14e2   :  { %6975 = vmatprep.subr.mxu1 %v12660_v47  ;;  %v6574_v59 = vpop.permute.xlu1 %6573  ;;  %v6452_v35 = vpop.permute.xlu0 %6451 }
0x14e3   :  { %v6580_v25 = vsel %vm5492_vm13, %v6572_v48, %v6574_v59  ;;  %v6604_v0 = vsel %vm5492_vm13, %v6574_v59, %v6572_v48  ;;  %6976 = vmatpush2.msra.mxu1 %v12654_v62  ;;  %v13076_v62 = vrot.slane %v8360_v23, %v9250_v13  ;;  %v6523_v57 = vmul.f32 %v13064_v24, %v6501_v34  ;;  %v14427_v23 = vld [vmem:[#allocation33_spill] sm:$0xff] }
0x14e4   :  { %v6627_v50 = vmul.f32 %v12967_v21, %v6580_v25  ;;  %6977 = vmatprep.subr.mxu1 %v12640_v53  ;;  %v6628_v47 = vmul.f32 %v12978_v6, %v6604_v0  ;;  %v6578_v53 = vsel %vm5492_vm13, %v12933_v58, %v12974_v38  ;;  %v6482_v38 = vsel %vm5394_vm14, %v13001_v26, %v12947_v5  ;;  %v14430_v0 = vld [vmem:[#allocation38_spill] sm:$0xff] }
0x14e5   :  { %6978 = vmatpush2.msra.mxu1 %v12646_v41  ;;  %v6624_v41 = vmul.f32 %v12978_v6, %v6602_v7  ;;  %v6623_v61 = vmul.f32 %v12967_v21, %v6578_v53  ;;  %v6522_v6 = vmul.f32 %v13076_v62, %v6482_v38  ;;  %v6520_v2 = vmul.f32 %v13076_v62, %v6481_v60  ;;  %v14429_v7 = vld [vmem:[#allocation49_spill] sm:$0xff]  ;;  %v14434_v53 = vld [vmem:[#allocation46_spill] sm:$0xff]  ;;  %v6753_v38 = vld [vmem:[%s14045_s18 + $0x20] sm:$0xff] }
0x14e6   :  { %6979 = vmatprep.subr.mxu1 %v12620_v54  ;;  %7060 = vmatprep.subr.mxu0 %v6628_v47  ;;  %v6478_v9 = vpop.permute.xlu1 %6477  ;;  %v14431_v47 = vld [vmem:[#allocation20_spill] sm:$0xff]  ;;  %v6761_v60 = vld [vmem:[%s14045_s18 + $0x60] sm:$0xff] }
0x14e7   :  { %v6484_v33 = vsel %vm5394_vm14, %v6478_v9, %v6460_v36  ;;  %v6502_v32 = vsel %vm5394_vm14, %v6460_v36, %v6478_v9  ;;  %6980 = vmatpush2.msra.mxu1 %v12618_v31  ;;  %7061 = vmatpush1.msra.mxu0 %v6627_v50  ;;  %v6500_v31 = vsel %vm5394_vm14, %v12947_v5, %v13001_v26  ;;  %v6370_v26 = vpop.permute.xlu0 %6369 }
0x14e8   :  { %v6525_v58 = vmul.f32 %v13064_v24, %v6502_v32  ;;  %6981 = vmatprep.subr.mxu1 %v12600_v22  ;;  %7062 = vmatprep.subr.mxu0 %v6626_v4  ;;  %v6526_v54 = vmul.f32 %v13076_v62, %v6484_v33  ;;  %v6524_v22 = vmul.f32 %v13076_v62, %v6483_v18  ;;  %v14432_v18 = vld [vmem:[#allocation24_spill] sm:$0xff] }
0x14e9   :  { %6982 = vmatpush2.msra.mxu1 %v12598_v3  ;;  %7063 = vmatpush1.msra.mxu0 %v6625_v40  ;;  %v6621_v3 = vmul.f32 %v12967_v21, %v6577_v45  ;;  %v6499_v5 = vsel %vm5394_vm14, %v12999_v55, %v13037_v30  ;;  %v6521_v42 = vmul.f32 %v13064_v24, %v6500_v31  ;;  %v6754_v32 = vld [vmem:[%s14045_s18 + $0x28] sm:$0xff]  ;;  %v14436_v45 = vld [vmem:[#allocation23_spill] sm:$0xff] }
0x14ea   :  { %6983 = vmatprep.subr.mxu1 %v6526_v54  ;;  %7064 = vmatprep.subr.mxu0 %v6624_v41  ;;  %v6470_v14 = vpop.permute.xlu1 %6469  ;;  %v6718_v21 = vrot.slane %v8364_v19, %v9244_v10  ;;  %v6722_v55 = vrot.slane %v8364_v19, %v9250_v13  ;;  %v6519_v11 = vmul.f32 %v13064_v24, %v6499_v5  ;;  %v6749_v41 = vld [vmem:[%s14045_s18] sm:$0xff]  ;;  %v6751_v54 = vld [vmem:[%s14045_s18 + $0x10] sm:$0xff]  ;;  %v6758_v31 = vld [vmem:[%s14045_s18 + $0x48] sm:$0xff] }
0x14eb   :  { %6984 = vmatpush2.msra.mxu1 %v6525_v58  ;;  %7065 = vmatpush1.msra.mxu0 %v6623_v61  ;;  %v6480_v49 = vsel %vm5394_vm14, %v6470_v14, %v6452_v35  ;;  %v6498_v46 = vsel %vm5394_vm14, %v6452_v35, %v6470_v14  ;;  %v6450_v20 = vpop.permute.xlu0 %6449  ;;  %v6433_v9 = vmul.f32 %v14432_v18, %v6411_v37  ;;  %v6756_v61 = vld [vmem:[%s14045_s18 + $0x38] sm:$0xff]  ;;  %v6755_v14 = vld [vmem:[%s14045_s18 + $0x30] sm:$0xff]  ;;  %v6762_v19 = vld [vmem:[%s14045_s18 + $0x68] sm:$0xff] }
0x14ec   :  { %6985 = vmatprep.subr.mxu1 %v6524_v22  ;;  %7066 = vmatprep.subr.mxu0 %v6622_v15  ;;  %v6518_v8 = vmul.f32 %v13076_v62, %v6480_v49  ;;  %v6517_v12 = vmul.f32 %v13064_v24, %v6498_v46  ;;  %v6734_v30 = vmul.f32 %v6722_v55, %v6411_v37  ;;  %v6760_v22 = vld [vmem:[%s14045_s18 + $0x58] sm:$0xff]  ;;  %v6757_v15 = vld [vmem:[%s14045_s18 + $0x40] sm:$0xff]  ;;  %v6766_v5 = vld [vmem:[%s14045_s18 + $0x88] sm:$0xff] }
0x14ed   :  { %6986 = vmatpush2.msra.mxu1 %v6523_v57  ;;  %7067 = vmatpush1.msra.mxu0 %v6621_v3  ;;  %v6733_v51 = vmul.f32 %v6718_v21, %v6393_v1  ;;  %v6732_v44 = vmul.f32 %v6722_v55, %v14427_v23  ;;  %v6731_v59 = vmul.f32 %v6718_v21, %v14428_v27  ;;  %v6759_v57 = vld [vmem:[%s14045_s18 + $0x50] sm:$0xff]  ;;  %v6764_v3 = vld [vmem:[%s14045_s18 + $0x78] sm:$0xff]  ;;  %v6770_v49 = vld [vmem:[%s14045_s18 + $0xa8] sm:$0xff] }
0x14ee   :  { %6987 = vmatprep.subr.mxu1 %v6522_v6  ;;  %v6388_v16 = vpop.permute.xlu1 %6387  ;;  %v6730_v50 = vmul.f32 %v6722_v55, %v14430_v0  ;;  %v6729_v40 = vmul.f32 %v6718_v21, %v14431_v47  ;;  %v6727_v35 = vmul.f32 %v6718_v21, %v14434_v53  ;;  %v6726_v33 = vmul.f32 %v6722_v55, %v14435_v52  ;;  %v6768_v6 = vld [vmem:[%s14045_s18 + $0x98] sm:$0xff] }
0x14ef   :  { %v6394_v43 = vsel %vm5302_vm9, %v6388_v16, %v6370_v26  ;;  %v6412_v56 = vsel %vm5302_vm9, %v6370_v26, %v6388_v16  ;;  %6988 = vmatpush2.msra.mxu1 %v6521_v42  ;;  %v6725_v58 = vmul.f32 %v6718_v21, %v14436_v45  ;;  %v6763_v26 = vld [vmem:[%s14045_s18 + $0x70] sm:$0xff]  ;;  %v6765_v42 = vld [vmem:[%s14045_s18 + $0x80] sm:$0xff]  ;;  %v6772_v46 = vld [vmem:[%s14045_s18 + $0xb8] sm:$0xff] }
0x14f0   :  { %v6735_v63 = vmul.f32 %v6718_v21, %v6394_v43  ;;  %6989 = vmatprep.subr.mxu1 %v6520_v2  ;;  %v6736_v17 = vmul.f32 %v6722_v55, %v6412_v56  ;;  %v6436_v25 = vmul.f32 %v14429_v7, %v6394_v43  ;;  %v6435_v4 = vmul.f32 %v14432_v18, %v6412_v56  ;;  %v6767_v21 = vld [vmem:[%s14045_s18 + $0x90] sm:$0xff]  ;;  %v6769_v16 = vld [vmem:[%s14045_s18 + $0xa0] sm:$0xff] }
0x14f1   :  { %6990 = vmatpush2.msra.mxu1 %v6519_v11  ;;  %v6771_v2 = vld [vmem:[%s14045_s18 + $0xb0] sm:$0xff]  ;;  %s14439_s18 = smov 15  }
0x14f2   :  { %6991 = vmatprep.subr.mxu1 %v6518_v8  ;;  %7088 = vmatprep.subr.mxu0 %v6736_v17  ;;  %v6468_v48 = vpop.permute.xlu1 %6467 }
0x14f3   :  { %v6479_v29 = vsel %vm5394_vm14, %v6468_v48, %v6450_v20  ;;  %v6497_v36 = vsel %vm5394_vm14, %v6450_v20, %v6468_v48  ;;  %6992 = vmatpush2.msra.mxu1 %v6517_v12  ;;  %7089 = vmatpush2.msra.mxu0 %v6735_v63 }
0x14f4   :  { %v6515_v39 = vmul.f32 %v13064_v24, %v6497_v36  ;;  %7090 = vmatprep.subr.mxu0 %v6734_v30  ;;  %v6516_v28 = vmul.f32 %v13076_v62, %v6479_v29  ;;  %v6434_v24 = vmul.f32 %v14429_v7, %v6393_v1  ;;  %v14433_v62 = vld [vmem:[#allocation44_spill] sm:$0xff] }
0x14f5   :  { %7091 = vmatpush2.msra.mxu0 %v6733_v51  ;;  %v6728_v34 = vmul.f32 %v6722_v55, %v14433_v62 }
0x14f6   :  { %6993 = vmatprep.subr.mxu1 %v6516_v28  ;;  %7092 = vmatprep.subr.mxu0 %v6732_v44 }
0x14f7   :  { %6994 = vmatpush2.msra.mxu1 %v6515_v39  ;;  %7093 = vmatpush2.msra.mxu0 %v6731_v59  ;;  %v6905_v55 = vpop.permute.xlu0 %6904 }
0x14f8   :  { %6995 = vmatprep.subr.mxu1 %v6436_v25  ;;  %7094 = vmatprep.subr.mxu0 %v6730_v50 }
0x14f9   :  { %6996 = vmatpush2.msra.mxu1 %v6435_v4  ;;  %7095 = vmatpush2.msra.mxu0 %v6729_v40 }
0x14fa   :  { %6997 = vmatprep.subr.mxu1 %v6434_v24  ;;  %7096 = vmatprep.subr.mxu0 %v6728_v34 }
0x14fb   :  { %6998 = vmatpush2.msra.mxu1 %v6433_v9  ;;  %7097 = vmatpush2.msra.mxu0 %v6727_v35  ;;  %v6895_v56 = vpop.permute.xlu0 %6894 }
0x14fc   :  { %7000 = vmatmul.mubr.f32.vlgmr.msra.gmra.mxu1 %v6749_v41  ;;  %7098 = vmatprep.subr.mxu0 %v6726_v33 }
0x14fd   :  { %7099 = vmatpush2.msra.mxu0 %v6725_v58  ;;  %7005 = vmatprep.mubr.f32.mxu1 %v6754_v32 }
0x14fe   :  { %7101 = vmatmul.mubr.f32.vlgmr.msra.gmra.mxu0 %v6751_v54 }
0x14ff   :  { %8366 = vmatprep.mubr.msk.f32.mxu0 %vm3496_vm11, %v6756_v61  ;;  %v6900_v8 = vpop.permute.xlu1 %6899  ;;  %v6915_v45 = vpop.permute.xlu0 %6914 }
0x1500   :  { %7006 = vmatmul.mubr.f32.gmra.mxu1 %v6753_v38 }
0x1501   :  { %7011 = vmatprep.mubr.f32.mxu1 %v6758_v31 }
0x1502   :  { %7107 = vmatmul.mubr.f32.gmra.mxu0 %v6755_v14 }
0x1503   :  { %8367 = vmatprep.mubr.msk.f32.mxu0 %vm3496_vm11, %v6760_v22  ;;  %v6890_v44 = vpop.permute.xlu1 %6889 }
0x1504   :  { %7012 = vmatmul.mubr.f32.gmra.mxu1 %v6757_v15 }
0x1505   :  { %7017 = vmatprep.mubr.f32.mxu1 %v6762_v19 }
0x1506   :  { %7113 = vmatmul.mubr.f32.gmra.mxu0 %v6759_v57 }
0x1507   :  { %8368 = vmatprep.mubr.msk.f32.mxu0 %vm3496_vm11, %v6764_v3  ;;  %v6910_v35 = vpop.permute.xlu1 %6909 }
0x1508   :  { %7018 = vmatmul.mubr.f32.gmra.mxu1 %v6761_v60 }
0x1509   :  { %7023 = vmatprep.mubr.f32.mxu1 %v6766_v5 }
0x150a   :  { %7119 = vmatmul.mubr.f32.gmra.mxu0 %v6763_v26 }
0x150b   :  { %8369 = vmatprep.mubr.msk.f32.mxu0 %vm3496_vm11, %v6768_v6 }
0x150c   :  { %7024 = vmatmul.mubr.f32.gmra.mxu1 %v6765_v42 }
0x150d   :  { %7029 = vmatprep.mubr.f32.mxu1 %v6770_v49 }
0x150e   :  { %7125 = vmatmul.mubr.f32.gmra.mxu0 %v6767_v21 }
0x150f   :  { %8370 = vmatprep.mubr.msk.f32.mxu0 %vm3496_vm11, %v6772_v46 }
0x1510   :  { %7030 = vmatmul.mubr.f32.gmra.mxu1 %v6769_v16 }
0x1512   :  { %7131 = vmatmul.mubr.f32.gmra.mxu0 %v6771_v2 }
0x15bc   :  { %v7001_v11 = vpop.f32.mrf.mxu1 }
0x15bd   :  { %v7002_v9 = vadd.f32 %v7001_v11, %v6890_v44 }
0x15be   :  { %v7003_v37 = vpop.f32.mrf.mxu1  ;;  %v7102_v43 = vpop.f32.mrf.mxu0 }
0x15bf   :  { %v7004_v4 = vadd.f32 %v7003_v37, %v6890_v44  ;;  %v7103_v14 = vadd.f32 %v7102_v43, %v7002_v9 }
0x15c0   :  { %v7007_v1 = vpop.f32.mrf.mxu1  ;;  %v7104_v63 = vpop.f32.mrf.mxu0 }
0x15c1   :  { %v7008_v17 = vadd.f32 %v7007_v1, %v6895_v56  ;;  %v7105_v58 = vadd.f32 %v7104_v63, %v7004_v4 }
0x15c2   :  { %v7009_v12 = vpop.f32.mrf.mxu1  ;;  %v7108_v20 = vpop.f32.mrf.mxu0 }
0x15c3   :  { %v7010_v48 = vadd.f32 %v7009_v12, %v6895_v56  ;;  %v7109_v29 = vadd.f32 %v7108_v20, %v7008_v17  ;;  %v7137_v3 = vadd.f32 %v7105_v58, %v7103_v14 }
0x15c4   :  { %v7013_v30 = vpop.f32.mrf.mxu1  ;;  %v7110_v51 = vpop.f32.mrf.mxu0 }
0x15c5   :  { %v7014_v36 = vadd.f32 %v7013_v30, %v6900_v8  ;;  %v7111_v39 = vadd.f32 %v7110_v51, %v7010_v48 }
0x15c6   :  { %v7015_v28 = vpop.f32.mrf.mxu1  ;;  %v7114_v23 = vpop.f32.mrf.mxu0 }
0x15c7   :  { %v7140_v27 = vadd.f32 %v7111_v39, %v7109_v29  ;;  %v7016_v59 = vadd.f32 %v7015_v28, %v6900_v8  ;;  %v7115_v0 = vadd.f32 %v7114_v23, %v7014_v36 }
0x15c8   :  { %v7019_v7 = vpop.f32.mrf.mxu1  ;;  %v7116_v25 = vpop.f32.mrf.mxu0 }
0x15c9   :  { %v7020_v50 = vadd.f32 %v7019_v7, %v6905_v55  ;;  %v7117_v47 = vadd.f32 %v7116_v25, %v7016_v59  ;;  %7141 = vadd.xlane.f32.xlu0 %v7140_v27 }
0x15ca   :  { %v7021_v40 = vpop.f32.mrf.mxu1  ;;  %v7120_v18 = vpop.f32.mrf.mxu0 }
0x15cb   :  { %v7143_v24 = vadd.f32 %v7117_v47, %v7115_v0  ;;  %v7022_v62 = vadd.f32 %v7021_v40, %v6905_v55  ;;  %v7121_v41 = vadd.f32 %v7120_v18, %v7020_v50 }
0x15cc   :  { %v7025_v34 = vpop.f32.mrf.mxu1  ;;  %v7122_v53 = vpop.f32.mrf.mxu0 }
0x15cd   :  { %v7123_v52 = vadd.f32 %v7122_v53, %v7022_v62  ;;  %7144 = vadd.xlane.f32.xlu1 %v7143_v24  ;;  %v7026_v22 = vadd.f32 %v7025_v34, %v6910_v35 }
0x15ce   :  { %v7027_v33 = vpop.f32.mrf.mxu1  ;;  %v7126_v32 = vpop.f32.mrf.mxu0 }
0x15cf   :  { %v7146_v54 = vadd.f32 %v7123_v52, %v7121_v41  ;;  %v7028_v61 = vadd.f32 %v7027_v33, %v6910_v35  ;;  %v7127_v6 = vadd.f32 %v7126_v32, %v7026_v22 }
0x15d0   :  { %v7031_v38 = vpop.f32.mrf.mxu1  ;;  %v7128_v31 = vpop.f32.mrf.mxu0 }
0x15d1   :  { %v7032_v15 = vadd.f32 %v7031_v38, %v6915_v45  ;;  %7147 = vadd.xlane.f32.xlu0 %v7146_v54  ;;  %v7129_v60 = vadd.f32 %v7128_v31, %v7028_v61 }
0x15d2   :  { %v7033_v19 = vpop.f32.mrf.mxu1  ;;  %v7132_v57 = vpop.f32.mrf.mxu0 }
0x15d3   :  { %v7034_v5 = vadd.f32 %v7033_v19, %v6915_v45  ;;  %v7133_v42 = vadd.f32 %v7132_v57, %v7032_v15  ;;  %v7149_v21 = vadd.f32 %v7129_v60, %v7127_v6 }
0x15d4   :  { %v7134_v26 = vpop.f32.mrf.mxu0 }
0x15d5   :  { %v7135_v49 = vadd.f32 %v7134_v26, %v7034_v5  ;;  %7138 = vadd.xlane.f32.xlu0 %v7137_v3 }
0x15d7   :  { %v7152_v46 = vadd.f32 %v7135_v49, %v7133_v42 }
0x15d9   :  { %7153 = vadd.xlane.f32.xlu1 %v7152_v46  ;;  %7150 = vadd.xlane.f32.xlu0 %v7149_v21 }
0x1652   :  { %v7142_v16 = vpop.xlane.xlu0 %7141 }
0x1653   :  { %v7156_v2 = vmul.f32 0.00390625, %v7142_v16 }
0x1655   :  { %v13222_v55 = vsub.f32 %v7109_v29, %v7156_v2  ;;  %v13224_v11 = vsub.f32 %v7111_v39, %v7156_v2 }
0x1656   :  { %v7145_v1 = vpop.xlane.xlu1 %7144 }
0x1657   :  { %v7175_v37 = vmul.f32 %v13222_v55, %v13222_v55  ;;  %v7176_v43 = vmul.f32 %v13224_v11, %v13224_v11  ;;  %v7157_v17 = vmul.f32 0.00390625, %v7145_v1 }
0x1659   :  { %v7188_v56 = vadd.f32 %v7176_v43, %v7175_v37  ;;  %v13238_v36 = vsub.f32 %v7115_v0, %v7157_v17  ;;  %v13240_v44 = vsub.f32 %v7117_v47, %v7157_v17 }
0x165a   :  { %v7148_v63 = vpop.xlane.xlu0 %7147 }
0x165b   :  { %v7158_v8 = vmul.f32 0.00390625, %v7148_v63  ;;  %7189 = vadd.xlane.f32.xlu1 %v7188_v56  ;;  %v7177_v18 = vmul.f32 %v13238_v36, %v13238_v36  ;;  %v7178_v0 = vmul.f32 %v13240_v44, %v13240_v44 }
0x165d   :  { %v13230_v12 = vsub.f32 %v7121_v41, %v7158_v8  ;;  %v13232_v20 = vsub.f32 %v7123_v52, %v7158_v8  ;;  %v7191_v33 = vadd.f32 %v7178_v0, %v7177_v18 }
0x165e   :  { %v7139_v48 = vpop.xlane.xlu0 %7138 }
0x165f   :  { %v7179_v30 = vmul.f32 %v13230_v12, %v13230_v12  ;;  %v7180_v51 = vmul.f32 %v13232_v20, %v13232_v20  ;;  %v7155_v29 = vmul.f32 0.00390625, %v7139_v48 }
0x1661   :  { %v7161_v39 = vsub.f32 %v7103_v14, %v7155_v29  ;;  %v7162_v28 = vsub.f32 %v7105_v58, %v7155_v29  ;;  %v7194_v23 = vadd.f32 %v7180_v51, %v7179_v30 }
0x1662   :  { %v7151_v27 = vpop.xlane.xlu0 %7150  ;;  %v7154_v59 = vpop.xlane.xlu1 %7153 }
0x1663   :  { %v7173_v7 = vmul.f32 %v7161_v39, %v7161_v39  ;;  %v7174_v25 = vmul.f32 %v7162_v28, %v7162_v28  ;;  %v7159_v50 = vmul.f32 0.00390625, %v7151_v27  ;;  %v7160_v40 = vmul.f32 0.00390625, %v7154_v59  ;;  %7195 = vadd.xlane.f32.xlu1 %v7194_v23 }
0x1665   :  { %v13244_v4 = vsub.f32 %v7133_v42, %v7160_v40  ;;  %v13246_v24 = vsub.f32 %v7135_v49, %v7160_v40  ;;  %v13250_v62 = vsub.f32 %v7127_v6, %v7159_v50  ;;  %v13252_v47 = vsub.f32 %v7129_v60, %v7159_v50 }
0x1666   :  { %v7185_v34 = vadd.f32 %v7174_v25, %v7173_v7 }
0x1667   :  { %v7183_v53 = vmul.f32 %v13244_v4, %v13244_v4  ;;  %v7184_v35 = vmul.f32 %v13246_v24, %v13246_v24  ;;  %v7181_v41 = vmul.f32 %v13250_v62, %v13250_v62  ;;  %v7182_v52 = vmul.f32 %v13252_v47, %v13252_v47 }
0x1668   :  { %7186 = vadd.xlane.f32.xlu0 %v7185_v34 }
0x1669   :  { %v7200_v9 = vadd.f32 %v7184_v35, %v7183_v53  ;;  %v7197_v32 = vadd.f32 %v7182_v52, %v7181_v41 }
0x166b   :  { %7201 = vadd.xlane.f32.xlu1 %v7200_v9 }
0x166c   :  { %7192 = vadd.xlane.f32.xlu0 %v7191_v33 }
0x1670   :  { %7198 = vadd.xlane.f32.xlu0 %v7197_v32 }
0x16e4   :  { %v7190_v61 = vpop.xlane.xlu1 %7189 }
0x16e5   :  { %v7204_v38 = vmul.f32 0.00390625, %v7190_v61 }
0x16e7   :  { %v7210_v15 = vadd.f32 1e-05, %v7204_v38 }
0x16ec   :  { %v7196_v16 = vpop.xlane.xlu1 %7195 }
0x16ed   :  { %v7206_v2 = vmul.f32 0.00390625, %v7196_v16 }
0x16f1   :  { %v7187_v45 = vpop.xlane.xlu0 %7186 }
0x16f2   :  { %v7203_v58 = vmul.f32 0.00390625, %v7187_v45 }
0x16f4   :  { %v7209_v54 = vadd.f32 1e-05, %v7203_v58  ;;  %v7202_v29 = vpop.xlane.xlu1 %7201 }
0x16f5   :  { %v7193_v26 = vpop.xlane.xlu0 %7192 }
0x16f6   :  { %8477 = vrsqrt.f32 %v7209_v54  ;;  %v7205_v49 = vmul.f32 0.00390625, %v7193_v26 }
0x16f7   :  { %8479 = vrsqrt.f32 %v7210_v15 }
0x16f8   :  { %v7211_v21 = vadd.f32 1e-05, %v7205_v49 }
0x16f9   :  { %v7199_v8 = vpop.xlane.xlu0 %7198 }
0x16fa   :  { %8481 = vrsqrt.f32 %v7211_v21  ;;  %v7207_v30 = vmul.f32 0.00390625, %v7199_v8 }
0x1703   :  { %v8478_v31 = vpop.eup %8477 }
0x1704   :  { %v7221_v14 = vmul.f32 %v8478_v31, %v7161_v39  ;;  %v7222_v22 = vmul.f32 %v8478_v31, %v7162_v28  ;;  %v8480_v3 = vpop.eup %8479 }
0x1705   :  { %v7223_v60 = vmul.f32 %v8480_v3, %v13222_v55  ;;  %v7224_v5 = vmul.f32 %v8480_v3, %v13224_v11  ;;  %v7212_v11 = vadd.f32 1e-05, %v7206_v2 }
0x1706   :  { %v13262_v19 = vmax.f32 %v7221_v14, 0.0  ;;  %v13264_v57 = vmax.f32 %v7222_v22, 0.0 }
0x1707   :  { %v13292_v6 = vmax.f32 %v7223_v60, 0.0  ;;  %v13294_v42 = vmax.f32 %v7224_v5, 0.0  ;;  %v8482_v46 = vpop.eup %8481  ;;  %8483 = vrsqrt.f32 %v7212_v11 }
0x1708   :  { %14437 = vst [vmem:[#allocation42_spill] sm:$0xff] %v13262_v19  ;;  %14438 = vst [vmem:[#allocation39_spill] sm:$0xff] %v13264_v57  ;;  %7437 = vrot.lane.b32.xlu0 %v13264_v57, %s14439_s18  ;;  %7455 = vrot.lane.b32.xlu1 %v13262_v19, %s14439_s18  ;;  %v7226_v55 = vmul.f32 %v8482_v46, %v13240_v44  ;;  %v7225_v37 = vmul.f32 %v8482_v46, %v13238_v36  ;;  %v7208_v36 = vmul.f32 0.00390625, %v7202_v29 }
0x1709   :  { %14443 = vst [vmem:[#allocation22_spill] sm:$0xff] %v13292_v6  ;;  %14444 = vst [vmem:[#allocation40_spill] sm:$0xff] %v13294_v42 }
0x170a   :  { %v13326_v43 = vmax.f32 %v7226_v55, 0.0  ;;  %v13332_v56 = vmax.f32 %v7225_v37, 0.0  ;;  %v7214_v28 = vadd.f32 1e-05, %v7208_v36 }
0x170c   :  { %7347 = vrot.lane.b32.xlu0 %v13264_v57, %s14440_s14  ;;  %7365 = vrot.lane.b32.xlu1 %v13262_v19, %s14440_s14  ;;  %14446 = vst [vmem:[#allocation43_spill] sm:$0xff] %v13326_v43  ;;  %14447 = vst [vmem:[#allocation17_spill] sm:$0xff] %v13332_v56 }
0x1710   :  { %7251 = vrot.lane.b32.xlu0 %v13264_v57, %s14441_s12  ;;  %7275 = vrot.lane.b32.xlu1 %v13262_v19, %s14441_s12 }
0x1714   :  { %7809 = vrot.lane.b32.xlu0 %v13262_v19, %s14442_s3  ;;  %7811 = vrot.lane.b32.xlu1 %v13264_v57, %s14442_s3  ;;  %v8484_v1 = vpop.eup %8483 }
0x1715   :  { %v7227_v63 = vmul.f32 %v8484_v1, %v13230_v12  ;;  %v7228_v17 = vmul.f32 %v8484_v1, %v13232_v20  ;;  %v7213_v12 = vadd.f32 1e-05, %v7207_v30 }
0x1717   :  { %v13356_v48 = vmax.f32 %v7227_v63, 0.0  ;;  %v13362_v51 = vmax.f32 %v7228_v17, 0.0  ;;  %8485 = vrsqrt.f32 %v7213_v12 }
0x1718   :  { %7629 = vrot.lane.b32.xlu0 %v13262_v19, %s14231_s28  ;;  %7631 = vrot.lane.b32.xlu1 %v13264_v57, %s14231_s28  ;;  %8487 = vrsqrt.f32 %v7214_v28 }
0x1719   :  { %14448 = vst [vmem:[#allocation45_spill] sm:$0xff] %v13356_v48  ;;  %14449 = vst [vmem:[#allocation48_spill] sm:$0xff] %v13362_v51 }
0x171c   :  { %7719 = vrot.lane.b32.xlu0 %v13262_v19, %s14230_s27  ;;  %7721 = vrot.lane.b32.xlu1 %v13264_v57, %s14230_s27 }
0x1720   :  { %7439 = vrot.lane.b32.xlu0 %v13294_v42, %s14439_s18  ;;  %7457 = vrot.lane.b32.xlu1 %v13292_v6, %s14439_s18 }
0x1724   :  { %7349 = vrot.lane.b32.xlu0 %v13294_v42, %s14440_s14  ;;  %7367 = vrot.lane.b32.xlu1 %v13292_v6, %s14440_s14  ;;  %v8486_v20 = vpop.eup %8485 }
0x1725   :  { %v7230_v39 = vmul.f32 %v8486_v20, %v13252_v47  ;;  %v7229_v44 = vmul.f32 %v8486_v20, %v13250_v62  ;;  %v8488_v40 = vpop.eup %8487 }
0x1726   :  { %v7232_v62 = vmul.f32 %v8488_v40, %v13246_v24  ;;  %v7231_v32 = vmul.f32 %v8488_v40, %v13244_v4 }
0x1727   :  { %v13389_v23 = vmax.f32 %v7230_v39, 0.0  ;;  %v13400_v27 = vmax.f32 %v7229_v44, 0.0 }
0x1728   :  { %7253 = vrot.lane.b32.xlu0 %v13294_v42, %s14441_s12  ;;  %7277 = vrot.lane.b32.xlu1 %v13292_v6, %s14441_s12  ;;  %v13435_v9 = vmax.f32 %v7232_v62, 0.0  ;;  %v13458_v38 = vmax.f32 %v7231_v32, 0.0 }
0x1729   :  { %14450 = vst [vmem:[#allocation19_spill] sm:$0xff] %v13400_v27 }
0x172c   :  { %7813 = vrot.lane.b32.xlu0 %v13292_v6, %s14442_s3  ;;  %7815 = vrot.lane.b32.xlu1 %v13294_v42, %s14442_s3 }
0x1730   :  { %7633 = vrot.lane.b32.xlu0 %v13292_v6, %s14231_s28  ;;  %7635 = vrot.lane.b32.xlu1 %v13294_v42, %s14231_s28 }
0x1734   :  { %7723 = vrot.lane.b32.xlu0 %v13292_v6, %s14230_s27  ;;  %7725 = vrot.lane.b32.xlu1 %v13294_v42, %s14230_s27 }
0x1738   :  { %7529 = vrot.lane.b32.xlu0 %v13294_v42, %s14445_s2  ;;  %7547 = vrot.lane.b32.xlu1 %v13292_v6, %s14445_s2 }
0x173c   :  { %7351 = vrot.lane.b32.xlu0 %v13326_v43, %s14440_s14  ;;  %7441 = vrot.lane.b32.xlu1 %v13326_v43, %s14439_s18 }
0x1740   :  { %7255 = vrot.lane.b32.xlu0 %v13326_v43, %s14441_s12  ;;  %7459 = vrot.lane.b32.xlu1 %v13332_v56, %s14439_s18 }
0x1744   :  { %7817 = vrot.lane.b32.xlu0 %v13332_v56, %s14442_s3  ;;  %7369 = vrot.lane.b32.xlu1 %v13332_v56, %s14440_s14 }
0x1748   :  { %7727 = vrot.lane.b32.xlu0 %v13332_v56, %s14230_s27  ;;  %7279 = vrot.lane.b32.xlu1 %v13332_v56, %s14441_s12 }
0x174c   :  { %7637 = vrot.lane.b32.xlu0 %v13332_v56, %s14231_s28  ;;  %7819 = vrot.lane.b32.xlu1 %v13326_v43, %s14442_s3 }
0x1750   :  { %7531 = vrot.lane.b32.xlu0 %v13326_v43, %s14445_s2  ;;  %7729 = vrot.lane.b32.xlu1 %v13326_v43, %s14230_s27 }
0x1754   :  { %7639 = vrot.lane.b32.xlu1 %v13326_v43, %s14231_s28  ;;  %7461 = vrot.lane.b32.xlu0 %v13356_v48, %s14439_s18 }
0x1758   :  { %7549 = vrot.lane.b32.xlu1 %v13332_v56, %s14445_s2  ;;  %7353 = vrot.lane.b32.xlu0 %v13362_v51, %s14440_s14 }
0x175c   :  { %7443 = vrot.lane.b32.xlu1 %v13362_v51, %s14439_s18  ;;  %7257 = vrot.lane.b32.xlu0 %v13362_v51, %s14441_s12 }
0x1760   :  { %7371 = vrot.lane.b32.xlu1 %v13356_v48, %s14440_s14  ;;  %7821 = vrot.lane.b32.xlu0 %v13356_v48, %s14442_s3 }
0x1764   :  { %7281 = vrot.lane.b32.xlu1 %v13356_v48, %s14441_s12  ;;  %7731 = vrot.lane.b32.xlu0 %v13356_v48, %s14230_s27 }
0x1768   :  { %7823 = vrot.lane.b32.xlu1 %v13362_v51, %s14442_s3  ;;  %7641 = vrot.lane.b32.xlu0 %v13356_v48, %s14231_s28 }
0x176c   :  { %7733 = vrot.lane.b32.xlu1 %v13362_v51, %s14230_s27  ;;  %7533 = vrot.lane.b32.xlu0 %v13362_v51, %s14445_s2 }
0x1770   :  { %7643 = vrot.lane.b32.xlu1 %v13362_v51, %s14231_s28  ;;  %7355 = vrot.lane.b32.xlu0 %v13389_v23, %s14440_s14 }
0x1774   :  { %7551 = vrot.lane.b32.xlu1 %v13356_v48, %s14445_s2  ;;  %7259 = vrot.lane.b32.xlu0 %v13389_v23, %s14441_s12 }
0x1778   :  { %7373 = vrot.lane.b32.xlu1 %v13400_v27, %s14440_s14  ;;  %7825 = vrot.lane.b32.xlu0 %v13400_v27, %s14442_s3 }
0x177a   :  { %v13406_v59 = vpop.permute.xlu0 %7437  ;;  %v13408_v7 = vpop.permute.xlu1 %7455 }
0x177c   :  { %7283 = vrot.lane.b32.xlu1 %v13400_v27, %s14441_s12  ;;  %7735 = vrot.lane.b32.xlu0 %v13400_v27, %s14230_s27 }
0x177e   :  { %v7348_v25 = vpop.permute.xlu0 %7347  ;;  %v7366_v50 = vpop.permute.xlu1 %7365 }
0x177f   :  { %v13415_v18 = vsel %vm586_vm4, %v7366_v50, %v7348_v25  ;;  %v13418_v0 = vsel %vm586_vm4, %v7348_v25, %v7366_v50 }
0x1780   :  { %7827 = vrot.lane.b32.xlu1 %v13389_v23, %s14442_s3  ;;  %7645 = vrot.lane.b32.xlu0 %v13400_v27, %s14231_s28 }
0x1782   :  { %v7252_v47 = vpop.permute.xlu0 %7251  ;;  %v7276_v34 = vpop.permute.xlu1 %7275 }
0x1783   :  { %v13426_v53 = vsel %vm521_vm5, %v7276_v34, %v7252_v47  ;;  %v13429_v35 = vsel %vm521_vm5, %v7252_v47, %v7276_v34 }
0x1784   :  { %7737 = vrot.lane.b32.xlu1 %v13389_v23, %s14230_s27  ;;  %7535 = vrot.lane.b32.xlu0 %v13389_v23, %s14445_s2 }
0x1786   :  { %v7810_v41 = vpop.permute.xlu0 %7809  ;;  %v7812_v52 = vpop.permute.xlu1 %7811 }
0x1787   :  { %v13438_v24 = vsel %vm920_vm6, %v7810_v41, %v7812_v52  ;;  %v13441_v33 = vsel %vm920_vm6, %v7812_v52, %v7810_v41 }
0x1788   :  { %7647 = vrot.lane.b32.xlu1 %v13389_v23, %s14231_s28  ;;  %7357 = vrot.lane.b32.xlu0 %v13435_v9, %s14440_s14 }
0x178a   :  { %v7630_v45 = vpop.permute.xlu0 %7629  ;;  %v7632_v58 = vpop.permute.xlu1 %7631 }
0x178b   :  { %v13449_v54 = vsel %vm788_vm8, %v7630_v45, %v7632_v58  ;;  %v13452_v61 = vsel %vm788_vm8, %v7632_v58, %v7630_v45 }
0x178c   :  { %7553 = vrot.lane.b32.xlu1 %v13400_v27, %s14445_s2  ;;  %7915 = vrot.lane.b32.xlu0 %v13400_v27, %s14232_s30 }
0x178e   :  { %v7720_v31 = vpop.permute.xlu0 %7719  ;;  %v7722_v14 = vpop.permute.xlu1 %7721 }
0x178f   :  { %v13461_v4 = vsel %vm854_vm7, %v7720_v31, %v7722_v14  ;;  %v13464_v22 = vsel %vm854_vm7, %v7722_v14, %v7720_v31 }
0x1790   :  { %14451 = vst [vmem:[#allocation15_spill] sm:$0xff] %v13461_v4  ;;  %14452 = vst [vmem:[#allocation16_spill] sm:$0xff] %v13464_v22  ;;  %7261 = vrot.lane.b32.xlu0 %v13435_v9, %s14441_s12  ;;  %7375 = vrot.lane.b32.xlu1 %v13458_v38, %s14440_s14 }
0x1792   :  { %v13470_v15 = vpop.permute.xlu0 %7439  ;;  %v13472_v3 = vpop.permute.xlu1 %7457 }
0x1794   :  { %7829 = vrot.lane.b32.xlu0 %v13458_v38, %s14442_s3  ;;  %7917 = vrot.lane.b32.xlu1 %v13389_v23, %s14232_s30 }
0x1796   :  { %v7350_v60 = vpop.permute.xlu0 %7349  ;;  %v7368_v5 = vpop.permute.xlu1 %7367 }
0x1797   :  { %v13479_v26 = vsel %vm586_vm4, %v7368_v5, %v7350_v60  ;;  %v13482_v49 = vsel %vm586_vm4, %v7350_v60, %v7368_v5  ;;  %v7990_v60 = vld [vmem:[%s14046_s20 + $0x8] sm:$0xff] }
0x1798   :  { %7527 = vrot.lane.b32.xlu0 %v13264_v57, %s14445_s2  ;;  %7285 = vrot.lane.b32.xlu1 %v13458_v38, %s14441_s12 }
0x1799   :  { %8187 = vmatprep.mubr.f32.mxu0 %v7990_v60  ;;  %v8372_v60 = vld [vmem:[%s14229_s0 + $0x2] ss:$8 sm:$0x3] }
0x179a   :  { %v7254_v21 = vpop.permute.xlu0 %7253  ;;  %v7278_v46 = vpop.permute.xlu1 %7277 }
0x179b   :  { %v13489_v16 = vsel %vm521_vm5, %v7278_v46, %v7254_v21  ;;  %v13492_v2 = vsel %vm521_vm5, %v7254_v21, %v7278_v46  ;;  %v7992_v46 = vld [vmem:[%s14046_s20 + $0x18] sm:$0xff] }
0x179c   :  { %7911 = vrot.lane.b32.xlu0 %v13356_v48, %s14232_s30  ;;  %7831 = vrot.lane.b32.xlu1 %v13435_v9, %s14442_s3 }
0x179d   :  { %8378 = vmatprep.mubr.msk.f32.mxu1 %vm3496_vm11, %v7992_v46  ;;  %v13617_v46 = vrot.slane %v8372_v60, %v9244_v10 }
0x179e   :  { %v7814_v55 = vpop.permute.xlu0 %7813  ;;  %v7816_v11 = vpop.permute.xlu1 %7815 }
0x179f   :  { %v13499_v37 = vsel %vm920_vm6, %v7814_v55, %v7816_v11  ;;  %v13502_v1 = vsel %vm920_vm6, %v7816_v11, %v7814_v55  ;;  %14460 = vst [vmem:[#allocation3_spill] sm:$0xff] %v13617_v46 }
0x17a0   :  { %7739 = vrot.lane.b32.xlu0 %v13458_v38, %s14230_s27  ;;  %7545 = vrot.lane.b32.xlu1 %v13262_v19, %s14445_s2 }
0x17a2   :  { %v7634_v63 = vpop.permute.xlu0 %7633  ;;  %v7636_v8 = vpop.permute.xlu1 %7635 }
0x17a3   :  { %v13509_v17 = vsel %vm788_vm8, %v7634_v63, %v7636_v8  ;;  %v13512_v30 = vsel %vm788_vm8, %v7636_v8, %v7634_v63  ;;  %v8105_v63 = vld [vmem:[%s14047_s21] sm:$0xff] }
0x17a4   :  { %7907 = vrot.lane.b32.xlu0 %v13332_v56, %s14232_s30  ;;  %7913 = vrot.lane.b32.xlu1 %v13362_v51, %s14232_s30 }
0x17a6   :  { %v7724_v12 = vpop.permute.xlu0 %7723  ;;  %v7726_v20 = vpop.permute.xlu1 %7725 }
0x17a7   :  { %v13519_v29 = vsel %vm854_vm7, %v7724_v12, %v7726_v20  ;;  %v13522_v36 = vsel %vm854_vm7, %v7726_v20, %v7724_v12 }
0x17a8   :  { %14453 = vst [vmem:[#allocation29_spill] sm:$0xff] %v13519_v29  ;;  %7445 = vrot.lane.b32.xlu0 %v13389_v23, %s14439_s18  ;;  %7741 = vrot.lane.b32.xlu1 %v13435_v9, %s14230_s27 }
0x17aa   :  { %v7530_v39 = vpop.permute.xlu0 %7529  ;;  %v7548_v28 = vpop.permute.xlu1 %7547 }
0x17ab   :  { %v13529_v44 = vsel %vm718_vm2, %v7548_v28, %v7530_v39  ;;  %v13532_v25 = vsel %vm718_vm2, %v7530_v39, %v7548_v28 }
0x17ac   :  { %14454 = vst [vmem:[#allocation47_spill] sm:$0xff] %v13529_v44  ;;  %14455 = vst [vmem:[#allocation50_spill] sm:$0xff] %v13532_v25  ;;  %7649 = vrot.lane.b32.xlu0 %v13458_v38, %s14231_s28  ;;  %7909 = vrot.lane.b32.xlu1 %v13326_v43, %s14232_s30 }
0x17ae   :  { %v7352_v50 = vpop.permute.xlu0 %7351  ;;  %v7442_v40 = vpop.permute.xlu1 %7441 }
0x17b0   :  { %7537 = vrot.lane.b32.xlu0 %v13435_v9, %s14445_s2  ;;  %7463 = vrot.lane.b32.xlu1 %v13400_v27, %s14439_s18 }
0x17b2   :  { %v7256_v62 = vpop.permute.xlu0 %7255  ;;  %v7460_v47 = vpop.permute.xlu1 %7459 }
0x17b4   :  { %7919 = vrot.lane.b32.xlu0 %v13458_v38, %s14232_s30  ;;  %7651 = vrot.lane.b32.xlu1 %v13435_v9, %s14231_s28 }
0x17b6   :  { %v7818_v34 = vpop.permute.xlu0 %7817  ;;  %v7370_v41 = vpop.permute.xlu1 %7369 }
0x17b7   :  { %v13547_v52 = vsel %vm586_vm4, %v7370_v41, %v7352_v50  ;;  %v13550_v32 = vsel %vm586_vm4, %v7352_v50, %v7370_v41  ;;  %v8106_v41 = vld [vmem:[%s14047_s21 + $0x8] sm:$0x3] }
0x17b8   :  { %7903 = vrot.lane.b32.xlu0 %v13292_v6, %s14232_s30  ;;  %7555 = vrot.lane.b32.xlu1 %v13458_v38, %s14445_s2 }
0x17ba   :  { %v7728_v45 = vpop.permute.xlu0 %7727  ;;  %v7280_v58 = vpop.permute.xlu1 %7279 }
0x17bb   :  { %v13557_v31 = vsel %vm521_vm5, %v7280_v58, %v7256_v62  ;;  %v13560_v14 = vsel %vm521_vm5, %v7256_v62, %v7280_v58 }
0x17bc   :  { %7447 = vrot.lane.b32.xlu0 %v13435_v9, %s14439_s18  ;;  %7921 = vrot.lane.b32.xlu1 %v13435_v9, %s14232_s30 }
0x17be   :  { %v7638_v5 = vpop.permute.xlu0 %7637  ;;  %v7820_v21 = vpop.permute.xlu1 %7819 }
0x17bf   :  { %v13573_v55 = vsel %vm920_vm6, %v7818_v34, %v7820_v21  ;;  %v13576_v11 = vsel %vm920_vm6, %v7820_v21, %v7818_v34 }
0x17c0   :  { %7899 = vrot.lane.b32.xlu0 %v13262_v19, %s14232_s30  ;;  %7905 = vrot.lane.b32.xlu1 %v13294_v42, %s14232_s30  ;;  %v7469_v19 = vsel %vm652_vm3, %v7460_v47, %v7442_v40 }
0x17c2   :  { %v7532_v8 = vpop.permute.xlu0 %7531  ;;  %v7730_v12 = vpop.permute.xlu1 %7729 }
0x17c3   :  { %v13587_v20 = vsel %vm854_vm7, %v7728_v45, %v7730_v12  ;;  %v13590_v39 = vsel %vm854_vm7, %v7730_v12, %v7728_v45 }
0x17c4   :  { %8109 = vperm.xlu0 %8403, %v8105_v63   ;;  %7465 = vrot.lane.b32.xlu1 %v13458_v38, %s14439_s18  ;;  %v13620_v63 = vrot.slane %v8372_v60, %v9250_v13  ;;  %v7486_v60 = vsel %vm652_vm3, %v13470_v15, %v13472_v3 }
0x17c6   :  { %v7462_v28 = vpop.permute.xlu0 %7461  ;;  %v7640_v50 = vpop.permute.xlu1 %7639  ;;  %14461 = vst [vmem:[#allocation4_spill] sm:$0xff] %v13620_v63 }
0x17c7   :  { %v13595_v62 = vsel %vm788_vm8, %v7638_v5, %v7640_v50  ;;  %v13598_v34 = vsel %vm788_vm8, %v7640_v50, %v7638_v5 }
0x17c8   :  { %14456 = vst [vmem:[#allocation25_spill] sm:$0xff] %v13595_v62  ;;  %14457 = vst [vmem:[#allocation26_spill] sm:$0xff] %v13598_v34  ;;  %7901 = vrot.lane.b32.xlu1 %v13264_v57, %s14232_s30 }
0x17ca   :  { %v13605_v45 = vpop.permute.xlu0 %7353  ;;  %v7550_v58 = vpop.permute.xlu1 %7549 }
0x17cb   :  { %v13611_v21 = vsel %vm718_vm2, %v7550_v58, %v7532_v8  ;;  %v13614_v5 = vsel %vm718_vm2, %v7532_v8, %v7550_v58  ;;  %v7468_v58 = vsel %vm652_vm3, %v13472_v3, %v13470_v15 }
0x17cc   :  { %14458 = vst [vmem:[#allocation5_spill] sm:$0xff] %v13611_v21  ;;  %14459 = vst [vmem:[#allocation6_spill] sm:$0xff] %v13614_v5  ;;  %8114 = vperm.xlu1 %8404, %v8106_v41   ;;  %v7487_v21 = vsel %vm652_vm3, %v7442_v40, %v7460_v47  ;;  %v7508_v5 = vmul.f32 %v13620_v63, %v7469_v19  ;;  %v7485_v40 = vsel %vm652_vm3, %v13406_v59, %v13408_v7 }
0x17cd   :  { %v7506_v47 = vmul.f32 %v13620_v63, %v7468_v58  ;;  %v7505_v19 = vmul.f32 %v13617_v46, %v7486_v60 }
0x17ce   :  { %v13622_v12 = vpop.permute.xlu0 %7257  ;;  %v7444_v50 = vpop.permute.xlu1 %7443 }
0x17cf   :  { %v7470_v57 = vsel %vm652_vm3, %v7462_v28, %v7444_v50  ;;  %v7488_v6 = vsel %vm652_vm3, %v7444_v50, %v7462_v28 }
0x17d0   :  { %v7509_v8 = vmul.f32 %v13617_v46, %v7488_v6  ;;  %v7510_v41 = vmul.f32 %v13620_v63, %v7470_v57  ;;  %v7467_v6 = vsel %vm652_vm3, %v13408_v7, %v13406_v59  ;;  %v7507_v57 = vmul.f32 %v13617_v46, %v7487_v21 }
0x17d1   :  { %v7504_v50 = vmul.f32 %v13620_v63, %v7467_v6 }
0x17d2   :  { %v13637_v42 = vpop.permute.xlu0 %7821  ;;  %8123 = vmatprep.subr.mxu0 %v7510_v41  ;;  %v7372_v28 = vpop.permute.xlu1 %7371  ;;  %v7503_v41 = vmul.f32 %v13617_v46, %v7485_v40 }
0x17d3   :  { %8124 = vmatpush1.msra.mxu0 %v7509_v8 }
0x17d4   :  { %8125 = vmatprep.subr.mxu0 %v7508_v5 }
0x17d5   :  { %8126 = vmatpush1.msra.mxu0 %v7507_v57 }
0x17d6   :  { %v7732_v15 = vpop.permute.xlu0 %7731  ;;  %8127 = vmatprep.subr.mxu0 %v7506_v47  ;;  %v13648_v3 = vpop.permute.xlu1 %7281 }
0x17d7   :  { %8128 = vmatpush1.msra.mxu0 %v7505_v19 }
0x17d8   :  { %8129 = vmatprep.subr.mxu0 %v7504_v50 }
0x17d9   :  { %8130 = vmatpush1.msra.mxu0 %v7503_v41 }
0x17da   :  { %v7642_v21 = vpop.permute.xlu0 %7641  ;;  %v13652_v8 = vpop.permute.xlu1 %7823 }
0x17de   :  { %v7534_v59 = vpop.permute.xlu0 %7533  ;;  %v7734_v7 = vpop.permute.xlu1 %7733 }
0x17df   :  { %v13655_v5 = vsel %vm854_vm7, %v7732_v15, %v7734_v7  ;;  %v13658_v58 = vsel %vm854_vm7, %v7734_v7, %v7732_v15 }
0x17e2   :  { %v7356_v60 = vpop.permute.xlu0 %7355  ;;  %v7644_v57 = vpop.permute.xlu1 %7643 }
0x17e3   :  { %v13661_v6 = vsel %vm788_vm8, %v7642_v21, %v7644_v57  ;;  %v13664_v40 = vsel %vm788_vm8, %v7644_v57, %v7642_v21 }
0x17e4   :  { %14462 = vst [vmem:[#allocation7_spill] sm:$0xff] %v13661_v6  ;;  %14463 = vst [vmem:[#allocation8_spill] sm:$0xff] %v13664_v40 }
0x17e6   :  { %v13666_v47 = vpop.permute.xlu0 %7259  ;;  %v7552_v19 = vpop.permute.xlu1 %7551 }
0x17e7   :  { %v13669_v50 = vsel %vm718_vm2, %v7552_v19, %v7534_v59  ;;  %v13672_v41 = vsel %vm718_vm2, %v7534_v59, %v7552_v19  ;;  %v8371_v19 = vld [vmem:[%s14229_s0 + $0x1] ss:$8 sm:$0x3] }
0x17e8   :  { %14464 = vst [vmem:[#allocation9_spill] sm:$0xff] %v13669_v50  ;;  %14465 = vst [vmem:[#allocation10_spill] sm:$0xff] %v13672_v41  ;;  %v7406_v41 = vrot.slane %v8371_v19, %v9244_v10  ;;  %v7410_v62 = vrot.slane %v8371_v19, %v9250_v13 }
0x17ea   :  { %v13674_v63 = vpop.permute.xlu0 %7825  ;;  %v7374_v15 = vpop.permute.xlu1 %7373 }
0x17ee   :  { %v13676_v7 = vpop.permute.xlu0 %7735  ;;  %v7284_v46 = vpop.permute.xlu1 %7283 }
0x17f2   :  { %v13678_v56 = vpop.permute.xlu0 %7645  ;;  %v7828_v6 = vpop.permute.xlu1 %7827 }
0x17f3   :  { %14466 = vst [vmem:[#allocation11_spill] sm:$0xff] %v13678_v56  ;;  %v7380_v56 = vsel %vm586_vm4, %v7372_v28, %v13605_v45 }
0x17f4   :  { %v7420_v29 = vmul.f32 %v7410_v62, %v7380_v56 }
0x17f6   :  { %v13680_v21 = vpop.permute.xlu0 %7535  ;;  %v13682_v57 = vpop.permute.xlu1 %7737 }
0x17f7   :  { %14467 = vst [vmem:[#allocation12_spill] sm:$0xff] %v13680_v21  ;;  %v7381_v21 = vsel %vm586_vm4, %v7374_v15, %v7356_v60 }
0x17f8   :  { %v7422_v22 = vmul.f32 %v7410_v62, %v7381_v21 }
0x17fa   :  { %v7358_v40 = vpop.permute.xlu0 %7357  ;;  %v13684_v34 = vpop.permute.xlu1 %7647 }
0x17fb   :  { %14468 = vst [vmem:[#allocation13_spill] sm:$0xff] %v13684_v34  ;;  %v7398_v34 = vsel %vm586_vm4, %v13605_v45, %v7372_v28  ;;  %v7418_v45 = vmul.f32 %v7410_v62, %v13547_v52 }
0x17fe   :  { %v13686_v50 = vpop.permute.xlu0 %7915  ;;  %v13688_v59 = vpop.permute.xlu1 %7553 }
0x17ff   :  { %14469 = vst [vmem:[#allocation14_spill] sm:$0xff] %v13686_v50  ;;  %14470 = vst [vmem:[#allocation36_spill] sm:$0xff] %v13688_v59  ;;  %v7399_v50 = vsel %vm586_vm4, %v7356_v60, %v7374_v15  ;;  %v7291_v15 = vsel %vm521_vm5, %v7284_v46, %v13666_v47 }
0x1800   :  { %v7421_v27 = vmul.f32 %v7406_v41, %v7399_v50  ;;  %v7414_v50 = vmul.f32 %v7410_v62, %v13415_v18  ;;  %v7837_v18 = vsel %vm920_vm6, %v13674_v63, %v7828_v6 }
0x1802   :  { %v7262_v44 = vpop.permute.xlu0 %7261  ;;  %v7376_v43 = vpop.permute.xlu1 %7375 }
0x1803   :  { %v7382_v25 = vsel %vm586_vm4, %v7376_v43, %v7358_v40  ;;  %v7400_v48 = vsel %vm586_vm4, %v7358_v40, %v7376_v43  ;;  %v7311_v43 = vld [vmem:[%s14229_s0] ss:$8 sm:$0x3]  ;;  %v7413_v40 = vmul.f32 %v7406_v41, %v13418_v0  ;;  %vm14497_vm4 = vcmask 908288  }
0x1804   :  { %v7423_v51 = vmul.f32 %v7406_v41, %v7400_v48  ;;  %v7424_v59 = vmul.f32 %v7410_v62, %v7382_v25  ;;  %v7419_v48 = vmul.f32 %v7406_v41, %v7398_v34  ;;  %v8376_v25 = vld [vmem:[%s14229_s0 + $0x7] ss:$8 sm:$0x3]  ;;  %v13716_v56 = vrot.slane %v7311_v43, %v9244_v10  ;;  %vm14502_vm15 = vmmov %vm14497_vm4 }
0x1805   :  { %v13723_v34 = vrot.slane %v8376_v25, %v9244_v10  ;;  %v13726_v52 = vrot.slane %v8376_v25, %v9250_v13  ;;  %v7836_v25 = vsel %vm920_vm6, %v13637_v42, %v13652_v8  ;;  %vm14503_vm0 = vmmov %vm14497_vm4 }
0x1806   :  { %v7830_v19 = vpop.permute.xlu0 %7829  ;;  %8131 = vmatprep.subr.mxu0 %v7424_v59  ;;  %v13703_v4 = vpop.permute.xlu1 %7917  ;;  %vm14506_vm1 = vmmov %vm14503_vm0 }
0x1807   :  { %8132 = vmatpush1.msra.mxu0 %v7423_v51  ;;  %v7417_v51 = vmul.f32 %v7406_v41, %v13550_v32  ;;  %vm14507_vm9 = vmmov %vm14503_vm0 }
0x1808   :  { %8133 = vmatprep.subr.mxu0 %v7422_v22  ;;  %v13719_v22 = vrot.slane %v7311_v43, %v9250_v13  ;;  %v7309_v43 = vsel %vm521_vm5, %v13666_v47, %v7284_v46  ;;  %v8374_v46 = vld [vmem:[%s14229_s0 + $0x5] ss:$8 sm:$0x3]  ;;  %v7290_v47 = vsel %vm521_vm5, %v13648_v3, %v13622_v12  ;;  %vm14511_vm10 = vmmov %vm14503_vm0 }
0x1809   :  { %8134 = vmatpush1.msra.mxu0 %v7421_v27  ;;  %v7416_v27 = vmul.f32 %v7410_v62, %v13479_v26 }
0x180a   :  { %v13712_v28 = vpop.permute.xlu0 %7527  ;;  %8135 = vmatprep.subr.mxu0 %v7420_v29  ;;  %v7286_v60 = vpop.permute.xlu1 %7285  ;;  %v7415_v29 = vmul.f32 %v7406_v41, %v13482_v49  ;;  %v7861_v49 = vsel %vm920_vm6, %v7828_v6, %v13674_v63  ;;  %v7860_v63 = vsel %vm920_vm6, %v13652_v8, %v13637_v42  ;;  %v13774_v42 = vrot.slane %v8374_v46, %v9244_v10 }
0x180b   :  { %8136 = vmatpush1.msra.mxu0 %v7419_v48  ;;  %v7292_v32 = vsel %vm521_vm5, %v7286_v60, %v7262_v44  ;;  %v7310_v26 = vsel %vm521_vm5, %v7262_v44, %v7286_v60  ;;  %v7884_v60 = vmul.f32 %v13726_v52, %v7861_v49  ;;  %v7330_v8 = vmul.f32 %v13719_v22, %v7290_v47 }
0x180c   :  { %8137 = vmatprep.subr.mxu0 %v7418_v45  ;;  %v7334_v44 = vmul.f32 %v13719_v22, %v7292_v32  ;;  %v7333_v6 = vmul.f32 %v13716_v56, %v7310_v26  ;;  %v7332_v45 = vmul.f32 %v13719_v22, %v7291_v15  ;;  %v7882_v32 = vmul.f32 %v13726_v52, %v7860_v63 }
0x180d   :  { %8138 = vmatpush1.msra.mxu0 %v7417_v51  ;;  %v7881_v15 = vmul.f32 %v13723_v34, %v7836_v25 }
0x180e   :  { %v13735_v21 = vpop.permute.xlu0 %7911  ;;  %8139 = vmatprep.subr.mxu0 %v7416_v27  ;;  %v7832_v59 = vpop.permute.xlu1 %7831 }
0x180f   :  { %v7838_v48 = vsel %vm920_vm6, %v7830_v19, %v7832_v59  ;;  %v7862_v0 = vsel %vm920_vm6, %v7832_v59, %v7830_v19  ;;  %8140 = vmatpush1.msra.mxu0 %v7415_v29  ;;  %v7308_v19 = vsel %vm521_vm5, %v13622_v12, %v13648_v3  ;;  %v8375_v12 = vld [vmem:[%s14229_s0 + $0x6] ss:$8 sm:$0x3]  ;;  %v7331_v3 = vmul.f32 %v13716_v56, %v7309_v43  ;;  %vm14498_vm5 = vmmov %vm14497_vm4 }
0x1810   :  { %v7885_v62 = vmul.f32 %v13723_v34, %v7838_v48  ;;  %v7886_v41 = vmul.f32 %v13726_v52, %v7862_v0  ;;  %8141 = vmatprep.subr.mxu0 %v7414_v50  ;;  %v7883_v29 = vmul.f32 %v13723_v34, %v7837_v18  ;;  %v7329_v50 = vmul.f32 %v13716_v56, %v7308_v19  ;;  %vm14499_vm6 = vmmov %vm14497_vm4 }
0x1811   :  { %8142 = vmatpush1.msra.mxu0 %v7413_v40  ;;  %v13779_v40 = vrot.slane %v8374_v46, %v9250_v13  ;;  %v13784_v26 = vrot.slane %v8375_v12, %v9244_v10  ;;  %v7328_v59 = vmul.f32 %v13719_v22, %v13557_v31  ;;  %v7880_v43 = vmul.f32 %v13726_v52, %v13576_v11 }
0x1812   :  { %v7740_v51 = vpop.permute.xlu0 %7739  ;;  %8143 = vmatprep.subr.mxu0 %v7334_v44  ;;  %8200 = vmatprep.subr.mxu1 %v7886_v41  ;;  %v13766_v27 = vpop.permute.xlu1 %7545  ;;  %v13795_v0 = vrot.slane %v8375_v12, %v9250_v13  ;;  %v7327_v18 = vmul.f32 %v13716_v56, %v13560_v14  ;;  %v7879_v44 = vmul.f32 %v13723_v34, %v13573_v55  ;;  %v14472_v12 = vld [vmem:[#allocation19_spill] sm:$0xff] }
0x1813   :  { %8144 = vmatpush1.msra.mxu0 %v7333_v6  ;;  %8201 = vmatpush1.msra.mxu1 %v7885_v62  ;;  %v7323_v31 = vmul.f32 %v13716_v56, %v13429_v35  ;;  %v7326_v11 = vmul.f32 %v13719_v22, %v13489_v16  ;;  %v7878_v62 = vmul.f32 %v13726_v52, %v13502_v1  ;;  %v8377_v6 = vld [vmem:[%s14229_s0 + $0x10] ss:$8 sm:$0x3] }
0x1814   :  { %8145 = vmatprep.subr.mxu0 %v7332_v45  ;;  %8202 = vmatprep.subr.mxu1 %v7884_v60  ;;  %v7324_v41 = vmul.f32 %v13719_v22, %v13426_v53  ;;  %v7325_v14 = vmul.f32 %v13716_v56, %v13492_v2  ;;  %v7877_v55 = vmul.f32 %v13723_v34, %v13499_v37 }
0x1815   :  { %8146 = vmatpush1.msra.mxu0 %v7331_v3  ;;  %8203 = vmatpush1.msra.mxu1 %v7883_v29  ;;  %v7875_v35 = vmul.f32 %v13723_v34, %v13438_v24  ;;  %v7876_v16 = vmul.f32 %v13726_v52, %v13441_v33  ;;  %v7698_v1 = vmul.f32 %v13779_v40, %v13512_v30  ;;  %v14474_v29 = vld [vmem:[#allocation16_spill] sm:$0xff] }
0x1816   :  { %v13790_v49 = vpop.permute.xlu0 %7907  ;;  %8147 = vmatprep.subr.mxu0 %v7330_v8  ;;  %8204 = vmatprep.subr.mxu1 %v7882_v32  ;;  %v13792_v48 = vpop.permute.xlu1 %7913  ;;  %v7771_v2 = vsel %vm854_vm7, %v13682_v57, %v13676_v7  ;;  %v7747_v24 = vsel %vm854_vm7, %v13676_v7, %v13682_v57  ;;  %v7697_v22 = vmul.f32 %v13774_v42, %v13509_v17  ;;  %v14476_v32 = vld [vmem:[#allocation11_spill] sm:$0xff] }
0x1817   :  { %8148 = vmatpush1.msra.mxu0 %v7329_v50  ;;  %8205 = vmatpush1.msra.mxu1 %v7881_v15  ;;  %v7696_v34 = vmul.f32 %v13779_v40, %v13452_v61  ;;  %v7794_v52 = vmul.f32 %v13795_v0, %v7771_v2  ;;  %v7695_v57 = vmul.f32 %v13774_v42, %v13449_v54  ;;  %v8373_v61 = vld [vmem:[%s14229_s0 + $0x3] ss:$8 sm:$0x3] }
0x1818   :  { %8149 = vmatprep.subr.mxu0 %v7328_v59  ;;  %8206 = vmatprep.subr.mxu1 %v7880_v43  ;;  %v7793_v19 = vmul.f32 %v13784_v26, %v7747_v24  ;;  %v7792_v17 = vmul.f32 %v13795_v0, %v13658_v58  ;;  %v7791_v63 = vmul.f32 %v13784_v26, %v13655_v5  ;;  %v14477_v15 = vld [vmem:[#allocation48_spill] sm:$0xff] }
0x1819   :  { %8150 = vmatpush1.msra.mxu0 %v7327_v18  ;;  %8207 = vmatpush1.msra.mxu1 %v7879_v44  ;;  %v7790_v54 = vmul.f32 %v13795_v0, %v13590_v39  ;;  %v7789_v45 = vmul.f32 %v13784_v26, %v13587_v20  ;;  %v7788_v5 = vmul.f32 %v13795_v0, %v13522_v36  ;;  %v14473_v36 = vld [vmem:[#allocation15_spill] sm:$0xff]  ;;  %v14486_v24 = vld [vmem:[#allocation36_spill] sm:$0xff] }
0x181a   :  { %v13819_v46 = vpop.permute.xlu0 %7445  ;;  %8151 = vmatprep.subr.mxu0 %v7326_v11  ;;  %8208 = vmatprep.subr.mxu1 %v7878_v62  ;;  %v7742_v53 = vpop.permute.xlu1 %7741  ;;  %v13862_v39 = vrot.slane %v8373_v61, %v9244_v10  ;;  %v13865_v60 = vrot.slane %v8373_v61, %v9250_v13  ;;  %v13871_v20 = vrot.slane %v8377_v6, %v9244_v10  ;;  %v14480_v62 = vld [vmem:[#allocation43_spill] sm:$0xff] }
0x181b   :  { %v7748_v37 = vsel %vm854_vm7, %v7740_v51, %v7742_v53  ;;  %v7772_v56 = vsel %vm854_vm7, %v7742_v53, %v7740_v51  ;;  %8152 = vmatpush1.msra.mxu0 %v7325_v14  ;;  %8209 = vmatpush1.msra.mxu1 %v7877_v55  ;;  %v7785_v3 = vmul.f32 %v13784_v26, %v14473_v36  ;;  %v14482_v55 = vld [vmem:[#allocation25_spill] sm:$0xff]  ;;  %vm14500_vm7 = vmmov %vm14497_vm4 }
0x181c   :  { %v7795_v33 = vmul.f32 %v13784_v26, %v7748_v37  ;;  %v7796_v30 = vmul.f32 %v13795_v0, %v7772_v56  ;;  %8153 = vmatprep.subr.mxu0 %v7324_v41  ;;  %8210 = vmatprep.subr.mxu1 %v7876_v16  ;;  %v7786_v8 = vmul.f32 %v13795_v0, %v14474_v29  ;;  %v14479_v0 = vld [vmem:[#allocation50_spill] sm:$0xff]  ;;  %v14481_v41 = vld [vmem:[#allocation47_spill] sm:$0xff]  ;;  %v14484_v53 = vld [vmem:[#allocation17_spill] sm:$0xff] }
0x181d   :  { %8154 = vmatpush1.msra.mxu0 %v7323_v31  ;;  %8211 = vmatpush1.msra.mxu1 %v7875_v35  ;;  %v13893_v18 = vmul.f32 %v13862_v39, %v14479_v0  ;;  %v13900_v14 = vmul.f32 %v13865_v60, %v14481_v41  ;;  %v7699_v35 = vmul.f32 %v13774_v42, %v14482_v55  ;;  %v14483_v16 = vld [vmem:[#allocation26_spill] sm:$0xff]  ;;  %v14485_v56 = vld [vmem:[#allocation12_spill] sm:$0xff] }
0x181e   :  { %v7650_v47 = vpop.permute.xlu0 %7649  ;;  %8155 = vmatprep.subr.mxu0 %v7698_v1  ;;  %8212 = vmatprep.subr.mxu1 %v7796_v30  ;;  %v13836_v7 = vpop.permute.xlu1 %7909  ;;  %v7700_v1 = vmul.f32 %v13779_v40, %v14483_v16  ;;  %v14487_v30 = vld [vmem:[#allocation40_spill] sm:$0xff] }
0x181f   :  { %8156 = vmatpush2.msra.mxu0 %v7697_v22  ;;  %8213 = vmatpush1.msra.mxu1 %v7795_v33  ;;  %v7561_v33 = vsel %vm718_vm2, %v14486_v24, %v14485_v56 }
0x1820   :  { %8157 = vmatprep.subr.mxu0 %v7696_v34  ;;  %8214 = vmatprep.subr.mxu1 %v7794_v52  ;;  %v7579_v34 = vsel %vm718_vm2, %v14485_v56, %v14486_v24  ;;  %v7602_v29 = vmul.f32 %v13865_v60, %v7561_v33  ;;  %v14508_v33 = vld [vmem:[#allocation3_spill] sm:$0xff] }
0x1821   :  { %8158 = vmatpush2.msra.mxu0 %v7695_v57  ;;  %8215 = vmatpush1.msra.mxu1 %v7793_v19  ;;  %v14488_v57 = vld [vmem:[#allocation22_spill] sm:$0xff]  ;;  %v14489_v19 = vld [vmem:[#allocation8_spill] sm:$0xff] }
0x1822   :  { %v7538_v25 = vpop.permute.xlu0 %7537  ;;  %8159 = vmatprep.subr.mxu0 %v13435_v9  ;;  %8216 = vmatprep.subr.mxu1 %v7792_v17  ;;  %v13854_v58 = vpop.permute.xlu1 %7463  ;;  %v14471_v9 = vld [vmem:[#allocation29_spill] sm:$0xff]  ;;  %v7702_v17 = vmul.f32 %v13779_v40, %v14489_v19  ;;  %v7989_v19 = vld [vmem:[%s14046_s20] sm:$0xff] }
0x1823   :  { %8160 = vmatpush2.msra.mxu0 %v13458_v38  ;;  %8217 = vmatpush1.msra.mxu1 %v7791_v63  ;;  %v7787_v51 = vmul.f32 %v13784_v26, %v14471_v9  ;;  %v13874_v38 = vrot.slane %v8377_v6, %v9250_v13  ;;  %v14478_v26 = vld [vmem:[#allocation45_spill] sm:$0xff] }
0x1824   :  { %8161 = vmatprep.subr.mxu0 %v13389_v23  ;;  %8218 = vmatprep.subr.mxu1 %v7790_v54  ;;  %v14475_v23 = vld [vmem:[#allocation13_spill] sm:$0xff]  ;;  %v14490_v54 = vld [vmem:[#allocation39_spill] sm:$0xff] }
0x1825   :  { %8162 = vmatpush2.msra.mxu0 %v14472_v12  ;;  %8219 = vmatpush1.msra.mxu1 %v7789_v45  ;;  %v7657_v50 = vsel %vm788_vm8, %v14476_v32, %v14475_v23  ;;  %v7681_v13 = vsel %vm788_vm8, %v14475_v23, %v14476_v32  ;;  %v14491_v6 = vld [vmem:[#allocation5_spill] sm:$0xff]  ;;  %v14494_v12 = vld [vmem:[#allocation42_spill] sm:$0xff] }
0x1826   :  { %8163 = vmatprep.subr.mxu0 %v14477_v15  ;;  %8220 = vmatprep.subr.mxu1 %v7788_v5  ;;  %v7652_v10 = vpop.permute.xlu1 %7651  ;;  %v7920_v44 = vpop.permute.xlu0 %7919  ;;  %v7703_v2 = vmul.f32 %v13774_v42, %v7657_v50  ;;  %v7704_v37 = vmul.f32 %v13779_v40, %v7681_v13  ;;  %v7598_v45 = vmul.f32 %v13865_v60, %v14491_v6  ;;  %v14492_v5 = vld [vmem:[#allocation7_spill] sm:$0xff]  ;;  %v14496_v32 = vld [vmem:[#allocation14_spill] sm:$0xff] }
0x1827   :  { %v7658_v59 = vsel %vm788_vm8, %v7650_v47, %v7652_v10  ;;  %v7682_v43 = vsel %vm788_vm8, %v7652_v10, %v7650_v47  ;;  %8164 = vmatpush2.msra.mxu0 %v14478_v26  ;;  %8221 = vmatpush1.msra.mxu1 %v7787_v51  ;;  %v7701_v9 = vmul.f32 %v13774_v42, %v14492_v5  ;;  %vm14501_vm8 = vmmov %vm14497_vm4  ;;  %v7996_v6 = vld [vmem:[%s14046_s20 + $0x38] sm:$0x3] }
0x1828   :  { %v7705_v31 = vmul.f32 %v13774_v42, %v7658_v59  ;;  %v7706_v11 = vmul.f32 %v13779_v40, %v7682_v43  ;;  %8165 = vmatprep.subr.mxu0 %v14480_v62  ;;  %8222 = vmatprep.subr.mxu1 %v7786_v8  ;;  %v14495_v40 = vld [vmem:[#allocation9_spill] sm:$0xff]  ;;  %v7951_v42 = vsel %vm14497_vm4, %v13703_v4, %v14496_v32 }
0x1829   :  { %8166 = vmatpush2.msra.mxu0 %v14484_v53  ;;  %8223 = vmatpush1.msra.mxu1 %v7785_v3  ;;  %v7600_v36 = vmul.f32 %v13865_v60, %v14495_v40  ;;  %v7601_v3 = vmul.f32 %v13862_v39, %v7579_v34  ;;  %v7927_v10 = vsel %vm14500_vm7, %v14496_v32, %v13703_v4 }
0x182a   :  { %8167 = vmatprep.subr.mxu0 %v14487_v30  ;;  %8224 = vmatprep.subr.mxu1 %v7706_v11  ;;  %v7556_v22 = vpop.permute.xlu1 %7555  ;;  %v7904_v8 = vpop.permute.xlu0 %7903  ;;  %v7557_v43 = vsel %vm718_vm2, %v13766_v27, %v13712_v28  ;;  %v7575_v26 = vsel %vm718_vm2, %v13712_v28, %v13766_v27  ;;  %v7950_v0 = vsel %vm14501_vm8, %v13792_v48, %v13735_v21  ;;  %v14504_v28 = vld [vmem:[#allocation6_spill] sm:$0xff] }
0x182b   :  { %v7562_v52 = vsel %vm718_vm2, %v7556_v22, %v7538_v25  ;;  %v7580_v47 = vsel %vm718_vm2, %v7538_v25, %v7556_v22  ;;  %8168 = vmatpush2.msra.mxu0 %v14488_v57  ;;  %8225 = vmatpush1.msra.mxu1 %v7705_v31  ;;  %v14493_v25 = vld [vmem:[#allocation10_spill] sm:$0xff]  ;;  %v7974_v4 = vmul.f32 %v13874_v38, %v7951_v42  ;;  %vm14505_vm2 = vmmov %vm14503_vm0  ;;  %v14509_v22 = vld [vmem:[#allocation4_spill] sm:$0xff] }
0x182c   :  { %v7603_v61 = vmul.f32 %v13862_v39, %v7580_v47  ;;  %v7604_v63 = vmul.f32 %v13865_v60, %v7562_v52  ;;  %8169 = vmatprep.subr.mxu0 %v14490_v54  ;;  %8226 = vmatprep.subr.mxu1 %v7704_v37  ;;  %v7599_v51 = vmul.f32 %v13862_v39, %v14493_v25  ;;  %v7991_v54 = vld [vmem:[%s14046_s20 + $0x10] sm:$0xff] }
0x182d   :  { %8170 = vmatpush2.msra.mxu0 %v14494_v12  ;;  %8227 = vmatpush1.msra.mxu1 %v7703_v2  ;;  %v7925_v31 = vsel %vm14503_vm0, %v13790_v49, %v13836_v7  ;;  %v7597_v27 = vmul.f32 %v13862_v39, %v14504_v28  ;;  %v7973_v62 = vmul.f32 %v13871_v20, %v7927_v10 }
0x182e   :  { %8171 = vmatprep.subr.mxu0 %v7604_v63  ;;  %8228 = vmatprep.subr.mxu1 %v7702_v17  ;;  %v7922_v23 = vpop.permute.xlu1 %7921  ;;  %v7949_v41 = vsel %vm14505_vm2, %v13836_v7, %v13790_v49  ;;  %v7972_v55 = vmul.f32 %v13874_v38, %v7950_v0  ;;  %v7471_v7 = vsel %vm652_vm3, %v13854_v58, %v13819_v46  ;;  %v7994_v63 = vld [vmem:[%s14046_s20 + $0x28] sm:$0x3] }
0x182f   :  { %v7928_v50 = vsel %vm14498_vm5, %v7920_v44, %v7922_v23  ;;  %v7952_v15 = vsel %vm14499_vm6, %v7922_v23, %v7920_v44  ;;  %8172 = vmatpush2.msra.mxu0 %v7603_v61  ;;  %8229 = vmatpush1.msra.mxu1 %v7701_v9  ;;  %v7926_v44 = vsel %vm14502_vm15, %v13735_v21, %v13792_v48 }
0x1830   :  { %v7975_v13 = vmul.f32 %v13871_v20, %v7928_v50  ;;  %v7976_v59 = vmul.f32 %v13874_v38, %v7952_v15  ;;  %8173 = vmatprep.subr.mxu0 %v7602_v29  ;;  %8230 = vmatprep.subr.mxu1 %v7700_v1  ;;  %v7593_v21 = vmul.f32 %v13862_v39, %v7575_v26 }
0x1831   :  { %8174 = vmatpush2.msra.mxu0 %v7601_v3  ;;  %8231 = vmatpush1.msra.mxu1 %v7699_v35  ;;  %v7594_v48 = vmul.f32 %v13865_v60, %v7557_v43  ;;  %v7448_v35 = vpop.permute.xlu0 %7447  ;;  %v7971_v16 = vmul.f32 %v13871_v20, %v7926_v44  ;;  %v7969_v1 = vmul.f32 %v13871_v20, %v7925_v31 }
0x1832   :  { %8175 = vmatprep.subr.mxu0 %v7600_v36  ;;  %8252 = vmatprep.subr.mxu1 %v7976_v59  ;;  %v7906_v11 = vpop.permute.xlu1 %7905  ;;  %v7970_v49 = vmul.f32 %v13874_v38, %v7949_v41  ;;  %v7489_v2 = vsel %vm652_vm3, %v13819_v46, %v13854_v58  ;;  %v7512_v46 = vmul.f32 %v14509_v22, %v7471_v7 }
0x1833   :  { %8176 = vmatpush2.msra.mxu0 %v7599_v51  ;;  %8253 = vmatpush2.msra.mxu1 %v7975_v13  ;;  %v7948_v53 = vsel %vm14506_vm1, %v7906_v11, %v7904_v8  ;;  %v7924_v39 = vsel %vm14507_vm9, %v7904_v8, %v7906_v11 }
0x1834   :  { %8177 = vmatprep.subr.mxu0 %v7598_v45  ;;  %8254 = vmatprep.subr.mxu1 %v7974_v4  ;;  %v7968_v24 = vmul.f32 %v13874_v38, %v7948_v53 }
0x1835   :  { %8178 = vmatpush2.msra.mxu0 %v7597_v27  ;;  %8255 = vmatpush2.msra.mxu1 %v7973_v62  ;;  %v7900_v58 = vpop.permute.xlu0 %7899 }
0x1836   :  { %8179 = vmatprep.subr.mxu0 %v13900_v14  ;;  %8256 = vmatprep.subr.mxu1 %v7972_v55  ;;  %v7466_v60 = vpop.permute.xlu1 %7465  ;;  %v7967_v14 = vmul.f32 %v13871_v20, %v7924_v39 }
0x1837   :  { %v7472_v37 = vsel %vm652_vm3, %v7466_v60, %v7448_v35  ;;  %v7490_v56 = vsel %vm652_vm3, %v7448_v35, %v7466_v60  ;;  %8180 = vmatpush2.msra.mxu0 %v13893_v18  ;;  %8257 = vmatpush2.msra.mxu1 %v7971_v16  ;;  %v7511_v18 = vmul.f32 %v14508_v33, %v7489_v2  ;;  %vm14510_vm3 = vmmov %vm14503_vm0 }
0x1838   :  { %v7513_v30 = vmul.f32 %v14508_v33, %v7490_v56  ;;  %v7514_v34 = vmul.f32 %v14509_v22, %v7472_v37  ;;  %8181 = vmatprep.subr.mxu0 %v7594_v48  ;;  %8258 = vmatprep.subr.mxu1 %v7970_v49 }
0x1839   :  { %8182 = vmatpush2.msra.mxu0 %v7593_v21  ;;  %8259 = vmatpush2.msra.mxu1 %v7969_v1 }
0x183a   :  { %8183 = vmatprep.subr.mxu0 %v7514_v34  ;;  %8260 = vmatprep.subr.mxu1 %v7968_v24  ;;  %v7902_v52 = vpop.permute.xlu1 %7901 }
0x183b   :  { %v7923_v47 = vsel %vm14510_vm3, %v7900_v58, %v7902_v52  ;;  %v7947_v57 = vsel %vm14511_vm10, %v7902_v52, %v7900_v58  ;;  %8184 = vmatpush2.msra.mxu0 %v7513_v30  ;;  %8261 = vmatpush2.msra.mxu1 %v7967_v14 }
0x183c   :  { %v7965_v17 = vmul.f32 %v13871_v20, %v7923_v47  ;;  %v7966_v61 = vmul.f32 %v13874_v38, %v7947_v57  ;;  %8185 = vmatprep.subr.mxu0 %v7512_v46  ;;  %v7993_v20 = vld [vmem:[%s14046_s20 + $0x20] sm:$0x3]  ;;  %v7995_v38 = vld [vmem:[%s14046_s20 + $0x30] sm:$0x3] }
0x183d   :  { %8186 = vmatpush2.msra.mxu0 %v7511_v18 }
0x183e   :  { %8188 = vmatmul.mubr.f32.vlgmr.msra.gmra.mxu0 %v7989_v19  ;;  %8262 = vmatprep.subr.mxu1 %v7966_v61 }
0x183f   :  { %8263 = vmatpush2.msra.mxu1 %v7965_v17  ;;  %8193 = vmatprep.mubr.f32.mxu0 %v7994_v63  ;;  %v8110_v45 = vpop.permute.xlu0 %8109 }
0x1840   :  { %8265 = vmatmul.mubr.f32.vlgmr.msra.gmra.mxu1 %v7991_v54 }
0x1841   :  { %8379 = vmatprep.mubr.msk.f32.mxu1 %vm3496_vm11, %v7996_v6 }
0x1842   :  { %8194 = vmatmul.mubr.f32.gmra.mxu0 %v7993_v20 }
0x1844   :  { %8271 = vmatmul.mubr.f32.gmra.mxu1 %v7995_v38 }
0x1847   :  { %v8115_v12 = vpop.permute.xlu1 %8114 }
0x18fe   :  { %v8189_v5 = vpop.f32.mrf.mxu0 }
0x18ff   :  { %v8190_v9 = vadd.f32 %v8189_v5, %v8110_v45 }
0x1900   :  { %v8191_v25 = vpop.f32.mrf.mxu0  ;;  %v8266_v51 = vpop.f32.mrf.mxu1 }
0x1901   :  { %v8192_v40 = vadd.f32 %v8191_v25, %v8110_v45  ;;  %v8267_v36 = vadd.f32 %v8266_v51, %v8190_v9 }
0x1902   :  { %v8195_v3 = vpop.f32.mrf.mxu0  ;;  %v8268_v29 = vpop.f32.mrf.mxu1 }
0x1903   :  { %8277 = vst [vmem:[%s14048_s22] sm:$0xff] %v8267_v36  ;;  %v8196_v8 = vadd.f32 %v8195_v3, %v8115_v12  ;;  %v8269_v23 = vadd.f32 %v8268_v29, %v8192_v40 }
0x1904   :  { %v8197_v32 = vpop.f32.mrf.mxu0  ;;  %v8272_v42 = vpop.f32.mrf.mxu1 }
0x1905   :  { %8278 = vst [vmem:[%s14048_s22 + $0x8] sm:$0xff] %v8269_v23  ;;  %v8198_v50 = vadd.f32 %v8197_v32, %v8115_v12  ;;  %v8273_v15 = vadd.f32 %v8272_v42, %v8196_v8 }
0x1906   :  { %v8274_v10 = vpop.f32.mrf.mxu1 }
0x1907   :  { %8279 = vst [vmem:[%s14048_s22 + $0x10] sm:$0x3] %v8273_v15  ;;  %v8275_v13 = vadd.f32 %v8274_v10, %v8198_v50 }
0x1909   :  { %8280 = vst [vmem:[%s14048_s22 + $0x18] sm:$0x3] %v8275_v13 }

</bundles_post_ra>
